<compile_context>
chip_gen: v5e
topology: v5e:2x2
jax: 0.10.0
libtpu: 0.0.40
codegen_flags: <defaults>
</compile_context>

<pallas_src>
import math
import numpy as np
import jax
import jax.numpy as jnp
from jax.experimental import pallas as pl
from jax.experimental.pallas import tpu as pltpu  # noqa: F401  (TPU backend)

# --------------------------- model configuration ---------------------------
B = 2                              # batch (== x_g_norm batch, crops = 1)
C_IN = 3                           # in_chans
IMG = 16                           # square image -> no pos-embed interpolation
PS = 8                             # patch_size
N_PATCH = (IMG // PS) ** 2         # 4
SEQ = N_PATCH + 1                  # [cls] + patches = 5
BS = B * SEQ                       # 10 token rows (batch folded into block)
EMBED_DIM = 192                    # matches SAT_embed's hard-coded d_model=192
NUM_HEADS = 3
HEAD_DIM = EMBED_DIM // NUM_HEADS  # 64
DEPTH = 2
MLP_HID = int(EMBED_DIM * 4.0)     # mlp_ratio = 4.0 -> 768
NUM_ELE_SLICE = 10
SAT_H, SAT_DK, SAT_DV = 8, 32, 32  # ScaledDotProductAttention(192, 32, 32, 8)
SAT_HK = SAT_H * SAT_DK            # 256
LN_EPS = 1e-5                      # nn.LayerNorm default
NEG_INF = -1e30


# --------------------------- in-kernel helpers ------------------------------
def _layer_norm(x, w, b):
    mean = jnp.mean(x, axis=-1, keepdims=True)
    xc = x - mean
    var = jnp.mean(xc * xc, axis=-1, keepdims=True)
    return xc * jax.lax.rsqrt(var + LN_EPS) * w + b


def _softmax_lastdim(x):
    m = jnp.max(x, axis=-1, keepdims=True)
    e = jnp.exp(x - m)
    return e * pl.reciprocal(jnp.sum(e, axis=-1, keepdims=True), approx=True)


def _sigmoid(x):
    return pl.reciprocal(1.0 + jnp.exp(-x), approx=True)


def _gelu_tanh(x):
    # tanh-approx GELU (EUP tanh); ~1e-3 max abs error vs exact erf nn.GELU.
    c = 0.7978845608028654  # sqrt(2/pi)
    return 0.5 * x * (1.0 + jnp.tanh(c * (x + 0.044715 * (x * x * x))))


# ------------------------------ fused kernel --------------------------------
def _fused_forward_kernel(patches_ref, pw_ref, pb_ref,
                          tokbase_ref, scat_ref, ele_ref,
                          satw_ref, satb_ref, satow_ref, satob_ref,
                          hmask_ref, abias_ref,
                          wq_ref, wk_ref, wv_ref, wpj_ref,
                          vec6_ref, bfc1_ref, wfc1_ref, wfc2_ref,
                          normwb_ref, out_ref):
    f32 = jnp.float32

    # ---- patch embedding: Conv2d(stride=ps) rewritten as one matmul ----
    ptok = jnp.dot(patches_ref[...], pw_ref[...],
                   preferred_element_type=f32) + pb_ref[...]             # (B*N, D)

    # ---- token assembly: (cls+pos) rows, patches scattered to rows s>=1.
    #      Scatter is a constant 0/1 matmul -> stays on the MXU, no relayouts.
    tok = tokbase_ref[...] + jnp.dot(scat_ref[...], ptok,
                                     preferred_element_type=f32)         # (B*S, D)

    # ---- SAT_embed elevation fusion ----------------------------------------
    # Original: per token t, attention over the 2-row sequence [t, ele_emb];
    # the two output rows are summed and REPLACE the token.  With sequence
    # length 2 the softmax reduces to sigmoids; per-head dot products and the
    # per-head broadcast use a constant 0/1 head mask on the MXU (no sub-128
    # lane slicing, transposes or concatenations).
    ele = ele_ref[...]                                                    # (B*S, D)
    satw = satw_ref[...]
    satb = satb_ref[...]
    tqkv = jnp.dot(tok, satw, preferred_element_type=f32) + satb          # (B*S, 3*HK)
    eqkv = jnp.dot(ele, satw, preferred_element_type=f32) + satb
    tq, tk, tv = tqkv[:, :SAT_HK], tqkv[:, SAT_HK:2 * SAT_HK], tqkv[:, 2 * SAT_HK:]
    eq, ek, ev = eqkv[:, :SAT_HK], eqkv[:, SAT_HK:2 * SAT_HK], eqkv[:, 2 * SAT_HK:]
    hm = hmask_ref[...]                                                   # (HK, SAT_H)
    sat_scale = 1.0 / math.sqrt(SAT_DK)
    s_tt = jnp.dot(tq * tk, hm, preferred_element_type=f32)               # (B*S, SAT_H)
    s_te = jnp.dot(tq * ek, hm, preferred_element_type=f32)
    s_et = jnp.dot(eq * tk, hm, preferred_element_type=f32)
    s_ee = jnp.dot(eq * ek, hm, preferred_element_type=f32)
    # TODO(synk): SAT attention dropout is an eval-mode identity here.
    alpha = (_sigmoid((s_tt - s_te) * sat_scale)
             + _sigmoid((s_et - s_ee) * sat_scale))                       # (B*S, SAT_H)
    alpha_e = jax.lax.dot_general(alpha, hm, (((1,), (1,)), ((), ())),
                                  preferred_element_type=f32)             # (B*S, HK)
    ctx = alpha_e * tv + (2.0 - alpha_e) * ev                             # sum of 2 rows
    tok = jnp.dot(ctx, satow_ref[...], preferred_element_type=f32) \
        + 2.0 * satob_ref[...]                                            # (B*S, D)

    # ---- transformer blocks (pre-norm MHSA + MLP), batch folded in ---------
    abias = abias_ref[...]                                                # block-diag mask
    attn_scale = 1.0 / math.sqrt(HEAD_DIM)
    for l in range(DEPTH):
        vecs = vec6_ref[l]                                                # (6, D)
        ln1w, ln1b, bproj = vecs[0:1], vecs[1:2], vecs[2:3]
        ln2w, ln2b, bfc2 = vecs[3:4], vecs[4:5], vecs[5:6]

        xn = _layer_norm(tok, ln1w, ln1b)
        acc = jnp.zeros_like(tok)
        for h in range(NUM_HEADS):
            wi = l * NUM_HEADS + h
            q = jnp.dot(xn, wq_ref[wi], preferred_element_type=f32)       # (B*S, HD)
            k = jnp.dot(xn, wk_ref[wi], preferred_element_type=f32)
            v = jnp.dot(xn, wv_ref[wi], preferred_element_type=f32)
            s = jax.lax.dot_general(q, k, (((1,), (1,)), ((), ())),
                                    preferred_element_type=f32)           # q @ k^T
            p = _softmax_lastdim(s * attn_scale + abias)                  # (B*S, B*S)
            o = jnp.dot(p, v, preferred_element_type=f32)                 # (B*S, HD)
            acc = acc + jnp.dot(o, wpj_ref[wi], preferred_element_type=f32)
        tok = tok + acc + bproj                                           # residual

        xn2 = _layer_norm(tok, ln2w, ln2b)
        hid = jnp.dot(xn2, wfc1_ref[l], preferred_element_type=f32) + bfc1_ref[l]
        hid = _gelu_tanh(hid)
        tok = tok + jnp.dot(hid, wfc2_ref[l], preferred_element_type=f32) + bfc2

    # ---- final LayerNorm on the cls rows only; emit (B, D) directly --------
    cls = jnp.concatenate([tok[b * SEQ:b * SEQ + 1, :] for b in range(B)], axis=0)
    nwb = normwb_ref[...]
    out_ref[...] = _layer_norm(cls, nwb[0:1], nwb[1:2])


# ----------------------------- JAX wrapper ----------------------------------
def _extract_patches(x):
    # NCHW -> (B*N, C*ps*ps), same ordering as Conv2d(stride=ps).flatten(2).T
    bq, c, hh, ww = x.shape
    gh, gw = hh // PS, ww // PS
    xp = x.reshape(bq, c, gh, PS, gw, PS)
    xp = xp.transpose(0, 2, 4, 1, 3, 5)            # (B, gh, gw, C, ps, ps)
    return xp.reshape(bq * gh * gw, c * PS * PS)


def _forward(params, x, x_g_norm):
    bq = x.shape[0]
    bt = x_g_norm.shape[0]
    crops = bq // bt

    # --- layout plumbing + elevation index lookup (tiny; fused under jit) ---
    patches = _extract_patches(x)                                      # (B*N, C*ps*ps)
    means = jnp.mean(x_g_norm.reshape(bt, -1), axis=1)
    idx = jnp.searchsorted(params["per_li"], means, side="left")       # bisect_left
    # TODO(synk): original indexes eleva_embed[idx] unclamped and would fail
    # for means > per_li[-1]; clamp defensively (identical when means <= 1.0).
    idx = jnp.clip(idx, 0, NUM_ELE_SLICE - 1)
    idx_img = jnp.tile(idx, crops)                                     # crops outer, batch inner
    ele_rows = params["eleva_embed"][idx_img]                          # (bq, D)
    ele_full = jnp.repeat(ele_rows, SEQ, axis=0)                       # (bq*SEQ, D)

    base = params["pos_embed"][0].at[0].add(params["cls_token"][0, 0])  # (SEQ, D)
    tok_base = jnp.tile(base, (bq, 1))                                  # (bq*SEQ, D)

    # --- single fused pallas_call: everything VMEM-resident, one grid step ---
    return pl.pallas_call(
        _fused_forward_kernel,
        out_shape=jax.ShapeDtypeStruct((bq, EMBED_DIM), jnp.float32),
    )(patches, params["patch_w"], params["patch_b"],
      tok_base, params["scatter_mat"], ele_full,
      params["sat_wqkv"], params["sat_bqkv"], params["sat_wo"], params["sat_bo"],
      params["head_mask"], params["attn_bias"],
      params["wq_h"], params["wk_h"], params["wv_h"], params["wproj_h"],
      params["vec6"], params["b_fc1"], params["w_fc1"], params["w_fc2"],
      params["norm_wb"])


forward = jax.jit(_forward)


# ----------------------------- parameter init --------------------------------
def _constant_tables():
    # block-diagonal attention bias: 0 within a batch, -1e30 across batches
    blk = np.kron(np.eye(B), np.ones((SEQ, SEQ)))
    attn_bias = ((1.0 - blk) * NEG_INF).astype(np.float32)
    # scatter matrix: patch token n of image b -> token row b*SEQ + 1 + n
    scat = np.zeros((BS, B * N_PATCH), np.float32)
    for b in range(B):
        for n in range(N_PATCH):
            scat[b * SEQ + 1 + n, b * N_PATCH + n] = 1.0
    # per-head 0/1 column mask for the SAT attention: (HK, SAT_H)
    hmask = np.kron(np.eye(SAT_H), np.ones((SAT_DK, 1))).astype(np.float32)
    return jnp.asarray(attn_bias), jnp.asarray(scat), jnp.asarray(hmask)


def init_params(key):
    ks = iter(jax.random.split(key, 32))

    def tn(shape):  # deterministic stand-in for trunc_normal_(std=0.02)
        return 0.02 * jax.random.normal(next(ks), shape, jnp.float32)

    ones = lambda s: jnp.ones(s, jnp.float32)
    zeros = lambda s: jnp.zeros(s, jnp.float32)

    attn_bias, scat, hmask = _constant_tables()

    # per-layer (D,)-sized vectors packed: ln1_w, ln1_b, b_proj, ln2_w, ln2_b, b_fc2
    layer_vec = jnp.concatenate(
        [ones((1, EMBED_DIM)), zeros((1, EMBED_DIM)), zeros((1, EMBED_DIM)),
         ones((1, EMBED_DIM)), zeros((1, EMBED_DIM)), zeros((1, EMBED_DIM))], axis=0)
    vec6 = jnp.stack([layer_vec] * DEPTH, axis=0)                     # (DEPTH, 6, D)

    params = {
        # patch embed (Conv2d weight reshaped to (C*ps*ps, D))
        "patch_w": tn((C_IN * PS * PS, EMBED_DIM)),
        "patch_b": zeros((1, EMBED_DIM)),
        "cls_token": tn((1, 1, EMBED_DIM)),
        "pos_embed": tn((1, SEQ, EMBED_DIM)),
        "eleva_embed": tn((NUM_ELE_SLICE, EMBED_DIM)),
        "per_li": jnp.asarray(np.linspace(0.1, 1.0, NUM_ELE_SLICE), jnp.float32),
        # SAT_embed = ScaledDotProductAttention(d_model=192, d_k=d_v=32, h=8)
        "sat_wqkv": tn((EMBED_DIM, 3 * SAT_HK)),      # [Wq | Wk | Wv]
        "sat_bqkv": zeros((1, 3 * SAT_HK)),
        "sat_wo": tn((SAT_HK, EMBED_DIM)),
        "sat_bo": zeros((1, EMBED_DIM)),
        # transformer blocks, weights stacked over (layer, head) -> no lane slicing
        "wq_h": tn((DEPTH * NUM_HEADS, EMBED_DIM, HEAD_DIM)),
        "wk_h": tn((DEPTH * NUM_HEADS, EMBED_DIM, HEAD_DIM)),
        "wv_h": tn((DEPTH * NUM_HEADS, EMBED_DIM, HEAD_DIM)),
        "wproj_h": tn((DEPTH * NUM_HEADS, HEAD_DIM, EMBED_DIM)),
        "vec6": vec6,
        "b_fc1": zeros((DEPTH, 1, MLP_HID)),
        "w_fc1": tn((DEPTH, EMBED_DIM, MLP_HID)),
        "w_fc2": tn((DEPTH, MLP_HID, EMBED_DIM)),
        "norm_wb": jnp.concatenate([ones((1, EMBED_DIM)), zeros((1, EMBED_DIM))], axis=0),
        # compile-time constant tables passed into the fused kernel
        "attn_bias": attn_bias,
        "scatter_mat": scat,
        "head_mask": hmask,
    }
    return params


if __name__ == "__main__":
    key = jax.random.PRNGKey(0)
    pkey, xkey, gkey = jax.random.split(key, 3)
    params = init_params(pkey)

    x = jax.random.normal(xkey, (B, C_IN, IMG, IMG), jnp.float32)        # NCHW
    x_g_norm = jax.random.uniform(gkey, (B, 1, IMG, IMG), jnp.float32)   # in [0,1)

    out = forward(params, x, x_g_norm)
    out = jax.block_until_ready(out)
    assert out.shape == (B, EMBED_DIM) and out.dtype == jnp.float32
    assert bool(jnp.all(jnp.isfinite(out)))
    print("KERNEL_OK")
</pallas_src>

<mosaic_0001>
module attributes {stable_mosaic.version = 11 : i64} {
  func.func @_fused_forward_kernel(%arg0: memref<8x192xf32, #tpu.memory_space<vmem>>, %arg1: memref<192x192xf32, #tpu.memory_space<vmem>>, %arg2: memref<1x192xf32, #tpu.memory_space<vmem>>, %arg3: memref<10x192xf32, #tpu.memory_space<vmem>>, %arg4: memref<10x8xf32, #tpu.memory_space<vmem>>, %arg5: memref<10x192xf32, #tpu.memory_space<vmem>>, %arg6: memref<192x768xf32, #tpu.memory_space<vmem>>, %arg7: memref<1x768xf32, #tpu.memory_space<vmem>>, %arg8: memref<256x192xf32, #tpu.memory_space<vmem>>, %arg9: memref<1x192xf32, #tpu.memory_space<vmem>>, %arg10: memref<256x8xf32, #tpu.memory_space<vmem>>, %arg11: memref<10x10xf32, #tpu.memory_space<vmem>>, %arg12: memref<6x192x64xf32, #tpu.memory_space<vmem>>, %arg13: memref<6x192x64xf32, #tpu.memory_space<vmem>>, %arg14: memref<6x192x64xf32, #tpu.memory_space<vmem>>, %arg15: memref<6x64x192xf32, #tpu.memory_space<vmem>>, %arg16: memref<2x6x192xf32, #tpu.memory_space<vmem>>, %arg17: memref<2x1x768xf32, #tpu.memory_space<vmem>>, %arg18: memref<2x192x768xf32, #tpu.memory_space<vmem>>, %arg19: memref<2x768x192xf32, #tpu.memory_space<vmem>>, %arg20: memref<2x192xf32, #tpu.memory_space<vmem>>, %arg21: memref<2x192xf32, #tpu.memory_space<vmem>>) attributes {dimension_semantics = [], scalar_prefetch = 0 : i64, scratch_operands = 0 : i64, tpu.core_type = #tpu.core_type<tc>} {
    %c0 = arith.constant 0 : index
    %c0_0 = arith.constant 0 : index
    %0 = vector.load %arg0[%c0, %c0_0] : memref<8x192xf32, #tpu.memory_space<vmem>>, vector<8x192xf32>
    %c0_1 = arith.constant 0 : index
    %c0_2 = arith.constant 0 : index
    %1 = vector.load %arg1[%c0_1, %c0_2] : memref<192x192xf32, #tpu.memory_space<vmem>>, vector<192x192xf32>
    %cst = arith.constant dense<0.000000e+00> : vector<8x192xf32>
    %2 = tpu.matmul %0, %1, %cst {dimension_numbers = #tpu.dot_dimension_numbers<[1], [0], [0], [1], [0, 0, 1, 1], [], []>} : vector<8x192xf32>, vector<192x192xf32>, vector<8x192xf32> -> vector<8x192xf32>
    %c0_3 = arith.constant 0 : index
    %c0_4 = arith.constant 0 : index
    %3 = vector.load %arg2[%c0_3, %c0_4] : memref<1x192xf32, #tpu.memory_space<vmem>>, vector<1x192xf32>
    %4 = vector.broadcast %3 : vector<1x192xf32> to vector<8x192xf32>
    %5 = arith.addf %2, %4 : vector<8x192xf32>
    %c0_5 = arith.constant 0 : index
    %c0_6 = arith.constant 0 : index
    %6 = vector.load %arg3[%c0_5, %c0_6] : memref<10x192xf32, #tpu.memory_space<vmem>>, vector<10x192xf32>
    %c0_7 = arith.constant 0 : index
    %c0_8 = arith.constant 0 : index
    %7 = vector.load %arg4[%c0_7, %c0_8] : memref<10x8xf32, #tpu.memory_space<vmem>>, vector<10x8xf32>
    %cst_9 = arith.constant dense<0.000000e+00> : vector<10x192xf32>
    %8 = tpu.matmul %7, %5, %cst_9 {dimension_numbers = #tpu.dot_dimension_numbers<[1], [0], [0], [1], [0, 0, 1, 1], [], []>} : vector<10x8xf32>, vector<8x192xf32>, vector<10x192xf32> -> vector<10x192xf32>
    %9 = arith.addf %6, %8 : vector<10x192xf32>
    %c0_10 = arith.constant 0 : index
    %c0_11 = arith.constant 0 : index
    %10 = vector.load %arg5[%c0_10, %c0_11] : memref<10x192xf32, #tpu.memory_space<vmem>>, vector<10x192xf32>
    %c0_12 = arith.constant 0 : index
    %c0_13 = arith.constant 0 : index
    %11 = vector.load %arg6[%c0_12, %c0_13] : memref<192x768xf32, #tpu.memory_space<vmem>>, vector<192x768xf32>
    %c0_14 = arith.constant 0 : index
    %c0_15 = arith.constant 0 : index
    %12 = vector.load %arg7[%c0_14, %c0_15] : memref<1x768xf32, #tpu.memory_space<vmem>>, vector<1x768xf32>
    %cst_16 = arith.constant dense<0.000000e+00> : vector<10x768xf32>
    %13 = tpu.matmul %9, %11, %cst_16 {dimension_numbers = #tpu.dot_dimension_numbers<[1], [0], [0], [1], [0, 0, 1, 1], [], []>} : vector<10x192xf32>, vector<192x768xf32>, vector<10x768xf32> -> vector<10x768xf32>
    %14 = vector.broadcast %12 : vector<1x768xf32> to vector<10x768xf32>
    %15 = arith.addf %13, %14 : vector<10x768xf32>
    %cst_17 = arith.constant dense<0.000000e+00> : vector<10x768xf32>
    %16 = tpu.matmul %10, %11, %cst_17 {dimension_numbers = #tpu.dot_dimension_numbers<[1], [0], [0], [1], [0, 0, 1, 1], [], []>} : vector<10x192xf32>, vector<192x768xf32>, vector<10x768xf32> -> vector<10x768xf32>
    %17 = vector.broadcast %12 : vector<1x768xf32> to vector<10x768xf32>
    %18 = arith.addf %16, %17 : vector<10x768xf32>
    %19 = vector.extract_strided_slice %15 {offsets = [0, 0], sizes = [10, 256], strides = [1, 1]} : vector<10x768xf32> to vector<10x256xf32>
    %20 = vector.extract_strided_slice %15 {offsets = [0, 256], sizes = [10, 256], strides = [1, 1]} : vector<10x768xf32> to vector<10x256xf32>
    %21 = vector.extract_strided_slice %15 {offsets = [0, 512], sizes = [10, 256], strides = [1, 1]} : vector<10x768xf32> to vector<10x256xf32>
    %22 = vector.extract_strided_slice %18 {offsets = [0, 0], sizes = [10, 256], strides = [1, 1]} : vector<10x768xf32> to vector<10x256xf32>
    %23 = vector.extract_strided_slice %18 {offsets = [0, 256], sizes = [10, 256], strides = [1, 1]} : vector<10x768xf32> to vector<10x256xf32>
    %24 = vector.extract_strided_slice %18 {offsets = [0, 512], sizes = [10, 256], strides = [1, 1]} : vector<10x768xf32> to vector<10x256xf32>
    %c0_18 = arith.constant 0 : index
    %c0_19 = arith.constant 0 : index
    %25 = vector.load %arg10[%c0_18, %c0_19] : memref<256x8xf32, #tpu.memory_space<vmem>>, vector<256x8xf32>
    %26 = arith.mulf %19, %20 : vector<10x256xf32>
    %cst_20 = arith.constant dense<0.000000e+00> : vector<10x8xf32>
    %27 = tpu.matmul %26, %25, %cst_20 {dimension_numbers = #tpu.dot_dimension_numbers<[1], [0], [0], [1], [0, 0, 1, 1], [], []>} : vector<10x256xf32>, vector<256x8xf32>, vector<10x8xf32> -> vector<10x8xf32>
    %28 = arith.mulf %19, %23 : vector<10x256xf32>
    %cst_21 = arith.constant dense<0.000000e+00> : vector<10x8xf32>
    %29 = tpu.matmul %28, %25, %cst_21 {dimension_numbers = #tpu.dot_dimension_numbers<[1], [0], [0], [1], [0, 0, 1, 1], [], []>} : vector<10x256xf32>, vector<256x8xf32>, vector<10x8xf32> -> vector<10x8xf32>
    %30 = arith.mulf %22, %20 : vector<10x256xf32>
    %cst_22 = arith.constant dense<0.000000e+00> : vector<10x8xf32>
    %31 = tpu.matmul %30, %25, %cst_22 {dimension_numbers = #tpu.dot_dimension_numbers<[1], [0], [0], [1], [0, 0, 1, 1], [], []>} : vector<10x256xf32>, vector<256x8xf32>, vector<10x8xf32> -> vector<10x8xf32>
    %32 = arith.mulf %22, %23 : vector<10x256xf32>
    %cst_23 = arith.constant dense<0.000000e+00> : vector<10x8xf32>
    %33 = tpu.matmul %32, %25, %cst_23 {dimension_numbers = #tpu.dot_dimension_numbers<[1], [0], [0], [1], [0, 0, 1, 1], [], []>} : vector<10x256xf32>, vector<256x8xf32>, vector<10x8xf32> -> vector<10x8xf32>
    %34 = arith.subf %27, %29 : vector<10x8xf32>
    %cst_24 = arith.constant 0.176776692 : f32
    %35 = vector.broadcast %cst_24 : f32 to vector<10x8xf32>
    %36 = arith.mulf %34, %35 : vector<10x8xf32>
    %cst_25 = arith.constant 0.000000e+00 : f32
    %37 = vector.broadcast %cst_25 : f32 to vector<10x8xf32>
    %38 = arith.subf %37, %36 : vector<10x8xf32>
    %39 = math.exp %38 : vector<10x8xf32>
    %cst_26 = arith.constant 1.000000e+00 : f32
    %40 = vector.broadcast %cst_26 : f32 to vector<10x8xf32>
    %41 = arith.addf %40, %39 : vector<10x8xf32>
    %42 = tpu.reciprocal %41 {approx = true} : vector<10x8xf32> -> vector<10x8xf32>
    %43 = arith.subf %31, %33 : vector<10x8xf32>
    %cst_27 = arith.constant 0.176776692 : f32
    %44 = vector.broadcast %cst_27 : f32 to vector<10x8xf32>
    %45 = arith.mulf %43, %44 : vector<10x8xf32>
    %cst_28 = arith.constant 0.000000e+00 : f32
    %46 = vector.broadcast %cst_28 : f32 to vector<10x8xf32>
    %47 = arith.subf %46, %45 : vector<10x8xf32>
    %48 = math.exp %47 : vector<10x8xf32>
    %cst_29 = arith.constant 1.000000e+00 : f32
    %49 = vector.broadcast %cst_29 : f32 to vector<10x8xf32>
    %50 = arith.addf %49, %48 : vector<10x8xf32>
    %51 = tpu.reciprocal %50 {approx = true} : vector<10x8xf32> -> vector<10x8xf32>
    %52 = arith.addf %42, %51 : vector<10x8xf32>
    %cst_30 = arith.constant dense<0.000000e+00> : vector<10x256xf32>
    %53 = tpu.matmul %52, %25, %cst_30 {dimension_numbers = #tpu.dot_dimension_numbers<[1], [1], [0], [0], [0, 0, 1, 0], [], []>} : vector<10x8xf32>, vector<256x8xf32>, vector<10x256xf32> -> vector<10x256xf32>
    %54 = arith.mulf %53, %21 : vector<10x256xf32>
    %cst_31 = arith.constant 2.000000e+00 : f32
    %55 = vector.broadcast %cst_31 : f32 to vector<10x256xf32>
    %56 = arith.subf %55, %53 : vector<10x256xf32>
    %57 = arith.mulf %56, %24 : vector<10x256xf32>
    %58 = arith.addf %54, %57 : vector<10x256xf32>
    %c0_32 = arith.constant 0 : index
    %c0_33 = arith.constant 0 : index
    %59 = vector.load %arg8[%c0_32, %c0_33] : memref<256x192xf32, #tpu.memory_space<vmem>>, vector<256x192xf32>
    %cst_34 = arith.constant dense<0.000000e+00> : vector<10x192xf32>
    %60 = tpu.matmul %58, %59, %cst_34 {dimension_numbers = #tpu.dot_dimension_numbers<[1], [0], [0], [1], [0, 0, 1, 1], [], []>} : vector<10x256xf32>, vector<256x192xf32>, vector<10x192xf32> -> vector<10x192xf32>
    %c0_35 = arith.constant 0 : index
    %c0_36 = arith.constant 0 : index
    %61 = vector.load %arg9[%c0_35, %c0_36] : memref<1x192xf32, #tpu.memory_space<vmem>>, vector<1x192xf32>
    %cst_37 = arith.constant 2.000000e+00 : f32
    %62 = vector.broadcast %cst_37 : f32 to vector<1x192xf32>
    %63 = arith.mulf %62, %61 : vector<1x192xf32>
    %64 = vector.broadcast %63 : vector<1x192xf32> to vector<10x192xf32>
    %65 = arith.addf %60, %64 : vector<10x192xf32>
    %c0_38 = arith.constant 0 : index
    %c0_39 = arith.constant 0 : index
    %66 = vector.load %arg11[%c0_38, %c0_39] : memref<10x10xf32, #tpu.memory_space<vmem>>, vector<10x10xf32>
    %c0_40 = arith.constant 0 : index
    %c0_41 = arith.constant 0 : index
    %c0_42 = arith.constant 0 : index
    %67 = vector.load %arg16[%c0_40, %c0_41, %c0_42] : memref<2x6x192xf32, #tpu.memory_space<vmem>>, vector<1x6x192xf32>
    %68 = vector.shape_cast %67 : vector<1x6x192xf32> to vector<6x192xf32>
    %69 = vector.extract_strided_slice %68 {offsets = [0, 0], sizes = [1, 192], strides = [1, 1]} : vector<6x192xf32> to vector<1x192xf32>
    %70 = vector.extract_strided_slice %68 {offsets = [1, 0], sizes = [1, 192], strides = [1, 1]} : vector<6x192xf32> to vector<1x192xf32>
    %71 = vector.extract_strided_slice %68 {offsets = [2, 0], sizes = [1, 192], strides = [1, 1]} : vector<6x192xf32> to vector<1x192xf32>
    %72 = vector.extract_strided_slice %68 {offsets = [3, 0], sizes = [1, 192], strides = [1, 1]} : vector<6x192xf32> to vector<1x192xf32>
    %73 = vector.extract_strided_slice %68 {offsets = [4, 0], sizes = [1, 192], strides = [1, 1]} : vector<6x192xf32> to vector<1x192xf32>
    %74 = vector.extract_strided_slice %68 {offsets = [5, 0], sizes = [1, 192], strides = [1, 1]} : vector<6x192xf32> to vector<1x192xf32>
    %cst_43 = arith.constant dense<0.000000e+00> : vector<10xf32>
    %75 = vector.multi_reduction <add>, %65, %cst_43 [1] : vector<10x192xf32> to vector<10xf32>
    %76 = vector.shape_cast %75 : vector<10xf32> to vector<10x1xf32>
    %cst_44 = arith.constant 1.920000e+02 : f32
    %77 = vector.broadcast %cst_44 : f32 to vector<10x1xf32>
    %78 = arith.divf %76, %77 : vector<10x1xf32>
    %79 = vector.broadcast %78 : vector<10x1xf32> to vector<10x192xf32>
    %80 = arith.subf %65, %79 : vector<10x192xf32>
    %81 = arith.mulf %80, %80 : vector<10x192xf32>
    %cst_45 = arith.constant dense<0.000000e+00> : vector<10xf32>
    %82 = vector.multi_reduction <add>, %81, %cst_45 [1] : vector<10x192xf32> to vector<10xf32>
    %83 = vector.shape_cast %82 : vector<10xf32> to vector<10x1xf32>
    %cst_46 = arith.constant 1.920000e+02 : f32
    %84 = vector.broadcast %cst_46 : f32 to vector<10x1xf32>
    %85 = arith.divf %83, %84 : vector<10x1xf32>
    %cst_47 = arith.constant 9.99999974E-6 : f32
    %86 = vector.broadcast %cst_47 : f32 to vector<10x1xf32>
    %87 = arith.addf %85, %86 : vector<10x1xf32>
    %88 = math.rsqrt %87 : vector<10x1xf32>
    %89 = vector.broadcast %88 : vector<10x1xf32> to vector<10x192xf32>
    %90 = arith.mulf %80, %89 : vector<10x192xf32>
    %91 = vector.broadcast %69 : vector<1x192xf32> to vector<10x192xf32>
    %92 = arith.mulf %90, %91 : vector<10x192xf32>
    %93 = vector.broadcast %70 : vector<1x192xf32> to vector<10x192xf32>
    %94 = arith.addf %92, %93 : vector<10x192xf32>
    %cst_48 = arith.constant 0.000000e+00 : f32
    %95 = vector.broadcast %cst_48 : f32 to vector<10x192xf32>
    %c0_49 = arith.constant 0 : index
    %c0_50 = arith.constant 0 : index
    %c0_51 = arith.constant 0 : index
    %96 = vector.load %arg12[%c0_49, %c0_50, %c0_51] : memref<6x192x64xf32, #tpu.memory_space<vmem>>, vector<1x192x64xf32>
    %97 = vector.shape_cast %96 : vector<1x192x64xf32> to vector<192x64xf32>
    %cst_52 = arith.constant dense<0.000000e+00> : vector<10x64xf32>
    %98 = tpu.matmul %94, %97, %cst_52 {dimension_numbers = #tpu.dot_dimension_numbers<[1], [0], [0], [1], [0, 0, 1, 1], [], []>} : vector<10x192xf32>, vector<192x64xf32>, vector<10x64xf32> -> vector<10x64xf32>
    %c0_53 = arith.constant 0 : index
    %c0_54 = arith.constant 0 : index
    %c0_55 = arith.constant 0 : index
    %99 = vector.load %arg13[%c0_53, %c0_54, %c0_55] : memref<6x192x64xf32, #tpu.memory_space<vmem>>, vector<1x192x64xf32>
    %100 = vector.shape_cast %99 : vector<1x192x64xf32> to vector<192x64xf32>
    %cst_56 = arith.constant dense<0.000000e+00> : vector<10x64xf32>
    %101 = tpu.matmul %94, %100, %cst_56 {dimension_numbers = #tpu.dot_dimension_numbers<[1], [0], [0], [1], [0, 0, 1, 1], [], []>} : vector<10x192xf32>, vector<192x64xf32>, vector<10x64xf32> -> vector<10x64xf32>
    %c0_57 = arith.constant 0 : index
    %c0_58 = arith.constant 0 : index
    %c0_59 = arith.constant 0 : index
    %102 = vector.load %arg14[%c0_57, %c0_58, %c0_59] : memref<6x192x64xf32, #tpu.memory_space<vmem>>, vector<1x192x64xf32>
    %103 = vector.shape_cast %102 : vector<1x192x64xf32> to vector<192x64xf32>
    %cst_60 = arith.constant dense<0.000000e+00> : vector<10x64xf32>
    %104 = tpu.matmul %94, %103, %cst_60 {dimension_numbers = #tpu.dot_dimension_numbers<[1], [0], [0], [1], [0, 0, 1, 1], [], []>} : vector<10x192xf32>, vector<192x64xf32>, vector<10x64xf32> -> vector<10x64xf32>
    %cst_61 = arith.constant dense<0.000000e+00> : vector<10x10xf32>
    %105 = tpu.matmul %98, %101, %cst_61 {dimension_numbers = #tpu.dot_dimension_numbers<[1], [1], [0], [0], [0, 0, 1, 0], [], []>} : vector<10x64xf32>, vector<10x64xf32>, vector<10x10xf32> -> vector<10x10xf32>
    %cst_62 = arith.constant 1.250000e-01 : f32
    %106 = vector.broadcast %cst_62 : f32 to vector<10x10xf32>
    %107 = arith.mulf %105, %106 : vector<10x10xf32>
    %108 = arith.addf %107, %66 : vector<10x10xf32>
    %cst_63 = arith.constant dense<0xFF800000> : vector<10xf32>
    %109 = vector.multi_reduction <maximumf>, %108, %cst_63 [1] : vector<10x10xf32> to vector<10xf32>
    %110 = vector.shape_cast %109 : vector<10xf32> to vector<10x1xf32>
    %111 = vector.broadcast %110 : vector<10x1xf32> to vector<10x10xf32>
    %112 = arith.subf %108, %111 : vector<10x10xf32>
    %113 = math.exp %112 : vector<10x10xf32>
    %cst_64 = arith.constant dense<0.000000e+00> : vector<10xf32>
    %114 = vector.multi_reduction <add>, %113, %cst_64 [1] : vector<10x10xf32> to vector<10xf32>
    %115 = vector.shape_cast %114 : vector<10xf32> to vector<10x1xf32>
    %116 = tpu.reciprocal %115 {approx = true} : vector<10x1xf32> -> vector<10x1xf32>
    %117 = vector.broadcast %116 : vector<10x1xf32> to vector<10x10xf32>
    %118 = arith.mulf %113, %117 : vector<10x10xf32>
    %cst_65 = arith.constant dense<0.000000e+00> : vector<10x64xf32>
    %119 = tpu.matmul %118, %104, %cst_65 {dimension_numbers = #tpu.dot_dimension_numbers<[1], [0], [0], [1], [0, 0, 1, 1], [], []>} : vector<10x10xf32>, vector<10x64xf32>, vector<10x64xf32> -> vector<10x64xf32>
    %c0_66 = arith.constant 0 : index
    %c0_67 = arith.constant 0 : index
    %c0_68 = arith.constant 0 : index
    %120 = vector.load %arg15[%c0_66, %c0_67, %c0_68] : memref<6x64x192xf32, #tpu.memory_space<vmem>>, vector<1x64x192xf32>
    %121 = vector.shape_cast %120 : vector<1x64x192xf32> to vector<64x192xf32>
    %cst_69 = arith.constant dense<0.000000e+00> : vector<10x192xf32>
    %122 = tpu.matmul %119, %121, %cst_69 {dimension_numbers = #tpu.dot_dimension_numbers<[1], [0], [0], [1], [0, 0, 1, 1], [], []>} : vector<10x64xf32>, vector<64x192xf32>, vector<10x192xf32> -> vector<10x192xf32>
    %123 = arith.addf %95, %122 : vector<10x192xf32>
    %c1 = arith.constant 1 : index
    %c0_70 = arith.constant 0 : index
    %c0_71 = arith.constant 0 : index
    %124 = vector.load %arg12[%c1, %c0_70, %c0_71] : memref<6x192x64xf32, #tpu.memory_space<vmem>>, vector<1x192x64xf32>
    %125 = vector.shape_cast %124 : vector<1x192x64xf32> to vector<192x64xf32>
    %cst_72 = arith.constant dense<0.000000e+00> : vector<10x64xf32>
    %126 = tpu.matmul %94, %125, %cst_72 {dimension_numbers = #tpu.dot_dimension_numbers<[1], [0], [0], [1], [0, 0, 1, 1], [], []>} : vector<10x192xf32>, vector<192x64xf32>, vector<10x64xf32> -> vector<10x64xf32>
    %c1_73 = arith.constant 1 : index
    %c0_74 = arith.constant 0 : index
    %c0_75 = arith.constant 0 : index
    %127 = vector.load %arg13[%c1_73, %c0_74, %c0_75] : memref<6x192x64xf32, #tpu.memory_space<vmem>>, vector<1x192x64xf32>
    %128 = vector.shape_cast %127 : vector<1x192x64xf32> to vector<192x64xf32>
    %cst_76 = arith.constant dense<0.000000e+00> : vector<10x64xf32>
    %129 = tpu.matmul %94, %128, %cst_76 {dimension_numbers = #tpu.dot_dimension_numbers<[1], [0], [0], [1], [0, 0, 1, 1], [], []>} : vector<10x192xf32>, vector<192x64xf32>, vector<10x64xf32> -> vector<10x64xf32>
    %c1_77 = arith.constant 1 : index
    %c0_78 = arith.constant 0 : index
    %c0_79 = arith.constant 0 : index
    %130 = vector.load %arg14[%c1_77, %c0_78, %c0_79] : memref<6x192x64xf32, #tpu.memory_space<vmem>>, vector<1x192x64xf32>
    %131 = vector.shape_cast %130 : vector<1x192x64xf32> to vector<192x64xf32>
    %cst_80 = arith.constant dense<0.000000e+00> : vector<10x64xf32>
    %132 = tpu.matmul %94, %131, %cst_80 {dimension_numbers = #tpu.dot_dimension_numbers<[1], [0], [0], [1], [0, 0, 1, 1], [], []>} : vector<10x192xf32>, vector<192x64xf32>, vector<10x64xf32> -> vector<10x64xf32>
    %cst_81 = arith.constant dense<0.000000e+00> : vector<10x10xf32>
    %133 = tpu.matmul %126, %129, %cst_81 {dimension_numbers = #tpu.dot_dimension_numbers<[1], [1], [0], [0], [0, 0, 1, 0], [], []>} : vector<10x64xf32>, vector<10x64xf32>, vector<10x10xf32> -> vector<10x10xf32>
    %cst_82 = arith.constant 1.250000e-01 : f32
    %134 = vector.broadcast %cst_82 : f32 to vector<10x10xf32>
    %135 = arith.mulf %133, %134 : vector<10x10xf32>
    %136 = arith.addf %135, %66 : vector<10x10xf32>
    %cst_83 = arith.constant dense<0xFF800000> : vector<10xf32>
    %137 = vector.multi_reduction <maximumf>, %136, %cst_83 [1] : vector<10x10xf32> to vector<10xf32>
    %138 = vector.shape_cast %137 : vector<10xf32> to vector<10x1xf32>
    %139 = vector.broadcast %138 : vector<10x1xf32> to vector<10x10xf32>
    %140 = arith.subf %136, %139 : vector<10x10xf32>
    %141 = math.exp %140 : vector<10x10xf32>
    %cst_84 = arith.constant dense<0.000000e+00> : vector<10xf32>
    %142 = vector.multi_reduction <add>, %141, %cst_84 [1] : vector<10x10xf32> to vector<10xf32>
    %143 = vector.shape_cast %142 : vector<10xf32> to vector<10x1xf32>
    %144 = tpu.reciprocal %143 {approx = true} : vector<10x1xf32> -> vector<10x1xf32>
    %145 = vector.broadcast %144 : vector<10x1xf32> to vector<10x10xf32>
    %146 = arith.mulf %141, %145 : vector<10x10xf32>
    %cst_85 = arith.constant dense<0.000000e+00> : vector<10x64xf32>
    %147 = tpu.matmul %146, %132, %cst_85 {dimension_numbers = #tpu.dot_dimension_numbers<[1], [0], [0], [1], [0, 0, 1, 1], [], []>} : vector<10x10xf32>, vector<10x64xf32>, vector<10x64xf32> -> vector<10x64xf32>
    %c1_86 = arith.constant 1 : index
    %c0_87 = arith.constant 0 : index
    %c0_88 = arith.constant 0 : index
    %148 = vector.load %arg15[%c1_86, %c0_87, %c0_88] : memref<6x64x192xf32, #tpu.memory_space<vmem>>, vector<1x64x192xf32>
    %149 = vector.shape_cast %148 : vector<1x64x192xf32> to vector<64x192xf32>
    %cst_89 = arith.constant dense<0.000000e+00> : vector<10x192xf32>
    %150 = tpu.matmul %147, %149, %cst_89 {dimension_numbers = #tpu.dot_dimension_numbers<[1], [0], [0], [1], [0, 0, 1, 1], [], []>} : vector<10x64xf32>, vector<64x192xf32>, vector<10x192xf32> -> vector<10x192xf32>
    %151 = arith.addf %123, %150 : vector<10x192xf32>
    %c2 = arith.constant 2 : index
    %c0_90 = arith.constant 0 : index
    %c0_91 = arith.constant 0 : index
    %152 = vector.load %arg12[%c2, %c0_90, %c0_91] : memref<6x192x64xf32, #tpu.memory_space<vmem>>, vector<1x192x64xf32>
    %153 = vector.shape_cast %152 : vector<1x192x64xf32> to vector<192x64xf32>
    %cst_92 = arith.constant dense<0.000000e+00> : vector<10x64xf32>
    %154 = tpu.matmul %94, %153, %cst_92 {dimension_numbers = #tpu.dot_dimension_numbers<[1], [0], [0], [1], [0, 0, 1, 1], [], []>} : vector<10x192xf32>, vector<192x64xf32>, vector<10x64xf32> -> vector<10x64xf32>
    %c2_93 = arith.constant 2 : index
    %c0_94 = arith.constant 0 : index
    %c0_95 = arith.constant 0 : index
    %155 = vector.load %arg13[%c2_93, %c0_94, %c0_95] : memref<6x192x64xf32, #tpu.memory_space<vmem>>, vector<1x192x64xf32>
    %156 = vector.shape_cast %155 : vector<1x192x64xf32> to vector<192x64xf32>
    %cst_96 = arith.constant dense<0.000000e+00> : vector<10x64xf32>
    %157 = tpu.matmul %94, %156, %cst_96 {dimension_numbers = #tpu.dot_dimension_numbers<[1], [0], [0], [1], [0, 0, 1, 1], [], []>} : vector<10x192xf32>, vector<192x64xf32>, vector<10x64xf32> -> vector<10x64xf32>
    %c2_97 = arith.constant 2 : index
    %c0_98 = arith.constant 0 : index
    %c0_99 = arith.constant 0 : index
    %158 = vector.load %arg14[%c2_97, %c0_98, %c0_99] : memref<6x192x64xf32, #tpu.memory_space<vmem>>, vector<1x192x64xf32>
    %159 = vector.shape_cast %158 : vector<1x192x64xf32> to vector<192x64xf32>
    %cst_100 = arith.constant dense<0.000000e+00> : vector<10x64xf32>
    %160 = tpu.matmul %94, %159, %cst_100 {dimension_numbers = #tpu.dot_dimension_numbers<[1], [0], [0], [1], [0, 0, 1, 1], [], []>} : vector<10x192xf32>, vector<192x64xf32>, vector<10x64xf32> -> vector<10x64xf32>
    %cst_101 = arith.constant dense<0.000000e+00> : vector<10x10xf32>
    %161 = tpu.matmul %154, %157, %cst_101 {dimension_numbers = #tpu.dot_dimension_numbers<[1], [1], [0], [0], [0, 0, 1, 0], [], []>} : vector<10x64xf32>, vector<10x64xf32>, vector<10x10xf32> -> vector<10x10xf32>
    %cst_102 = arith.constant 1.250000e-01 : f32
    %162 = vector.broadcast %cst_102 : f32 to vector<10x10xf32>
    %163 = arith.mulf %161, %162 : vector<10x10xf32>
    %164 = arith.addf %163, %66 : vector<10x10xf32>
    %cst_103 = arith.constant dense<0xFF800000> : vector<10xf32>
    %165 = vector.multi_reduction <maximumf>, %164, %cst_103 [1] : vector<10x10xf32> to vector<10xf32>
    %166 = vector.shape_cast %165 : vector<10xf32> to vector<10x1xf32>
    %167 = vector.broadcast %166 : vector<10x1xf32> to vector<10x10xf32>
    %168 = arith.subf %164, %167 : vector<10x10xf32>
    %169 = math.exp %168 : vector<10x10xf32>
    %cst_104 = arith.constant dense<0.000000e+00> : vector<10xf32>
    %170 = vector.multi_reduction <add>, %169, %cst_104 [1] : vector<10x10xf32> to vector<10xf32>
    %171 = vector.shape_cast %170 : vector<10xf32> to vector<10x1xf32>
    %172 = tpu.reciprocal %171 {approx = true} : vector<10x1xf32> -> vector<10x1xf32>
    %173 = vector.broadcast %172 : vector<10x1xf32> to vector<10x10xf32>
    %174 = arith.mulf %169, %173 : vector<10x10xf32>
    %cst_105 = arith.constant dense<0.000000e+00> : vector<10x64xf32>
    %175 = tpu.matmul %174, %160, %cst_105 {dimension_numbers = #tpu.dot_dimension_numbers<[1], [0], [0], [1], [0, 0, 1, 1], [], []>} : vector<10x10xf32>, vector<10x64xf32>, vector<10x64xf32> -> vector<10x64xf32>
    %c2_106 = arith.constant 2 : index
    %c0_107 = arith.constant 0 : index
    %c0_108 = arith.constant 0 : index
    %176 = vector.load %arg15[%c2_106, %c0_107, %c0_108] : memref<6x64x192xf32, #tpu.memory_space<vmem>>, vector<1x64x192xf32>
    %177 = vector.shape_cast %176 : vector<1x64x192xf32> to vector<64x192xf32>
    %cst_109 = arith.constant dense<0.000000e+00> : vector<10x192xf32>
    %178 = tpu.matmul %175, %177, %cst_109 {dimension_numbers = #tpu.dot_dimension_numbers<[1], [0], [0], [1], [0, 0, 1, 1], [], []>} : vector<10x64xf32>, vector<64x192xf32>, vector<10x192xf32> -> vector<10x192xf32>
    %179 = arith.addf %151, %178 : vector<10x192xf32>
    %180 = arith.addf %65, %179 : vector<10x192xf32>
    %181 = vector.broadcast %71 : vector<1x192xf32> to vector<10x192xf32>
    %182 = arith.addf %180, %181 : vector<10x192xf32>
    %cst_110 = arith.constant dense<0.000000e+00> : vector<10xf32>
    %183 = vector.multi_reduction <add>, %182, %cst_110 [1] : vector<10x192xf32> to vector<10xf32>
    %184 = vector.shape_cast %183 : vector<10xf32> to vector<10x1xf32>
    %cst_111 = arith.constant 1.920000e+02 : f32
    %185 = vector.broadcast %cst_111 : f32 to vector<10x1xf32>
    %186 = arith.divf %184, %185 : vector<10x1xf32>
    %187 = vector.broadcast %186 : vector<10x1xf32> to vector<10x192xf32>
    %188 = arith.subf %182, %187 : vector<10x192xf32>
    %189 = arith.mulf %188, %188 : vector<10x192xf32>
    %cst_112 = arith.constant dense<0.000000e+00> : vector<10xf32>
    %190 = vector.multi_reduction <add>, %189, %cst_112 [1] : vector<10x192xf32> to vector<10xf32>
    %191 = vector.shape_cast %190 : vector<10xf32> to vector<10x1xf32>
    %cst_113 = arith.constant 1.920000e+02 : f32
    %192 = vector.broadcast %cst_113 : f32 to vector<10x1xf32>
    %193 = arith.divf %191, %192 : vector<10x1xf32>
    %cst_114 = arith.constant 9.99999974E-6 : f32
    %194 = vector.broadcast %cst_114 : f32 to vector<10x1xf32>
    %195 = arith.addf %193, %194 : vector<10x1xf32>
    %196 = math.rsqrt %195 : vector<10x1xf32>
    %197 = vector.broadcast %196 : vector<10x1xf32> to vector<10x192xf32>
    %198 = arith.mulf %188, %197 : vector<10x192xf32>
    %199 = vector.broadcast %72 : vector<1x192xf32> to vector<10x192xf32>
    %200 = arith.mulf %198, %199 : vector<10x192xf32>
    %201 = vector.broadcast %73 : vector<1x192xf32> to vector<10x192xf32>
    %202 = arith.addf %200, %201 : vector<10x192xf32>
    %c0_115 = arith.constant 0 : index
    %c0_116 = arith.constant 0 : index
    %c0_117 = arith.constant 0 : index
    %203 = vector.load %arg18[%c0_115, %c0_116, %c0_117] : memref<2x192x768xf32, #tpu.memory_space<vmem>>, vector<1x192x768xf32>
    %204 = vector.shape_cast %203 : vector<1x192x768xf32> to vector<192x768xf32>
    %cst_118 = arith.constant dense<0.000000e+00> : vector<10x768xf32>
    %205 = tpu.matmul %202, %204, %cst_118 {dimension_numbers = #tpu.dot_dimension_numbers<[1], [0], [0], [1], [0, 0, 1, 1], [], []>} : vector<10x192xf32>, vector<192x768xf32>, vector<10x768xf32> -> vector<10x768xf32>
    %c0_119 = arith.constant 0 : index
    %c0_120 = arith.constant 0 : index
    %c0_121 = arith.constant 0 : index
    %206 = vector.load %arg17[%c0_119, %c0_120, %c0_121] : memref<2x1x768xf32, #tpu.memory_space<vmem>>, vector<1x1x768xf32>
    %207 = vector.shape_cast %206 : vector<1x1x768xf32> to vector<1x768xf32>
    %208 = vector.broadcast %207 : vector<1x768xf32> to vector<10x768xf32>
    %209 = arith.addf %205, %208 : vector<10x768xf32>
    %cst_122 = arith.constant 5.000000e-01 : f32
    %210 = vector.broadcast %cst_122 : f32 to vector<10x768xf32>
    %211 = arith.mulf %210, %209 : vector<10x768xf32>
    %212 = arith.mulf %209, %209 : vector<10x768xf32>
    %213 = arith.mulf %212, %209 : vector<10x768xf32>
    %cst_123 = arith.constant 4.471500e-02 : f32
    %214 = vector.broadcast %cst_123 : f32 to vector<10x768xf32>
    %215 = arith.mulf %214, %213 : vector<10x768xf32>
    %216 = arith.addf %209, %215 : vector<10x768xf32>
    %cst_124 = arith.constant 0.797884583 : f32
    %217 = vector.broadcast %cst_124 : f32 to vector<10x768xf32>
    %218 = arith.mulf %217, %216 : vector<10x768xf32>
    %219 = math.tanh %218 : vector<10x768xf32>
    %cst_125 = arith.constant 1.000000e+00 : f32
    %220 = vector.broadcast %cst_125 : f32 to vector<10x768xf32>
    %221 = arith.addf %220, %219 : vector<10x768xf32>
    %222 = arith.mulf %211, %221 : vector<10x768xf32>
    %c0_126 = arith.constant 0 : index
    %c0_127 = arith.constant 0 : index
    %c0_128 = arith.constant 0 : index
    %223 = vector.load %arg19[%c0_126, %c0_127, %c0_128] : memref<2x768x192xf32, #tpu.memory_space<vmem>>, vector<1x768x192xf32>
    %224 = vector.shape_cast %223 : vector<1x768x192xf32> to vector<768x192xf32>
    %cst_129 = arith.constant dense<0.000000e+00> : vector<10x192xf32>
    %225 = tpu.matmul %222, %224, %cst_129 {dimension_numbers = #tpu.dot_dimension_numbers<[1], [0], [0], [1], [0, 0, 1, 1], [], []>} : vector<10x768xf32>, vector<768x192xf32>, vector<10x192xf32> -> vector<10x192xf32>
    %226 = arith.addf %182, %225 : vector<10x192xf32>
    %227 = vector.broadcast %74 : vector<1x192xf32> to vector<10x192xf32>
    %228 = arith.addf %226, %227 : vector<10x192xf32>
    %c1_130 = arith.constant 1 : index
    %c0_131 = arith.constant 0 : index
    %c0_132 = arith.constant 0 : index
    %229 = vector.load %arg16[%c1_130, %c0_131, %c0_132] : memref<2x6x192xf32, #tpu.memory_space<vmem>>, vector<1x6x192xf32>
    %230 = vector.shape_cast %229 : vector<1x6x192xf32> to vector<6x192xf32>
    %231 = vector.extract_strided_slice %230 {offsets = [0, 0], sizes = [1, 192], strides = [1, 1]} : vector<6x192xf32> to vector<1x192xf32>
    %232 = vector.extract_strided_slice %230 {offsets = [1, 0], sizes = [1, 192], strides = [1, 1]} : vector<6x192xf32> to vector<1x192xf32>
    %233 = vector.extract_strided_slice %230 {offsets = [2, 0], sizes = [1, 192], strides = [1, 1]} : vector<6x192xf32> to vector<1x192xf32>
    %234 = vector.extract_strided_slice %230 {offsets = [3, 0], sizes = [1, 192], strides = [1, 1]} : vector<6x192xf32> to vector<1x192xf32>
    %235 = vector.extract_strided_slice %230 {offsets = [4, 0], sizes = [1, 192], strides = [1, 1]} : vector<6x192xf32> to vector<1x192xf32>
    %236 = vector.extract_strided_slice %230 {offsets = [5, 0], sizes = [1, 192], strides = [1, 1]} : vector<6x192xf32> to vector<1x192xf32>
    %cst_133 = arith.constant dense<0.000000e+00> : vector<10xf32>
    %237 = vector.multi_reduction <add>, %228, %cst_133 [1] : vector<10x192xf32> to vector<10xf32>
    %238 = vector.shape_cast %237 : vector<10xf32> to vector<10x1xf32>
    %cst_134 = arith.constant 1.920000e+02 : f32
    %239 = vector.broadcast %cst_134 : f32 to vector<10x1xf32>
    %240 = arith.divf %238, %239 : vector<10x1xf32>
    %241 = vector.broadcast %240 : vector<10x1xf32> to vector<10x192xf32>
    %242 = arith.subf %228, %241 : vector<10x192xf32>
    %243 = arith.mulf %242, %242 : vector<10x192xf32>
    %cst_135 = arith.constant dense<0.000000e+00> : vector<10xf32>
    %244 = vector.multi_reduction <add>, %243, %cst_135 [1] : vector<10x192xf32> to vector<10xf32>
    %245 = vector.shape_cast %244 : vector<10xf32> to vector<10x1xf32>
    %cst_136 = arith.constant 1.920000e+02 : f32
    %246 = vector.broadcast %cst_136 : f32 to vector<10x1xf32>
    %247 = arith.divf %245, %246 : vector<10x1xf32>
    %cst_137 = arith.constant 9.99999974E-6 : f32
    %248 = vector.broadcast %cst_137 : f32 to vector<10x1xf32>
    %249 = arith.addf %247, %248 : vector<10x1xf32>
    %250 = math.rsqrt %249 : vector<10x1xf32>
    %251 = vector.broadcast %250 : vector<10x1xf32> to vector<10x192xf32>
    %252 = arith.mulf %242, %251 : vector<10x192xf32>
    %253 = vector.broadcast %231 : vector<1x192xf32> to vector<10x192xf32>
    %254 = arith.mulf %252, %253 : vector<10x192xf32>
    %255 = vector.broadcast %232 : vector<1x192xf32> to vector<10x192xf32>
    %256 = arith.addf %254, %255 : vector<10x192xf32>
    %cst_138 = arith.constant 0.000000e+00 : f32
    %257 = vector.broadcast %cst_138 : f32 to vector<10x192xf32>
    %c3 = arith.constant 3 : index
    %c0_139 = arith.constant 0 : index
    %c0_140 = arith.constant 0 : index
    %258 = vector.load %arg12[%c3, %c0_139, %c0_140] : memref<6x192x64xf32, #tpu.memory_space<vmem>>, vector<1x192x64xf32>
    %259 = vector.shape_cast %258 : vector<1x192x64xf32> to vector<192x64xf32>
    %cst_141 = arith.constant dense<0.000000e+00> : vector<10x64xf32>
    %260 = tpu.matmul %256, %259, %cst_141 {dimension_numbers = #tpu.dot_dimension_numbers<[1], [0], [0], [1], [0, 0, 1, 1], [], []>} : vector<10x192xf32>, vector<192x64xf32>, vector<10x64xf32> -> vector<10x64xf32>
    %c3_142 = arith.constant 3 : index
    %c0_143 = arith.constant 0 : index
    %c0_144 = arith.constant 0 : index
    %261 = vector.load %arg13[%c3_142, %c0_143, %c0_144] : memref<6x192x64xf32, #tpu.memory_space<vmem>>, vector<1x192x64xf32>
    %262 = vector.shape_cast %261 : vector<1x192x64xf32> to vector<192x64xf32>
    %cst_145 = arith.constant dense<0.000000e+00> : vector<10x64xf32>
    %263 = tpu.matmul %256, %262, %cst_145 {dimension_numbers = #tpu.dot_dimension_numbers<[1], [0], [0], [1], [0, 0, 1, 1], [], []>} : vector<10x192xf32>, vector<192x64xf32>, vector<10x64xf32> -> vector<10x64xf32>
    %c3_146 = arith.constant 3 : index
    %c0_147 = arith.constant 0 : index
    %c0_148 = arith.constant 0 : index
    %264 = vector.load %arg14[%c3_146, %c0_147, %c0_148] : memref<6x192x64xf32, #tpu.memory_space<vmem>>, vector<1x192x64xf32>
    %265 = vector.shape_cast %264 : vector<1x192x64xf32> to vector<192x64xf32>
    %cst_149 = arith.constant dense<0.000000e+00> : vector<10x64xf32>
    %266 = tpu.matmul %256, %265, %cst_149 {dimension_numbers = #tpu.dot_dimension_numbers<[1], [0], [0], [1], [0, 0, 1, 1], [], []>} : vector<10x192xf32>, vector<192x64xf32>, vector<10x64xf32> -> vector<10x64xf32>
    %cst_150 = arith.constant dense<0.000000e+00> : vector<10x10xf32>
    %267 = tpu.matmul %260, %263, %cst_150 {dimension_numbers = #tpu.dot_dimension_numbers<[1], [1], [0], [0], [0, 0, 1, 0], [], []>} : vector<10x64xf32>, vector<10x64xf32>, vector<10x10xf32> -> vector<10x10xf32>
    %cst_151 = arith.constant 1.250000e-01 : f32
    %268 = vector.broadcast %cst_151 : f32 to vector<10x10xf32>
    %269 = arith.mulf %267, %268 : vector<10x10xf32>
    %270 = arith.addf %269, %66 : vector<10x10xf32>
    %cst_152 = arith.constant dense<0xFF800000> : vector<10xf32>
    %271 = vector.multi_reduction <maximumf>, %270, %cst_152 [1] : vector<10x10xf32> to vector<10xf32>
    %272 = vector.shape_cast %271 : vector<10xf32> to vector<10x1xf32>
    %273 = vector.broadcast %272 : vector<10x1xf32> to vector<10x10xf32>
    %274 = arith.subf %270, %273 : vector<10x10xf32>
    %275 = math.exp %274 : vector<10x10xf32>
    %cst_153 = arith.constant dense<0.000000e+00> : vector<10xf32>
    %276 = vector.multi_reduction <add>, %275, %cst_153 [1] : vector<10x10xf32> to vector<10xf32>
    %277 = vector.shape_cast %276 : vector<10xf32> to vector<10x1xf32>
    %278 = tpu.reciprocal %277 {approx = true} : vector<10x1xf32> -> vector<10x1xf32>
    %279 = vector.broadcast %278 : vector<10x1xf32> to vector<10x10xf32>
    %280 = arith.mulf %275, %279 : vector<10x10xf32>
    %cst_154 = arith.constant dense<0.000000e+00> : vector<10x64xf32>
    %281 = tpu.matmul %280, %266, %cst_154 {dimension_numbers = #tpu.dot_dimension_numbers<[1], [0], [0], [1], [0, 0, 1, 1], [], []>} : vector<10x10xf32>, vector<10x64xf32>, vector<10x64xf32> -> vector<10x64xf32>
    %c3_155 = arith.constant 3 : index
    %c0_156 = arith.constant 0 : index
    %c0_157 = arith.constant 0 : index
    %282 = vector.load %arg15[%c3_155, %c0_156, %c0_157] : memref<6x64x192xf32, #tpu.memory_space<vmem>>, vector<1x64x192xf32>
    %283 = vector.shape_cast %282 : vector<1x64x192xf32> to vector<64x192xf32>
    %cst_158 = arith.constant dense<0.000000e+00> : vector<10x192xf32>
    %284 = tpu.matmul %281, %283, %cst_158 {dimension_numbers = #tpu.dot_dimension_numbers<[1], [0], [0], [1], [0, 0, 1, 1], [], []>} : vector<10x64xf32>, vector<64x192xf32>, vector<10x192xf32> -> vector<10x192xf32>
    %285 = arith.addf %257, %284 : vector<10x192xf32>
    %c4 = arith.constant 4 : index
    %c0_159 = arith.constant 0 : index
    %c0_160 = arith.constant 0 : index
    %286 = vector.load %arg12[%c4, %c0_159, %c0_160] : memref<6x192x64xf32, #tpu.memory_space<vmem>>, vector<1x192x64xf32>
    %287 = vector.shape_cast %286 : vector<1x192x64xf32> to vector<192x64xf32>
    %cst_161 = arith.constant dense<0.000000e+00> : vector<10x64xf32>
    %288 = tpu.matmul %256, %287, %cst_161 {dimension_numbers = #tpu.dot_dimension_numbers<[1], [0], [0], [1], [0, 0, 1, 1], [], []>} : vector<10x192xf32>, vector<192x64xf32>, vector<10x64xf32> -> vector<10x64xf32>
    %c4_162 = arith.constant 4 : index
    %c0_163 = arith.constant 0 : index
    %c0_164 = arith.constant 0 : index
    %289 = vector.load %arg13[%c4_162, %c0_163, %c0_164] : memref<6x192x64xf32, #tpu.memory_space<vmem>>, vector<1x192x64xf32>
    %290 = vector.shape_cast %289 : vector<1x192x64xf32> to vector<192x64xf32>
    %cst_165 = arith.constant dense<0.000000e+00> : vector<10x64xf32>
    %291 = tpu.matmul %256, %290, %cst_165 {dimension_numbers = #tpu.dot_dimension_numbers<[1], [0], [0], [1], [0, 0, 1, 1], [], []>} : vector<10x192xf32>, vector<192x64xf32>, vector<10x64xf32> -> vector<10x64xf32>
    %c4_166 = arith.constant 4 : index
    %c0_167 = arith.constant 0 : index
    %c0_168 = arith.constant 0 : index
    %292 = vector.load %arg14[%c4_166, %c0_167, %c0_168] : memref<6x192x64xf32, #tpu.memory_space<vmem>>, vector<1x192x64xf32>
    %293 = vector.shape_cast %292 : vector<1x192x64xf32> to vector<192x64xf32>
    %cst_169 = arith.constant dense<0.000000e+00> : vector<10x64xf32>
    %294 = tpu.matmul %256, %293, %cst_169 {dimension_numbers = #tpu.dot_dimension_numbers<[1], [0], [0], [1], [0, 0, 1, 1], [], []>} : vector<10x192xf32>, vector<192x64xf32>, vector<10x64xf32> -> vector<10x64xf32>
    %cst_170 = arith.constant dense<0.000000e+00> : vector<10x10xf32>
    %295 = tpu.matmul %288, %291, %cst_170 {dimension_numbers = #tpu.dot_dimension_numbers<[1], [1], [0], [0], [0, 0, 1, 0], [], []>} : vector<10x64xf32>, vector<10x64xf32>, vector<10x10xf32> -> vector<10x10xf32>
    %cst_171 = arith.constant 1.250000e-01 : f32
    %296 = vector.broadcast %cst_171 : f32 to vector<10x10xf32>
    %297 = arith.mulf %295, %296 : vector<10x10xf32>
    %298 = arith.addf %297, %66 : vector<10x10xf32>
    %cst_172 = arith.constant dense<0xFF800000> : vector<10xf32>
    %299 = vector.multi_reduction <maximumf>, %298, %cst_172 [1] : vector<10x10xf32> to vector<10xf32>
    %300 = vector.shape_cast %299 : vector<10xf32> to vector<10x1xf32>
    %301 = vector.broadcast %300 : vector<10x1xf32> to vector<10x10xf32>
    %302 = arith.subf %298, %301 : vector<10x10xf32>
    %303 = math.exp %302 : vector<10x10xf32>
    %cst_173 = arith.constant dense<0.000000e+00> : vector<10xf32>
    %304 = vector.multi_reduction <add>, %303, %cst_173 [1] : vector<10x10xf32> to vector<10xf32>
    %305 = vector.shape_cast %304 : vector<10xf32> to vector<10x1xf32>
    %306 = tpu.reciprocal %305 {approx = true} : vector<10x1xf32> -> vector<10x1xf32>
    %307 = vector.broadcast %306 : vector<10x1xf32> to vector<10x10xf32>
    %308 = arith.mulf %303, %307 : vector<10x10xf32>
    %cst_174 = arith.constant dense<0.000000e+00> : vector<10x64xf32>
    %309 = tpu.matmul %308, %294, %cst_174 {dimension_numbers = #tpu.dot_dimension_numbers<[1], [0], [0], [1], [0, 0, 1, 1], [], []>} : vector<10x10xf32>, vector<10x64xf32>, vector<10x64xf32> -> vector<10x64xf32>
    %c4_175 = arith.constant 4 : index
    %c0_176 = arith.constant 0 : index
    %c0_177 = arith.constant 0 : index
    %310 = vector.load %arg15[%c4_175, %c0_176, %c0_177] : memref<6x64x192xf32, #tpu.memory_space<vmem>>, vector<1x64x192xf32>
    %311 = vector.shape_cast %310 : vector<1x64x192xf32> to vector<64x192xf32>
    %cst_178 = arith.constant dense<0.000000e+00> : vector<10x192xf32>
    %312 = tpu.matmul %309, %311, %cst_178 {dimension_numbers = #tpu.dot_dimension_numbers<[1], [0], [0], [1], [0, 0, 1, 1], [], []>} : vector<10x64xf32>, vector<64x192xf32>, vector<10x192xf32> -> vector<10x192xf32>
    %313 = arith.addf %285, %312 : vector<10x192xf32>
    %c5 = arith.constant 5 : index
    %c0_179 = arith.constant 0 : index
    %c0_180 = arith.constant 0 : index
    %314 = vector.load %arg12[%c5, %c0_179, %c0_180] : memref<6x192x64xf32, #tpu.memory_space<vmem>>, vector<1x192x64xf32>
    %315 = vector.shape_cast %314 : vector<1x192x64xf32> to vector<192x64xf32>
    %cst_181 = arith.constant dense<0.000000e+00> : vector<10x64xf32>
    %316 = tpu.matmul %256, %315, %cst_181 {dimension_numbers = #tpu.dot_dimension_numbers<[1], [0], [0], [1], [0, 0, 1, 1], [], []>} : vector<10x192xf32>, vector<192x64xf32>, vector<10x64xf32> -> vector<10x64xf32>
    %c5_182 = arith.constant 5 : index
    %c0_183 = arith.constant 0 : index
    %c0_184 = arith.constant 0 : index
    %317 = vector.load %arg13[%c5_182, %c0_183, %c0_184] : memref<6x192x64xf32, #tpu.memory_space<vmem>>, vector<1x192x64xf32>
    %318 = vector.shape_cast %317 : vector<1x192x64xf32> to vector<192x64xf32>
    %cst_185 = arith.constant dense<0.000000e+00> : vector<10x64xf32>
    %319 = tpu.matmul %256, %318, %cst_185 {dimension_numbers = #tpu.dot_dimension_numbers<[1], [0], [0], [1], [0, 0, 1, 1], [], []>} : vector<10x192xf32>, vector<192x64xf32>, vector<10x64xf32> -> vector<10x64xf32>
    %c5_186 = arith.constant 5 : index
    %c0_187 = arith.constant 0 : index
    %c0_188 = arith.constant 0 : index
    %320 = vector.load %arg14[%c5_186, %c0_187, %c0_188] : memref<6x192x64xf32, #tpu.memory_space<vmem>>, vector<1x192x64xf32>
    %321 = vector.shape_cast %320 : vector<1x192x64xf32> to vector<192x64xf32>
    %cst_189 = arith.constant dense<0.000000e+00> : vector<10x64xf32>
    %322 = tpu.matmul %256, %321, %cst_189 {dimension_numbers = #tpu.dot_dimension_numbers<[1], [0], [0], [1], [0, 0, 1, 1], [], []>} : vector<10x192xf32>, vector<192x64xf32>, vector<10x64xf32> -> vector<10x64xf32>
    %cst_190 = arith.constant dense<0.000000e+00> : vector<10x10xf32>
    %323 = tpu.matmul %316, %319, %cst_190 {dimension_numbers = #tpu.dot_dimension_numbers<[1], [1], [0], [0], [0, 0, 1, 0], [], []>} : vector<10x64xf32>, vector<10x64xf32>, vector<10x10xf32> -> vector<10x10xf32>
    %cst_191 = arith.constant 1.250000e-01 : f32
    %324 = vector.broadcast %cst_191 : f32 to vector<10x10xf32>
    %325 = arith.mulf %323, %324 : vector<10x10xf32>
    %326 = arith.addf %325, %66 : vector<10x10xf32>
    %cst_192 = arith.constant dense<0xFF800000> : vector<10xf32>
    %327 = vector.multi_reduction <maximumf>, %326, %cst_192 [1] : vector<10x10xf32> to vector<10xf32>
    %328 = vector.shape_cast %327 : vector<10xf32> to vector<10x1xf32>
    %329 = vector.broadcast %328 : vector<10x1xf32> to vector<10x10xf32>
    %330 = arith.subf %326, %329 : vector<10x10xf32>
    %331 = math.exp %330 : vector<10x10xf32>
    %cst_193 = arith.constant dense<0.000000e+00> : vector<10xf32>
    %332 = vector.multi_reduction <add>, %331, %cst_193 [1] : vector<10x10xf32> to vector<10xf32>
    %333 = vector.shape_cast %332 : vector<10xf32> to vector<10x1xf32>
    %334 = tpu.reciprocal %333 {approx = true} : vector<10x1xf32> -> vector<10x1xf32>
    %335 = vector.broadcast %334 : vector<10x1xf32> to vector<10x10xf32>
    %336 = arith.mulf %331, %335 : vector<10x10xf32>
    %cst_194 = arith.constant dense<0.000000e+00> : vector<10x64xf32>
    %337 = tpu.matmul %336, %322, %cst_194 {dimension_numbers = #tpu.dot_dimension_numbers<[1], [0], [0], [1], [0, 0, 1, 1], [], []>} : vector<10x10xf32>, vector<10x64xf32>, vector<10x64xf32> -> vector<10x64xf32>
    %c5_195 = arith.constant 5 : index
    %c0_196 = arith.constant 0 : index
    %c0_197 = arith.constant 0 : index
    %338 = vector.load %arg15[%c5_195, %c0_196, %c0_197] : memref<6x64x192xf32, #tpu.memory_space<vmem>>, vector<1x64x192xf32>
    %339 = vector.shape_cast %338 : vector<1x64x192xf32> to vector<64x192xf32>
    %cst_198 = arith.constant dense<0.000000e+00> : vector<10x192xf32>
    %340 = tpu.matmul %337, %339, %cst_198 {dimension_numbers = #tpu.dot_dimension_numbers<[1], [0], [0], [1], [0, 0, 1, 1], [], []>} : vector<10x64xf32>, vector<64x192xf32>, vector<10x192xf32> -> vector<10x192xf32>
    %341 = arith.addf %313, %340 : vector<10x192xf32>
    %342 = arith.addf %228, %341 : vector<10x192xf32>
    %343 = vector.broadcast %233 : vector<1x192xf32> to vector<10x192xf32>
    %344 = arith.addf %342, %343 : vector<10x192xf32>
    %cst_199 = arith.constant dense<0.000000e+00> : vector<10xf32>
    %345 = vector.multi_reduction <add>, %344, %cst_199 [1] : vector<10x192xf32> to vector<10xf32>
    %346 = vector.shape_cast %345 : vector<10xf32> to vector<10x1xf32>
    %cst_200 = arith.constant 1.920000e+02 : f32
    %347 = vector.broadcast %cst_200 : f32 to vector<10x1xf32>
    %348 = arith.divf %346, %347 : vector<10x1xf32>
    %349 = vector.broadcast %348 : vector<10x1xf32> to vector<10x192xf32>
    %350 = arith.subf %344, %349 : vector<10x192xf32>
    %351 = arith.mulf %350, %350 : vector<10x192xf32>
    %cst_201 = arith.constant dense<0.000000e+00> : vector<10xf32>
    %352 = vector.multi_reduction <add>, %351, %cst_201 [1] : vector<10x192xf32> to vector<10xf32>
    %353 = vector.shape_cast %352 : vector<10xf32> to vector<10x1xf32>
    %cst_202 = arith.constant 1.920000e+02 : f32
    %354 = vector.broadcast %cst_202 : f32 to vector<10x1xf32>
    %355 = arith.divf %353, %354 : vector<10x1xf32>
    %cst_203 = arith.constant 9.99999974E-6 : f32
    %356 = vector.broadcast %cst_203 : f32 to vector<10x1xf32>
    %357 = arith.addf %355, %356 : vector<10x1xf32>
    %358 = math.rsqrt %357 : vector<10x1xf32>
    %359 = vector.broadcast %358 : vector<10x1xf32> to vector<10x192xf32>
    %360 = arith.mulf %350, %359 : vector<10x192xf32>
    %361 = vector.broadcast %234 : vector<1x192xf32> to vector<10x192xf32>
    %362 = arith.mulf %360, %361 : vector<10x192xf32>
    %363 = vector.broadcast %235 : vector<1x192xf32> to vector<10x192xf32>
    %364 = arith.addf %362, %363 : vector<10x192xf32>
    %c1_204 = arith.constant 1 : index
    %c0_205 = arith.constant 0 : index
    %c0_206 = arith.constant 0 : index
    %365 = vector.load %arg18[%c1_204, %c0_205, %c0_206] : memref<2x192x768xf32, #tpu.memory_space<vmem>>, vector<1x192x768xf32>
    %366 = vector.shape_cast %365 : vector<1x192x768xf32> to vector<192x768xf32>
    %cst_207 = arith.constant dense<0.000000e+00> : vector<10x768xf32>
    %367 = tpu.matmul %364, %366, %cst_207 {dimension_numbers = #tpu.dot_dimension_numbers<[1], [0], [0], [1], [0, 0, 1, 1], [], []>} : vector<10x192xf32>, vector<192x768xf32>, vector<10x768xf32> -> vector<10x768xf32>
    %c1_208 = arith.constant 1 : index
    %c0_209 = arith.constant 0 : index
    %c0_210 = arith.constant 0 : index
    %368 = vector.load %arg17[%c1_208, %c0_209, %c0_210] : memref<2x1x768xf32, #tpu.memory_space<vmem>>, vector<1x1x768xf32>
    %369 = vector.shape_cast %368 : vector<1x1x768xf32> to vector<1x768xf32>
    %370 = vector.broadcast %369 : vector<1x768xf32> to vector<10x768xf32>
    %371 = arith.addf %367, %370 : vector<10x768xf32>
    %cst_211 = arith.constant 5.000000e-01 : f32
    %372 = vector.broadcast %cst_211 : f32 to vector<10x768xf32>
    %373 = arith.mulf %372, %371 : vector<10x768xf32>
    %374 = arith.mulf %371, %371 : vector<10x768xf32>
    %375 = arith.mulf %374, %371 : vector<10x768xf32>
    %cst_212 = arith.constant 4.471500e-02 : f32
    %376 = vector.broadcast %cst_212 : f32 to vector<10x768xf32>
    %377 = arith.mulf %376, %375 : vector<10x768xf32>
    %378 = arith.addf %371, %377 : vector<10x768xf32>
    %cst_213 = arith.constant 0.797884583 : f32
    %379 = vector.broadcast %cst_213 : f32 to vector<10x768xf32>
    %380 = arith.mulf %379, %378 : vector<10x768xf32>
    %381 = math.tanh %380 : vector<10x768xf32>
    %cst_214 = arith.constant 1.000000e+00 : f32
    %382 = vector.broadcast %cst_214 : f32 to vector<10x768xf32>
    %383 = arith.addf %382, %381 : vector<10x768xf32>
    %384 = arith.mulf %373, %383 : vector<10x768xf32>
    %c1_215 = arith.constant 1 : index
    %c0_216 = arith.constant 0 : index
    %c0_217 = arith.constant 0 : index
    %385 = vector.load %arg19[%c1_215, %c0_216, %c0_217] : memref<2x768x192xf32, #tpu.memory_space<vmem>>, vector<1x768x192xf32>
    %386 = vector.shape_cast %385 : vector<1x768x192xf32> to vector<768x192xf32>
    %cst_218 = arith.constant dense<0.000000e+00> : vector<10x192xf32>
    %387 = tpu.matmul %384, %386, %cst_218 {dimension_numbers = #tpu.dot_dimension_numbers<[1], [0], [0], [1], [0, 0, 1, 1], [], []>} : vector<10x768xf32>, vector<768x192xf32>, vector<10x192xf32> -> vector<10x192xf32>
    %388 = arith.addf %344, %387 : vector<10x192xf32>
    %389 = vector.broadcast %236 : vector<1x192xf32> to vector<10x192xf32>
    %390 = arith.addf %388, %389 : vector<10x192xf32>
    %391 = vector.extract_strided_slice %390 {offsets = [0, 0], sizes = [1, 192], strides = [1, 1]} : vector<10x192xf32> to vector<1x192xf32>
    %392 = vector.extract_strided_slice %390 {offsets = [5, 0], sizes = [1, 192], strides = [1, 1]} : vector<10x192xf32> to vector<1x192xf32>
    %393 = tpu.concatenate %391, %392 in 0 : vector<1x192xf32>, vector<1x192xf32> -> vector<2x192xf32>
    %c0_219 = arith.constant 0 : index
    %c0_220 = arith.constant 0 : index
    %394 = vector.load %arg20[%c0_219, %c0_220] : memref<2x192xf32, #tpu.memory_space<vmem>>, vector<2x192xf32>
    %395 = vector.extract_strided_slice %394 {offsets = [0, 0], sizes = [1, 192], strides = [1, 1]} : vector<2x192xf32> to vector<1x192xf32>
    %396 = vector.extract_strided_slice %394 {offsets = [1, 0], sizes = [1, 192], strides = [1, 1]} : vector<2x192xf32> to vector<1x192xf32>
    %cst_221 = arith.constant dense<0.000000e+00> : vector<2xf32>
    %397 = vector.multi_reduction <add>, %393, %cst_221 [1] : vector<2x192xf32> to vector<2xf32>
    %398 = vector.shape_cast %397 : vector<2xf32> to vector<2x1xf32>
    %cst_222 = arith.constant 1.920000e+02 : f32
    %399 = vector.broadcast %cst_222 : f32 to vector<2x1xf32>
    %400 = arith.divf %398, %399 : vector<2x1xf32>
    %401 = vector.broadcast %400 : vector<2x1xf32> to vector<2x192xf32>
    %402 = arith.subf %393, %401 : vector<2x192xf32>
    %403 = arith.mulf %402, %402 : vector<2x192xf32>
    %cst_223 = arith.constant dense<0.000000e+00> : vector<2xf32>
    %404 = vector.multi_reduction <add>, %403, %cst_223 [1] : vector<2x192xf32> to vector<2xf32>
    %405 = vector.shape_cast %404 : vector<2xf32> to vector<2x1xf32>
    %cst_224 = arith.constant 1.920000e+02 : f32
    %406 = vector.broadcast %cst_224 : f32 to vector<2x1xf32>
    %407 = arith.divf %405, %406 : vector<2x1xf32>
    %cst_225 = arith.constant 9.99999974E-6 : f32
    %408 = vector.broadcast %cst_225 : f32 to vector<2x1xf32>
    %409 = arith.addf %407, %408 : vector<2x1xf32>
    %410 = math.rsqrt %409 : vector<2x1xf32>
    %411 = vector.broadcast %410 : vector<2x1xf32> to vector<2x192xf32>
    %412 = arith.mulf %402, %411 : vector<2x192xf32>
    %413 = vector.broadcast %395 : vector<1x192xf32> to vector<2x192xf32>
    %414 = arith.mulf %412, %413 : vector<2x192xf32>
    %415 = vector.broadcast %396 : vector<1x192xf32> to vector<2x192xf32>
    %416 = arith.addf %414, %415 : vector<2x192xf32>
    %c0_226 = arith.constant 0 : index
    %c0_227 = arith.constant 0 : index
    %417 = vector.load %arg21[%c0_226, %c0_227] : memref<2x192xf32, #tpu.memory_space<vmem>>, vector<2x192xf32>
    tpu.vector_store %arg21[%c0_226, %c0_227], %416 {strides = array<i32>} : memref<2x192xf32, #tpu.memory_space<vmem>>, vector<2x192xf32>,
    return
  }
}

</mosaic_0001>

<bundles_post_ra>
// kernel: custom-call.1
= control target key start
LH: loop header
LB: loop body
LE: loop exit
PB: predicated region body
PF: predicated region fallthrough
CT: control target
= control target key end

     0   :  { %s6_s0 = inlined_call_operand.vmem [shape: u32[2], index: 0, kind: output, shape index: {}]  }

// kernel: tile.9
= control target key start
LH: loop header
LB: loop body
LE: loop exit
PB: predicated region body
PF: predicated region fallthrough
CT: control target
= control target key end

     0   :  { %vm4_vm0 = vcmask 523264   ;;  %s70_s0 = inlined_call_operand.vmem [shape: f32[2,5,192], index: 0, kind: input, shape index: {}]   ;;  %s71_s1 = inlined_call_operand.vmem [shape: f32[10,192], index: 1, kind: output, shape index: {}]  }
   0x1   :  { %v22_v0 = vld [vmem:[%s70_s0 + $0x8] sm:$0x1f]   ;;  %v24_v1 = vld [vmem:[%s70_s0 + $0x18] sm:$0x1f]   ;;  %v14_v2 = vld [vmem:[%s70_s0] sm:$0x1f]  }
   0x2   :  { %23 = vst.msk [vmem:[%s71_s1 + $0x8] sm:$0x1f] %vm4_vm0, %v22_v0   ;;  %v27_v3 = vld [vmem:[%s70_s0 + $0x10] sm:$0x1f]  }
   0x3   :  { %25 = vst.msk [vmem:[%s71_s1 + $0xd] sm:$0x7] %vm4_vm0, %v24_v1  }
   0x4   :  { %26 = vst.msk [vmem:[%s71_s1 + $0x15] sm:$0x18] %vm4_vm0, %v24_v1  }
   0x5   :  { %15 = vst [vmem:[%s71_s1] sm:$0x1f] %v14_v2  }
   0x6   :  { %28 = vst [vmem:[%s71_s1 + $0x5] sm:$0x7] %v27_v3  }
   0x7   :  { %29 = vst [vmem:[%s71_s1 + $0xd] sm:$0x18] %v27_v3  }

// kernel: _forward.1
= control target key start
LH: loop header
LB: loop body
LE: loop exit
PB: predicated region body
PF: predicated region fallthrough
CT: control target
= control target key end

     0   :  { %s14048_s0 = inlined_call_operand.vmem [shape: f32[8,192], index: 0, kind: input, shape index: {}]   ;;  %s14049_s1 = inlined_call_operand.vmem [shape: f32[192,192], index: 1, kind: input, shape index: {}]   ;;  %s14050_s2 = inlined_call_operand.vmem [shape: f32[1,192], index: 2, kind: input, shape index: {}]   ;;  %s14051_s3 = inlined_call_operand.vmem [shape: f32[10,192], index: 3, kind: input, shape index: {}]   ;;  %s14052_s4 = inlined_call_operand.vmem [shape: f32[10,8], index: 4, kind: input, shape index: {}]   ;;  %s14053_s5 = inlined_call_operand.vmem [shape: f32[10,192], index: 5, kind: input, shape index: {}]   ;;  %s14054_s6 = inlined_call_operand.vmem [shape: f32[192,768], index: 6, kind: input, shape index: {}]   ;;  %s14055_s7 = inlined_call_operand.vmem [shape: f32[1,768], index: 7, kind: input, shape index: {}]   ;;  %s14056_s8 = inlined_call_operand.vmem [shape: f32[256,192], index: 8, kind: input, shape index: {}]   ;;  %s14057_s9 = inlined_call_operand.vmem [shape: f32[1,192], index: 9, kind: input, shape index: {}]   ;;  %s14058_s10 = inlined_call_operand.vmem [shape: f32[256,8], index: 10, kind: input, shape index: {}]   ;;  %s14059_s11 = inlined_call_operand.vmem [shape: f32[10,10], index: 11, kind: input, shape index: {}]   ;;  %s14060_s12 = inlined_call_operand.vmem [shape: f32[6,192,64], index: 12, kind: input, shape index: {}]   ;;  %s14061_s13 = inlined_call_operand.vmem [shape: f32[6,192,64], index: 13, kind: input, shape index: {}]   ;;  %s14062_s14 = inlined_call_operand.vmem [shape: f32[6,192,64], index: 14, kind: input, shape index: {}]   ;;  %s14063_s15 = inlined_call_operand.vmem [shape: f32[6,64,192], index: 15, kind: input, shape index: {}]   ;;  %s14064_s16 = inlined_call_operand.vmem [shape: f32[2,6,192], index: 16, kind: input, shape index: {}]   ;;  %s14065_s17 = inlined_call_operand.vmem [shape: f32[2,1,768], index: 17, kind: input, shape index: {}]   ;;  %s14066_s18 = inlined_call_operand.vmem [shape: f32[2,192,768], index: 18, kind: input, shape index: {}]   ;;  %s14067_s19 = inlined_call_operand.vmem [shape: f32[2,768,192], index: 19, kind: input, shape index: {}]   ;;  %s14068_s20 = inlined_call_operand.vmem [shape: f32[2,192], index: 20, kind: input, shape index: {}]   ;;  %s14069_s21 = inlined_call_operand.hbm [shape: f32[2,192], index: 21, kind: output, shape index: {}]  }
   0x1   :  { %14135 = sst [smem:[#allocation65_spill]] %s14048_s0 }
   0x2   :  { %14136 = sst [smem:[#allocation66_spill]] %s14049_s1 }
   0x3   :  { %14137 = sst [smem:[#allocation67_spill]] %s14050_s2 }
   0x4   :  { %14138 = sst [smem:[#allocation68_spill]] %s14051_s3 }
   0x5   :  { %14139 = sst [smem:[#allocation69_spill]] %s14052_s4 }
   0x6   :  { %14140 = sst [smem:[#allocation70_spill]] %s14053_s5 }
   0x7   :  { %s14141_s26 = sld [smem:[#allocation66_spill]] }
   0xd   :  { %v101_v0 = vld [vmem:[%s14141_s26 + $0xf0] sm:$0xff]  ;;  %v102_v1 = vld [vmem:[%s14141_s26 + $0xf8] sm:$0xff]  ;;  %v99_v2 = vld [vmem:[%s14141_s26 + $0xe0] sm:$0xff] }
   0xe   :  { %129 = vmatpush.msra.mxu0 %v101_v0  ;;  %169 = vmatpush.msra.mxu2 %v102_v1  ;;  %v100_v3 = vld [vmem:[%s14141_s26 + $0xe8] sm:$0xff]  ;;  %v97_v4 = vld [vmem:[%s14141_s26 + $0xd0] sm:$0xff]  ;;  %v98_v5 = vld [vmem:[%s14141_s26 + $0xd8] sm:$0xff] }
   0xf   :  { %v95_v6 = vld [vmem:[%s14141_s26 + $0xc0] sm:$0xff]  ;;  %v96_v7 = vld [vmem:[%s14141_s26 + $0xc8] sm:$0xff]  ;;  %v93_v8 = vld [vmem:[%s14141_s26 + $0xb0] sm:$0xff] }
  0x10   :  { %130 = vmatpush.msra.mxu0 %v99_v2  ;;  %170 = vmatpush.msra.mxu2 %v100_v3  ;;  %v94_v9 = vld [vmem:[%s14141_s26 + $0xb8] sm:$0xff]  ;;  %v117_v10 = vld [vmem:[%s14141_s26 + $0x170] sm:$0xff]  ;;  %v115_v12 = vld [vmem:[%s14141_s26 + $0x160] sm:$0xff] }
  0x11   :  { %v118_v11 = vld [vmem:[%s14141_s26 + $0x178] sm:$0xff]  ;;  %v91_v13 = vld [vmem:[%s14141_s26 + $0xa0] sm:$0xff]  ;;  %v92_v14 = vld [vmem:[%s14141_s26 + $0xa8] sm:$0xff]  ;;  %157 = vmatpush.msra.mxu1 %v117_v10 }
  0x12   :  { %131 = vmatpush.msra.mxu0 %v97_v4  ;;  %171 = vmatpush.msra.mxu2 %v98_v5  ;;  %v116_v15 = vld [vmem:[%s14141_s26 + $0x168] sm:$0xff]  ;;  %v113_v16 = vld [vmem:[%s14141_s26 + $0x150] sm:$0xff]  ;;  %v114_v17 = vld [vmem:[%s14141_s26 + $0x158] sm:$0xff] }
  0x13   :  { %197 = vmatpush.msra.mxu3 %v118_v11  ;;  %v89_v18 = vld [vmem:[%s14141_s26 + $0x90] sm:$0xff]  ;;  %v90_v19 = vld [vmem:[%s14141_s26 + $0x98] sm:$0xff]  ;;  %158 = vmatpush.msra.mxu1 %v115_v12  ;;  %v111_v20 = vld [vmem:[%s14141_s26 + $0x140] sm:$0xff] }
  0x14   :  { %132 = vmatpush.msra.mxu0 %v95_v6  ;;  %172 = vmatpush.msra.mxu2 %v96_v7  ;;  %v112_v21 = vld [vmem:[%s14141_s26 + $0x148] sm:$0xff]  ;;  %v87_v22 = vld [vmem:[%s14141_s26 + $0x80] sm:$0xff]  ;;  %v109_v24 = vld [vmem:[%s14141_s26 + $0x130] sm:$0xff] }
  0x15   :  { %198 = vmatpush.msra.mxu3 %v116_v15  ;;  %v88_v23 = vld [vmem:[%s14141_s26 + $0x88] sm:$0xff]  ;;  %159 = vmatpush.msra.mxu1 %v113_v16  ;;  %v110_v25 = vld [vmem:[%s14141_s26 + $0x138] sm:$0xff]  ;;  %v85_v26 = vld [vmem:[%s14141_s26 + $0x70] sm:$0xff] }
  0x16   :  { %133 = vmatpush.msra.mxu0 %v93_v8  ;;  %173 = vmatpush.msra.mxu2 %v94_v9  ;;  %v86_v27 = vld [vmem:[%s14141_s26 + $0x78] sm:$0xff]  ;;  %v107_v28 = vld [vmem:[%s14141_s26 + $0x120] sm:$0xff]  ;;  %v108_v29 = vld [vmem:[%s14141_s26 + $0x128] sm:$0xff] }
  0x17   :  { %199 = vmatpush.msra.mxu3 %v114_v17  ;;  %160 = vmatpush.msra.mxu1 %v111_v20  ;;  %v83_v30 = vld [vmem:[%s14141_s26 + $0x60] sm:$0xff]  ;;  %v84_v31 = vld [vmem:[%s14141_s26 + $0x68] sm:$0xff]  ;;  %v105_v32 = vld [vmem:[%s14141_s26 + $0x110] sm:$0xff] }
  0x18   :  { %134 = vmatpush.msra.mxu0 %v91_v13  ;;  %174 = vmatpush.msra.mxu2 %v92_v14  ;;  %v106_v33 = vld [vmem:[%s14141_s26 + $0x118] sm:$0xff] }
  0x19   :  { %200 = vmatpush.msra.mxu3 %v112_v21  ;;  %161 = vmatpush.msra.mxu1 %v109_v24 }
  0x1a   :  { %135 = vmatpush.msra.mxu0 %v89_v18  ;;  %175 = vmatpush.msra.mxu2 %v90_v19 }
  0x1b   :  { %201 = vmatpush.msra.mxu3 %v110_v25 }
  0x1c   :  { %136 = vmatpush.msra.mxu0 %v87_v22  ;;  %176 = vmatpush.msra.mxu2 %v88_v23 }
  0x1e   :  { %137 = vmatpush.msra.mxu0 %v85_v26  ;;  %177 = vmatpush.msra.mxu2 %v86_v27 }
  0x1f   :  { %26 = vsyncpa [#allocation3], 0  ;;  %v81_v34 = vld [vmem:[%s14141_s26 + $0x50] sm:$0xff]  ;;  %v82_v35 = vld [vmem:[%s14141_s26 + $0x58] sm:$0xff]  ;;  %162 = vmatpush.msra.mxu1 %v107_v28  ;;  %202 = vmatpush.msra.mxu3 %v108_v29  ;;  %s14142_s1 = sld [smem:[#allocation65_spill]]  ;;  %vm125_vm0 = vcmask 523264  }
  0x20   :  { %138 = vmatpush.msra.mxu0 %v83_v30  ;;  %178 = vmatpush.msra.mxu2 %v84_v31  ;;  %v103_v36 = vld [vmem:[%s14141_s26 + $0x100] sm:$0xff]  ;;  %v104_v37 = vld [vmem:[%s14141_s26 + $0x108] sm:$0xff]  ;;  %v77_v41 = vld [vmem:[%s14141_s26 + $0x30] sm:$0xff]  ;;  %s14143_s22 = sld [smem:[#allocation67_spill]]  ;;  %vm215_vm1 = vcmask 64512   ;;  %vm1595_vm2 = vcmask 1041408  }
  0x21   :  { %v79_v38 = vld [vmem:[%s14141_s26 + $0x40] sm:$0xff]  ;;  %v80_v39 = vld [vmem:[%s14141_s26 + $0x48] sm:$0xff]  ;;  %163 = vmatpush.msra.mxu1 %v105_v32  ;;  %203 = vmatpush.msra.mxu3 %v106_v33  ;;  %v78_v42 = vld [vmem:[%s14141_s26 + $0x38] sm:$0xff]  ;;  %s14191_s23 = sld [smem:[#allocation68_spill]]  ;;  %vm1597_vm3 = vcmask 517120   ;;  %vm1923_vm11 = vcmask 80896  }
  0x22   :  { %139 = vmatpush.msra.mxu0 %v81_v34  ;;  %179 = vmatpush.msra.mxu2 %v82_v35  ;;  %v75_v43 = vld [vmem:[%s14141_s26 + $0x20] sm:$0xff]  ;;  %v76_v44 = vld [vmem:[%s14141_s26 + $0x28] sm:$0xff]  ;;  %v73_v45 = vld [vmem:[%s14141_s26 + $0x10] sm:$0xff]  ;;  %s14206_s24 = sld [smem:[#allocation70_spill]]  ;;  %vm1927_vm12 = vcmask 74752  }
  0x23   :  { %164 = vmatpush.msra.mxu1 %v103_v36  ;;  %204 = vmatpush.msra.mxu3 %v104_v37  ;;  %v74_v46 = vld [vmem:[%s14141_s26 + $0x18] sm:$0xff]  ;;  %v71_v47 = vld [vmem:[%s14141_s26] sm:$0xff]  ;;  %v72_v48 = vld [vmem:[%s14141_s26 + $0x8] sm:$0xff]  ;;  %s14144_s26 = sld [smem:[#allocation69_spill]] }
  0x24   :  { %140 = vmatpush.msra.mxu0 %v79_v38  ;;  %180 = vmatpush.msra.mxu2 %v80_v39  ;;  %v7690_v50 = vld [vmem:[%s14054_s6 + $0x2d8] sm:$0xff]  ;;  %v7696_v51 = vld [vmem:[%s14054_s6 + $0x2a8] sm:$0xff]  ;;  %v7743_v2 = vld [vmem:[%s14054_s6 + $0x2d0] sm:$0xff] }
  0x25   :  { %v70_v40 = vld [vmem:[%s14142_s1 + $0x8] sm:$0xff]  ;;  %v69_v49 = vld [vmem:[%s14142_s1] sm:$0xff]  ;;  %v7702_v52 = vld [vmem:[%s14054_s6 + $0x278] sm:$0xff] }
  0x26   :  { %6282 = vmatmul.msk.f32.vlgmr.msra.gmra.mxu1 %vm125_vm0, %v70_v40  ;;  %6283 = vmatmul.msk.f32.vlgmr.msra.gmra.mxu3 %vm125_vm0, %v70_v40  ;;  %v119_v53 = vld [vmem:[%s14143_s22] sm:$0x3]  ;;  %v7711_v54 = vld [vmem:[%s14054_s6 + $0x248] sm:$0xff]  ;;  %v7717_v56 = vld [vmem:[%s14054_s6 + $0x218] sm:$0xff] }
  0x27   :  { %141 = vmatpush.msra.mxu0 %v77_v41  ;;  %181 = vmatpush.msra.mxu2 %v78_v42  ;;  %v121_v55 = vperm.slane %v119_v53, 0  ;;  %v7723_v57 = vld [vmem:[%s14054_s6 + $0x1e8] sm:$0xff]  ;;  %v7729_v61 = vld [vmem:[%s14054_s6 + $0x1b8] sm:$0xff]  ;;  %v122_v63 = vperm.slane %v119_v53, 1  ;;  %v7755_v6 = vld [vmem:[%s14054_s6 + $0x2a0] sm:$0xff] }
  0x28   :  { %v7738_v1 = vld [vmem:[%s14054_s6 + $0x188] sm:$0xff]  ;;  %v7749_v3 = vld [vmem:[%s14054_s6 + $0x158] sm:$0xff]  ;;  %v7767_v9 = vld [vmem:[%s14054_s6 + $0x270] sm:$0xff] }
  0x29   :  { %142 = vmatpush.msra.mxu0 %v75_v43  ;;  %182 = vmatpush.msra.mxu2 %v76_v44  ;;  %v213_v0 = vld [vmem:[%s14144_s26] sm:$0xff]  ;;  %v7760_v7 = vld [vmem:[%s14054_s6 + $0x128] sm:$0xff]  ;;  %v7774_v11 = vld [vmem:[%s14054_s6 + $0xf8] sm:$0xff] }
  0x2a   :  { %v7779_v12 = vld [vmem:[%s14054_s6 + $0x240] sm:$0xff]  ;;  %v7784_v13 = vld [vmem:[%s14054_s6 + $0x450] sm:$0xff]  ;;  %v214_v14 = vld [vmem:[%s14144_s26 + $0x8] sm:$0x3] }
  0x2b   :  { %143 = vmatpush.msra.mxu0 %v73_v45  ;;  %183 = vmatpush.msra.mxu2 %v74_v46  ;;  %v7793_v15 = vld [vmem:[%s14054_s6 + $0xc8] sm:$0xff]  ;;  %v7799_v16 = vld [vmem:[%s14054_s6 + $0x210] sm:$0xff]  ;;  %v7804_v17 = vld [vmem:[%s14054_s6 + $0x420] sm:$0xff] }
  0x2c   :  { %v7812_v18 = vld [vmem:[%s14054_s6 + $0x98] sm:$0xff]  ;;  %v7818_v19 = vld [vmem:[%s14054_s6 + $0x1e0] sm:$0xff]  ;;  %v7823_v20 = vld [vmem:[%s14054_s6 + $0x3f0] sm:$0xff] }
  0x2d   :  { %144 = vmatpush.msra.mxu0 %v71_v47  ;;  %184 = vmatpush.msra.mxu2 %v72_v48  ;;  %v7831_v21 = vld [vmem:[%s14054_s6 + $0x68] sm:$0xff]  ;;  %v7836_v22 = vld [vmem:[%s14054_s6 + $0x1b0] sm:$0xff]  ;;  %v7841_v23 = vld [vmem:[%s14054_s6 + $0x3c0] sm:$0xff] }
  0x2e   :  { %145 = vmatmul.f32.vlgmr.msra.gmra.mxu0 %v69_v49  ;;  %185 = vmatmul.f32.vlgmr.msra.gmra.mxu2 %v69_v49  ;;  %v7847_v24 = vld [vmem:[%s14054_s6 + $0x458] sm:$0xff]  ;;  %v7859_v26 = vld [vmem:[%s14054_s6 + $0x180] sm:$0xff]  ;;  %v7864_v27 = vld [vmem:[%s14054_s6 + $0x390] sm:$0xff] }
  0x2f   :  { %486 = vmatpush.msrb.mxu0 %v7690_v50  ;;  %v7854_v25 = vld [vmem:[%s14054_s6 + $0x38] sm:$0xff]  ;;  %517 = vmatpush.msrb.mxu2 %v7847_v24  ;;  %v7873_v28 = vld [vmem:[%s14054_s6 + $0x8] sm:$0xff]  ;;  %v7884_v30 = vld [vmem:[%s14054_s6 + $0x150] sm:$0xff] }
  0x30   :  { %v7878_v29 = vld [vmem:[%s14054_s6 + $0x428] sm:$0xff]  ;;  %v7889_v31 = vld [vmem:[%s14054_s6 + $0x360] sm:$0xff]  ;;  %v7897_v32 = vld [vmem:[%s14054_s6 + $0x2f8] sm:$0xff] }
  0x31   :  { %487 = vmatpush.msrb.mxu0 %v7696_v51  ;;  %14145 = vst [vmem:[#allocation5_spill] sm:$0xff] %v7897_v32  ;;  %v7902_v33 = vld [vmem:[%s14054_s6 + $0x3f8] sm:$0xff]  ;;  %v7907_v34 = vld [vmem:[%s14054_s6 + $0x120] sm:$0xff]  ;;  %v7912_v35 = vld [vmem:[%s14054_s6 + $0x330] sm:$0xff]  ;;  %518 = vmatpush.msrb.mxu2 %v7878_v29 }
  0x32   :  { %14146 = vst [vmem:[#allocation6_spill] sm:$0xff] %v7907_v34  ;;  %v7921_v36 = vld [vmem:[%s14054_s6 + $0x2c8] sm:$0xff]  ;;  %v7931_v38 = vld [vmem:[%s14054_s6 + $0xf0] sm:$0xff]  ;;  %v7936_v39 = vld [vmem:[%s14054_s6 + $0x300] sm:$0xff] }
  0x33   :  { %488 = vmatpush.msrb.mxu0 %v7702_v52  ;;  %14147 = vst [vmem:[#allocation7_spill] sm:$0xff] %v7921_v36  ;;  %v7926_v37 = vld [vmem:[%s14054_s6 + $0x3c8] sm:$0xff]  ;;  %519 = vmatpush.msrb.mxu2 %v7902_v33  ;;  %v7945_v40 = vld [vmem:[%s14054_s6 + $0x2e0] sm:$0xff]  ;;  %v7950_v41 = vld [vmem:[%s14054_s6 + $0x298] sm:$0xff] }
  0x34   :  { %14148 = vst [vmem:[#allocation8_spill] sm:$0xff] %v7931_v38  ;;  %v7955_v42 = vld [vmem:[%s14054_s6 + $0xc0] sm:$0xff]  ;;  %v7962_v43 = vld [vmem:[%s14054_s6 + $0x398] sm:$0xff]  ;;  %v7969_v44 = vld [vmem:[%s14054_s6 + $0x2b0] sm:$0xff] }
  0x35   :  { %489 = vmatpush.msrb.mxu0 %v7711_v54  ;;  %14149 = vst [vmem:[#allocation9_spill] sm:$0xff] %v7950_v41  ;;  %520 = vmatpush.msrb.mxu2 %v7926_v37  ;;  %v7974_v45 = vld [vmem:[%s14054_s6 + $0x268] sm:$0xff]  ;;  %v7979_v46 = vld [vmem:[%s14054_s6 + $0x90] sm:$0xff]  ;;  %v7992_v48 = vld [vmem:[%s14054_s6 + $0x280] sm:$0xff] }
  0x36   :  { %14150 = vst [vmem:[#allocation10_spill] sm:$0xff] %v7955_v42  ;;  %v7986_v47 = vld [vmem:[%s14054_s6 + $0x368] sm:$0xff]  ;;  %v7998_v49 = vld [vmem:[%s14054_s6 + $0x238] sm:$0xff]  ;;  %v8003_v53 = vld [vmem:[%s14054_s6 + $0x60] sm:$0xff] }
  0x37   :  { %490 = vmatpush.msrb.mxu0 %v7717_v56  ;;  %14151 = vst [vmem:[#allocation11_spill] sm:$0xff] %v7974_v45  ;;  %521 = vmatpush.msrb.mxu2 %v7962_v43 }
  0x38   :  { %14152 = vst [vmem:[#allocation12_spill] sm:$0xff] %v7979_v46 }
  0x39   :  { %491 = vmatpush.msrb.mxu0 %v7723_v57  ;;  %14153 = vst [vmem:[#allocation13_spill] sm:$0xff] %v7992_v48  ;;  %522 = vmatpush.msrb.mxu2 %v7986_v47 }
  0x3a   :  { %14154 = vst [vmem:[#allocation14_spill] sm:$0xff] %v7998_v49 }
  0x3b   :  { %492 = vmatpush.msrb.mxu0 %v7729_v61  ;;  %14155 = vst [vmem:[#allocation15_spill] sm:$0xff] %v8003_v53 }
  0x3d   :  { %493 = vmatpush.msrb.mxu0 %v7738_v1 }
  0x3f   :  { %494 = vmatpush.msrb.mxu0 %v7749_v3 }
  0x41   :  { %495 = vmatpush.msrb.mxu0 %v7760_v7 }
  0x43   :  { %496 = vmatpush.msrb.mxu0 %v7774_v11 }
  0x45   :  { %497 = vmatpush.msrb.mxu0 %v7793_v15 }
  0x47   :  { %498 = vmatpush.msrb.mxu0 %v7812_v18 }
  0x49   :  { %499 = vmatpush.msrb.mxu0 %v7831_v21 }
  0x4b   :  { %500 = vmatpush.msrb.mxu0 %v7854_v25 }
  0x4d   :  { %501 = vmatpush.msrb.mxu0 %v7873_v28 }
  0x4f   :  { %670 = vmatpush.msra.mxu0 %v7897_v32  ;;  %v8163_v32 = vld [vmem:[%s14054_s6 + $0x460] sm:$0xff] }
  0x50   :  { %14165 = vst [vmem:[#allocation25_spill] sm:$0xff] %v8163_v32 }
  0x51   :  { %671 = vmatpush.msra.mxu0 %v7921_v36  ;;  %v8141_v36 = vld [vmem:[%s14054_s6 + $0x308] sm:$0xff] }
  0x53   :  { %672 = vmatpush.msra.mxu0 %v7950_v41  ;;  %v8122_v41 = vld [vmem:[%s14054_s6 + $0x108] sm:$0xff] }
  0x55   :  { %673 = vmatpush.msra.mxu0 %v7974_v45  ;;  %v8104_v45 = vld [vmem:[%s14054_s6 + $0x198] sm:$0xff] }
  0x57   :  { %674 = vmatpush.msra.mxu0 %v7998_v49  ;;  %v8092_v49 = vld [vmem:[%s14054_s6 + $0x1f8] sm:$0xff] }
  0xa3   :  { %v166_v59 = vpop.f32.mrf.mxu1 }
  0xa9   :  { %v206_v5 = vpop.f32.mrf.mxu3 }
  0xab   :  { %v146_v58 = vpop.f32.mrf.mxu0 }
  0xac   :  { %v147_v60 = vadd.f32 %v146_v58, %v121_v55  ;;  %v8010_v55 = vld [vmem:[%s14054_s6 + $0x338] sm:$0xff]  ;;  %v8016_v58 = vld [vmem:[%s14054_s6 + $0x250] sm:$0xff] }
  0xad   :  { %14156 = vst [vmem:[#allocation16_spill] sm:$0xff] %v8016_v58  ;;  %523 = vmatpush.msrb.mxu2 %v8010_v55 }
  0xae   :  { %v167_v62 = vadd.f32 %v166_v59, %v147_v60  ;;  %v8022_v59 = vld [vmem:[%s14054_s6 + $0x208] sm:$0xff]  ;;  %v8027_v60 = vld [vmem:[%s14054_s6 + $0x30] sm:$0xff] }
  0xaf   :  { %14157 = vst [vmem:[#allocation17_spill] sm:$0xff] %v8022_v59  ;;  %675 = vmatpush.msra.mxu0 %v8022_v59  ;;  %v8086_v59 = vld [vmem:[%s14054_s6 + $0x228] sm:$0xff]  ;;  %524 = vmatpush.msrb.mxu2 %v8141_v36 }
  0xb0   :  { %237 = vmatpush.msrb.mxu1 %v167_v62  ;;  %14158 = vst [vmem:[#allocation18_spill] sm:$0xff] %v8027_v60  ;;  %v8035_v62 = vld [vmem:[%s14054_s6 + $0x220] sm:$0xff] }
  0xb1   :  { %v186_v4 = vpop.f32.mrf.mxu2  ;;  %6284 = vmatmul.msk.f32.vlgmr.msrb.gmra.mxu1 %vm215_vm1, %v213_v0  ;;  %14159 = vst [vmem:[#allocation19_spill] sm:$0xff] %v8035_v62  ;;  %563 = vmatpush.msra.mxu2 %v8163_v32  ;;  %v8194_v32 = vld [vmem:[%s14054_s6 + $0x18] sm:$0xff] }
  0xb2   :  { %v187_v8 = vadd.f32 %v186_v4, %v122_v63  ;;  %440 = vmatpush.msra.mxu1 %v7743_v2  ;;  %v8041_v63 = vld [vmem:[%s14054_s6] sm:$0xff]  ;;  %v8054_v4 = vld [vmem:[%s14054_s6 + $0x1f0] sm:$0xff]  ;;  %14169 = vst [vmem:[#allocation29_spill] sm:$0xff] %v8194_v32 }
  0xb3   :  { %14160 = vst [vmem:[#allocation20_spill] sm:$0xff] %v8041_v63 }
  0xb4   :  { %v207_v10 = vadd.f32 %v206_v5, %v187_v8  ;;  %441 = vmatpush.msra.mxu1 %v7755_v6  ;;  %14161 = vst [vmem:[#allocation21_spill] sm:$0xff] %v8054_v4  ;;  %v8061_v5 = vld [vmem:[%s14054_s6 + $0x2b8] sm:$0xff]  ;;  %v8066_v8 = vld [vmem:[%s14054_s6 + $0x1c0] sm:$0xff] }
  0xb5   :  { %14162 = vst [vmem:[#allocation22_spill] sm:$0xff] %v8066_v8 }
  0xb6   :  { %260 = vmatpush.msrb.mxu3 %v207_v10  ;;  %442 = vmatpush.msra.mxu1 %v7767_v9  ;;  %v8073_v10 = vld [vmem:[%s14054_s6 + $0x288] sm:$0xff] }
  0xb7   :  { %6286 = vmatmul.msk.f32.vlgmr.msrb.gmra.mxu3 %vm215_vm1, %v213_v0  ;;  %v8049_v0 = vld [vmem:[%s14054_s6 + $0x2e8] sm:$0xff] }
  0xb8   :  { %443 = vmatpush.msra.mxu1 %v7779_v12  ;;  %471 = vmatpush.msra.mxu3 %v7784_v13 }
  0xb9   :  { %6285 = vmatmul.msk.f32.gmra.mxu1 %vm215_vm1, %v214_v14 }
  0xba   :  { %444 = vmatpush.msra.mxu1 %v7799_v16  ;;  %472 = vmatpush.msra.mxu3 %v7804_v17 }
  0xbc   :  { %445 = vmatpush.msra.mxu1 %v7818_v19  ;;  %473 = vmatpush.msra.mxu3 %v7823_v20 }
  0xbe   :  { %446 = vmatpush.msra.mxu1 %v7836_v22  ;;  %474 = vmatpush.msra.mxu3 %v7841_v23 }
  0xbf   :  { %6287 = vmatmul.msk.f32.gmra.mxu3 %vm215_vm1, %v214_v14  ;;  %v8080_v14 = vld [vmem:[%s14054_s6 + $0x258] sm:$0xff] }
  0xc0   :  { %447 = vmatpush.msra.mxu1 %v7859_v26  ;;  %475 = vmatpush.msra.mxu3 %v7864_v27 }
  0xc2   :  { %448 = vmatpush.msra.mxu1 %v7884_v30  ;;  %476 = vmatpush.msra.mxu3 %v7889_v31 }
  0xc4   :  { %449 = vmatpush.msra.mxu1 %v7907_v34  ;;  %477 = vmatpush.msra.mxu3 %v7912_v35  ;;  %v8204_v34 = vld [vmem:[%s14054_s6 + $0x130] sm:$0xff] }
  0xc5   :  { %14171 = vst [vmem:[#allocation31_spill] sm:$0xff] %v8204_v34 }
  0xc6   :  { %450 = vmatpush.msra.mxu1 %v7931_v38  ;;  %478 = vmatpush.msra.mxu3 %v7936_v39  ;;  %v8175_v38 = vld [vmem:[%s14054_s6 + $0x1a8] sm:$0xff] }
  0xc7   :  { %14166 = vst [vmem:[#allocation26_spill] sm:$0xff] %v8175_v38 }
  0xc8   :  { %532 = vmatpush.msrb.mxu3 %v7945_v40  ;;  %451 = vmatpush.msra.mxu1 %v7955_v42  ;;  %v8158_v42 = vld [vmem:[%s14054_s6 + $0x190] sm:$0xff] }
  0xc9   :  { %14164 = vst [vmem:[#allocation24_spill] sm:$0xff] %v8158_v42 }
  0xca   :  { %533 = vmatpush.msrb.mxu3 %v7969_v44  ;;  %452 = vmatpush.msra.mxu1 %v7979_v46  ;;  %v8146_v46 = vld [vmem:[%s14054_s6 + $0x78] sm:$0xff] }
  0xcc   :  { %534 = vmatpush.msrb.mxu3 %v7992_v48  ;;  %453 = vmatpush.msra.mxu1 %v8003_v53  ;;  %v8128_v53 = vld [vmem:[%s14054_s6 + $0xd8] sm:$0xff] }
  0xcd   :  { %v8199_v48 = vld [vmem:[%s14054_s6 + $0x178] sm:$0xff] }
  0xce   :  { %535 = vmatpush.msrb.mxu3 %v8016_v58  ;;  %454 = vmatpush.msra.mxu1 %v8027_v60  ;;  %v8110_v60 = vld [vmem:[%s14054_s6 + $0x168] sm:$0xff]  ;;  %14170 = vst [vmem:[#allocation30_spill] sm:$0xff] %v8199_v48 }
  0xcf   :  { %v8170_v58 = vld [vmem:[%s14054_s6 + $0x48] sm:$0xff] }
  0xd0   :  { %536 = vmatpush.msrb.mxu3 %v8035_v62  ;;  %455 = vmatpush.msra.mxu1 %v8041_v63  ;;  %v8098_v63 = vld [vmem:[%s14054_s6 + $0x1c8] sm:$0xff]  ;;  %v8151_v62 = vld [vmem:[%s14054_s6 + $0x1d8] sm:$0xff] }
  0xd1   :  { %14163 = vst [vmem:[#allocation23_spill] sm:$0xff] %v8151_v62  ;;  %676 = vmatpush.msra.mxu0 %v8151_v62  ;;  %v8182_v62 = vld [vmem:[%s14054_s6 + $0x160] sm:$0xff] }
  0xd2   :  { %578 = vmatpush.msrb.mxu1 %v8049_v0  ;;  %537 = vmatpush.msrb.mxu3 %v8054_v4  ;;  %v8134_v4 = vld [vmem:[%s14054_s6 + $0xa8] sm:$0xff]  ;;  %14167 = vst [vmem:[#allocation27_spill] sm:$0xff] %v8182_v62 }
  0xd3   :  { %677 = vmatpush.msra.mxu0 %v8175_v38  ;;  %v8211_v38 = vld [vmem:[%s14054_s6 + $0x400] sm:$0xff] }
  0xd4   :  { %579 = vmatpush.msrb.mxu1 %v8061_v5  ;;  %538 = vmatpush.msrb.mxu3 %v8066_v8  ;;  %v8116_v8 = vld [vmem:[%s14054_s6 + $0x138] sm:$0xff]  ;;  %14172 = vst [vmem:[#allocation32_spill] sm:$0xff] %v8211_v38 }
  0xd5   :  { %678 = vmatpush.msra.mxu0 %v8199_v48  ;;  %v8236_v48 = vld [vmem:[%s14054_s6 + $0x118] sm:$0xff] }
  0xd6   :  { %580 = vmatpush.msrb.mxu1 %v8073_v10  ;;  %539 = vmatpush.msrb.mxu3 %v8158_v42  ;;  %v8187_v42 = vld [vmem:[%s14054_s6 + $0x430] sm:$0xff]  ;;  %14176 = vst [vmem:[#allocation36_spill] sm:$0xff] %v8236_v48 }
  0xd7   :  { %14168 = vst [vmem:[#allocation28_spill] sm:$0xff] %v8187_v42  ;;  %564 = vmatpush.msra.mxu2 %v8187_v42  ;;  %v8223_v42 = vld [vmem:[%s14054_s6 + $0x100] sm:$0xff] }
  0xd8   :  { %581 = vmatpush.msrb.mxu1 %v8080_v14  ;;  %540 = vmatpush.msrb.mxu3 %v8182_v62  ;;  %v8216_v62 = vld [vmem:[%s14054_s6 + $0x148] sm:$0xff]  ;;  %14174 = vst [vmem:[#allocation34_spill] sm:$0xff] %v8223_v42 }
  0xd9   :  { %14173 = vst [vmem:[#allocation33_spill] sm:$0xff] %v8216_v62  ;;  %565 = vmatpush.msra.mxu2 %v8211_v38  ;;  %679 = vmatpush.msra.mxu0 %v8216_v62  ;;  %v8247_v38 = vld [vmem:[%s14054_s6 + $0x3a0] sm:$0xff]  ;;  %v8254_v62 = vld [vmem:[%s14054_s6 + $0xe8] sm:$0xff] }
  0xda   :  { %582 = vmatpush.msrb.mxu1 %v8086_v59  ;;  %541 = vmatpush.msrb.mxu3 %v8204_v34  ;;  %v8242_v34 = vld [vmem:[%s14054_s6 + $0xd0] sm:$0xff]  ;;  %14178 = vst [vmem:[#allocation38_spill] sm:$0xff] %v8247_v38 }
  0xdb   :  { %14177 = vst [vmem:[#allocation37_spill] sm:$0xff] %v8242_v34  ;;  %680 = vmatpush.msra.mxu0 %v8236_v48  ;;  %v8272_v48 = vld [vmem:[%s14054_s6 + $0xb8] sm:$0xff] }
  0xdc   :  { %583 = vmatpush.msrb.mxu1 %v8092_v49  ;;  %542 = vmatpush.msrb.mxu3 %v8223_v42  ;;  %14179 = vst [vmem:[#allocation39_spill] sm:$0xff] %v8254_v62  ;;  %v8265_v42 = vld [vmem:[%s14054_s6 + $0x370] sm:$0xff] }
  0xdd   :  { %14181 = vst [vmem:[#allocation41_spill] sm:$0xff] %v8265_v42  ;;  %681 = vmatpush.msra.mxu0 %v8254_v62  ;;  %v8290_v62 = vld [vmem:[%s14054_s6 + $0x88] sm:$0xff] }
  0xde   :  { %584 = vmatpush.msrb.mxu1 %v8098_v63  ;;  %543 = vmatpush.msrb.mxu3 %v8242_v34  ;;  %14182 = vst [vmem:[#allocation42_spill] sm:$0xff] %v8272_v48  ;;  %v8283_v34 = vld [vmem:[%s14054_s6 + $0x340] sm:$0xff] }
  0xdf   :  { %14184 = vst [vmem:[#allocation44_spill] sm:$0xff] %v8283_v34  ;;  %682 = vmatpush.msra.mxu0 %v8272_v48  ;;  %v8308_v48 = vld [vmem:[%s14054_s6 + $0x58] sm:$0xff] }
  0xe0   :  { %585 = vmatpush.msrb.mxu1 %v8104_v45  ;;  %14185 = vst [vmem:[#allocation45_spill] sm:$0xff] %v8290_v62 }
  0xe1   :  { %683 = vmatpush.msra.mxu0 %v8290_v62  ;;  %14188 = vst [vmem:[#allocation48_spill] sm:$0xff] %v8308_v48  ;;  %v8321_v62 = vld [vmem:[%s14054_s6 + $0x28] sm:$0xff] }
  0xe2   :  { %586 = vmatpush.msrb.mxu1 %v8110_v60  ;;  %14190 = vst [vmem:[#allocation50_spill] sm:$0xff] %v8321_v62 }
  0xe3   :  { %684 = vmatpush.msra.mxu0 %v8308_v48  ;;  %v8332_v48 = vld [vmem:[%s14054_s6 + $0x478] sm:$0xff] }
  0xe4   :  { %587 = vmatpush.msrb.mxu1 %v8116_v8  ;;  %14192 = vst [vmem:[#allocation51_spill] sm:$0xff] %v8332_v48 }
  0xe5   :  { %685 = vmatpush.msra.mxu0 %v8321_v62  ;;  %v8356_v62 = vld [vmem:[%s14054_s6 + $0x3e8] sm:$0xff] }
  0xe6   :  { %588 = vmatpush.msrb.mxu1 %v8122_v41  ;;  %14195 = vst [vmem:[#allocation54_spill] sm:$0xff] %v8356_v62 }
  0xe8   :  { %589 = vmatpush.msrb.mxu1 %v8128_v53 }
  0xea   :  { %590 = vmatpush.msrb.mxu1 %v8134_v4 }
  0xec   :  { %591 = vmatpush.msrb.mxu1 %v8146_v46 }
  0xee   :  { %592 = vmatpush.msrb.mxu1 %v8170_v58 }
  0xf0   :  { %593 = vmatpush.msrb.mxu1 %v8194_v32  ;;  %v8228_v32 = vld [vmem:[%s14054_s6 + $0x3d0] sm:$0xff] }
  0xf1   :  { %14175 = vst [vmem:[#allocation35_spill] sm:$0xff] %v8228_v32  ;;  %566 = vmatpush.msra.mxu2 %v8228_v32  ;;  %v8260_v32 = vld [vmem:[%s14054_s6 + $0xa0] sm:$0xff] }
  0xf2   :  { %14180 = vst [vmem:[#allocation40_spill] sm:$0xff] %v8260_v32  ;;  %544 = vmatpush.msrb.mxu3 %v8260_v32  ;;  %v8301_v32 = vld [vmem:[%s14054_s6 + $0x310] sm:$0xff] }
  0xf3   :  { %567 = vmatpush.msra.mxu2 %v8247_v38  ;;  %v8278_v38 = vld [vmem:[%s14054_s6 + $0x70] sm:$0xff]  ;;  %14187 = vst [vmem:[#allocation47_spill] sm:$0xff] %v8301_v32 }
  0xf4   :  { %14183 = vst [vmem:[#allocation43_spill] sm:$0xff] %v8278_v38  ;;  %545 = vmatpush.msrb.mxu3 %v8278_v38 }
  0xf5   :  { %568 = vmatpush.msra.mxu2 %v8265_v42  ;;  %v8296_v42 = vld [vmem:[%s14054_s6 + $0x40] sm:$0xff] }
  0xf6   :  { %14186 = vst [vmem:[#allocation46_spill] sm:$0xff] %v8296_v42  ;;  %546 = vmatpush.msrb.mxu3 %v8296_v42 }
  0xf7   :  { %569 = vmatpush.msra.mxu2 %v8283_v34  ;;  %v8314_v34 = vld [vmem:[%s14054_s6 + $0x10] sm:$0xff] }
  0xf8   :  { %14189 = vst [vmem:[#allocation49_spill] sm:$0xff] %v8314_v34  ;;  %547 = vmatpush.msrb.mxu3 %v8314_v34  ;;  %v8338_v34 = vld [vmem:[%s14054_s6 + $0x448] sm:$0xff] }
  0xf9   :  { %570 = vmatpush.msra.mxu2 %v8301_v32  ;;  %v209_v32 = vld [vmem:[%s14191_s23] sm:$0xff]  ;;  %14193 = vst [vmem:[#allocation52_spill] sm:$0xff] %v8338_v34 }
 0x12e   :  { %v239_v42 = vpop.f32.mrf.mxu1 }
 0x12f   :  { %v8327_v38 = vadd.f32 %v239_v42, %v209_v32  ;;  %v8346_v32 = vld [vmem:[%s14054_s6 + $0x418] sm:$0xff]  ;;  %v211_v42 = vld [vmem:[%s14191_s23 + $0x10] sm:$0x3] }
 0x130   :  { %14194 = vst [vmem:[#allocation53_spill] sm:$0xff] %v8346_v32 }
 0x131   :  { %456 = vmatmul.f32.vlgmr.msra.gmra.mxu1 %v8327_v38  ;;  %502 = vmatmul.f32.vlgmr.msrb.gmra.mxu0 %v8327_v38 }
 0x132   :  { %701 = vmatpush.msra.mxu1 %v8332_v48  ;;  %799 = vmatpush.msrb.mxu0 %v7847_v24 }
 0x134   :  { %702 = vmatpush.msra.mxu1 %v8338_v34  ;;  %800 = vmatpush.msrb.mxu0 %v7878_v29  ;;  %v8365_v34 = vld [vmem:[%s14054_s6 + $0x3b8] sm:$0xff]  ;;  %v210_v29 = vld [vmem:[%s14191_s23 + $0x8] sm:$0xff] }
 0x135   :  { %14196 = vst [vmem:[#allocation55_spill] sm:$0xff] %v8365_v34 }
 0x136   :  { %v242_v48 = vpop.f32.mrf.mxu1  ;;  %703 = vmatpush.msra.mxu1 %v8346_v32  ;;  %801 = vmatpush.msrb.mxu0 %v7902_v33  ;;  %v8376_v33 = vld [vmem:[%s14054_s6 + $0x388] sm:$0xff]  ;;  %v8458_v32 = vld [vmem:[%s14054_s6 + $0x230] sm:$0xff] }
 0x137   :  { %v8360_v24 = vadd.f32 %v242_v48, %v211_v42  ;;  %14197 = vst [vmem:[#allocation56_spill] sm:$0xff] %v8376_v33 }
 0x138   :  { %704 = vmatpush.msra.mxu1 %v8356_v62  ;;  %802 = vmatpush.msrb.mxu0 %v7926_v37  ;;  %v8386_v37 = vld [vmem:[%s14054_s6 + $0x2f0] sm:$0xff]  ;;  %v8391_v62 = vld [vmem:[%s14054_s6 + $0x358] sm:$0xff] }
 0x139   :  { %459 = vmatmul.f32.gmra.mxu1 %v8360_v24  ;;  %505 = vmatmul.f32.gmra.mxu0 %v8360_v24  ;;  %14198 = vst [vmem:[#allocation57_spill] sm:$0xff] %v8386_v37 }
 0x13a   :  { %v262_v48 = vpop.f32.mrf.mxu3  ;;  %705 = vmatpush.msra.mxu1 %v8365_v34  ;;  %803 = vmatpush.msrb.mxu0 %v7962_v43  ;;  %14199 = vst [vmem:[#allocation58_spill] sm:$0xff] %v8391_v62  ;;  %v8397_v34 = vld [vmem:[%s14054_s6 + $0x468] sm:$0xff]  ;;  %v8407_v43 = vld [vmem:[%s14054_s6 + $0x2c0] sm:$0xff] }
 0x13b   :  { %v8381_v42 = vadd.f32 %v262_v48, %v210_v29  ;;  %14200 = vst [vmem:[#allocation59_spill] sm:$0xff] %v8407_v43  ;;  %v8412_v29 = vld [vmem:[%s14054_s6 + $0x328] sm:$0xff]  ;;  %v8425_v48 = vld [vmem:[%s14054_s6 + $0x290] sm:$0xff] }
 0x13c   :  { %706 = vmatpush.msra.mxu1 %v8376_v33  ;;  %804 = vmatpush.msrb.mxu0 %v7986_v47  ;;  %14201 = vst [vmem:[#allocation60_spill] sm:$0xff] %v8412_v29  ;;  %v8419_v47 = vld [vmem:[%s14054_s6 + $0x438] sm:$0xff] }
 0x13d   :  { %6288 = vmatmul.msk.f32.vlgmr.msra.gmra.mxu3 %vm125_vm0, %v8381_v42  ;;  %6290 = vmatmul.msk.f32.vlgmr.msrb.gmra.mxu2 %vm125_vm0, %v8381_v42  ;;  %v8453_v33 = vld [vmem:[%s14054_s6 + $0x3d8] sm:$0xff] }
 0x13e   :  { %624 = vmatpush.msrb.mxu2 %v8386_v37  ;;  %707 = vmatpush.msra.mxu1 %v8391_v62  ;;  %v212_v37 = vld [vmem:[%s14191_s23 + $0x18] sm:$0x3]  ;;  %v8436_v62 = vld [vmem:[%s14054_s6 + $0x408] sm:$0xff]  ;;  %s6273_s23 = sshll.u32 %s14069_s21, 4  ;;  %s6274_s23 = int_to_ptr.hbm [resolvable:$true] %s6273_s23 }
 0x13f   :  { %609 = vmatpush.msra.mxu3 %v8397_v34  ;;  %805 = vmatpush.msrb.mxu0 %v8010_v55  ;;  %v8443_v55 = vld [vmem:[%s14054_s6 + $0x260] sm:$0xff] }
 0x140   :  { %625 = vmatpush.msrb.mxu2 %v8407_v43  ;;  %708 = vmatpush.msra.mxu1 %v8412_v29 }
 0x141   :  { %594 = vmatmul.f32.vlgmr.msrb.gmra.mxu1 %v8327_v38  ;;  %610 = vmatpush.msra.mxu3 %v8419_v47 }
 0x142   :  { %v265_v43 = vpop.f32.mrf.mxu3  ;;  %626 = vmatpush.msrb.mxu2 %v8425_v48  ;;  %768 = vmatpush.msrb.mxu1 %v7690_v50  ;;  %v8470_v50 = vld [vmem:[%s14054_s6 + $0x3a8] sm:$0xff] }
 0x143   :  { %v8447_v29 = vadd.f32 %v265_v43, %v212_v37  ;;  %611 = vmatpush.msra.mxu3 %v8436_v62  ;;  %686 = vmatmul.f32.vlgmr.msra.gmra.mxu0 %v8327_v38  ;;  %v8475_v37 = vld [vmem:[%s14054_s6 + $0x200] sm:$0xff]  ;;  %v8491_v43 = vld [vmem:[%s14054_s6 + $0x1d0] sm:$0xff] }
 0x144   :  { %627 = vmatpush.msrb.mxu2 %v8443_v55  ;;  %769 = vmatpush.msrb.mxu1 %v7696_v51  ;;  %v8483_v51 = vld [vmem:[%s14054_s6 + $0x378] sm:$0xff]  ;;  %14202 = vst [vmem:[#allocation61_spill] sm:$0xff] %v8491_v43 }
 0x145   :  { %6289 = vmatmul.msk.f32.gmra.mxu3 %vm125_vm0, %v8447_v29  ;;  %6291 = vmatmul.msk.f32.gmra.mxu2 %vm125_vm0, %v8447_v29 }
 0x146   :  { %612 = vmatpush.msra.mxu3 %v8453_v33  ;;  %628 = vmatpush.msrb.mxu2 %v8458_v32 }
 0x147   :  { %770 = vmatpush.msrb.mxu1 %v7702_v52  ;;  %806 = vmatpush.msrb.mxu0 %v8141_v36  ;;  %v8497_v52 = vld [vmem:[%s14054_s6 + $0x348] sm:$0xff]  ;;  %v8505_v36 = vld [vmem:[%s14054_s6 + $0x1a0] sm:$0xff] }
 0x148   :  { %613 = vmatpush.msra.mxu3 %v8470_v50  ;;  %629 = vmatpush.msrb.mxu2 %v8475_v37 }
 0x149   :  { %771 = vmatpush.msrb.mxu1 %v7711_v54  ;;  %860 = vmatpush.msra.mxu0 %v8049_v0  ;;  %v8513_v54 = vld [vmem:[%s14054_s6 + $0x318] sm:$0xff]  ;;  %v8518_v0 = vld [vmem:[%s14054_s6 + $0x170] sm:$0xff] }
 0x14a   :  { %597 = vmatmul.f32.gmra.mxu1 %v8360_v24  ;;  %614 = vmatpush.msra.mxu3 %v8483_v51  ;;  %14203 = vst [vmem:[#allocation62_spill] sm:$0xff] %v8518_v0 }
 0x14b   :  { %630 = vmatpush.msrb.mxu2 %v8491_v43  ;;  %772 = vmatpush.msrb.mxu1 %v7717_v56  ;;  %v8526_v56 = vld [vmem:[%s14054_s6 + $0x470] sm:$0xff]  ;;  %v8534_v43 = vld [vmem:[%s14054_s6 + $0x140] sm:$0xff] }
 0x14c   :  { %615 = vmatpush.msra.mxu3 %v8497_v52  ;;  %861 = vmatpush.msra.mxu0 %v8061_v5  ;;  %v8548_v5 = vld [vmem:[%s14054_s6 + $0x110] sm:$0xff] }
 0x14d   :  { %631 = vmatpush.msrb.mxu2 %v8505_v36  ;;  %773 = vmatpush.msrb.mxu1 %v7723_v57  ;;  %v8541_v57 = vld [vmem:[%s14054_s6 + $0x440] sm:$0xff]  ;;  %14204 = vst [vmem:[#allocation63_spill] sm:$0xff] %v8548_v5 }
 0x14e   :  { %548 = vmatmul.f32.vlgmr.msrb.gmra.mxu3 %v8327_v38  ;;  %6292 = vmatmul.msk.f32.vlgmr.msra.gmra.mxu2 %vm125_vm0, %v8381_v42 }
 0x14f   :  { %616 = vmatpush.msra.mxu3 %v8513_v54  ;;  %632 = vmatpush.msrb.mxu2 %v8518_v0  ;;  %v8554_v0 = vld [vmem:[%s14054_s6 + $0x410] sm:$0xff] }
 0x150   :  { %774 = vmatpush.msrb.mxu1 %v7729_v61  ;;  %862 = vmatpush.msra.mxu0 %v8073_v10  ;;  %v8562_v61 = vld [vmem:[%s14054_s6 + $0xe0] sm:$0xff]  ;;  %v8579_v10 = vld [vmem:[%s14054_s6 + $0xb0] sm:$0xff] }
 0x151   :  { %655 = vmatpush.msrb.mxu3 %v8526_v56  ;;  %633 = vmatpush.msrb.mxu2 %v8534_v43  ;;  %14205 = vst [vmem:[#allocation64_spill] sm:$0xff] %v8562_v61 }
 0x152   :  { %775 = vmatpush.msrb.mxu1 %v7738_v1  ;;  %v8572_v1 = vld [vmem:[%s14054_s6 + $0x3e0] sm:$0xff]  ;;  %689 = vmatmul.f32.gmra.mxu0 %v8360_v24 }
 0x153   :  { %656 = vmatpush.msrb.mxu3 %v8541_v57  ;;  %6298 = vmatmul.msk.f32.vlgmr.msra.gmra.mxu1 %vm125_vm0, %v8381_v42 }
 0x154   :  { %634 = vmatpush.msrb.mxu2 %v8548_v5  ;;  %776 = vmatpush.msrb.mxu1 %v7749_v3  ;;  %v8586_v3 = vld [vmem:[%s14054_s6 + $0x3b0] sm:$0xff] }
 0x155   :  { %657 = vmatpush.msrb.mxu3 %v8554_v0  ;;  %863 = vmatpush.msra.mxu0 %v8080_v14  ;;  %v8608_v5 = vld [vmem:[%s14054_s6 + $0x50] sm:$0xff]  ;;  %v8622_v14 = vld [vmem:[%s14054_s6 + $0x20] sm:$0xff] }
 0x156   :  { %635 = vmatpush.msrb.mxu2 %v8562_v61  ;;  %777 = vmatpush.msrb.mxu1 %v7760_v7  ;;  %v8594_v61 = vld [vmem:[%s14054_s6 + $0x80] sm:$0xff] }
 0x157   :  { %551 = vmatmul.f32.gmra.mxu3 %v8360_v24  ;;  %6293 = vmatmul.msk.f32.gmra.mxu2 %vm125_vm0, %v8447_v29  ;;  %v8601_v7 = vld [vmem:[%s14054_s6 + $0x380] sm:$0xff] }
 0x158   :  { %658 = vmatpush.msrb.mxu3 %v8572_v1  ;;  %636 = vmatpush.msrb.mxu2 %v8579_v10 }
 0x159   :  { %778 = vmatpush.msrb.mxu1 %v7774_v11  ;;  %864 = vmatpush.msra.mxu0 %v8086_v59  ;;  %v8617_v11 = vld [vmem:[%s14054_s6 + $0x350] sm:$0xff] }
 0x15a   :  { %659 = vmatpush.msrb.mxu3 %v8586_v3  ;;  %637 = vmatpush.msrb.mxu2 %v8594_v61  ;;  %v14234_v59 = vld [vmem:[#allocation34_spill] sm:$0xff] }
 0x15b   :  { %779 = vmatpush.msrb.mxu1 %v7793_v15  ;;  %865 = vmatpush.msra.mxu0 %v8092_v49  ;;  %v8634_v15 = vld [vmem:[%s14054_s6 + $0x320] sm:$0xff] }
 0x15c   :  { %660 = vmatpush.msrb.mxu3 %v8601_v7  ;;  %6299 = vmatmul.msk.f32.gmra.mxu1 %vm125_vm0, %v8447_v29  ;;  %v14231_v49 = vld [vmem:[#allocation53_spill] sm:$0xff] }
 0x15d   :  { %638 = vmatpush.msrb.mxu2 %v8608_v5  ;;  %780 = vmatpush.msrb.mxu1 %v7812_v18  ;;  %v8646_v18 = vld [vmem:[%s14206_s24 + $0x8] sm:$0xff] }
 0x15e   :  { %661 = vmatpush.msrb.mxu3 %v8617_v11  ;;  %866 = vmatpush.msra.mxu0 %v8098_v63  ;;  %v14237_v63 = vld [vmem:[#allocation23_spill] sm:$0xff] }
 0x15f   :  { %639 = vmatpush.msrb.mxu2 %v8622_v14  ;;  %781 = vmatpush.msrb.mxu1 %v7831_v21  ;;  %v8655_v21 = vld [vmem:[%s14206_s24] sm:$0xff] }
 0x160   :  { %6294 = vmatmul.msk.f32.vlgmr.msra.gmra.mxu3 %vm125_vm0, %v8381_v42  ;;  %640 = vmatmul.f32.vlgmr.msrb.gmra.mxu2 %v8327_v38  ;;  %v14224_v38 = vld [vmem:[#allocation24_spill] sm:$0xff] }
 0x161   :  { %662 = vmatpush.msrb.mxu3 %v8634_v15  ;;  %753 = vmatpush.msra.mxu2 %v7784_v13  ;;  %v14209_v13 = vld [vmem:[#allocation13_spill] sm:$0xff] }
 0x162   :  { %782 = vmatpush.msrb.mxu1 %v7854_v25  ;;  %867 = vmatpush.msra.mxu0 %v8104_v45  ;;  %v14216_v25 = vld [vmem:[#allocation12_spill] sm:$0xff]  ;;  %v14229_v45 = vld [vmem:[#allocation14_spill] sm:$0xff] }
 0x163   :  { %722 = vmatpush.msra.mxu3 %v7743_v2  ;;  %754 = vmatpush.msra.mxu2 %v7804_v17  ;;  %v8676_v2 = vld [vmem:[%s14206_s24 + $0x18] sm:$0x3]  ;;  %v14211_v17 = vld [vmem:[#allocation16_spill] sm:$0xff] }
 0x164   :  { %6302 = vmatmul.msk.f32.vlgmr.msrb.gmra.mxu0 %vm125_vm0, %v8646_v18  ;;  %783 = vmatpush.msrb.mxu1 %v7873_v28  ;;  %v14219_v28 = vld [vmem:[#allocation15_spill] sm:$0xff] }
 0x165   :  { %723 = vmatpush.msra.mxu3 %v7755_v6  ;;  %868 = vmatpush.msra.mxu0 %v8110_v60  ;;  %v8688_v6 = vld [vmem:[%s14206_s24 + $0x10] sm:$0x3] }
 0x166   :  { %755 = vmatpush.msra.mxu2 %v7823_v20  ;;  %784 = vmatmul.f32.vlgmr.msrb.gmra.mxu1 %v8655_v21  ;;  %v14213_v20 = vld [vmem:[#allocation10_spill] sm:$0xff] }
 0x167   :  { %724 = vmatpush.msra.mxu3 %v7767_v9  ;;  %869 = vmatpush.msra.mxu0 %v8116_v8  ;;  %v14207_v9 = vld [vmem:[#allocation29_spill] sm:$0xff]  ;;  %v14235_v60 = vld [vmem:[#allocation54_spill] sm:$0xff]  ;;  %v14239_v8 = vld [vmem:[#allocation55_spill] sm:$0xff] }
 0x168   :  { %891 = vmatpush.msra.mxu1 %v8397_v34  ;;  %756 = vmatpush.msra.mxu2 %v7841_v23  ;;  %v14215_v23 = vld [vmem:[#allocation19_spill] sm:$0xff]  ;;  %v14222_v34 = vld [vmem:[#allocation52_spill] sm:$0xff] }
 0x169   :  { %725 = vmatpush.msra.mxu3 %v7779_v12  ;;  %870 = vmatpush.msra.mxu0 %v8122_v41  ;;  %v14208_v12 = vld [vmem:[#allocation6_spill] sm:$0xff]  ;;  %v14227_v41 = vld [vmem:[#allocation27_spill] sm:$0xff] }
 0x16a   :  { %892 = vmatpush.msra.mxu1 %v8419_v47  ;;  %6295 = vmatmul.msk.f32.gmra.mxu3 %vm125_vm0, %v8447_v29  ;;  %v14244_v47 = vld [vmem:[#allocation30_spill] sm:$0xff] }
 0x16b   :  { %643 = vmatmul.f32.gmra.mxu2 %v8360_v24  ;;  %726 = vmatpush.msra.mxu3 %v7799_v16  ;;  %v14210_v16 = vld [vmem:[#allocation8_spill] sm:$0xff]  ;;  %v14240_v24 = vld [vmem:[#allocation35_spill] sm:$0xff] }
 0x16c   :  { %757 = vmatpush.msra.mxu2 %v7864_v27  ;;  %871 = vmatpush.msra.mxu0 %v8128_v53  ;;  %v14218_v27 = vld [vmem:[#allocation21_spill] sm:$0xff]  ;;  %v14232_v53 = vld [vmem:[#allocation28_spill] sm:$0xff] }
 0x16d   :  { %893 = vmatpush.msra.mxu1 %v8436_v62  ;;  %6303 = vmatmul.msk.f32.gmra.mxu0 %vm125_vm0, %v8676_v2  ;;  %v14236_v62 = vld [vmem:[#allocation32_spill] sm:$0xff] }
 0x16e   :  { %758 = vmatpush.msra.mxu2 %v7889_v31  ;;  %727 = vmatpush.msra.mxu3 %v7818_v19  ;;  %v14212_v19 = vld [vmem:[#allocation5_spill] sm:$0xff]  ;;  %v14221_v31 = vld [vmem:[#allocation22_spill] sm:$0xff] }
 0x16f   :  { %872 = vmatpush.msra.mxu0 %v8134_v4  ;;  %894 = vmatpush.msra.mxu1 %v8453_v33  ;;  %v14238_v4 = vld [vmem:[#allocation37_spill] sm:$0xff]  ;;  %v14241_v33 = vld [vmem:[#allocation26_spill] sm:$0xff] }
 0x170   :  { %759 = vmatpush.msra.mxu2 %v7912_v35  ;;  %787 = vmatmul.f32.gmra.mxu1 %v8688_v6  ;;  %v14223_v35 = vld [vmem:[#allocation18_spill] sm:$0xff] }
 0x171   :  { %728 = vmatpush.msra.mxu3 %v7836_v22  ;;  %873 = vmatpush.msra.mxu0 %v8146_v46  ;;  %v14214_v22 = vld [vmem:[#allocation51_spill] sm:$0xff] }
 0x172   :  { %895 = vmatpush.msra.mxu1 %v8470_v50  ;;  %760 = vmatpush.msra.mxu2 %v7936_v39  ;;  %v14225_v39 = vld [vmem:[#allocation11_spill] sm:$0xff] }
 0x173   :  { %729 = vmatpush.msra.mxu3 %v7859_v26  ;;  %874 = vmatpush.msra.mxu0 %v8170_v58  ;;  %v14217_v26 = vld [vmem:[#allocation7_spill] sm:$0xff]  ;;  %v14233_v58 = vld [vmem:[#allocation17_spill] sm:$0xff] }
 0x174   :  { %814 = vmatpush.msrb.mxu2 %v7945_v40  ;;  %896 = vmatpush.msra.mxu1 %v8483_v51  ;;  %v14226_v40 = vld [vmem:[#allocation20_spill] sm:$0xff]  ;;  %v14230_v46 = vld [vmem:[#allocation31_spill] sm:$0xff] }
 0x175   :  { %6296 = vmatmul.msk.f32.vlgmr.msrb.gmra.mxu3 %vm125_vm0, %v8381_v42  ;;  %875 = vmatpush.msra.mxu0 %v14207_v9  ;;  %v14242_v42 = vld [vmem:[#allocation40_spill] sm:$0xff]  ;;  %v14245_v50 = vld [vmem:[#allocation43_spill] sm:$0xff]  ;;  %v14249_v9 = vld [vmem:[#allocation46_spill] sm:$0xff] }
 0x176   :  { %815 = vmatpush.msrb.mxu2 %v7969_v44  ;;  %730 = vmatpush.msra.mxu3 %v7884_v30  ;;  %v14220_v30 = vld [vmem:[#allocation9_spill] sm:$0xff]  ;;  %v14246_v51 = vld [vmem:[#allocation56_spill] sm:$0xff] }
 0x177   :  { %897 = vmatpush.msra.mxu1 %v8497_v52  ;;  %876 = vmatmul.f32.vlgmr.msra.gmra.mxu0 %v8655_v21  ;;  %v14228_v44 = vld [vmem:[#allocation25_spill] sm:$0xff] }
 0x178   :  { %731 = vmatpush.msra.mxu3 %v14208_v12  ;;  %816 = vmatpush.msrb.mxu2 %v14209_v13  ;;  %v14247_v52 = vld [vmem:[#allocation41_spill] sm:$0xff]  ;;  %v14250_v12 = vld [vmem:[#allocation58_spill] sm:$0xff]  ;;  %v14251_v13 = vld [vmem:[#allocation44_spill] sm:$0xff] }
 0x179   :  { %898 = vmatpush.msra.mxu1 %v8513_v54  ;;  %6300 = vmatmul.msk.f32.vlgmr.msra.gmra.mxu2 %vm125_vm0, %v8646_v18  ;;  %v14248_v54 = vld [vmem:[#allocation33_spill] sm:$0xff] }
 0x17a   :  { %6306 = vmatmul.msk.f32.vlgmr.msra.gmra.mxu1 %vm125_vm0, %v8646_v18  ;;  %732 = vmatpush.msra.mxu3 %v14210_v16  ;;  %v14252_v16 = vld [vmem:[#allocation36_spill] sm:$0xff] }
 0x17b   :  { %817 = vmatpush.msrb.mxu2 %v14211_v17  ;;  %952 = vmatpush.msrb.mxu1 %v14212_v19  ;;  %v14253_v17 = vld [vmem:[#allocation49_spill] sm:$0xff]  ;;  %v14254_v19 = vld [vmem:[#allocation60_spill] sm:$0xff] }
 0x17c   :  { %733 = vmatpush.msra.mxu3 %v14213_v20  ;;  %983 = vmatpush.msrb.mxu0 %v14214_v22  ;;  %v14255_v20 = vld [vmem:[#allocation47_spill] sm:$0xff]  ;;  %v14256_v22 = vld [vmem:[#allocation57_spill] sm:$0xff] }
 0x17d   :  { %818 = vmatpush.msrb.mxu2 %v14215_v23  ;;  %6297 = vmatmul.msk.f32.gmra.mxu3 %vm125_vm0, %v8447_v29  ;;  %v14243_v29 = vld [vmem:[#allocation38_spill] sm:$0xff]  ;;  %v14257_v23 = vld [vmem:[#allocation39_spill] sm:$0xff] }
 0x17e   :  { %734 = vmatpush.msra.mxu3 %v14216_v25  ;;  %953 = vmatpush.msrb.mxu1 %v14217_v26  ;;  %v14258_v25 = vld [vmem:[#allocation59_spill] sm:$0xff] }
 0x17f   :  { %819 = vmatpush.msrb.mxu2 %v14218_v27  ;;  %879 = vmatmul.f32.gmra.mxu0 %v8688_v6  ;;  %v8786_v26 = vld [vmem:[%s14058_s10 + $0x78] sm:$0xff]  ;;  %v14259_v27 = vld [vmem:[#allocation42_spill] sm:$0xff] }
 0x180   :  { %735 = vmatpush.msra.mxu3 %v14219_v28  ;;  %954 = vmatpush.msrb.mxu1 %v14220_v30  ;;  %v14265_v28 = vld [vmem:[#allocation63_spill] sm:$0xff] }
 0x181   :  { %820 = vmatpush.msrb.mxu2 %v14221_v31  ;;  %984 = vmatpush.msrb.mxu0 %v14222_v34  ;;  %v8880_v30 = vld [vmem:[%s14058_s10 + $0x50] sm:$0xff]  ;;  %v14266_v31 = vld [vmem:[#allocation64_spill] sm:$0xff]  ;;  %v8889_v34 = vld [vmem:[%s14058_s10 + $0xc8] sm:$0xff] }
 0x182   :  { %6307 = vmatmul.msk.f32.gmra.mxu1 %vm125_vm0, %v8676_v2  ;;  %736 = vmatpush.msra.mxu3 %v14223_v35  ;;  %v8894_v35 = vld [vmem:[%s14058_s10 + $0x48] sm:$0xff] }
 0x183   :  { %821 = vmatpush.msrb.mxu2 %v14224_v38  ;;  %955 = vmatpush.msrb.mxu1 %v14225_v39  ;;  %v8906_v39 = vld [vmem:[%s14058_s10 + $0xc0] sm:$0xff] }
 0x184   :  { %737 = vmatpush.msra.mxu3 %v14226_v40  ;;  %6301 = vmatmul.msk.f32.gmra.mxu2 %vm125_vm0, %v8676_v2  ;;  %v8911_v40 = vld [vmem:[%s14058_s10 + $0x40] sm:$0xff] }
 0x185   :  { %822 = vmatpush.msrb.mxu2 %v14227_v41  ;;  %738 = vmatmul.f32.vlgmr.msra.gmra.mxu3 %v8655_v21  ;;  %v8925_v41 = vld [vmem:[%s14058_s10 + $0x38] sm:$0xff] }
 0x186   :  { %845 = vmatpush.msrb.mxu3 %v14228_v44  ;;  %956 = vmatpush.msrb.mxu1 %v14229_v45  ;;  %v8939_v44 = vld [vmem:[%s14058_s10 + $0x30] sm:$0xff]  ;;  %v8954_v45 = vld [vmem:[%s14058_s10 + $0x28] sm:$0xff] }
 0x187   :  { %823 = vmatpush.msrb.mxu2 %v14230_v46  ;;  %985 = vmatpush.msrb.mxu0 %v14231_v49  ;;  %v8970_v49 = vld [vmem:[%s14058_s10 + $0x20] sm:$0xff] }
 0x188   :  { %846 = vmatpush.msrb.mxu3 %v14232_v53  ;;  %957 = vmatpush.msrb.mxu1 %v14233_v58  ;;  %v8977_v53 = vld [vmem:[%s14058_s10 + $0x98] sm:$0xff] }
 0x189   :  { %824 = vmatpush.msrb.mxu2 %v14234_v59  ;;  %986 = vmatpush.msrb.mxu0 %v14235_v60  ;;  %v8993_v59 = vld [vmem:[%s14058_s10 + $0x90] sm:$0xff] }
 0x18a   :  { %847 = vmatpush.msrb.mxu3 %v14236_v62  ;;  %958 = vmatpush.msrb.mxu1 %v14237_v63  ;;  %v9000_v60 = vld [vmem:[%s14058_s10 + $0x10] sm:$0xff]  ;;  %v9007_v62 = vld [vmem:[%s14058_s10 + $0x88] sm:$0xff] }
 0x18b   :  { %825 = vmatpush.msrb.mxu2 %v14238_v4  ;;  %987 = vmatpush.msrb.mxu0 %v14239_v8  ;;  %v9014_v63 = vld [vmem:[%s14058_s10 + $0x8] sm:$0xff]  ;;  %v9023_v8 = vld [vmem:[%s14058_s10 + $0x80] sm:$0xff] }
 0x18c   :  { %848 = vmatpush.msrb.mxu3 %v14240_v24  ;;  %959 = vmatpush.msrb.mxu1 %v14241_v33  ;;  %v9030_v24 = vld [vmem:[%s14058_s10] sm:$0xff] }
 0x18d   :  { %826 = vmatpush.msrb.mxu2 %v14242_v42  ;;  %741 = vmatmul.f32.gmra.mxu3 %v8688_v6 }
 0x18e   :  { %849 = vmatpush.msrb.mxu3 %v14243_v29  ;;  %960 = vmatpush.msrb.mxu1 %v14244_v47 }
 0x18f   :  { %827 = vmatpush.msrb.mxu2 %v14245_v50  ;;  %988 = vmatpush.msrb.mxu0 %v14246_v51  ;;  %v9062_v51 = vld [vmem:[%s14055_s7] sm:$0x3f] }
 0x190   :  { %850 = vmatpush.msrb.mxu3 %v14247_v52  ;;  %961 = vmatpush.msrb.mxu1 %v14248_v54  ;;  %v9071_v52 = vperm.slane %v9062_v51, 0 }
 0x191   :  { %828 = vmatpush.msrb.mxu2 %v14249_v9  ;;  %989 = vmatpush.msrb.mxu0 %v14250_v12  ;;  %v9080_v9 = vperm.slane %v9062_v51, 2 }
 0x192   :  { %851 = vmatpush.msrb.mxu3 %v14251_v13  ;;  %962 = vmatpush.msrb.mxu1 %v14252_v16 }
 0x193   :  { %829 = vmatpush.msrb.mxu2 %v14253_v17  ;;  %990 = vmatpush.msrb.mxu0 %v14254_v19 }
 0x194   :  { %830 = vmatmul.f32.vlgmr.msrb.gmra.mxu2 %v8655_v21  ;;  %852 = vmatpush.msrb.mxu3 %v14255_v20 }
 0x195   :  { %6304 = vmatmul.msk.f32.vlgmr.msrb.gmra.mxu3 %vm125_vm0, %v8646_v18  ;;  %937 = vmatpush.msra.mxu2 %v8526_v56  ;;  %v8795_v56 = vld [vmem:[%s14058_s10 + $0x70] sm:$0xff] }
 0x196   :  { %906 = vmatpush.msra.mxu3 %v14256_v22  ;;  %963 = vmatpush.msrb.mxu1 %v14257_v23 }
 0x197   :  { %938 = vmatpush.msra.mxu2 %v8541_v57  ;;  %6310 = vmatmul.msk.f32.vlgmr.msrb.gmra.mxu0 %vm125_vm0, %v8646_v18  ;;  %v14260_v57 = vld [vmem:[#allocation45_spill] sm:$0xff] }
 0x198   :  { %907 = vmatpush.msra.mxu3 %v14258_v25  ;;  %964 = vmatpush.msrb.mxu1 %v14259_v27 }
 0x199   :  { %939 = vmatpush.msra.mxu2 %v8554_v0  ;;  %1084 = vmatpush.msra.mxu0 %v8786_v26  ;;  %v14261_v0 = vld [vmem:[#allocation48_spill] sm:$0xff] }
 0x19a   :  { %908 = vmatpush.msra.mxu3 %v8425_v48  ;;  %965 = vmatpush.msrb.mxu1 %v14260_v57  ;;  %v8809_v48 = vld [vmem:[%s14058_s10 + $0x68] sm:$0xff] }
 0x19b   :  { %940 = vmatpush.msra.mxu2 %v8572_v1  ;;  %1085 = vmatpush.msra.mxu0 %v8795_v56  ;;  %v14262_v1 = vld [vmem:[#allocation50_spill] sm:$0xff] }
 0x19c   :  { %833 = vmatmul.f32.gmra.mxu2 %v8688_v6  ;;  %909 = vmatpush.msra.mxu3 %v8443_v55  ;;  %v8818_v55 = vld [vmem:[%s14058_s10 + $0xf8] sm:$0xff] }
 0x19d   :  { %6305 = vmatmul.msk.f32.gmra.mxu3 %vm125_vm0, %v8676_v2  ;;  %941 = vmatpush.msra.mxu2 %v8586_v3  ;;  %v8827_v3 = vld [vmem:[%s14058_s10 + $0xf0] sm:$0xff] }
 0x19e   :  { %910 = vmatpush.msra.mxu3 %v8458_v32  ;;  %966 = vmatpush.msrb.mxu1 %v14261_v0  ;;  %v14263_v32 = vld [vmem:[#allocation61_spill] sm:$0xff] }
 0x19f   :  { %942 = vmatpush.msra.mxu2 %v8601_v7  ;;  %1086 = vmatpush.msra.mxu0 %v8809_v48  ;;  %v14264_v7 = vld [vmem:[#allocation62_spill] sm:$0xff] }
 0x1a0   :  { %911 = vmatpush.msra.mxu3 %v8475_v37  ;;  %967 = vmatpush.msrb.mxu1 %v14262_v1  ;;  %v8837_v37 = vld [vmem:[%s14058_s10 + $0xe8] sm:$0xff] }
 0x1a1   :  { %943 = vmatpush.msra.mxu2 %v8617_v11  ;;  %968 = vmatmul.f32.vlgmr.msrb.gmra.mxu1 %v8655_v21  ;;  %v8852_v11 = vld [vmem:[%s14058_s10 + $0x60] sm:$0xff] }
 0x1a2   :  { %1107 = vmatpush.msra.mxu1 %v8818_v55  ;;  %912 = vmatpush.msra.mxu3 %v14263_v32  ;;  %v9129_v32 = vperm.slane %v9062_v51, 1 }
 0x1a3   :  { %944 = vmatpush.msra.mxu2 %v8634_v15  ;;  %1087 = vmatpush.msra.mxu0 %v8852_v11  ;;  %v8861_v15 = vld [vmem:[%s14058_s10 + $0xd8] sm:$0xff] }
 0x1a4   :  { %1108 = vmatpush.msra.mxu1 %v8827_v3  ;;  %913 = vmatpush.msra.mxu3 %v8505_v36  ;;  %v8847_v36 = vld [vmem:[%s14058_s10 + $0xe0] sm:$0xff] }
 0x1a5   :  { %1034 = vmatpush.msrb.mxu2 %v8786_v26  ;;  %6311 = vmatmul.msk.f32.gmra.mxu0 %vm125_vm0, %v8676_v2 }
 0x1a6   :  { %6308 = vmatmul.msk.f32.vlgmr.msra.gmra.mxu2 %vm125_vm0, %v8646_v18  ;;  %1109 = vmatpush.msra.mxu1 %v8837_v37  ;;  %v8866_v18 = vld [vmem:[%s14058_s10 + $0x58] sm:$0xff] }
 0x1a7   :  { %914 = vmatpush.msra.mxu3 %v14264_v7  ;;  %1035 = vmatpush.msrb.mxu2 %v8795_v56 }
 0x1a8   :  { %1110 = vmatpush.msra.mxu1 %v8847_v36  ;;  %1088 = vmatpush.msra.mxu0 %v8866_v18 }
 0x1a9   :  { %915 = vmatpush.msra.mxu3 %v8534_v43  ;;  %1036 = vmatpush.msrb.mxu2 %v8809_v48  ;;  %v8875_v43 = vld [vmem:[%s14058_s10 + $0xd0] sm:$0xff] }
 0x1aa   :  { %1111 = vmatpush.msra.mxu1 %v8861_v15  ;;  %1089 = vmatpush.msra.mxu0 %v8880_v30 }
 0x1ab   :  { %916 = vmatpush.msra.mxu3 %v14265_v28  ;;  %1037 = vmatpush.msrb.mxu2 %v8852_v11 }
 0x1ac   :  { %1112 = vmatpush.msra.mxu1 %v8875_v43  ;;  %1090 = vmatpush.msra.mxu0 %v8894_v35 }
 0x1ad   :  { %917 = vmatpush.msra.mxu3 %v14266_v31  ;;  %1038 = vmatpush.msrb.mxu2 %v8866_v18  ;;  %v9140_v31 = vperm.slane %v9062_v51, 3 }
 0x1ae   :  { %6309 = vmatmul.msk.f32.gmra.mxu2 %vm125_vm0, %v8676_v2  ;;  %1113 = vmatpush.msra.mxu1 %v8889_v34  ;;  %v8899_v38 = vpop.f32.mrf.mxu1  ;;  %v8987_v58 = vpop.f32.mrf.mxu0 }
 0x1af   :  { %918 = vmatpush.msra.mxu3 %v8579_v10  ;;  %1039 = vmatpush.msrb.mxu2 %v8880_v30  ;;  %v8920_v10 = vld [vmem:[%s14058_s10 + $0xb8] sm:$0xff]  ;;  %v458_v12 = vadd.f32 %v8899_v38, %v9071_v52 }
 0x1b0   :  { %1114 = vmatpush.msra.mxu1 %v8906_v39  ;;  %1091 = vmatpush.msra.mxu0 %v8911_v40 }
 0x1b1   :  { %919 = vmatpush.msra.mxu3 %v8594_v61  ;;  %1040 = vmatpush.msrb.mxu2 %v8894_v35  ;;  %v8934_v61 = vld [vmem:[%s14058_s10 + $0xb0] sm:$0xff] }
 0x1b2   :  { %1115 = vmatpush.msra.mxu1 %v8920_v10  ;;  %1092 = vmatpush.msra.mxu0 %v8925_v41 }
 0x1b3   :  { %920 = vmatpush.msra.mxu3 %v8608_v5  ;;  %1041 = vmatpush.msrb.mxu2 %v8911_v40  ;;  %v8948_v5 = vld [vmem:[%s14058_s10 + $0xa8] sm:$0xff] }
 0x1b4   :  { %1116 = vmatpush.msra.mxu1 %v8934_v61  ;;  %1093 = vmatpush.msra.mxu0 %v8939_v44 }
 0x1b5   :  { %921 = vmatpush.msra.mxu3 %v8622_v14  ;;  %1042 = vmatpush.msrb.mxu2 %v8925_v41  ;;  %v8963_v14 = vld [vmem:[%s14058_s10 + $0xa0] sm:$0xff] }
 0x1b6   :  { %1117 = vmatpush.msra.mxu1 %v8948_v5  ;;  %v8957_v46 = vpop.f32.mrf.mxu1  ;;  %922 = vmatmul.f32.vlgmr.msra.gmra.mxu3 %v8655_v21  ;;  %v8984_v21 = vld [vmem:[%s14058_s10 + $0x18] sm:$0xff] }
 0x1b7   :  { %1057 = vmatpush.msrb.mxu3 %v8818_v55  ;;  %1043 = vmatpush.msrb.mxu2 %v8939_v44  ;;  %v461_v25 = vadd.f32 %v8957_v46, %v9071_v52  ;;  %v504_v46 = vadd.f32 %v8987_v58, %v9129_v32 }
 0x1b8   :  { %1118 = vmatpush.msra.mxu1 %v8963_v14  ;;  %1094 = vmatpush.msra.mxu0 %v8954_v45 }
 0x1b9   :  { %1058 = vmatpush.msrb.mxu3 %v8827_v3  ;;  %1044 = vmatpush.msrb.mxu2 %v8954_v45 }
 0x1ba   :  { %971 = vmatmul.f32.gmra.mxu1 %v8688_v6  ;;  %1095 = vmatpush.msra.mxu0 %v8970_v49 }
 0x1bb   :  { %1059 = vmatpush.msrb.mxu3 %v8837_v37  ;;  %1119 = vmatpush.msra.mxu1 %v8977_v53 }
 0x1bc   :  { %1045 = vmatpush.msrb.mxu2 %v8970_v49  ;;  %1096 = vmatpush.msra.mxu0 %v8984_v21 }
 0x1bd   :  { %1060 = vmatpush.msrb.mxu3 %v8847_v36  ;;  %1120 = vmatpush.msra.mxu1 %v8993_v59 }
 0x1be   :  { %1046 = vmatpush.msrb.mxu2 %v8984_v21  ;;  %v9017_v4 = vpop.f32.mrf.mxu1  ;;  %925 = vmatmul.f32.gmra.mxu3 %v8688_v6  ;;  %v9043_v6 = vpop.f32.mrf.mxu0 }
 0x1bf   :  { %1061 = vmatpush.msrb.mxu3 %v8861_v15  ;;  %1121 = vmatpush.msra.mxu1 %v9007_v62 }
 0x1c0   :  { %1047 = vmatpush.msrb.mxu2 %v9000_v60  ;;  %v480_v33 = vpop.f32.mrf.mxu3  ;;  %v9033_v42 = vpop.f32.mrf.mxu2  ;;  %1097 = vmatpush.msra.mxu0 %v9000_v60 }
 0x1c1   :  { %1062 = vmatpush.msrb.mxu3 %v8875_v43  ;;  %1122 = vmatpush.msra.mxu1 %v9023_v8  ;;  %v9099_v20 = vadd.f32 %v480_v33, %v458_v12  ;;  %v527_v58 = vadd.f32 %v9033_v42, %v504_v46 }
 0x1c2   :  { %1048 = vmatpush.msrb.mxu2 %v9014_v63  ;;  %1098 = vmatpush.msra.mxu0 %v9014_v63 }
 0x1c3   :  { %1207 = vmatpush.msrb.mxu1 %v8818_v55  ;;  %1063 = vmatpush.msrb.mxu3 %v8889_v34 }
 0x1c4   :  { %1049 = vmatpush.msrb.mxu2 %v9030_v24  ;;  %1099 = vmatpush.msra.mxu0 %v9030_v24 }
 0x1c5   :  { %1208 = vmatpush.msrb.mxu1 %v8827_v3  ;;  %1064 = vmatpush.msrb.mxu3 %v8906_v39 }
 0x1c6   :  { %1134 = vmatpush.msra.mxu2 %v8786_v26  ;;  %1184 = vmatpush.msrb.mxu0 %v8786_v26  ;;  %v9077_v54 = vpop.f32.mrf.mxu0 }
 0x1c7   :  { %1209 = vmatpush.msrb.mxu1 %v8837_v37  ;;  %1065 = vmatpush.msrb.mxu3 %v8920_v10  ;;  %v9051_v29 = vpop.f32.mrf.mxu1 }
 0x1c8   :  { %1135 = vmatpush.msra.mxu2 %v8795_v56  ;;  %v483_v47 = vpop.f32.mrf.mxu3  ;;  %v9055_v50 = vpop.f32.mrf.mxu2  ;;  %1185 = vmatpush.msrb.mxu0 %v8795_v56 }
 0x1c9   :  { %1210 = vmatpush.msrb.mxu1 %v8847_v36  ;;  %1066 = vmatpush.msrb.mxu3 %v8934_v61  ;;  %v9131_v7 = vadd.f32 %v483_v47, %v461_v25  ;;  %v596_v47 = vadd.f32 %v9017_v4, %v9140_v31 }
 0x1ca   :  { %1136 = vmatpush.msra.mxu2 %v8809_v48  ;;  %1186 = vmatpush.msrb.mxu0 %v8809_v48 }
 0x1cb   :  { %1211 = vmatpush.msrb.mxu1 %v8861_v15  ;;  %1067 = vmatpush.msrb.mxu3 %v8948_v5 }
 0x1cc   :  { %1137 = vmatpush.msra.mxu2 %v8852_v11  ;;  %1187 = vmatpush.msrb.mxu0 %v8852_v11 }
 0x1cd   :  { %1212 = vmatpush.msrb.mxu1 %v8875_v43  ;;  %1068 = vmatpush.msrb.mxu3 %v8963_v14 }
 0x1ce   :  { %1138 = vmatpush.msra.mxu2 %v8866_v18  ;;  %1188 = vmatpush.msrb.mxu0 %v8866_v18 }
 0x1cf   :  { %1213 = vmatpush.msrb.mxu1 %v8889_v34  ;;  %1069 = vmatpush.msrb.mxu3 %v8977_v53  ;;  %v9116_v27 = vpop.f32.mrf.mxu0 }
 0x1d0   :  { %1139 = vmatpush.msra.mxu2 %v8880_v30  ;;  %v9088_v13 = vpop.f32.mrf.mxu1  ;;  %1189 = vmatpush.msrb.mxu0 %v8880_v30 }
 0x1d1   :  { %1214 = vmatpush.msrb.mxu1 %v8906_v39  ;;  %1070 = vmatpush.msrb.mxu3 %v8993_v59  ;;  %v549_v16 = vpop.f32.mrf.mxu3  ;;  %v572_v17 = vpop.f32.mrf.mxu2 }
 0x1d2   :  { %1140 = vmatpush.msra.mxu2 %v8894_v35  ;;  %v550_v19 = vadd.f32 %v549_v16, %v9080_v9  ;;  %1190 = vmatpush.msrb.mxu0 %v8894_v35 }
 0x1d3   :  { %1215 = vmatpush.msrb.mxu1 %v8920_v10  ;;  %1071 = vmatpush.msrb.mxu3 %v9007_v62 }
 0x1d4   :  { %1141 = vmatpush.msra.mxu2 %v8911_v40  ;;  %v9101_v22 = vadd.f32 %v572_v17, %v550_v19  ;;  %1191 = vmatpush.msrb.mxu0 %v8911_v40 }
 0x1d5   :  { %1216 = vmatpush.msrb.mxu1 %v8934_v61  ;;  %1072 = vmatpush.msrb.mxu3 %v9023_v8 }
 0x1d6   :  { %1142 = vmatpush.msra.mxu2 %v8925_v41  ;;  %v1030_v23 = vmul.f32 %v9101_v22, %v9099_v20  ;;  %1192 = vmatpush.msrb.mxu0 %v8925_v41 }
 0x1d7   :  { %1157 = vmatpush.msra.mxu3 %v8818_v55  ;;  %1217 = vmatpush.msrb.mxu1 %v8948_v5 }
 0x1d8   :  { %1143 = vmatpush.msra.mxu2 %v8939_v44  ;;  %1193 = vmatpush.msrb.mxu0 %v8939_v44 }
 0x1d9   :  { %1158 = vmatpush.msra.mxu3 %v8827_v3  ;;  %1218 = vmatpush.msrb.mxu1 %v8963_v14  ;;  %v9119_v2 = vpop.f32.mrf.mxu1 }
 0x1da   :  { %1144 = vmatpush.msra.mxu2 %v8954_v45  ;;  %v552_v57 = vpop.f32.mrf.mxu3  ;;  %v575_v1 = vpop.f32.mrf.mxu2  ;;  %1194 = vmatpush.msrb.mxu0 %v8954_v45 }
 0x1db   :  { %1050 = vmatmul.f32.vlgmr.msrb.gmra.mxu2 %v1030_v23  ;;  %1159 = vmatpush.msra.mxu3 %v8837_v37  ;;  %v553_v0 = vadd.f32 %v552_v57, %v9080_v9 }
 0x1dc   :  { %1219 = vmatpush.msrb.mxu1 %v8977_v53  ;;  %1145 = vmatpush.msra.mxu2 %v8970_v49 }
 0x1dd   :  { %1160 = vmatpush.msra.mxu3 %v8847_v36  ;;  %v9133_v28 = vadd.f32 %v575_v1, %v553_v0  ;;  %1195 = vmatpush.msrb.mxu0 %v8970_v49 }
 0x1de   :  { %1220 = vmatpush.msrb.mxu1 %v8993_v59  ;;  %1146 = vmatpush.msra.mxu2 %v8984_v21 }
 0x1df   :  { %1161 = vmatpush.msra.mxu3 %v8861_v15  ;;  %v1032_v38 = vmul.f32 %v9133_v28, %v9131_v7  ;;  %1196 = vmatpush.msrb.mxu0 %v8984_v21 }
 0x1e0   :  { %1221 = vmatpush.msrb.mxu1 %v9007_v62  ;;  %1147 = vmatpush.msra.mxu2 %v9000_v60 }
 0x1e1   :  { %1162 = vmatpush.msra.mxu3 %v8875_v43  ;;  %v808_v33 = vpop.f32.mrf.mxu0  ;;  %1197 = vmatpush.msrb.mxu0 %v9000_v60 }
 0x1e2   :  { %1222 = vmatpush.msrb.mxu1 %v9023_v8  ;;  %1148 = vmatpush.msra.mxu2 %v9014_v63 }
 0x1e3   :  { %1053 = vmatmul.f32.gmra.mxu2 %v1032_v38  ;;  %1163 = vmatpush.msra.mxu3 %v8889_v34  ;;  %v785_v12 = vpop.f32.mrf.mxu1  ;;  %v618_v16 = vpop.f32.mrf.mxu3 }
 0x1e4   :  { %1149 = vmatpush.msra.mxu2 %v9030_v24  ;;  %v619_v17 = vadd.f32 %v618_v16, %v596_v47  ;;  %1198 = vmatpush.msrb.mxu0 %v9014_v63 }
 0x1e5   :  { %1164 = vmatpush.msra.mxu3 %v8906_v39 }
 0x1e6   :  { %6312 = vmatpush.xpose.msk.msrb.mxu2 %vm215_vm1, %v8786_v26  ;;  %v1031_v19 = vmul.f32 %v619_v17, %v527_v58  ;;  %v507_v26 = vadd.f32 %v9043_v6, %v9129_v32  ;;  %1199 = vmatpush.msrb.mxu0 %v9030_v24 }
 0x1e7   :  { %1165 = vmatpush.msra.mxu3 %v8920_v10 }
 0x1e8   :  { %1073 = vmatmul.f32.vlgmr.msrb.gmra.mxu3 %v1031_v19  ;;  %v530_v25 = vadd.f32 %v9055_v50, %v507_v26 }
 0x1e9   :  { %1166 = vmatpush.msra.mxu3 %v8934_v61 }
 0x1ea   :  { %6313 = vmatpush.xpose.msk.msrb.mxu2 %vm215_vm1, %v8795_v56  ;;  %v811_v4 = vpop.f32.mrf.mxu0  ;;  %v599_v56 = vadd.f32 %v9051_v29, %v9140_v31  ;;  %v9184_v29 = vpop.f32.mrf.mxu2 }
 0x1eb   :  { %1167 = vmatpush.msra.mxu3 %v8948_v5 }
 0x1ed   :  { %1168 = vmatpush.msra.mxu3 %v8963_v14  ;;  %v788_v42 = vpop.f32.mrf.mxu1  ;;  %v621_v23 = vpop.f32.mrf.mxu3 }
 0x1ee   :  { %6314 = vmatpush.xpose.msk.msrb.mxu2 %vm215_vm1, %v8809_v48  ;;  %v622_v6 = vadd.f32 %v621_v23, %v599_v56  ;;  %v786_v48 = vadd.f32 %v785_v12, %v9129_v32  ;;  %v789_v46 = vadd.f32 %v788_v42, %v9129_v32 }
 0x1ef   :  { %1169 = vmatpush.msra.mxu3 %v8977_v53 }
 0x1f0   :  { %v1033_v57 = vmul.f32 %v622_v6, %v530_v25  ;;  %v809_v50 = vadd.f32 %v808_v33, %v786_v48 }
 0x1f1   :  { %1170 = vmatpush.msra.mxu3 %v8993_v59 }
 0x1f2   :  { %6315 = vmatpush.xpose.msk.msrb.mxu2 %vm215_vm1, %v8852_v11  ;;  %1076 = vmatmul.f32.gmra.mxu3 %v1033_v57  ;;  %v1131_v38 = vmul.f32 %v809_v50, %v619_v17 }
 0x1f3   :  { %1171 = vmatpush.msra.mxu3 %v9007_v62 }
 0x1f4   :  { %v877_v0 = vpop.f32.mrf.mxu0 }
 0x1f5   :  { %1172 = vmatpush.msra.mxu3 %v9023_v8  ;;  %v878_v11 = vadd.f32 %v877_v0, %v9140_v31 }
 0x1f6   :  { %6316 = vmatpush.xpose.msk.msrb.mxu2 %vm215_vm1, %v8866_v18 }
 0x1f7   :  { %6330 = vmatpush.xpose.msk.msrb.mxu3 %vm215_vm1, %v8818_v55  ;;  %v900_v1 = vpop.f32.mrf.mxu1  ;;  %v9202_v55 = vpop.f32.mrf.mxu2 }
 0x1f8   :  { %v901_v47 = vadd.f32 %v900_v1, %v878_v11  ;;  %v9196_v12 = vpop.f32.mrf.mxu3 }
 0x1fa   :  { %6317 = vmatpush.xpose.msk.msrb.mxu2 %vm215_vm1, %v8880_v30  ;;  %v1081_v18 = vmul.f32 %v901_v47, %v527_v58  ;;  %1173 = vmatmul.f32.vlgmr.msra.gmra.mxu3 %v1131_v38  ;;  %v812_v30 = vadd.f32 %v811_v4, %v789_v46 }
 0x1fb   :  { %6331 = vmatpush.xpose.msk.msrb.mxu3 %vm215_vm1, %v8827_v3 }
 0x1fc   :  { %1123 = vmatmul.f32.vlgmr.msra.gmra.mxu1 %v1081_v18  ;;  %v880_v33 = vpop.f32.mrf.mxu0  ;;  %v1133_v17 = vmul.f32 %v812_v30, %v622_v6 }
 0x1fd   :  { %v881_v32 = vadd.f32 %v880_v33, %v9140_v31 }
 0x1fe   :  { %6318 = vmatpush.xpose.msk.msrb.mxu2 %vm215_vm1, %v8894_v35 }
 0x1ff   :  { %6332 = vmatpush.xpose.msk.msrb.mxu3 %vm215_vm1, %v8837_v37  ;;  %v903_v16 = vpop.f32.mrf.mxu1  ;;  %v762_v19 = vpop.f32.mrf.mxu2  ;;  %v1181_v37 = vmul.f32 %v901_v47, %v809_v50 }
 0x200   :  { %v904_v3 = vadd.f32 %v903_v16, %v881_v32  ;;  %v9209_v58 = vpop.f32.mrf.mxu3 }
 0x202   :  { %6319 = vmatpush.xpose.msk.msrb.mxu2 %vm215_vm1, %v8911_v40  ;;  %v1083_v35 = vmul.f32 %v904_v3, %v530_v25  ;;  %1176 = vmatmul.f32.gmra.mxu3 %v1133_v17  ;;  %v1183_v26 = vmul.f32 %v904_v3, %v812_v30 }
 0x203   :  { %6333 = vmatpush.xpose.msk.msrb.mxu3 %vm215_vm1, %v8847_v36 }
 0x204   :  { %1126 = vmatmul.f32.gmra.mxu1 %v1083_v35 }
 0x206   :  { %6320 = vmatpush.xpose.msk.msrb.mxu2 %vm215_vm1, %v8925_v41 }
 0x207   :  { %6334 = vmatpush.xpose.msk.msrb.mxu3 %vm215_vm1, %v8861_v15  ;;  %v765_v41 = vpop.f32.mrf.mxu2 }
 0x208   :  { %v739_v40 = vpop.f32.mrf.mxu3 }
 0x209   :  { %v740_v36 = vadd.f32 %v739_v40, %v9071_v52 }
 0x20a   :  { %6321 = vmatpush.xpose.msk.msrb.mxu2 %vm215_vm1, %v8939_v44 }
 0x20b   :  { %6335 = vmatpush.xpose.msk.msrb.mxu3 %vm215_vm1, %v8875_v43  ;;  %v763_v31 = vadd.f32 %v762_v19, %v740_v36  ;;  %v1454_v36 = vld [vmem:[%s14056_s8 + $0xf0] sm:$0xff] }
 0x20c   :  { %1223 = vmatmul.f32.vlgmr.msrb.gmra.mxu1 %v1181_v37 }
 0x20d   :  { %v1130_v15 = vmul.f32 %v763_v31, %v9101_v22 }
 0x20e   :  { %6322 = vmatpush.xpose.msk.msrb.mxu2 %vm215_vm1, %v8954_v45 }
 0x20f   :  { %6336 = vmatpush.xpose.msk.msrb.mxu3 %vm215_vm1, %v8889_v34  ;;  %1150 = vmatmul.f32.vlgmr.msra.gmra.mxu2 %v1130_v15  ;;  %v1452_v15 = vld [vmem:[%s14056_s8 + $0xe0] sm:$0xff] }
 0x210   :  { %v742_v44 = vpop.f32.mrf.mxu3 }
 0x211   :  { %v743_v43 = vadd.f32 %v742_v44, %v9071_v52 }
 0x212   :  { %6323 = vmatpush.xpose.msk.msrb.mxu2 %vm215_vm1, %v8970_v49 }
 0x213   :  { %6337 = vmatpush.xpose.msk.msrb.mxu3 %vm215_vm1, %v8906_v39  ;;  %v766_v45 = vadd.f32 %v765_v41, %v743_v43 }
 0x214   :  { %1226 = vmatmul.f32.gmra.mxu1 %v1183_v26  ;;  %v1484_v26 = vld [vmem:[%s14056_s8 + $0x1e0] sm:$0xff] }
 0x215   :  { %v1132_v34 = vmul.f32 %v766_v45, %v9133_v28 }
 0x216   :  { %6324 = vmatpush.xpose.msk.msrb.mxu2 %vm215_vm1, %v8984_v21 }
 0x217   :  { %6338 = vmatpush.xpose.msk.msrb.mxu3 %vm215_vm1, %v8920_v10  ;;  %v831_v49 = vpop.f32.mrf.mxu2  ;;  %1153 = vmatmul.f32.gmra.mxu2 %v1132_v34  ;;  %v1450_v34 = vld [vmem:[%s14056_s8 + $0xd0] sm:$0xff] }
 0x218   :  { %v832_v22 = vadd.f32 %v831_v49, %v9080_v9  ;;  %v854_v39 = vpop.f32.mrf.mxu3  ;;  %v1482_v49 = vld [vmem:[%s14056_s8 + $0x1d0] sm:$0xff] }
 0x21a   :  { %6325 = vmatpush.xpose.msk.msrb.mxu2 %vm215_vm1, %v9000_v60  ;;  %v855_v52 = vadd.f32 %v854_v39, %v832_v22 }
 0x21b   :  { %6339 = vmatpush.xpose.msk.msrb.mxu3 %vm215_vm1, %v8934_v61 }
 0x21c   :  { %v1080_v21 = vmul.f32 %v855_v52, %v9099_v20 }
 0x21e   :  { %6326 = vmatpush.xpose.msk.msrb.mxu2 %vm215_vm1, %v9014_v63  ;;  %1100 = vmatmul.f32.vlgmr.msra.gmra.mxu0 %v1080_v21 }
 0x21f   :  { %6340 = vmatpush.xpose.msk.msrb.mxu3 %vm215_vm1, %v8948_v5  ;;  %v834_v10 = vpop.f32.mrf.mxu2  ;;  %v1180_v5 = vmul.f32 %v855_v52, %v763_v31  ;;  %v1486_v31 = vld [vmem:[%s14056_s8 + $0x1f0] sm:$0xff]  ;;  %1495 = vmatpush.msra.mxu0 %v1454_v36 }
 0x220   :  { %v835_v60 = vadd.f32 %v834_v10, %v9080_v9  ;;  %v857_v28 = vpop.f32.mrf.mxu3  ;;  %v9265_v9 = vpop.f32.mrf.mxu1  ;;  %1518 = vmatpush.msra.mxu1 %v1486_v31 }
 0x221   :  { %1496 = vmatpush.msra.mxu0 %v1452_v15  ;;  %v1430_v15 = vld [vmem:[%s14056_s8 + $0x30] sm:$0xff] }
 0x222   :  { %6327 = vmatpush.xpose.msk.msrb.mxu2 %vm215_vm1, %v9030_v24  ;;  %v858_v61 = vadd.f32 %v857_v28, %v835_v60  ;;  %1519 = vmatpush.msra.mxu1 %v1484_v26  ;;  %v1448_v60 = vld [vmem:[%s14056_s8 + $0xc0] sm:$0xff] }
 0x223   :  { %6341 = vmatpush.xpose.msk.msrb.mxu3 %vm215_vm1, %v8963_v14  ;;  %v1480_v28 = vld [vmem:[%s14056_s8 + $0x1c0] sm:$0xff]  ;;  %1497 = vmatpush.msra.mxu0 %v1450_v34 }
 0x224   :  { %v1082_v4 = vmul.f32 %v858_v61, %v9131_v7  ;;  %v1182_v63 = vmul.f32 %v858_v61, %v766_v45  ;;  %1520 = vmatpush.msra.mxu1 %v1482_v49  ;;  %v1460_v26 = vld [vmem:[%s14056_s8 + $0x120] sm:$0xff] }
 0x225   :  { %1498 = vmatpush.msra.mxu0 %v1448_v60  ;;  %v1424_v49 = vld [vmem:[%s14056_s8] sm:$0xff]  ;;  %v1453_v60 = vld [vmem:[%s14056_s8 + $0xe8] sm:$0xff] }
 0x226   :  { %1103 = vmatmul.f32.gmra.mxu0 %v1082_v4  ;;  %1521 = vmatpush.msra.mxu1 %v1480_v28  ;;  %v1485_v28 = vld [vmem:[%s14056_s8 + $0x1e8] sm:$0xff] }
 0x227   :  { %6342 = vmatpush.xpose.msk.msrb.mxu3 %vm215_vm1, %v8977_v53  ;;  %v9267_v53 = vpop.f32.mrf.mxu0 }
 0x229   :  { %v9263_v24 = vpop.f32.mrf.mxu2 }
 0x22b   :  { %6343 = vmatpush.xpose.msk.msrb.mxu3 %vm215_vm1, %v8993_v59 }
 0x22e   :  { %1200 = vmatmul.f32.vlgmr.msrb.gmra.mxu0 %v1180_v5 }
 0x22f   :  { %6344 = vmatpush.xpose.msk.msrb.mxu3 %vm215_vm1, %v9007_v62  ;;  %v9275_v62 = vpop.f32.mrf.mxu0 }
 0x231   :  { %v9271_v59 = vpop.f32.mrf.mxu2 }
 0x233   :  { %6345 = vmatpush.xpose.msk.msrb.mxu3 %vm215_vm1, %v9023_v8 }
 0x236   :  { %1203 = vmatmul.f32.gmra.mxu0 %v1182_v63  ;;  %v1446_v63 = vld [vmem:[%s14056_s8 + $0xb0] sm:$0xff] }
 0x237   :  { %v9273_v7 = vpop.f32.mrf.mxu1  ;;  %1499 = vmatpush.msra.mxu0 %v1446_v63  ;;  %v1481_v63 = vld [vmem:[%s14056_s8 + $0x1c8] sm:$0xff] }
 0x239   :  { %v9261_v14 = vpop.f32.mrf.mxu3 }
 0x241   :  { %v9269_v20 = vpop.f32.mrf.mxu3 }
 0x25e   :  { %v1051_v8 = vpop.f32.mrf.mxu2 }
 0x266   :  { %v1054_v57 = vpop.f32.mrf.mxu2 }
 0x26b   :  { %v1074_v56 = vpop.f32.mrf.mxu3 }
 0x26c   :  { %v1075_v6 = vadd.f32 %v1074_v56, %v1051_v8  ;;  %v1478_v56 = vld [vmem:[%s14056_s8 + $0x1b0] sm:$0xff] }
 0x26d   :  { %1522 = vmatpush.msra.mxu1 %v1478_v56  ;;  %v1447_v56 = vld [vmem:[%s14056_s8 + $0xb8] sm:$0xff] }
 0x275   :  { %v1077_v48 = vpop.f32.mrf.mxu3 }
 0x276   :  { %v1078_v46 = vadd.f32 %v1077_v48, %v1054_v57  ;;  %v1442_v48 = vld [vmem:[%s14056_s8 + $0x90] sm:$0xff] }
 0x277   :  { %v1474_v57 = vld [vmem:[%s14056_s8 + $0x190] sm:$0xff] }
 0x279   :  { %v1124_v42 = vpop.f32.mrf.mxu1 }
 0x27d   :  { %v1174_v18 = vpop.f32.mrf.mxu3 }
 0x281   :  { %v1127_v50 = vpop.f32.mrf.mxu1 }
 0x285   :  { %v1177_v43 = vpop.f32.mrf.mxu3 }
 0x289   :  { %v1224_v30 = vpop.f32.mrf.mxu1 }
 0x291   :  { %v1227_v22 = vpop.f32.mrf.mxu1 }
 0x292   :  { %v1151_v47 = vpop.f32.mrf.mxu2 }
 0x293   :  { %v1175_v3 = vadd.f32 %v1174_v18, %v1151_v47  ;;  %v1470_v47 = vld [vmem:[%s14056_s8 + $0x170] sm:$0xff] }
 0x29a   :  { %v1154_v41 = vpop.f32.mrf.mxu2 }
 0x29b   :  { %v1101_v23 = vpop.f32.mrf.mxu0  ;;  %v1178_v52 = vadd.f32 %v1177_v43, %v1154_v41  ;;  %v1462_v41 = vld [vmem:[%s14056_s8 + $0x130] sm:$0xff] }
 0x29c   :  { %v1125_v25 = vadd.f32 %v1124_v42, %v1101_v23  ;;  %v1444_v42 = vld [vmem:[%s14056_s8 + $0xa0] sm:$0xff]  ;;  %v1426_v43 = vld [vmem:[%s14056_s8 + $0x10] sm:$0xff] }
 0x29d   :  { %v1476_v23 = vld [vmem:[%s14056_s8 + $0x1a0] sm:$0xff]  ;;  %1500 = vmatpush.msra.mxu0 %v1444_v42  ;;  %v1445_v42 = vld [vmem:[%s14056_s8 + $0xa8] sm:$0xff] }
 0x29e   :  { %v1230_v0 = vsub.f32 %v1075_v6, %v1125_v25  ;;  %1523 = vmatpush.msra.mxu1 %v1476_v23  ;;  %v1477_v23 = vld [vmem:[%s14056_s8 + $0x1a8] sm:$0xff] }
 0x29f   :  { %1501 = vmatpush.msra.mxu0 %v1442_v48  ;;  %v1441_v48 = vld [vmem:[%s14056_s8 + $0x88] sm:$0xff] }
 0x2a0   :  { %v1232_v1 = vmul.f32 0.17677669, %v1230_v0  ;;  %1524 = vmatpush.msra.mxu1 %v1474_v57  ;;  %v1473_v57 = vld [vmem:[%s14056_s8 + $0x188] sm:$0xff] }
 0x2a2   :  { %v1234_v33 = vsub.f32 0.0, %v1232_v1  ;;  %v1472_v1 = vld [vmem:[%s14056_s8 + $0x180] sm:$0xff] }
 0x2a3   :  { %v1104_v11 = vpop.f32.mrf.mxu0  ;;  %1525 = vmatpush.msra.mxu1 %v1472_v1  ;;  %v1469_v1 = vld [vmem:[%s14056_s8 + $0x168] sm:$0xff] }
 0x2a4   :  { %v1128_v38 = vadd.f32 %v1127_v50, %v1104_v11  ;;  %v1236_v17 = vmul.f32 1.442695, %v1234_v33  ;;  %v1440_v11 = vld [vmem:[%s14056_s8 + $0x80] sm:$0xff] }
 0x2a5   :  { %1502 = vmatpush.msra.mxu0 %v1440_v11  ;;  %v1436_v33 = vld [vmem:[%s14056_s8 + $0x60] sm:$0xff]  ;;  %1526 = vmatpush.msra.mxu1 %v1470_v47  ;;  %v1437_v11 = vld [vmem:[%s14056_s8 + $0x68] sm:$0xff] }
 0x2a6   :  { %v1231_v32 = vsub.f32 %v1078_v46, %v1128_v38  ;;  %7255 = vpow2.f32 %v1236_v17  ;;  %v1438_v46 = vld [vmem:[%s14056_s8 + $0x70] sm:$0xff]  ;;  %v1433_v47 = vld [vmem:[%s14056_s8 + $0x48] sm:$0xff] }
 0x2a7   :  { %1503 = vmatpush.msra.mxu0 %v1438_v46  ;;  %v1467_v46 = vld [vmem:[%s14056_s8 + $0x158] sm:$0xff] }
 0x2a8   :  { %v1233_v19 = vmul.f32 0.17677669, %v1231_v32 }
 0x2a9   :  { %1504 = vmatpush.msra.mxu0 %v1436_v33  ;;  %v1431_v33 = vld [vmem:[%s14056_s8 + $0x38] sm:$0xff] }
 0x2aa   :  { %v1235_v44 = vsub.f32 0.0, %v1233_v19  ;;  %v1432_v19 = vld [vmem:[%s14056_s8 + $0x40] sm:$0xff] }
 0x2ab   :  { %v1201_v16 = vpop.f32.mrf.mxu0 }
 0x2ac   :  { %v1225_v35 = vadd.f32 %v1224_v30, %v1201_v16  ;;  %v1238_v61 = vmul.f32 1.442695, %v1235_v44  ;;  %v7256_v4 = vpop.eup %7255  ;;  %v1468_v30 = vld [vmem:[%s14056_s8 + $0x160] sm:$0xff]  ;;  %v1434_v16 = vld [vmem:[%s14056_s8 + $0x50] sm:$0xff] }
 0x2ad   :  { %v1240_v25 = vadd.f32 1.0, %v7256_v4  ;;  %1527 = vmatpush.msra.mxu1 %v1468_v30  ;;  %1505 = vmatpush.msra.mxu0 %v1434_v16  ;;  %v1428_v44 = vld [vmem:[%s14056_s8 + $0x20] sm:$0xff]  ;;  %v1483_v4 = vld [vmem:[%s14056_s8 + $0x1d8] sm:$0xff]  ;;  %v1461_v16 = vld [vmem:[%s14056_s8 + $0x128] sm:$0xff] }
 0x2ae   :  { %v1244_v37 = vsub.f32 %v1175_v3, %v1225_v35  ;;  %v1466_v3 = vld [vmem:[%s14056_s8 + $0x150] sm:$0xff]  ;;  %v1463_v30 = vld [vmem:[%s14056_s8 + $0x138] sm:$0xff] }
 0x2af   :  { %1528 = vmatpush.msra.mxu1 %v1466_v3  ;;  %1506 = vmatpush.msra.mxu0 %v1432_v19  ;;  %v1427_v3 = vld [vmem:[%s14056_s8 + $0x18] sm:$0xff]  ;;  %v1457_v19 = vld [vmem:[%s14056_s8 + $0x108] sm:$0xff] }
 0x2b0   :  { %v1246_v40 = vmul.f32 0.17677669, %v1244_v37  ;;  %v1464_v37 = vld [vmem:[%s14056_s8 + $0x140] sm:$0xff] }
 0x2b1   :  { %1529 = vmatpush.msra.mxu1 %v1464_v37  ;;  %1507 = vmatpush.msra.mxu0 %v1430_v15  ;;  %v427_v37 = vperm.slane %v9062_v51, 5 }
 0x2b2   :  { %v1248_v45 = vsub.f32 0.0, %v1246_v40 }
 0x2b3   :  { %v1204_v39 = vpop.f32.mrf.mxu0  ;;  %1530 = vmatpush.msra.mxu1 %v1462_v41  ;;  %1508 = vmatpush.msra.mxu0 %v1428_v44  ;;  %v688_v15 = vadd.f32 %v9077_v54, %v427_v37 }
 0x2b4   :  { %v1250_v21 = vmul.f32 1.442695, %v1248_v45  ;;  %v1228_v10 = vadd.f32 %v1227_v22, %v1204_v39  ;;  %v1458_v45 = vld [vmem:[%s14056_s8 + $0x110] sm:$0xff]  ;;  %v1456_v22 = vld [vmem:[%s14056_s8 + $0x100] sm:$0xff] }
 0x2b5   :  { %1531 = vmatpush.msra.mxu1 %v1460_v26  ;;  %1509 = vmatpush.msra.mxu0 %v1426_v43  ;;  %v711_v44 = vadd.f32 %v9088_v13, %v688_v15  ;;  %v1691_v15 = vld [vmem:[%s14060_s12 + $0xb8] sm:$0xff] }
 0x2b6   :  { %7257 = vpow2.f32 %v1250_v21  ;;  %v1245_v5 = vsub.f32 %v1178_v52, %v1228_v10  ;;  %v1455_v21 = vld [vmem:[%s14056_s8 + $0xf8] sm:$0xff]  ;;  %1729 = vmatpush.msra.mxu3 %v1691_v15 }
 0x2b7   :  { %7259 = vpow2.f32 %v1238_v61  ;;  %1532 = vmatpush.msra.mxu1 %v1458_v45  ;;  %v1487_v10 = vld [vmem:[%s14056_s8 + $0x1f8] sm:$0xff]  ;;  %1510 = vmatpush.msra.mxu0 %v1424_v49 }
 0x2b8   :  { %v1247_v8 = vmul.f32 0.17677669, %v1245_v5  ;;  %7261 = vrcp.f32 %v1240_v25  ;;  %v1451_v61 = vld [vmem:[%s14056_s8 + $0xd8] sm:$0xff]  ;;  %v1449_v5 = vld [vmem:[%s14056_s8 + $0xc8] sm:$0xff] }
 0x2b9   :  { %1533 = vmatpush.msra.mxu1 %v1456_v22  ;;  %1541 = vmatpush.msrb.mxu0 %v1455_v21  ;;  %v1443_v25 = vld [vmem:[%s14056_s8 + $0x98] sm:$0xff] }
 0x2ba   :  { %v1249_v6 = vsub.f32 0.0, %v1247_v8  ;;  %v1479_v8 = vld [vmem:[%s14056_s8 + $0x1b8] sm:$0xff] }
 0x2bb   :  { %1564 = vmatpush.msrb.mxu1 %v1487_v10  ;;  %1542 = vmatpush.msrb.mxu0 %v1453_v60  ;;  %v1767_v15 = vld [vmem:[%s14061_s13 + $0xb8] sm:$0xff] }
 0x2bc   :  { %v7258_v50 = vpop.eup %7257  ;;  %v1252_v0 = vmul.f32 1.442695, %v1249_v6  ;;  %v1475_v6 = vld [vmem:[%s14056_s8 + $0x198] sm:$0xff] }
 0x2bd   :  { %v1254_v38 = vadd.f32 1.0, %v7258_v50  ;;  %v7260_v18 = vpop.eup %7259  ;;  %1565 = vmatpush.msrb.mxu1 %v1485_v28  ;;  %1543 = vmatpush.msrb.mxu0 %v1451_v61  ;;  %v1439_v50 = vld [vmem:[%s14056_s8 + $0x78] sm:$0xff] }
 0x2be   :  { %7263 = vpow2.f32 %v1252_v0  ;;  %v1241_v32 = vadd.f32 1.0, %v7260_v18  ;;  %v7262_v17 = vpop.eup %7261  ;;  %v1471_v0 = vld [vmem:[%s14056_s8 + $0x178] sm:$0xff]  ;;  %v1465_v18 = vld [vmem:[%s14056_s8 + $0x148] sm:$0xff] }
 0x2bf   :  { %7265 = vrcp.f32 %v1254_v38  ;;  %1566 = vmatpush.msrb.mxu1 %v1483_v4  ;;  %1544 = vmatpush.msrb.mxu0 %v1449_v5  ;;  %v1435_v38 = vld [vmem:[%s14056_s8 + $0x58] sm:$0xff] }
 0x2c0   :  { %7267 = vrcp.f32 %v1241_v32  ;;  %v1429_v32 = vld [vmem:[%s14056_s8 + $0x28] sm:$0xff] }
 0x2c1   :  { %1567 = vmatpush.msrb.mxu1 %v1481_v63  ;;  %1545 = vmatpush.msrb.mxu0 %v1447_v56 }
 0x2c3   :  { %1568 = vmatpush.msrb.mxu1 %v1479_v8  ;;  %1546 = vmatpush.msrb.mxu0 %v1445_v42 }
 0x2c4   :  { %v7264_v35 = vpop.eup %7263 }
 0x2c5   :  { %v7266_v40 = vpop.eup %7265  ;;  %v1255_v36 = vadd.f32 1.0, %v7264_v35  ;;  %1569 = vmatpush.msrb.mxu1 %v1477_v23  ;;  %1547 = vmatpush.msrb.mxu0 %v1443_v25  ;;  %v1425_v35 = vld [vmem:[%s14056_s8 + $0x8] sm:$0xff] }
 0x2c6   :  { %v1258_v31 = vadd.f32 %v7266_v40, %v7262_v17  ;;  %v7268_v34 = vpop.eup %7267  ;;  %v1459_v17 = vld [vmem:[%s14056_s8 + $0x118] sm:$0xff]  ;;  %v426_v40 = vperm.slane %v9062_v51, 4 }
 0x2c7   :  { %7269 = vrcp.f32 %v1255_v36  ;;  %1570 = vmatpush.msrb.mxu1 %v1475_v6  ;;  %1548 = vmatpush.msrb.mxu0 %v1441_v48 }
 0x2c8   :  { %6328 = vmatmul.msk.f32.vlgmr.msrb.gmra.mxu2 %vm215_vm1, %v1258_v31  ;;  %6346 = vmatmul.msk.f32.vlgmr.msrb.gmra.mxu3 %vm215_vm1, %v1258_v31  ;;  %v924_v36 = vadd.f32 %v9261_v14, %v426_v40  ;;  %v970_v31 = vadd.f32 %v9265_v9, %v427_v37  ;;  %v642_v41 = vadd.f32 %v9184_v29, %v426_v40 }
 0x2c9   :  { %1571 = vmatpush.msrb.mxu1 %v1473_v57  ;;  %1549 = vmatpush.msrb.mxu0 %v1439_v50  ;;  %v927_v54 = vadd.f32 %v9269_v20, %v426_v40  ;;  %v973_v29 = vadd.f32 %v9273_v7, %v427_v37  ;;  %v645_v10 = vadd.f32 %v9202_v55, %v426_v40 }
 0x2ca   :  { %v665_v26 = vadd.f32 %v9196_v12, %v642_v41  ;;  %v993_v49 = vadd.f32 %v9267_v53, %v970_v31  ;;  %v691_v12 = vadd.f32 %v9116_v27, %v427_v37  ;;  %v1683_v31 = vld [vmem:[%s14060_s12 + $0x78] sm:$0xff]  ;;  %v1682_v41 = vld [vmem:[%s14060_s12 + $0x70] sm:$0xff] }
 0x2cb   :  { %1572 = vmatpush.msrb.mxu1 %v1471_v0  ;;  %1550 = vmatpush.msrb.mxu0 %v1437_v11  ;;  %v668_v53 = vadd.f32 %v9209_v58, %v645_v10  ;;  %v950_v61 = vadd.f32 %v9271_v59, %v927_v54  ;;  %v996_v20 = vadd.f32 %v9275_v62, %v973_v29  ;;  %v1488_v59 = vld [vmem:[%s14057_s9] sm:$0x3]  ;;  %v1686_v54 = vld [vmem:[%s14060_s12 + $0x90] sm:$0xff]  ;;  %v1677_v29 = vld [vmem:[%s14060_s12 + $0x48] sm:$0xff] }
 0x2cc   :  { %v1489_v62 = vmul.f32 2.0, %v1488_v59  ;;  %1698 = vmatpush.msra.mxu2 %v1683_v31  ;;  %v1684_v10 = vld [vmem:[%s14060_s12 + $0x80] sm:$0xff]  ;;  %v1751_v31 = vld [vmem:[%s14061_s13 + $0x38] sm:$0xff] }
 0x2cd   :  { %v7270_v39 = vpop.eup %7269  ;;  %1573 = vmatpush.msrb.mxu1 %v1469_v1  ;;  %1551 = vmatpush.msrb.mxu0 %v1435_v38 }
 0x2ce   :  { %v1259_v52 = vadd.f32 %v7270_v39, %v7268_v34  ;;  %v947_v34 = vadd.f32 %v9263_v24, %v924_v36  ;;  %v714_v24 = vadd.f32 %v9119_v2, %v691_v12  ;;  %v1491_v25 = vperm.slane %v1489_v62, 0  ;;  %1699 = vmatpush.msra.mxu2 %v1682_v41  ;;  %v1676_v12 = vld [vmem:[%s14060_s12 + $0x40] sm:$0xff]  ;;  %v1821_v41 = vld [vmem:[%s14062_s14 + $0x38] sm:$0xff] }
 0x2cf   :  { %1574 = vmatpush.msrb.mxu1 %v1467_v46  ;;  %1552 = vmatpush.msrb.mxu0 %v1433_v47  ;;  %v1492_v6 = vperm.slane %v1489_v62, 1 }
 0x2d0   :  { %6329 = vmatmul.msk.f32.gmra.mxu2 %vm215_vm1, %v1259_v52  ;;  %6347 = vmatmul.msk.f32.gmra.mxu3 %vm215_vm1, %v1259_v52 }
 0x2d1   :  { %1575 = vmatpush.msrb.mxu1 %v1465_v18  ;;  %1553 = vmatpush.msrb.mxu0 %v1431_v33 }
 0x2d3   :  { %1576 = vmatpush.msrb.mxu1 %v1463_v30  ;;  %1554 = vmatpush.msrb.mxu0 %v1429_v32 }
 0x2d5   :  { %1577 = vmatpush.msrb.mxu1 %v1461_v16  ;;  %1555 = vmatpush.msrb.mxu0 %v1427_v3 }
 0x2d7   :  { %1578 = vmatpush.msrb.mxu1 %v1459_v17  ;;  %1556 = vmatpush.msrb.mxu0 %v1425_v35 }
 0x2d9   :  { %1579 = vmatpush.msrb.mxu1 %v1457_v19  ;;  %v7423_v19 = vmov 192.0  }
 0x2da   :  { %7271 = vrcp.f32 %v7423_v19  ;;  %v1669_v19 = vld [vmem:[%s14060_s12 + $0x8] sm:$0xff] }
 0x2e0   :  { %v7272_v37 = vpop.eup %7271 }
 0x2e1   :  { %v1603_v40 = vmul.f32 192.0, %v7272_v37  ;;  %vm1607_vm4 = vweird.f32 %v7272_v37 }
 0x2e3   :  { %v1604_v36 = vsub.f32 1.0, %v1603_v40  ;;  %v1822_v40 = vld [vmem:[%s14062_s14 + $0x40] sm:$0xff] }
 0x34b   :  { %v1379_v43 = vpop.f32.mrf.mxu2  ;;  %v1402_v45 = vpop.f32.mrf.mxu3 }
 0x34c   :  { %v1412_v22 = vsub.f32 2.0, %v1379_v43  ;;  %v1413_v51 = vsub.f32 2.0, %v1402_v45  ;;  %v1408_v39 = vmul.f32 %v1379_v43, %v665_v26  ;;  %v1409_v52 = vmul.f32 %v1402_v45, %v711_v44  ;;  %v1690_v44 = vld [vmem:[%s14060_s12 + $0xb0] sm:$0xff]  ;;  %v1681_v26 = vld [vmem:[%s14060_s12 + $0x68] sm:$0xff] }
 0x34d   :  { %v1689_v43 = vld [vmem:[%s14060_s12 + $0xa8] sm:$0xff]  ;;  %1730 = vmatpush.msra.mxu3 %v1690_v44  ;;  %v1605_v45 = vmul.f32 %v7272_v37, %v1604_v36  ;;  %1700 = vmatpush.msra.mxu2 %v1681_v26  ;;  %v1668_v36 = vld [vmem:[%s14060_s12] sm:$0xff]  ;;  %v1837_v44 = vld [vmem:[%s14062_s14 + $0xb8] sm:$0xff] }
 0x34e   :  { %v1416_v14 = vmul.f32 %v1412_v22, %v947_v34  ;;  %v1417_v9 = vmul.f32 %v1413_v51, %v993_v49  ;;  %v1680_v34 = vld [vmem:[%s14060_s12 + $0x60] sm:$0xff]  ;;  %v1759_v22 = vld [vmem:[%s14061_s13 + $0x78] sm:$0xff]  ;;  %v1750_v26 = vld [vmem:[%s14061_s13 + $0x30] sm:$0xff] }
 0x34f   :  { %v1688_v49 = vld [vmem:[%s14060_s12 + $0xa0] sm:$0xff]  ;;  %1731 = vmatpush.msra.mxu3 %v1689_v43  ;;  %v1679_v51 = vld [vmem:[%s14060_s12 + $0x58] sm:$0xff]  ;;  %1701 = vmatpush.msra.mxu2 %v1680_v34  ;;  %v1766_v43 = vld [vmem:[%s14061_s13 + $0xb0] sm:$0xff] }
 0x350   :  { %v1420_v21 = vadd.f32 %v1416_v14, %v1408_v39  ;;  %v1421_v13 = vadd.f32 %v1417_v9, %v1409_v52  ;;  %v1687_v39 = vld [vmem:[%s14060_s12 + $0x98] sm:$0xff]  ;;  %v1758_v14 = vld [vmem:[%s14061_s13 + $0x70] sm:$0xff]  ;;  %v1606_v52 = vadd.f32 %v7272_v37, %v1605_v45 }
 0x351   :  { %1732 = vmatpush.msra.mxu3 %v1688_v49  ;;  %v1678_v9 = vld [vmem:[%s14060_s12 + $0x50] sm:$0xff]  ;;  %1702 = vmatpush.msra.mxu2 %v1679_v51  ;;  %v1749_v49 = vld [vmem:[%s14061_s13 + $0x28] sm:$0xff] }
 0x352   :  { %1511 = vmatmul.f32.vlgmr.msra.gmra.mxu0 %v1420_v21  ;;  %1534 = vmatmul.f32.vlgmr.msra.gmra.mxu1 %v1421_v13  ;;  %v1820_v45 = vld [vmem:[%s14062_s14 + $0x30] sm:$0xff]  ;;  %v1819_v51 = vld [vmem:[%s14062_s14 + $0x28] sm:$0xff] }
 0x353   :  { %v1382_v60 = vpop.f32.mrf.mxu2  ;;  %v1405_v28 = vpop.f32.mrf.mxu3  ;;  %1768 = vmatpush.msra.mxu0 %v1759_v22  ;;  %1733 = vmatpush.msra.mxu3 %v1687_v39  ;;  %v1836_v34 = vld [vmem:[%s14062_s14 + $0xb0] sm:$0xff]  ;;  %v1765_v22 = vld [vmem:[%s14061_s13 + $0xa8] sm:$0xff] }
 0x354   :  { %v1414_v4 = vsub.f32 2.0, %v1382_v60  ;;  %v1415_v7 = vsub.f32 2.0, %v1405_v28  ;;  %v1410_v5 = vmul.f32 %v1382_v60, %v668_v53  ;;  %v1411_v56 = vmul.f32 %v1405_v28, %v714_v24  ;;  %1703 = vmatpush.msra.mxu2 %v1678_v9  ;;  %v1829_v24 = vld [vmem:[%s14062_s14 + $0x78] sm:$0xff]  ;;  %1799 = vmatpush.msra.mxu1 %v1767_v15  ;;  %v1835_v39 = vld [vmem:[%s14062_s14 + $0xa8] sm:$0xff]  ;;  %v1818_v9 = vld [vmem:[%s14062_s14 + $0x20] sm:$0xff] }
 0x355   :  { %1769 = vmatpush.msra.mxu0 %v1758_v14  ;;  %1734 = vmatpush.msra.mxu3 %v1686_v54  ;;  %v1675_v60 = vld [vmem:[%s14060_s12 + $0x38] sm:$0xff]  ;;  %v1748_v14 = vld [vmem:[%s14061_s13 + $0x20] sm:$0xff] }
 0x356   :  { %v1418_v63 = vmul.f32 %v1414_v4, %v950_v61  ;;  %v1419_v27 = vmul.f32 %v1415_v7, %v996_v20  ;;  %1704 = vmatpush.msra.mxu2 %v1677_v29  ;;  %1800 = vmatpush.msra.mxu1 %v1766_v43  ;;  %v1834_v54 = vld [vmem:[%s14062_s14 + $0xa0] sm:$0xff]  ;;  %v1747_v29 = vld [vmem:[%s14061_s13 + $0x18] sm:$0xff] }
 0x358   :  { %v1422_v8 = vadd.f32 %v1418_v63, %v1410_v5  ;;  %v1423_v55 = vadd.f32 %v1419_v27, %v1411_v56  ;;  %1705 = vmatpush.msra.mxu2 %v1676_v12  ;;  %1801 = vmatpush.msra.mxu1 %v1765_v22  ;;  %v1817_v12 = vld [vmem:[%s14062_s14 + $0x18] sm:$0xff]  ;;  %v6375_v22 = vld [vmem:[%s14060_s12 + $0x130] sm:$0xff] }
 0x35a   :  { %1514 = vmatmul.f32.gmra.mxu0 %v1422_v8  ;;  %1537 = vmatmul.f32.gmra.mxu1 %v1423_v55 }
 0x35b   :  { %1706 = vmatpush.msra.mxu2 %v1675_v60  ;;  %v1816_v60 = vld [vmem:[%s14062_s14 + $0x10] sm:$0xff] }
 0x362   :  { %1557 = vmatmul.f32.vlgmr.msrb.gmra.mxu0 %v1420_v21  ;;  %1580 = vmatmul.f32.vlgmr.msrb.gmra.mxu1 %v1421_v13  ;;  %v1685_v21 = vld [vmem:[%s14060_s12 + $0x88] sm:$0xff]  ;;  %v9557_v13 = vsel %vm1607_vm4, %v7272_v37, %v1606_v52  ;;  %v1752_v37 = vld [vmem:[%s14061_s13 + $0x40] sm:$0xff] }
 0x363   :  { %1735 = vmatpush.msra.mxu3 %v1685_v21  ;;  %v1764_v52 = vld [vmem:[%s14061_s13 + $0xa0] sm:$0xff]  ;;  %v1763_v21 = vld [vmem:[%s14061_s13 + $0x98] sm:$0xff] }
 0x364   :  { %1802 = vmatpush.msra.mxu1 %v1764_v52  ;;  %v6374_v52 = vld [vmem:[%s14060_s12 + $0x128] sm:$0xff] }
 0x365   :  { %1736 = vmatpush.msra.mxu3 %v1684_v10  ;;  %v1833_v10 = vld [vmem:[%s14062_s14 + $0x98] sm:$0xff] }
 0x366   :  { %1803 = vmatpush.msra.mxu1 %v1763_v21 }
 0x367   :  { %1838 = vmatpush.msrb.mxu3 %v1829_v24  ;;  %v1746_v24 = vld [vmem:[%s14061_s13 + $0x10] sm:$0xff] }
 0x36a   :  { %1560 = vmatmul.f32.gmra.mxu0 %v1422_v8  ;;  %1583 = vmatmul.f32.gmra.mxu1 %v1423_v55 }
 0x3cf   :  { %v1512_v2 = vpop.f32.mrf.mxu0  ;;  %v1535_v58 = vpop.f32.mrf.mxu1 }
 0x3d0   :  { %v1513_v48 = vadd.f32 %v1512_v2, %v1491_v25 }
 0x3d2   :  { %v9496_v1 = vadd.f32 %v1535_v58, %v1513_v48  ;;  %v1827_v48 = vld [vmem:[%s14062_s14 + $0x68] sm:$0xff] }
 0x3d7   :  { %v1515_v42 = vpop.f32.mrf.mxu0  ;;  %v1538_v23 = vpop.f32.mrf.mxu1 }
 0x3d8   :  { %v1516_v38 = vadd.f32 %v1515_v42, %v1491_v25  ;;  %v1674_v25 = vld [vmem:[%s14060_s12 + $0x30] sm:$0xff] }
 0x3d9   :  { %1707 = vmatpush.msra.mxu2 %v1674_v25 }
 0x3da   :  { %v9501_v33 = vadd.f32 %v1538_v23, %v1516_v38  ;;  %v1828_v23 = vld [vmem:[%s14062_s14 + $0x70] sm:$0xff]  ;;  %v1672_v38 = vld [vmem:[%s14060_s12 + $0x20] sm:$0xff] }
 0x3db   :  { %1839 = vmatpush.msrb.mxu3 %v1828_v23 }
 0x3dc   :  { %v1596_v3 = vsel %vm1595_vm2, %v9501_v33, 0.0 }
 0x3dd   :  { %1840 = vmatpush.msrb.mxu3 %v1827_v48 }
 0x3df   :  { %v1558_v57 = vpop.f32.mrf.mxu0  ;;  %v1581_v50 = vpop.f32.mrf.mxu1 }
 0x3e0   :  { %v1559_v0 = vadd.f32 %v1558_v57, %v1492_v6  ;;  %v1673_v57 = vld [vmem:[%s14060_s12 + $0x28] sm:$0xff] }
 0x3e1   :  { %1708 = vmatpush.msra.mxu2 %v1673_v57 }
 0x3e2   :  { %v9494_v11 = vadd.f32 %v1581_v50, %v1559_v0  ;;  %v1756_v50 = vld [vmem:[%s14061_s13 + $0x60] sm:$0xff] }
 0x3e3   :  { %v1826_v0 = vld [vmem:[%s14062_s14 + $0x60] sm:$0xff]  ;;  %1709 = vmatpush.msra.mxu2 %v1672_v38 }
 0x3e4   :  { %v1591_v46 = vsel %vm125_vm0, %v9494_v11, 0.0  ;;  %1841 = vmatpush.msrb.mxu3 %v1826_v0  ;;  %v1589_v38 = vld [vmem:[%s14064_s16] sm:$0x3f] }
 0x3e5   :  { %v1592_v47 = vadd.f32 %v1591_v46, %v9496_v1  ;;  %v1755_v46 = vld [vmem:[%s14061_s13 + $0x58] sm:$0xff] }
 0x3e7   :  { %v1561_v18 = vpop.f32.mrf.mxu0  ;;  %1593 = vadd.xlane.f32.xlu0 %v1592_v47  ;;  %v1584_v32 = vpop.f32.mrf.mxu1  ;;  %v1825_v47 = vld [vmem:[%s14062_s14 + $0x58] sm:$0xff] }
 0x3e8   :  { %v1562_v30 = vadd.f32 %v1561_v18, %v1492_v6  ;;  %v1757_v6 = vld [vmem:[%s14061_s13 + $0x68] sm:$0xff]  ;;  %1842 = vmatpush.msrb.mxu3 %v1825_v47  ;;  %v1671_v18 = vld [vmem:[%s14060_s12 + $0x18] sm:$0xff] }
 0x3e9   :  { %1770 = vmatpush.msra.mxu0 %v1757_v6  ;;  %1710 = vmatpush.msra.mxu2 %v1671_v18 }
 0x3ea   :  { %v9503_v16 = vadd.f32 %v1584_v32, %v1562_v30  ;;  %v1754_v30 = vld [vmem:[%s14061_s13 + $0x50] sm:$0xff] }
 0x3eb   :  { %1771 = vmatpush.msra.mxu0 %v1756_v50  ;;  %v1824_v32 = vld [vmem:[%s14062_s14 + $0x50] sm:$0xff] }
 0x3ec   :  { %v1598_v17 = vsel %vm1597_vm3, %v9503_v16, 0.0  ;;  %1843 = vmatpush.msrb.mxu3 %v1824_v32 }
 0x3ed   :  { %v1599_v35 = vadd.f32 %v1598_v17, %v1596_v3  ;;  %1772 = vmatpush.msra.mxu0 %v1755_v46  ;;  %v1670_v3 = vld [vmem:[%s14060_s12 + $0x10] sm:$0xff]  ;;  %v1753_v17 = vld [vmem:[%s14061_s13 + $0x48] sm:$0xff] }
 0x3ee   :  { %1711 = vmatpush.msra.mxu2 %v1670_v3  ;;  %v1590_v46 = vld [vmem:[%s14064_s16 + $0x8] sm:$0x3f]  ;;  %v1656_v3 = vperm.slane %v1589_v38, 0 }
 0x3ef   :  { %1600 = vadd.xlane.f32.xlu0 %v1599_v35  ;;  %1773 = vmatpush.msra.mxu0 %v1754_v30  ;;  %v1823_v35 = vld [vmem:[%s14062_s14 + $0x48] sm:$0xff] }
 0x3f0   :  { %1844 = vmatpush.msrb.mxu3 %v1823_v35  ;;  %1712 = vmatpush.msra.mxu2 %v1669_v19 }
 0x3f1   :  { %1774 = vmatpush.msra.mxu0 %v1753_v17  ;;  %v1657_v17 = vperm.slane %v1590_v46, 0 }
 0x3f2   :  { %1845 = vmatpush.msrb.mxu3 %v1822_v40  ;;  %1713 = vmatpush.msra.mxu2 %v1668_v36  ;;  %v1663_v40 = vperm.slane %v1590_v46, 1 }
 0x3f3   :  { %1775 = vmatpush.msra.mxu0 %v1752_v37  ;;  %v1662_v37 = vperm.slane %v1589_v38, 1  ;;  %v6387_v38 = vld [vmem:[%s14061_s13 + $0xc0] sm:$0xff] }
 0x3f4   :  { %1846 = vmatpush.msrb.mxu3 %v1821_v41  ;;  %1869 = vmatpush.msrb.mxu2 %v1837_v44 }
 0x3f5   :  { %1776 = vmatpush.msra.mxu0 %v1751_v31 }
 0x3f6   :  { %1847 = vmatpush.msrb.mxu3 %v1820_v45  ;;  %1870 = vmatpush.msrb.mxu2 %v1836_v34 }
 0x3f7   :  { %1777 = vmatpush.msra.mxu0 %v1750_v26 }
 0x3f8   :  { %1848 = vmatpush.msrb.mxu3 %v1819_v51  ;;  %1871 = vmatpush.msrb.mxu2 %v1835_v39  ;;  %v6401_v51 = vld [vmem:[%s14061_s13 + $0x130] sm:$0xff] }
 0x3f9   :  { %1778 = vmatpush.msra.mxu0 %v1749_v49  ;;  %v6376_v49 = vld [vmem:[%s14060_s12 + $0x138] sm:$0xff] }
 0x3fa   :  { %1849 = vmatpush.msrb.mxu3 %v1818_v9  ;;  %1872 = vmatpush.msrb.mxu2 %v1834_v54  ;;  %v6400_v9 = vld [vmem:[%s14061_s13 + $0x128] sm:$0xff] }
 0x3fb   :  { %1779 = vmatpush.msra.mxu0 %v1748_v14 }
 0x3fc   :  { %1850 = vmatpush.msrb.mxu3 %v1817_v12  ;;  %1873 = vmatpush.msrb.mxu2 %v1833_v10  ;;  %v6372_v10 = vld [vmem:[%s14060_s12 + $0x118] sm:$0xff] }
 0x3fd   :  { %1780 = vmatpush.msra.mxu0 %v1747_v29 }
 0x3fe   :  { %1851 = vmatpush.msrb.mxu3 %v1816_v60  ;;  %v6397_v60 = vld [vmem:[%s14061_s13 + $0x110] sm:$0xff] }
 0x3ff   :  { %1781 = vmatpush.msra.mxu0 %v1746_v24  ;;  %v6398_v24 = vld [vmem:[%s14061_s13 + $0x118] sm:$0xff] }
 0x45a   :  { %v1594_v53 = vpop.xlane.xlu0 %1593 }
 0x45b   :  { %v1609_v28 = vmul.f32 %v9557_v13, %v1594_v53  ;;  %v1762_v53 = vld [vmem:[%s14061_s13 + $0x90] sm:$0xff] }
 0x45c   :  { %1804 = vmatpush.msra.mxu1 %v1762_v53  ;;  %v6371_v53 = vld [vmem:[%s14060_s12 + $0x110] sm:$0xff] }
 0x45d   :  { %v9573_v61 = vsub.f32 %v9496_v1, %v1609_v28  ;;  %v9576_v20 = vsub.f32 %v9494_v11, %v1609_v28  ;;  %v1832_v28 = vld [vmem:[%s14062_s14 + $0x90] sm:$0xff] }
 0x45e   :  { %1874 = vmatpush.msrb.mxu2 %v1832_v28  ;;  %v6370_v28 = vld [vmem:[%s14060_s12 + $0x108] sm:$0xff] }
 0x45f   :  { %v1615_v4 = vmul.f32 %v9573_v61, %v9573_v61  ;;  %v1616_v7 = vmul.f32 %v9576_v20, %v9576_v20 }
 0x461   :  { %v1619_v5 = vsel %vm125_vm0, %v1616_v7, 0.0  ;;  %v1761_v7 = vld [vmem:[%s14061_s13 + $0x88] sm:$0xff] }
 0x462   :  { %v1601_v63 = vpop.xlane.xlu0 %1600  ;;  %v1620_v56 = vadd.f32 %v1619_v5, %v1615_v4  ;;  %v1745_v4 = vld [vmem:[%s14061_s13 + $0x8] sm:$0xff]  ;;  %1805 = vmatpush.msra.mxu1 %v1761_v7  ;;  %v6369_v7 = vld [vmem:[%s14060_s12 + $0x100] sm:$0xff] }
 0x463   :  { %v1610_v27 = vmul.f32 %v9557_v13, %v1601_v63  ;;  %1782 = vmatpush.msra.mxu0 %v1745_v4  ;;  %v1815_v5 = vld [vmem:[%s14062_s14 + $0x8] sm:$0xff] }
 0x464   :  { %1621 = vadd.xlane.f32.xlu1 %v1620_v56  ;;  %v1831_v63 = vld [vmem:[%s14062_s14 + $0x88] sm:$0xff]  ;;  %1852 = vmatpush.msrb.mxu3 %v1815_v5  ;;  %v1744_v56 = vld [vmem:[%s14061_s13] sm:$0xff] }
 0x465   :  { %v9585_v8 = vsub.f32 %v9501_v33, %v1610_v27  ;;  %v9588_v55 = vsub.f32 %v9503_v16, %v1610_v27  ;;  %v1760_v27 = vld [vmem:[%s14061_s13 + $0x80] sm:$0xff]  ;;  %1875 = vmatpush.msrb.mxu2 %v1831_v63  ;;  %1783 = vmatpush.msra.mxu0 %v1744_v56  ;;  %v6396_v4 = vld [vmem:[%s14061_s13 + $0x108] sm:$0xff]  ;;  %v6368_v63 = vld [vmem:[%s14060_s12 + $0xf8] sm:$0xff] }
 0x466   :  { %1806 = vmatpush.msra.mxu1 %v1760_v27  ;;  %v6395_v5 = vld [vmem:[%s14061_s13 + $0x100] sm:$0xff]  ;;  %v6394_v56 = vld [vmem:[%s14061_s13 + $0xf8] sm:$0xff]  ;;  %v6367_v27 = vld [vmem:[%s14060_s12 + $0xf0] sm:$0xff] }
 0x467   :  { %v1617_v2 = vmul.f32 %v9585_v8, %v9585_v8  ;;  %v1618_v58 = vmul.f32 %v9588_v55, %v9588_v55 }
 0x469   :  { %v1623_v59 = vsel %vm1595_vm2, %v1617_v2, 0.0  ;;  %v1624_v62 = vsel %vm1597_vm3, %v1618_v58, 0.0  ;;  %v1814_v2 = vld [vmem:[%s14062_s14] sm:$0xff] }
 0x46a   :  { %v1625_v42 = vadd.f32 %v1624_v62, %v1623_v59  ;;  %v1830_v58 = vld [vmem:[%s14062_s14 + $0x80] sm:$0xff]  ;;  %1853 = vmatpush.msrb.mxu3 %v1814_v2  ;;  %v6393_v2 = vld [vmem:[%s14061_s13 + $0xf0] sm:$0xff] }
 0x46b   :  { %1876 = vmatpush.msrb.mxu2 %v1830_v58  ;;  %v6366_v58 = vld [vmem:[%s14060_s12 + $0xe8] sm:$0xff] }
 0x46c   :  { %1626 = vadd.xlane.f32.xlu1 %v1625_v42 }
 0x4d7   :  { %v1622_v59 = vpop.xlane.xlu1 %1621 }
 0x4d8   :  { %v1628_v62 = vmul.f32 %v1622_v59, %v9557_v13  ;;  %v6392_v59 = vld [vmem:[%s14061_s13 + $0xe8] sm:$0xff] }
 0x4da   :  { %v1630_v42 = vadd.f32 1e-05, %v1628_v62  ;;  %v6365_v62 = vld [vmem:[%s14060_s12 + $0xe0] sm:$0xff] }
 0x4dc   :  { %7273 = vrsqrt.f32 %v1630_v42  ;;  %vm1638_vm6 = vweird.f32 %v1630_v42 }
 0x4df   :  { %v1627_v23 = vpop.xlane.xlu1 %1626 }
 0x4e0   :  { %v1629_v25 = vmul.f32 %v1627_v23, %v9557_v13  ;;  %v6364_v23 = vld [vmem:[%s14060_s12 + $0xd8] sm:$0xff] }
 0x4e2   :  { %v7274_v6 = vpop.eup %7273  ;;  %v1631_v48 = vadd.f32 1e-05, %v1629_v25  ;;  %v6390_v25 = vld [vmem:[%s14061_s13 + $0xd8] sm:$0xff] }
 0x4e3   :  { %v1633_v57 = vmul.f32 %v7274_v6, %v1630_v42  ;;  %vm1639_vm5 = vweird.f32 %v7274_v6  ;;  %v6391_v42 = vld [vmem:[%s14061_s13 + $0xe0] sm:$0xff] }
 0x4e4   :  { %7275 = vrsqrt.f32 %v1631_v48  ;;  %vm1640_vm7 = vmor %vm1638_vm6, %vm1639_vm5  ;;  %vm1648_vm9 = vweird.f32 %v1631_v48 }
 0x4e5   :  { %v1634_v50 = vmul.f32 %v7274_v6, %v1633_v57  ;;  %v6362_v57 = vld [vmem:[%s14060_s12 + $0xc8] sm:$0xff] }
 0x4e7   :  { %v1635_v0 = vmul.f32 0.5, %v1634_v50  ;;  %v6388_v50 = vld [vmem:[%s14061_s13 + $0xc8] sm:$0xff] }
 0x4e9   :  { %v1636_v47 = vsub.f32 1.5, %v1635_v0  ;;  %v6361_v0 = vld [vmem:[%s14060_s12 + $0xc0] sm:$0xff] }
 0x4ea   :  { %v7276_v18 = vpop.eup %7275 }
 0x4eb   :  { %v1637_v30 = vmul.f32 %v7274_v6, %v1636_v47  ;;  %v1643_v32 = vmul.f32 %v7276_v18, %v1631_v48  ;;  %vm1649_vm8 = vweird.f32 %v7276_v18  ;;  %v6389_v48 = vld [vmem:[%s14061_s13 + $0xd0] sm:$0xff] }
 0x4ec   :  { %vm1650_vm10 = vmor %vm1648_vm9, %vm1649_vm8 }
 0x4ed   :  { %v1641_v35 = vsel %vm1640_vm7, %v7274_v6, %v1637_v30  ;;  %v1644_v19 = vmul.f32 %v7276_v18, %v1643_v32  ;;  %v6363_v6 = vld [vmem:[%s14060_s12 + $0xd0] sm:$0xff] }
 0x4ee   :  { %v1652_v36 = vmul.f32 %v1641_v35, %v9573_v61  ;;  %v1653_v31 = vmul.f32 %v1641_v35, %v9576_v20  ;;  %v6402_v61 = vld [vmem:[%s14061_s13 + $0x138] sm:$0xff] }
 0x4ef   :  { %v1645_v15 = vmul.f32 0.5, %v1644_v19 }
 0x4f0   :  { %v1658_v41 = vmul.f32 %v1656_v3, %v1652_v36  ;;  %v1659_v44 = vmul.f32 %v1657_v17, %v1653_v31  ;;  %v6383_v31 = vld [vmem:[%s14060_s12 + $0x170] sm:$0xff] }
 0x4f1   :  { %v1646_v26 = vsub.f32 1.5, %v1645_v15  ;;  %v6382_v15 = vld [vmem:[%s14060_s12 + $0x168] sm:$0xff] }
 0x4f2   :  { %v9762_v43 = vadd.f32 %v1662_v37, %v1658_v41  ;;  %v9764_v45 = vadd.f32 %v1663_v40, %v1659_v44  ;;  %v6381_v41 = vld [vmem:[%s14060_s12 + $0x160] sm:$0xff] }
 0x4f3   :  { %v1647_v34 = vmul.f32 %v7276_v18, %v1646_v26 }
 0x4f4   :  { %1714 = vmatmul.f32.vlgmr.msra.gmra.mxu2 %v9762_v43  ;;  %6348 = vmatmul.msk.f32.vlgmr.msra.gmra.mxu3 %vm125_vm0, %v9764_v45 }
 0x4f5   :  { %v1651_v20 = vsel %vm1650_vm10, %v7276_v18, %v1647_v34  ;;  %1784 = vmatmul.f32.vlgmr.msra.gmra.mxu0 %v9762_v43  ;;  %6350 = vmatmul.msk.f32.vlgmr.msra.gmra.mxu1 %vm125_vm0, %v9764_v45  ;;  %v6380_v34 = vld [vmem:[%s14060_s12 + $0x158] sm:$0xff] }
 0x4f6   :  { %v1654_v39 = vmul.f32 %v1651_v20, %v9585_v8  ;;  %v1655_v14 = vmul.f32 %v1651_v20, %v9588_v55  ;;  %2020 = vmatpush.msra.mxu2 %v6376_v49  ;;  %2091 = vmatpush.msra.mxu3 %v6402_v61  ;;  %v6373_v8 = vld [vmem:[%s14060_s12 + $0x120] sm:$0xff]  ;;  %v6379_v61 = vld [vmem:[%s14060_s12 + $0x150] sm:$0xff]  ;;  %v6378_v20 = vld [vmem:[%s14060_s12 + $0x148] sm:$0xff] }
 0x4f7   :  { %v6399_v55 = vld [vmem:[%s14061_s13 + $0x120] sm:$0xff] }
 0x4f8   :  { %v1660_v54 = vmul.f32 %v1656_v3, %v1654_v39  ;;  %v1661_v29 = vmul.f32 %v1657_v17, %v1655_v14  ;;  %2021 = vmatpush.msra.mxu2 %v6375_v22  ;;  %2092 = vmatpush.msra.mxu3 %v6401_v51  ;;  %v6377_v22 = vld [vmem:[%s14060_s12 + $0x140] sm:$0xff]  ;;  %v6428_v51 = vld [vmem:[%s14062_s14 + $0x138] sm:$0xff] }
 0x4fa   :  { %v9798_v21 = vadd.f32 %v1662_v37, %v1660_v54  ;;  %v9800_v12 = vadd.f32 %v1663_v40, %v1661_v29  ;;  %2022 = vmatpush.msra.mxu2 %v6374_v52  ;;  %2093 = vmatpush.msra.mxu3 %v6400_v9  ;;  %v6384_v40 = vld [vmem:[%s14060_s12 + $0x178] sm:$0xff]  ;;  %v6427_v9 = vld [vmem:[%s14062_s14 + $0x130] sm:$0xff]  ;;  %v6426_v29 = vld [vmem:[%s14062_s14 + $0x128] sm:$0xff] }
 0x4fc   :  { %2023 = vmatpush.msra.mxu2 %v6373_v8  ;;  %2094 = vmatpush.msra.mxu3 %v6399_v55  ;;  %v6425_v8 = vld [vmem:[%s14062_s14 + $0x120] sm:$0xff]  ;;  %v6424_v55 = vld [vmem:[%s14062_s14 + $0x118] sm:$0xff] }
 0x4fd   :  { %1717 = vmatmul.f32.gmra.mxu2 %v9798_v21  ;;  %6349 = vmatmul.msk.f32.gmra.mxu3 %vm125_vm0, %v9800_v12 }
 0x4fe   :  { %1787 = vmatmul.f32.gmra.mxu0 %v9798_v21  ;;  %6351 = vmatmul.msk.f32.gmra.mxu1 %vm125_vm0, %v9800_v12 }
 0x4ff   :  { %2024 = vmatpush.msra.mxu2 %v6372_v10  ;;  %2095 = vmatpush.msra.mxu3 %v6398_v24  ;;  %v6423_v10 = vld [vmem:[%s14062_s14 + $0x110] sm:$0xff]  ;;  %v6422_v24 = vld [vmem:[%s14062_s14 + $0x108] sm:$0xff] }
 0x501   :  { %2025 = vmatpush.msra.mxu2 %v6371_v53  ;;  %2096 = vmatpush.msra.mxu3 %v6397_v60  ;;  %v6421_v53 = vld [vmem:[%s14062_s14 + $0x100] sm:$0xff]  ;;  %v6420_v60 = vld [vmem:[%s14062_s14 + $0xf8] sm:$0xff] }
 0x503   :  { %2026 = vmatpush.msra.mxu2 %v6370_v28  ;;  %2097 = vmatpush.msra.mxu3 %v6396_v4  ;;  %v6419_v28 = vld [vmem:[%s14062_s14 + $0xf0] sm:$0xff]  ;;  %v6418_v4 = vld [vmem:[%s14062_s14 + $0xe8] sm:$0xff] }
 0x505   :  { %2027 = vmatpush.msra.mxu2 %v6369_v7  ;;  %2098 = vmatpush.msra.mxu3 %v6395_v5  ;;  %v6417_v7 = vld [vmem:[%s14062_s14 + $0xe0] sm:$0xff]  ;;  %v6416_v5 = vld [vmem:[%s14062_s14 + $0xd8] sm:$0xff] }
 0x506   :  { %1854 = vmatmul.f32.vlgmr.msrb.gmra.mxu3 %v9762_v43  ;;  %6352 = vmatmul.msk.f32.vlgmr.msrb.gmra.mxu2 %vm125_vm0, %v9764_v45 }
 0x507   :  { %2028 = vmatpush.msra.mxu2 %v6368_v63  ;;  %2099 = vmatpush.msra.mxu3 %v6394_v56  ;;  %v6415_v63 = vld [vmem:[%s14062_s14 + $0xd0] sm:$0xff]  ;;  %v6414_v56 = vld [vmem:[%s14062_s14 + $0xc8] sm:$0xff] }
 0x509   :  { %2029 = vmatpush.msra.mxu2 %v6367_v27  ;;  %2100 = vmatpush.msra.mxu3 %v6393_v2  ;;  %v6413_v27 = vld [vmem:[%s14062_s14 + $0xc0] sm:$0xff] }
 0x50b   :  { %2030 = vmatpush.msra.mxu2 %v6366_v58  ;;  %2101 = vmatpush.msra.mxu3 %v6392_v59  ;;  %v9976_v58 = vld [vmem:[%s14059_s11] sm:$0xff] }
 0x50d   :  { %2031 = vmatpush.msra.mxu2 %v6365_v62  ;;  %2102 = vmatpush.msra.mxu3 %v6391_v42 }
 0x50e   :  { %1857 = vmatmul.f32.gmra.mxu3 %v9798_v21  ;;  %6353 = vmatmul.msk.f32.gmra.mxu2 %vm125_vm0, %v9800_v12 }
 0x50f   :  { %2032 = vmatpush.msra.mxu2 %v6364_v23  ;;  %2103 = vmatpush.msra.mxu3 %v6390_v25  ;;  %v9983_v25 = vld [vmem:[%s14059_s11 + $0x8] sm:$0x3] }
 0x511   :  { %2033 = vmatpush.msra.mxu2 %v6363_v6  ;;  %2104 = vmatpush.msra.mxu3 %v6389_v48 }
 0x513   :  { %2034 = vmatpush.msra.mxu2 %v6362_v57  ;;  %2105 = vmatpush.msra.mxu3 %v6388_v50 }
 0x515   :  { %2035 = vmatpush.msra.mxu2 %v6361_v0  ;;  %2106 = vmatpush.msra.mxu3 %v6387_v38 }
 0x516   :  { %2036 = vmatmul.f32.vlgmr.msra.gmra.mxu2 %v9762_v43  ;;  %2107 = vmatmul.f32.vlgmr.msra.gmra.mxu3 %v9762_v43 }
 0x51e   :  { %2039 = vmatmul.f32.gmra.mxu2 %v9798_v21  ;;  %2110 = vmatmul.f32.gmra.mxu3 %v9798_v21 }
 0x572   :  { %v1785_v46 = vpop.f32.mrf.mxu0  ;;  %v1808_v47 = vpop.f32.mrf.mxu1 }
 0x573   :  { %v1809_v35 = vadd.f32 %v1808_v47, %v1785_v46 }
 0x577   :  { %v1715_v18 = vpop.f32.mrf.mxu2  ;;  %v1738_v30 = vpop.f32.mrf.mxu3 }
 0x578   :  { %v1739_v36 = vadd.f32 %v1738_v30, %v1715_v18 }
 0x57b   :  { %v1788_v32 = vpop.f32.mrf.mxu0  ;;  %v1811_v3 = vpop.f32.mrf.mxu1 }
 0x57c   :  { %v1812_v17 = vadd.f32 %v1811_v3, %v1788_v32 }
 0x57e   :  { %6354 = vmatpush.xpose.msk.msrb.mxu1 %vm125_vm0, %v1812_v17 }
 0x580   :  { %v1718_v19 = vpop.f32.mrf.mxu2  ;;  %v1741_v37 = vpop.f32.mrf.mxu3 }
 0x581   :  { %v1742_v49 = vadd.f32 %v1741_v37, %v1718_v19  ;;  %v6409_v19 = vld [vmem:[%s14061_s13 + $0x170] sm:$0xff]  ;;  %v6408_v37 = vld [vmem:[%s14061_s13 + $0x168] sm:$0xff] }
 0x582   :  { %6355 = vmatpush.xpose.msk.msrb.mxu1 %vm125_vm0, %v1809_v35  ;;  %v6410_v35 = vld [vmem:[%s14061_s13 + $0x178] sm:$0xff] }
 0x585   :  { %6356 = vmatmul.msk.f32.vlgmr.msrb.gmra.mxu1 %vm125_vm0, %v1739_v36  ;;  %v6406_v36 = vld [vmem:[%s14061_s13 + $0x158] sm:$0xff] }
 0x586   :  { %2051 = vmatpush.msra.mxu1 %v6384_v40  ;;  %v6407_v40 = vld [vmem:[%s14061_s13 + $0x160] sm:$0xff] }
 0x588   :  { %2052 = vmatpush.msra.mxu1 %v6383_v31  ;;  %v6405_v31 = vld [vmem:[%s14061_s13 + $0x150] sm:$0xff] }
 0x589   :  { %v1855_v44 = vpop.f32.mrf.mxu3  ;;  %v1878_v26 = vpop.f32.mrf.mxu2 }
 0x58a   :  { %2053 = vmatpush.msra.mxu1 %v6382_v15  ;;  %v1879_v54 = vadd.f32 %v1878_v26, %v1855_v44  ;;  %v6404_v15 = vld [vmem:[%s14061_s13 + $0x148] sm:$0xff] }
 0x58c   :  { %2054 = vmatpush.msra.mxu1 %v6381_v41  ;;  %v6403_v41 = vld [vmem:[%s14061_s13 + $0x140] sm:$0xff] }
 0x58d   :  { %6357 = vmatmul.msk.f32.gmra.mxu1 %vm125_vm0, %v1742_v49 }
 0x58e   :  { %2055 = vmatpush.msra.mxu1 %v6380_v34 }
 0x590   :  { %2056 = vmatpush.msra.mxu1 %v6379_v61  ;;  %v6436_v61 = vld [vmem:[%s14062_s14 + $0x178] sm:$0xff] }
 0x591   :  { %v1858_v39 = vpop.f32.mrf.mxu3  ;;  %v1881_v14 = vpop.f32.mrf.mxu2 }
 0x592   :  { %2057 = vmatpush.msra.mxu1 %v6378_v20  ;;  %v1882_v52 = vadd.f32 %v1881_v14, %v1858_v39  ;;  %v6435_v20 = vld [vmem:[%s14062_s14 + $0x170] sm:$0xff] }
 0x594   :  { %2058 = vmatpush.msra.mxu1 %v6377_v22  ;;  %6358 = vmatpush.msk.msrb.mxu0 %vm1595_vm2, %v1882_v52  ;;  %v6434_v22 = vld [vmem:[%s14062_s14 + $0x168] sm:$0xff]  ;;  %v6432_v52 = vld [vmem:[%s14062_s14 + $0x158] sm:$0xff] }
 0x595   :  { %6385 = vmatmul.msk.f32.vlgmr.msra.gmra.mxu1 %vm125_vm0, %v9764_v45 }
 0x596   :  { %2162 = vmatpush.msrb.mxu1 %v6428_v51  ;;  %1971 = vmatpush.msrb.mxu0 %v1879_v54  ;;  %v6433_v51 = vld [vmem:[%s14062_s14 + $0x160] sm:$0xff]  ;;  %v1993_v54 = vld [vmem:[%s14063_s15 + $0x70] sm:$0xff] }
 0x598   :  { %2163 = vmatpush.msrb.mxu1 %v6427_v9  ;;  %2122 = vmatpush.msra.mxu0 %v6410_v35  ;;  %v6431_v9 = vld [vmem:[%s14062_s14 + $0x150] sm:$0xff] }
 0x59a   :  { %2164 = vmatpush.msrb.mxu1 %v6426_v29  ;;  %2123 = vmatpush.msra.mxu0 %v6409_v19  ;;  %v1991_v29 = vld [vmem:[%s14063_s15 + $0x60] sm:$0xff] }
 0x59c   :  { %2165 = vmatpush.msrb.mxu1 %v6425_v8  ;;  %2124 = vmatpush.msra.mxu0 %v6408_v37  ;;  %v6430_v8 = vld [vmem:[%s14062_s14 + $0x148] sm:$0xff]  ;;  %v2037_v37 = vpop.f32.mrf.mxu2 }
 0x59d   :  { %6386 = vmatmul.msk.f32.gmra.mxu1 %vm125_vm0, %v9800_v12 }
 0x59e   :  { %2166 = vmatpush.msrb.mxu1 %v6424_v55  ;;  %2125 = vmatpush.msra.mxu0 %v6407_v40  ;;  %v1989_v55 = vld [vmem:[%s14063_s15 + $0x50] sm:$0xff] }
 0x5a0   :  { %2167 = vmatpush.msrb.mxu1 %v6423_v10  ;;  %2126 = vmatpush.msra.mxu0 %v6406_v36  ;;  %v6429_v10 = vld [vmem:[%s14062_s14 + $0x140] sm:$0xff] }
 0x5a2   :  { %2168 = vmatpush.msrb.mxu1 %v6422_v24  ;;  %2127 = vmatpush.msra.mxu0 %v6405_v31  ;;  %v1987_v24 = vld [vmem:[%s14063_s15 + $0x40] sm:$0xff] }
 0x5a4   :  { %2169 = vmatpush.msrb.mxu1 %v6421_v53  ;;  %2128 = vmatpush.msra.mxu0 %v6404_v15  ;;  %v1985_v53 = vld [vmem:[%s14063_s15 + $0x30] sm:$0xff] }
 0x5a6   :  { %2170 = vmatpush.msrb.mxu1 %v6420_v60  ;;  %2129 = vmatpush.msra.mxu0 %v6403_v41  ;;  %v1983_v60 = vld [vmem:[%s14063_s15 + $0x20] sm:$0xff]  ;;  %v2040_v41 = vpop.f32.mrf.mxu2 }
 0x5a8   :  { %2171 = vmatpush.msrb.mxu1 %v6419_v28  ;;  %v1981_v28 = vld [vmem:[%s14063_s15 + $0x10] sm:$0xff] }
 0x5aa   :  { %2172 = vmatpush.msrb.mxu1 %v6418_v4  ;;  %v1979_v4 = vld [vmem:[%s14063_s15] sm:$0xff] }
 0x5ac   :  { %2173 = vmatpush.msrb.mxu1 %v6417_v7  ;;  %v6511_v7 = vld [vmem:[%s14061_s13 + $0x1f8] sm:$0xff] }
 0x5ae   :  { %2174 = vmatpush.msrb.mxu1 %v6416_v5  ;;  %v6510_v5 = vld [vmem:[%s14061_s13 + $0x1f0] sm:$0xff] }
 0x5b0   :  { %2175 = vmatpush.msrb.mxu1 %v6415_v63  ;;  %v6509_v63 = vld [vmem:[%s14061_s13 + $0x1e8] sm:$0xff] }
 0x5b2   :  { %2176 = vmatpush.msrb.mxu1 %v6414_v56  ;;  %v6508_v56 = vld [vmem:[%s14061_s13 + $0x1e0] sm:$0xff] }
 0x5b4   :  { %2177 = vmatpush.msrb.mxu1 %v6413_v27  ;;  %v6507_v27 = vld [vmem:[%s14061_s13 + $0x1d8] sm:$0xff] }
 0x5b5   :  { %2178 = vmatmul.f32.vlgmr.msrb.gmra.mxu1 %v9762_v43 }
 0x5b6   :  { %2384 = vmatpush.msra.mxu1 %v1993_v54 }
 0x5b8   :  { %2385 = vmatpush.msra.mxu1 %v1991_v29 }
 0x5ba   :  { %2386 = vmatpush.msra.mxu1 %v1989_v55 }
 0x5bc   :  { %2387 = vmatpush.msra.mxu1 %v1987_v24 }
 0x5bd   :  { %2181 = vmatmul.f32.gmra.mxu1 %v9798_v21 }
 0x5be   :  { %2388 = vmatpush.msra.mxu1 %v1985_v53 }
 0x5c0   :  { %2389 = vmatpush.msra.mxu1 %v1983_v60 }
 0x5c2   :  { %2390 = vmatpush.msra.mxu1 %v1981_v28 }
 0x5c4   :  { %2391 = vmatpush.msra.mxu1 %v1979_v4 }
 0x5c6   :  { %2518 = vmatpush.msrb.mxu1 %v6511_v7 }
 0x5c8   :  { %2519 = vmatpush.msrb.mxu1 %v6510_v5  ;;  %v1994_v5 = vld [vmem:[%s14063_s15 + $0x78] sm:$0xff] }
 0x5ca   :  { %2520 = vmatpush.msrb.mxu1 %v6509_v63  ;;  %v1992_v63 = vld [vmem:[%s14063_s15 + $0x68] sm:$0xff] }
 0x5cc   :  { %2521 = vmatpush.msrb.mxu1 %v6508_v56  ;;  %v1990_v56 = vld [vmem:[%s14063_s15 + $0x58] sm:$0xff] }
 0x5ce   :  { %2522 = vmatpush.msrb.mxu1 %v6507_v27  ;;  %v1988_v27 = vld [vmem:[%s14063_s15 + $0x48] sm:$0xff] }
 0x602   :  { %v1913_v2 = vpop.f32.mrf.mxu1 }
 0x603   :  { %v1919_v59 = vmul.f32 0.125, %v1913_v2  ;;  %v6506_v2 = vld [vmem:[%s14061_s13 + $0x1d0] sm:$0xff] }
 0x604   :  { %2523 = vmatpush.msrb.mxu1 %v6506_v2  ;;  %v1986_v2 = vld [vmem:[%s14063_s15 + $0x38] sm:$0xff] }
 0x605   :  { %v1921_v62 = vadd.f32 %v1919_v59, %v9976_v58  ;;  %v6505_v59 = vld [vmem:[%s14061_s13 + $0x1c8] sm:$0xff] }
 0x606   :  { %2524 = vmatpush.msrb.mxu1 %v6505_v59  ;;  %v1984_v59 = vld [vmem:[%s14063_s15 + $0x28] sm:$0xff] }
 0x607   :  { %v1924_v42 = vsel %vm1923_vm11, %v1921_v62, -inf }
 0x608   :  { %1925 = vmax.xlane.f32.xlu2 %v1924_v42  ;;  %v6503_v42 = vld [vmem:[%s14061_s13 + $0x1b8] sm:$0xff] }
 0x60a   :  { %v1916_v23 = vpop.f32.mrf.mxu1 }
 0x60b   :  { %v1920_v6 = vmul.f32 0.125, %v1916_v23  ;;  %v6502_v23 = vld [vmem:[%s14061_s13 + $0x1b0] sm:$0xff] }
 0x60d   :  { %v1922_v48 = vadd.f32 %v1920_v6, %v9983_v25  ;;  %v6501_v6 = vld [vmem:[%s14061_s13 + $0x1a8] sm:$0xff] }
 0x60f   :  { %v1928_v57 = vsel %vm1927_vm12, %v1922_v48, -inf }
 0x610   :  { %1929 = vmax.xlane.f32.xlu2 %v1928_v57  ;;  %v6499_v57 = vld [vmem:[%s14061_s13 + $0x198] sm:$0xff] }
 0x67b   :  { %v1926_v50 = vpop.xlane.xlu2 %1925 }
 0x67c   :  { %v1931_v0 = vsub.f32 %v1921_v62, %v1926_v50  ;;  %v6504_v62 = vld [vmem:[%s14061_s13 + $0x1c0] sm:$0xff]  ;;  %v6498_v50 = vld [vmem:[%s14061_s13 + $0x190] sm:$0xff] }
 0x67d   :  { %2525 = vmatpush.msrb.mxu1 %v6504_v62  ;;  %v1982_v62 = vld [vmem:[%s14063_s15 + $0x18] sm:$0xff] }
 0x67e   :  { %v1933_v38 = vmul.f32 1.442695, %v1931_v0  ;;  %v6497_v0 = vld [vmem:[%s14061_s13 + $0x188] sm:$0xff] }
 0x67f   :  { %2526 = vmatpush.msrb.mxu1 %v6503_v42  ;;  %v1980_v42 = vld [vmem:[%s14063_s15 + $0x8] sm:$0xff] }
 0x680   :  { %7277 = vpow2.f32 %v1933_v38  ;;  %v6496_v38 = vld [vmem:[%s14061_s13 + $0x180] sm:$0xff] }
 0x681   :  { %2527 = vmatpush.msrb.mxu1 %v6502_v23 }
 0x683   :  { %v1930_v46 = vpop.xlane.xlu2 %1929  ;;  %2528 = vmatpush.msrb.mxu1 %v6501_v6 }
 0x684   :  { %v1932_v47 = vsub.f32 %v1922_v48, %v1930_v46  ;;  %v6500_v48 = vld [vmem:[%s14061_s13 + $0x1a0] sm:$0xff] }
 0x685   :  { %2529 = vmatpush.msrb.mxu1 %v6500_v48 }
 0x686   :  { %v7278_v18 = vpop.eup %7277  ;;  %v1935_v30 = vmul.f32 1.442695, %v1932_v47 }
 0x687   :  { %v1937_v32 = vsel %vm1923_vm11, %v7278_v18, 0.0  ;;  %2530 = vmatpush.msrb.mxu1 %v6499_v57 }
 0x688   :  { %7279 = vpow2.f32 %v1935_v30  ;;  %1938 = vadd.xlane.f32.xlu0 %v1937_v32  ;;  %v2108_v30 = vpop.f32.mrf.mxu3 }
 0x689   :  { %2531 = vmatpush.msrb.mxu1 %v6498_v50  ;;  %v6519_v50 = vld [vmem:[%s14061_s13 + $0x238] sm:$0xff] }
 0x68b   :  { %2532 = vmatpush.msrb.mxu1 %v6497_v0  ;;  %v6518_v0 = vld [vmem:[%s14061_s13 + $0x230] sm:$0xff] }
 0x68d   :  { %2533 = vmatpush.msrb.mxu1 %v6496_v38  ;;  %v6517_v38 = vld [vmem:[%s14061_s13 + $0x228] sm:$0xff] }
 0x68e   :  { %v7280_v3 = vpop.eup %7279 }
 0x68f   :  { %v1940_v17 = vsel %vm1927_vm12, %v7280_v3, 0.0 }
 0x690   :  { %1941 = vadd.xlane.f32.xlu1 %v1940_v17  ;;  %v2111_v17 = vpop.f32.mrf.mxu3 }
 0x6fb   :  { %v1939_v44 = vpop.xlane.xlu0 %1938 }
 0x6fc   :  { %7281 = vrcp.f32 %v1939_v44 }
 0x702   :  { %v7282_v26 = vpop.eup %7281 }
 0x703   :  { %v1945_v34 = vmul.f32 %v7282_v26, %v7278_v18  ;;  %v1942_v49 = vpop.xlane.xlu1 %1941  ;;  %v2060_v18 = vpop.f32.mrf.mxu1 }
 0x704   :  { %7283 = vrcp.f32 %v1942_v49  ;;  %v2061_v31 = vadd.f32 %v2060_v18, %v2037_v37  ;;  %v6516_v18 = vld [vmem:[%s14061_s13 + $0x220] sm:$0xff]  ;;  %v6545_v37 = vld [vmem:[%s14062_s14 + $0x238] sm:$0xff] }
 0x705   :  { %6359 = vmatmul.msk.f32.vlgmr.msrb.gmra.mxu0 %vm1923_vm11, %v1945_v34 }
 0x706   :  { %2193 = vmatpush.msrb.mxu0 %v6436_v61 }
 0x708   :  { %2194 = vmatpush.msrb.mxu0 %v6435_v20 }
 0x70a   :  { %v7284_v39 = vpop.eup %7283  ;;  %2195 = vmatpush.msrb.mxu0 %v6434_v22 }
 0x70b   :  { %v1946_v14 = vmul.f32 %v7284_v39, %v7280_v3  ;;  %v2063_v3 = vpop.f32.mrf.mxu1 }
 0x70c   :  { %2196 = vmatpush.msrb.mxu0 %v6433_v51  ;;  %v2064_v44 = vadd.f32 %v2063_v3, %v2040_v41  ;;  %v6515_v3 = vld [vmem:[%s14061_s13 + $0x218] sm:$0xff]  ;;  %v6460_v41 = vld [vmem:[%s14063_s15 + $0xf0] sm:$0xff] }
 0x70d   :  { %6360 = vmatmul.msk.f32.gmra.mxu0 %vm1923_vm11, %v1946_v14 }
 0x70e   :  { %2197 = vmatpush.msrb.mxu0 %v6432_v52 }
 0x710   :  { %2198 = vmatpush.msrb.mxu0 %v6431_v9 }
 0x712   :  { %2199 = vmatpush.msrb.mxu0 %v6430_v8 }
 0x713   :  { %v2179_v36 = vpop.f32.mrf.mxu1 }
 0x714   :  { %2200 = vmatpush.msrb.mxu0 %v6429_v10 }
 0x715   :  { %6411 = vmatmul.msk.f32.vlgmr.msra.gmra.mxu0 %vm125_vm0, %v9764_v45 }
 0x716   :  { %2332 = vmatpush.msra.mxu0 %v6460_v41  ;;  %v6529_v41 = vld [vmem:[%s14062_s14 + $0x1b8] sm:$0xff] }
 0x71b   :  { %v2182_v26 = vpop.f32.mrf.mxu1 }
 0x71d   :  { %6412 = vmatmul.msk.f32.gmra.mxu0 %vm125_vm0, %v9800_v12 }
 0x725   :  { %6437 = vmatmul.msk.f32.vlgmr.msrb.gmra.mxu0 %vm125_vm0, %v9764_v45 }
 0x72d   :  { %6438 = vmatmul.msk.f32.gmra.mxu0 %vm125_vm0, %v9800_v12 }
 0x782   :  { %v10119_v46 = vpop.f32.mrf.mxu0 }
 0x783   :  { %6466 = vmatmul.msk.f32.vlgmr.msra.gmra.mxu1 %vm125_vm0, %v10119_v46 }
 0x78a   :  { %v10123_v47 = vpop.f32.mrf.mxu0 }
 0x78b   :  { %6467 = vmatmul.msk.f32.gmra.mxu1 %vm125_vm0, %v10123_v47 }
 0x792   :  { %v2131_v32 = vpop.f32.mrf.mxu0 }
 0x793   :  { %2534 = vmatmul.f32.vlgmr.msrb.gmra.mxu1 %v9762_v43  ;;  %v2132_v40 = vadd.f32 %v2131_v32, %v2108_v30 }
 0x79a   :  { %v2134_v35 = vpop.f32.mrf.mxu0 }
 0x79b   :  { %v2135_v19 = vadd.f32 %v2134_v35, %v2111_v17  ;;  %2537 = vmatmul.f32.gmra.mxu1 %v9798_v21  ;;  %v6514_v17 = vld [vmem:[%s14061_s13 + $0x210] sm:$0xff]  ;;  %v6513_v35 = vld [vmem:[%s14061_s13 + $0x208] sm:$0xff] }
 0x79d   :  { %6439 = vmatpush.xpose.msk.msrb.mxu2 %vm125_vm0, %v2135_v19  ;;  %v6512_v19 = vld [vmem:[%s14061_s13 + $0x200] sm:$0xff] }
 0x7a1   :  { %6440 = vmatpush.xpose.msk.msrb.mxu2 %vm125_vm0, %v2132_v40  ;;  %v6544_v40 = vld [vmem:[%s14062_s14 + $0x230] sm:$0xff] }
 0x7a2   :  { %v2202_v15 = vpop.f32.mrf.mxu0 }
 0x7a3   :  { %v2203_v61 = vadd.f32 %v2202_v15, %v2179_v36  ;;  %v6543_v36 = vld [vmem:[%s14062_s14 + $0x228] sm:$0xff]  ;;  %v6541_v15 = vld [vmem:[%s14062_s14 + $0x218] sm:$0xff] }
 0x7a4   :  { %6441 = vmatmul.msk.f32.vlgmr.msrb.gmra.mxu2 %vm125_vm0, %v2061_v31  ;;  %v6542_v31 = vld [vmem:[%s14062_s14 + $0x220] sm:$0xff] }
 0x7aa   :  { %v2205_v34 = vpop.f32.mrf.mxu0 }
 0x7ab   :  { %v2206_v49 = vadd.f32 %v2205_v34, %v2182_v26  ;;  %v6458_v26 = vld [vmem:[%s14063_s15 + $0xe0] sm:$0xff]  ;;  %v6459_v34 = vld [vmem:[%s14063_s15 + $0xe8] sm:$0xff] }
 0x7ac   :  { %6442 = vmatmul.msk.f32.gmra.mxu2 %vm125_vm0, %v2064_v44  ;;  %v6461_v44 = vld [vmem:[%s14063_s15 + $0xf8] sm:$0xff]  ;;  %2333 = vmatpush.msra.mxu0 %v6458_v26  ;;  %v6528_v26 = vld [vmem:[%s14062_s14 + $0x1b0] sm:$0xff] }
 0x7ad   :  { %6443 = vmatpush.msk.msrb.mxu3 %vm1595_vm2, %v2206_v49  ;;  %2355 = vmatpush.msra.mxu2 %v6461_v44  ;;  %v6456_v49 = vld [vmem:[%s14063_s15 + $0xd0] sm:$0xff] }
 0x7ae   :  { %2334 = vmatpush.msra.mxu0 %v6456_v49  ;;  %v6526_v49 = vld [vmem:[%s14062_s14 + $0x1a0] sm:$0xff] }
 0x7af   :  { %2293 = vmatpush.msrb.mxu3 %v2203_v61  ;;  %v6457_v61 = vld [vmem:[%s14063_s15 + $0xd8] sm:$0xff]  ;;  %2356 = vmatpush.msra.mxu2 %v6459_v34  ;;  %v6527_v34 = vld [vmem:[%s14062_s14 + $0x1a8] sm:$0xff] }
 0x7b1   :  { %2407 = vmatpush.msra.mxu3 %v1994_v5  ;;  %2357 = vmatpush.msra.mxu2 %v6457_v61  ;;  %v6490_v5 = vld [vmem:[%s14060_s12 + $0x220] sm:$0xff] }
 0x7b3   :  { %2408 = vmatpush.msra.mxu3 %v1992_v63  ;;  %v6481_v63 = vld [vmem:[%s14060_s12 + $0x1d8] sm:$0xff] }
 0x7b5   :  { %2409 = vmatpush.msra.mxu3 %v1990_v56  ;;  %v6489_v56 = vld [vmem:[%s14060_s12 + $0x218] sm:$0xff] }
 0x7b7   :  { %2410 = vmatpush.msra.mxu3 %v1988_v27  ;;  %v6480_v27 = vld [vmem:[%s14060_s12 + $0x1d0] sm:$0xff] }
 0x7b9   :  { %2411 = vmatpush.msra.mxu3 %v1986_v2  ;;  %v6488_v2 = vld [vmem:[%s14060_s12 + $0x210] sm:$0xff] }
 0x7bb   :  { %2412 = vmatpush.msra.mxu3 %v1984_v59  ;;  %v6479_v59 = vld [vmem:[%s14060_s12 + $0x1c8] sm:$0xff] }
 0x7bd   :  { %2413 = vmatpush.msra.mxu3 %v1982_v62  ;;  %v6487_v62 = vld [vmem:[%s14060_s12 + $0x208] sm:$0xff] }
 0x7bf   :  { %2414 = vmatpush.msra.mxu3 %v1980_v42  ;;  %v6478_v42 = vld [vmem:[%s14060_s12 + $0x1c0] sm:$0xff] }
 0x827   :  { %v2237_v20 = vpop.f32.mrf.mxu2 }
 0x828   :  { %v2243_v22 = vmul.f32 0.125, %v2237_v20  ;;  %v6538_v20 = vld [vmem:[%s14062_s14 + $0x200] sm:$0xff] }
 0x82a   :  { %v2245_v51 = vadd.f32 %v2243_v22, %v9976_v58  ;;  %v6454_v22 = vld [vmem:[%s14063_s15 + $0xc0] sm:$0xff] }
 0x82b   :  { %2335 = vmatpush.msra.mxu0 %v6454_v22  ;;  %v6523_v22 = vld [vmem:[%s14062_s14 + $0x188] sm:$0xff] }
 0x82c   :  { %v2247_v39 = vsel %vm1923_vm11, %v2245_v51, -inf }
 0x82d   :  { %2248 = vmax.xlane.f32.xlu2 %v2247_v39  ;;  %v6452_v39 = vld [vmem:[%s14063_s15 + $0xb0] sm:$0xff] }
 0x82e   :  { %2336 = vmatpush.msra.mxu0 %v6452_v39 }
 0x82f   :  { %v2240_v14 = vpop.f32.mrf.mxu2 }
 0x830   :  { %v2244_v52 = vmul.f32 0.125, %v2240_v14  ;;  %v6453_v14 = vld [vmem:[%s14063_s15 + $0xb8] sm:$0xff] }
 0x832   :  { %v2246_v9 = vadd.f32 %v2244_v52, %v9983_v25  ;;  %v6450_v52 = vld [vmem:[%s14063_s15 + $0xa0] sm:$0xff] }
 0x833   :  { %2337 = vmatpush.msra.mxu0 %v6450_v52 }
 0x834   :  { %v2250_v54 = vsel %vm1927_vm12, %v2246_v9, -inf }
 0x835   :  { %2251 = vmax.xlane.f32.xlu0 %v2250_v54  ;;  %v6448_v54 = vld [vmem:[%s14063_s15 + $0x90] sm:$0xff] }
 0x836   :  { %2338 = vmatpush.msra.mxu0 %v6448_v54 }
 0x8a0   :  { %v2249_v29 = vpop.xlane.xlu2 %2248 }
 0x8a1   :  { %v2253_v8 = vsub.f32 %v2245_v51, %v2249_v29  ;;  %v6455_v51 = vld [vmem:[%s14063_s15 + $0xc8] sm:$0xff]  ;;  %v6449_v29 = vld [vmem:[%s14063_s15 + $0x98] sm:$0xff] }
 0x8a2   :  { %2358 = vmatpush.msra.mxu2 %v6455_v51  ;;  %v6522_v51 = vld [vmem:[%s14062_s14 + $0x180] sm:$0xff] }
 0x8a3   :  { %v2255_v55 = vmul.f32 1.442695, %v2253_v8  ;;  %v6446_v8 = vld [vmem:[%s14063_s15 + $0x80] sm:$0xff] }
 0x8a4   :  { %2359 = vmatpush.msra.mxu2 %v6453_v14  ;;  %2339 = vmatpush.msra.mxu0 %v6446_v8 }
 0x8a5   :  { %7285 = vpow2.f32 %v2255_v55  ;;  %v6447_v55 = vld [vmem:[%s14063_s15 + $0x88] sm:$0xff] }
 0x8a8   :  { %v2252_v10 = vpop.xlane.xlu0 %2251 }
 0x8a9   :  { %v2254_v24 = vsub.f32 %v2246_v9, %v2252_v10  ;;  %v6451_v9 = vld [vmem:[%s14063_s15 + $0xa8] sm:$0xff]  ;;  %v6485_v10 = vld [vmem:[%s14060_s12 + $0x1f8] sm:$0xff] }
 0x8aa   :  { %2360 = vmatpush.msra.mxu2 %v6451_v9  ;;  %2447 = vmatpush.msrb.mxu0 %v6485_v10 }
 0x8ab   :  { %v7286_v53 = vpop.eup %7285  ;;  %v2257_v60 = vmul.f32 1.442695, %v2254_v24  ;;  %v6493_v24 = vld [vmem:[%s14060_s12 + $0x238] sm:$0xff] }
 0x8ac   :  { %v2259_v28 = vsel %vm1923_vm11, %v7286_v53, 0.0  ;;  %2361 = vmatpush.msra.mxu2 %v6449_v29 }
 0x8ad   :  { %7287 = vpow2.f32 %v2257_v60  ;;  %2260 = vadd.xlane.f32.xlu1 %v2259_v28  ;;  %v6492_v60 = vld [vmem:[%s14060_s12 + $0x230] sm:$0xff]  ;;  %v6483_v28 = vld [vmem:[%s14060_s12 + $0x1e8] sm:$0xff] }
 0x8ae   :  { %2362 = vmatpush.msra.mxu2 %v6447_v55 }
 0x8b0   :  { %2478 = vmatpush.msrb.mxu2 %v6493_v24 }
 0x8b2   :  { %2479 = vmatpush.msrb.mxu2 %v6492_v60 }
 0x8b3   :  { %v7288_v4 = vpop.eup %7287 }
 0x8b4   :  { %v2262_v7 = vsel %vm1927_vm12, %v7288_v4, 0.0 }
 0x8b5   :  { %2263 = vadd.xlane.f32.xlu2 %v2262_v7  ;;  %v6482_v7 = vld [vmem:[%s14060_s12 + $0x1e0] sm:$0xff] }
 0x920   :  { %v2261_v23 = vpop.xlane.xlu1 %2260 }
 0x921   :  { %7289 = vrcp.f32 %v2261_v23  ;;  %v6486_v23 = vld [vmem:[%s14060_s12 + $0x200] sm:$0xff] }
 0x927   :  { %v7290_v6 = vpop.eup %7289 }
 0x928   :  { %v2267_v48 = vmul.f32 %v7290_v6, %v7286_v53  ;;  %v2264_v57 = vpop.xlane.xlu2 %2263  ;;  %v6484_v53 = vld [vmem:[%s14060_s12 + $0x1f0] sm:$0xff]  ;;  %v6477_v6 = vld [vmem:[%s14060_s12 + $0x1b8] sm:$0xff] }
 0x929   :  { %7291 = vrcp.f32 %v2264_v57  ;;  %2448 = vmatpush.msrb.mxu0 %v6484_v53  ;;  %v6475_v57 = vld [vmem:[%s14060_s12 + $0x1a8] sm:$0xff] }
 0x92a   :  { %6444 = vmatmul.msk.f32.vlgmr.msrb.gmra.mxu3 %vm1923_vm11, %v2267_v48  ;;  %v6476_v48 = vld [vmem:[%s14060_s12 + $0x1b0] sm:$0xff] }
 0x92b   :  { %2549 = vmatpush.msrb.mxu3 %v6519_v50  ;;  %2449 = vmatpush.msrb.mxu0 %v6483_v28  ;;  %v6474_v50 = vld [vmem:[%s14060_s12 + $0x1a0] sm:$0xff] }
 0x92d   :  { %2550 = vmatpush.msrb.mxu3 %v6518_v0  ;;  %2450 = vmatpush.msrb.mxu0 %v6482_v7  ;;  %v6473_v0 = vld [vmem:[%s14060_s12 + $0x198] sm:$0xff] }
 0x92f   :  { %v7292_v30 = vpop.eup %7291  ;;  %2551 = vmatpush.msrb.mxu3 %v6517_v38  ;;  %2451 = vmatpush.msrb.mxu0 %v6481_v63  ;;  %v6472_v38 = vld [vmem:[%s14060_s12 + $0x190] sm:$0xff] }
 0x930   :  { %v2268_v32 = vmul.f32 %v7292_v30, %v7288_v4  ;;  %v6491_v4 = vld [vmem:[%s14060_s12 + $0x228] sm:$0xff]  ;;  %v6470_v30 = vld [vmem:[%s14060_s12 + $0x180] sm:$0xff] }
 0x931   :  { %2552 = vmatpush.msrb.mxu3 %v6516_v18  ;;  %2480 = vmatpush.msrb.mxu2 %v6491_v4  ;;  %v6471_v18 = vld [vmem:[%s14060_s12 + $0x188] sm:$0xff] }
 0x932   :  { %6445 = vmatmul.msk.f32.gmra.mxu3 %vm1923_vm11, %v2268_v32  ;;  %2452 = vmatpush.msrb.mxu0 %v6480_v27  ;;  %v6537_v32 = vld [vmem:[%s14062_s14 + $0x1f8] sm:$0xff] }
 0x933   :  { %2553 = vmatpush.msrb.mxu3 %v6515_v3  ;;  %2481 = vmatpush.msrb.mxu2 %v6490_v5 }
 0x934   :  { %2453 = vmatpush.msrb.mxu0 %v6479_v59 }
 0x935   :  { %2554 = vmatpush.msrb.mxu3 %v6514_v17  ;;  %2482 = vmatpush.msrb.mxu2 %v6489_v56  ;;  %v6536_v17 = vld [vmem:[%s14062_s14 + $0x1f0] sm:$0xff] }
 0x936   :  { %2454 = vmatpush.msrb.mxu0 %v6478_v42 }
 0x937   :  { %2555 = vmatpush.msrb.mxu3 %v6513_v35  ;;  %2483 = vmatpush.msrb.mxu2 %v6488_v2  ;;  %v6535_v35 = vld [vmem:[%s14062_s14 + $0x1e8] sm:$0xff] }
 0x938   :  { %2455 = vmatpush.msrb.mxu0 %v6477_v6 }
 0x939   :  { %2556 = vmatpush.msrb.mxu3 %v6512_v19  ;;  %2484 = vmatpush.msrb.mxu2 %v6487_v62  ;;  %v6534_v19 = vld [vmem:[%s14062_s14 + $0x1e0] sm:$0xff] }
 0x93a   :  { %6468 = vmatmul.msk.f32.vlgmr.msra.gmra.mxu3 %vm125_vm0, %v10119_v46  ;;  %v6540_v46 = vld [vmem:[%s14062_s14 + $0x210] sm:$0xff]  ;;  %2456 = vmatpush.msrb.mxu0 %v6476_v48 }
 0x93b   :  { %2620 = vmatpush.msra.mxu3 %v6545_v37  ;;  %2485 = vmatpush.msrb.mxu2 %v6486_v23  ;;  %v6533_v37 = vld [vmem:[%s14062_s14 + $0x1d8] sm:$0xff] }
 0x93c   :  { %2457 = vmatpush.msrb.mxu0 %v6475_v57 }
 0x93d   :  { %2621 = vmatpush.msra.mxu3 %v6544_v40 }
 0x93e   :  { %2458 = vmatpush.msrb.mxu0 %v6474_v50 }
 0x93f   :  { %2622 = vmatpush.msra.mxu3 %v6543_v36  ;;  %v6532_v36 = vld [vmem:[%s14062_s14 + $0x1d0] sm:$0xff] }
 0x940   :  { %2459 = vmatpush.msrb.mxu0 %v6473_v0 }
 0x941   :  { %2623 = vmatpush.msra.mxu3 %v6542_v31  ;;  %v10368_v31 = vpop.f32.mrf.mxu1 }
 0x942   :  { %6469 = vmatmul.msk.f32.gmra.mxu3 %vm125_vm0, %v10123_v47  ;;  %v6539_v47 = vld [vmem:[%s14062_s14 + $0x208] sm:$0xff]  ;;  %2460 = vmatpush.msrb.mxu0 %v6472_v38 }
 0x943   :  { %2624 = vmatpush.msra.mxu3 %v6541_v15  ;;  %v6531_v15 = vld [vmem:[%s14062_s14 + $0x1c8] sm:$0xff] }
 0x944   :  { %2461 = vmatpush.msrb.mxu0 %v6471_v18 }
 0x945   :  { %2625 = vmatpush.msra.mxu3 %v6540_v46  ;;  %v6530_v46 = vld [vmem:[%s14062_s14 + $0x1c0] sm:$0xff] }
 0x946   :  { %2462 = vmatpush.msrb.mxu0 %v6470_v30 }
 0x947   :  { %2626 = vmatpush.msra.mxu3 %v6539_v47 }
 0x949   :  { %2627 = vmatpush.msra.mxu3 %v6538_v20  ;;  %v10390_v47 = vpop.f32.mrf.mxu1  ;;  %v6524_v20 = vld [vmem:[%s14062_s14 + $0x190] sm:$0xff] }
 0x94a   :  { %6520 = vmatmul.msk.f32.vlgmr.msrb.gmra.mxu3 %vm125_vm0, %v9764_v45 }
 0x951   :  { %v2535_v39 = vpop.f32.mrf.mxu1 }
 0x952   :  { %6521 = vmatmul.msk.f32.gmra.mxu3 %vm125_vm0, %v9800_v12 }
 0x95a   :  { %6546 = vmatmul.msk.f32.vlgmr.msra.gmra.mxu3 %vm125_vm0, %v9764_v45 }
 0x962   :  { %6547 = vmatmul.msk.f32.gmra.mxu3 %vm125_vm0, %v9800_v12 }
 0x9ad   :  { %v2295_v3 = vpop.f32.mrf.mxu3 }
 0x9ae   :  { %6462 = vmatmul.msk.f32.vlgmr.msra.gmra.mxu0 %vm125_vm0, %v2295_v3  ;;  %6464 = vmatmul.msk.f32.vlgmr.msra.gmra.mxu2 %vm125_vm0, %v2295_v3 }
 0x9af   :  { %2589 = vmatpush.msra.mxu2 %v6537_v32 }
 0x9b1   :  { %2590 = vmatpush.msra.mxu2 %v6536_v17 }
 0x9b3   :  { %2591 = vmatpush.msra.mxu2 %v6535_v35 }
 0x9b5   :  { %v2298_v40 = vpop.f32.mrf.mxu3  ;;  %2592 = vmatpush.msra.mxu2 %v6534_v19  ;;  %v6570_v19 = vld [vmem:[%s14063_s15 + $0x178] sm:$0xff] }
 0x9b6   :  { %6463 = vmatmul.msk.f32.gmra.mxu0 %vm125_vm0, %v2298_v40  ;;  %6465 = vmatmul.msk.f32.gmra.mxu2 %vm125_vm0, %v2298_v40  ;;  %v6568_v40 = vld [vmem:[%s14063_s15 + $0x168] sm:$0xff] }
 0x9b7   :  { %2593 = vmatpush.msra.mxu2 %v6533_v37  ;;  %v6567_v37 = vld [vmem:[%s14063_s15 + $0x160] sm:$0xff] }
 0x9b9   :  { %2594 = vmatpush.msra.mxu2 %v6532_v36  ;;  %v6565_v36 = vld [vmem:[%s14063_s15 + $0x150] sm:$0xff] }
 0x9bb   :  { %2595 = vmatpush.msra.mxu2 %v6531_v15  ;;  %v6566_v15 = vld [vmem:[%s14063_s15 + $0x158] sm:$0xff] }
 0x9bd   :  { %v10379_v44 = vpop.f32.mrf.mxu3  ;;  %2596 = vmatpush.msra.mxu2 %v6530_v46  ;;  %v6563_v46 = vld [vmem:[%s14063_s15 + $0x140] sm:$0xff] }
 0x9be   :  { %2463 = vmatmul.f32.vlgmr.msrb.gmra.mxu0 %v9762_v43  ;;  %6494 = vmatmul.msk.f32.vlgmr.msrb.gmra.mxu2 %vm125_vm0, %v9764_v45  ;;  %v6525_v45 = vld [vmem:[%s14062_s14 + $0x198] sm:$0xff] }
 0x9bf   :  { %2597 = vmatpush.msra.mxu2 %v6529_v41  ;;  %v6564_v41 = vld [vmem:[%s14063_s15 + $0x148] sm:$0xff] }
 0x9c1   :  { %2598 = vmatpush.msra.mxu2 %v6528_v26  ;;  %v6561_v26 = vld [vmem:[%s14063_s15 + $0x130] sm:$0xff] }
 0x9c3   :  { %2599 = vmatpush.msra.mxu2 %v6527_v34  ;;  %v6562_v34 = vld [vmem:[%s14063_s15 + $0x138] sm:$0xff] }
 0x9c5   :  { %v10398_v61 = vpop.f32.mrf.mxu3  ;;  %2600 = vmatpush.msra.mxu2 %v6526_v49  ;;  %v6559_v49 = vld [vmem:[%s14063_s15 + $0x120] sm:$0xff] }
 0x9c6   :  { %2466 = vmatmul.f32.gmra.mxu0 %v9798_v21  ;;  %6495 = vmatmul.msk.f32.gmra.mxu2 %vm125_vm0, %v9800_v12  ;;  %v2538_v12 = vpop.f32.mrf.mxu1 }
 0x9c7   :  { %2601 = vmatpush.msra.mxu2 %v6525_v45  ;;  %v6560_v45 = vld [vmem:[%s14063_s15 + $0x128] sm:$0xff] }
 0x9c9   :  { %2602 = vmatpush.msra.mxu2 %v6524_v20  ;;  %v6557_v20 = vld [vmem:[%s14063_s15 + $0x110] sm:$0xff] }
 0x9cb   :  { %2603 = vmatpush.msra.mxu2 %v6523_v22  ;;  %v6558_v22 = vld [vmem:[%s14063_s15 + $0x118] sm:$0xff] }
 0x9cd   :  { %v2558_v14 = vpop.f32.mrf.mxu3  ;;  %2604 = vmatpush.msra.mxu2 %v6522_v51 }
 0x9ce   :  { %2605 = vmatmul.f32.vlgmr.msra.gmra.mxu2 %v9762_v43  ;;  %v2559_v54 = vadd.f32 %v2558_v14, %v2535_v39 }
 0x9d5   :  { %v2561_v52 = vpop.f32.mrf.mxu3 }
 0x9d6   :  { %v2562_v9 = vadd.f32 %v2561_v52, %v2538_v12  ;;  %2608 = vmatmul.f32.gmra.mxu2 %v9798_v21 }
 0x9d8   :  { %6548 = vmatpush.xpose.msk.msra.mxu0 %vm125_vm0, %v2562_v9 }
 0x9dc   :  { %6549 = vmatpush.xpose.msk.msra.mxu0 %vm125_vm0, %v2559_v54  ;;  %v6555_v54 = vld [vmem:[%s14063_s15 + $0x100] sm:$0xff] }
 0x9dd   :  { %v2629_v4 = vpop.f32.mrf.mxu3 }
 0x9e0   :  { %2782 = vmatpush.msrb.mxu0 %v6570_v19  ;;  %v2939_v19 = vld [vmem:[%s14066_s18 + $0x1e0] sm:$0xff] }
 0x9e2   :  { %2783 = vmatpush.msrb.mxu0 %v6568_v40  ;;  %v2933_v40 = vld [vmem:[%s14066_s18 + $0x1b0] sm:$0xff] }
 0x9e4   :  { %2784 = vmatpush.msrb.mxu0 %v6566_v15  ;;  %v2927_v15 = vld [vmem:[%s14066_s18 + $0x180] sm:$0xff] }
 0x9e5   :  { %v2632_v5 = vpop.f32.mrf.mxu3 }
 0x9e6   :  { %2785 = vmatpush.msrb.mxu0 %v6564_v41 }
 0x9e8   :  { %2786 = vmatpush.msrb.mxu0 %v6562_v34  ;;  %v2921_v34 = vld [vmem:[%s14066_s18 + $0x150] sm:$0xff] }
 0x9ea   :  { %2787 = vmatpush.msrb.mxu0 %v6560_v45 }
 0x9ec   :  { %2788 = vmatpush.msrb.mxu0 %v6558_v22 }
 0xa2b   :  { %v10416_v29 = vpop.f32.mrf.mxu0 }
 0xa31   :  { %v10418_v8 = vpop.f32.mrf.mxu2 }
 0xa33   :  { %v10420_v55 = vpop.f32.mrf.mxu0 }
 0xa39   :  { %v10422_v10 = vpop.f32.mrf.mxu2 }
 0xa3b   :  { %v2464_v24 = vpop.f32.mrf.mxu0 }
 0xa41   :  { %v2487_v43 = vpop.f32.mrf.mxu2 }
 0xa42   :  { %v2488_v53 = vadd.f32 %v2487_v43, %v2464_v24  ;;  %v6556_v24 = vld [vmem:[%s14063_s15 + $0x108] sm:$0xff] }
 0xa43   :  { %v2467_v60 = vpop.f32.mrf.mxu0  ;;  %2789 = vmatpush.msrb.mxu0 %v6556_v24 }
 0xa44   :  { %6550 = vmatmul.msk.f32.vlgmr.msra.gmra.mxu0 %vm125_vm0, %v2488_v53 }
 0xa49   :  { %v2490_v21 = vpop.f32.mrf.mxu2 }
 0xa4a   :  { %v2491_v28 = vadd.f32 %v2490_v21, %v2467_v60  ;;  %v2417_v60 = vadd.f32 %v10379_v44, %v10418_v8  ;;  %v10503_v44 = vld [vmem:[%s14064_s16] sm:$0x3f] }
 0xa4c   :  { %6551 = vmatmul.msk.f32.gmra.mxu0 %vm125_vm0, %v2491_v28 }
 0xa51   :  { %v2606_v7 = vpop.f32.mrf.mxu2 }
 0xa52   :  { %v2630_v27 = vadd.f32 %v2629_v4, %v2606_v7  ;;  %v10493_v7 = vld [vmem:[%s14064_s16 + $0x8] sm:$0x3f] }
 0xa59   :  { %v2609_v63 = vpop.f32.mrf.mxu2 }
 0xa5a   :  { %v2633_v56 = vadd.f32 %v2632_v5, %v2609_v63  ;;  %v2806_v5 = vperm.slane %v10493_v7, 2  ;;  %v2394_v63 = vadd.f32 %v10368_v31, %v10416_v29 }
 0xa5c   :  { %6552 = vmatpush.msk.msra.mxu1 %vm1595_vm2, %v2633_v56 }
 0xa5e   :  { %2720 = vmatpush.msra.mxu1 %v2630_v27  ;;  %v2420_v27 = vadd.f32 %v10398_v61, %v10422_v10  ;;  %v2397_v61 = vadd.f32 %v10390_v47, %v10420_v55  ;;  %v2970_v55 = vld [vmem:[%s14066_s18 + $0x2d8] sm:$0xff] }
 0xac1   :  { %v2664_v2 = vpop.f32.mrf.mxu0 }
 0xac2   :  { %v2670_v59 = vmul.f32 0.125, %v2664_v2 }
 0xac4   :  { %v2672_v62 = vadd.f32 %v2670_v59, %v9976_v58 }
 0xac6   :  { %v2674_v42 = vsel %vm1923_vm11, %v2672_v62, -inf }
 0xac7   :  { %2675 = vmax.xlane.f32.xlu0 %v2674_v42 }
 0xac9   :  { %v2667_v23 = vpop.f32.mrf.mxu0 }
 0xaca   :  { %v2671_v6 = vmul.f32 0.125, %v2667_v23 }
 0xacc   :  { %v2673_v48 = vadd.f32 %v2671_v6, %v9983_v25  ;;  %v6569_v25 = vld [vmem:[%s14063_s15 + $0x170] sm:$0xff] }
 0xacd   :  { %2759 = vmatpush.msrb.mxu3 %v6569_v25  ;;  %v2946_v25 = vld [vmem:[%s14066_s18 + $0x218] sm:$0xff] }
 0xace   :  { %v2677_v57 = vsel %vm1927_vm12, %v2673_v48, -inf }
 0xacf   :  { %2678 = vmax.xlane.f32.xlu1 %v2677_v57  ;;  %2760 = vmatpush.msrb.mxu3 %v6567_v37  ;;  %v2940_v37 = vld [vmem:[%s14066_s18 + $0x1e8] sm:$0xff] }
 0xad1   :  { %2761 = vmatpush.msrb.mxu3 %v6565_v36  ;;  %v2934_v36 = vld [vmem:[%s14066_s18 + $0x1b8] sm:$0xff] }
 0xad3   :  { %2762 = vmatpush.msrb.mxu3 %v6563_v46  ;;  %v2928_v46 = vld [vmem:[%s14066_s18 + $0x188] sm:$0xff] }
 0xad5   :  { %2763 = vmatpush.msrb.mxu3 %v6561_v26 }
 0xad7   :  { %2764 = vmatpush.msrb.mxu3 %v6559_v49 }
 0xad9   :  { %2765 = vmatpush.msrb.mxu3 %v6557_v20 }
 0xadb   :  { %2766 = vmatpush.msrb.mxu3 %v6555_v54 }
 0xadd   :  { %3089 = vmatpush.msra.mxu3 %v2970_v55  ;;  %v2981_v55 = vld [vmem:[%s14066_s18 + $0x330] sm:$0xff] }
 0xb3a   :  { %v2676_v50 = vpop.xlane.xlu0 %2675 }
 0xb3b   :  { %v2680_v0 = vsub.f32 %v2672_v62, %v2676_v50 }
 0xb3d   :  { %v2682_v38 = vmul.f32 1.442695, %v2680_v0 }
 0xb3f   :  { %7293 = vpow2.f32 %v2682_v38 }
 0xb42   :  { %v2679_v18 = vpop.xlane.xlu1 %2678 }
 0xb43   :  { %v2681_v30 = vsub.f32 %v2673_v48, %v2679_v18  ;;  %v2964_v18 = vld [vmem:[%s14066_s18 + $0x2a8] sm:$0xff] }
 0xb44   :  { %3090 = vmatpush.msra.mxu3 %v2964_v18  ;;  %v2982_v18 = vld [vmem:[%s14066_s18 + $0x338] sm:$0xff] }
 0xb45   :  { %v7294_v32 = vpop.eup %7293  ;;  %v2684_v3 = vmul.f32 1.442695, %v2681_v30  ;;  %v2957_v30 = vld [vmem:[%s14066_s18 + $0x270] sm:$0xff] }
 0xb46   :  { %v2686_v58 = vsel %vm1923_vm11, %v7294_v32, 0.0 }
 0xb47   :  { %7295 = vpow2.f32 %v2684_v3  ;;  %2687 = vadd.xlane.f32.xlu2 %v2686_v58  ;;  %v2951_v3 = vld [vmem:[%s14066_s18 + $0x240] sm:$0xff]  ;;  %v2952_v58 = vld [vmem:[%s14066_s18 + $0x248] sm:$0xff] }
 0xb4d   :  { %v7296_v17 = vpop.eup %7295 }
 0xb4e   :  { %v2689_v35 = vsel %vm1927_vm12, %v7296_v17, 0.0 }
 0xb4f   :  { %2690 = vadd.xlane.f32.xlu0 %v2689_v35  ;;  %v2945_v35 = vld [vmem:[%s14066_s18 + $0x210] sm:$0xff] }
 0xbba   :  { %v2688_v51 = vpop.xlane.xlu2 %2687 }
 0xbbb   :  { %7297 = vrcp.f32 %v2688_v51 }
 0xbc1   :  { %v7298_v39 = vpop.eup %7297 }
 0xbc2   :  { %v2694_v14 = vmul.f32 %v7298_v39, %v7294_v32  ;;  %v2691_v12 = vpop.xlane.xlu0 %2690  ;;  %v2958_v32 = vld [vmem:[%s14066_s18 + $0x278] sm:$0xff] }
 0xbc3   :  { %7299 = vrcp.f32 %v2691_v12  ;;  %3091 = vmatpush.msra.mxu3 %v2958_v32  ;;  %v2975_v32 = vld [vmem:[%s14066_s18 + $0x300] sm:$0xff] }
 0xbc4   :  { %6553 = vmatmul.msk.f32.vlgmr.msra.gmra.mxu1 %vm1923_vm11, %v2694_v14 }
 0xbc5   :  { %3092 = vmatpush.msra.mxu3 %v2952_v58  ;;  %v2976_v58 = vld [vmem:[%s14066_s18 + $0x308] sm:$0xff] }
 0xbc7   :  { %3093 = vmatpush.msra.mxu3 %v2946_v25  ;;  %v3019_v25 = vld [vmem:[%s14066_s18 + $0x460] sm:$0xff] }
 0xbc9   :  { %v7300_v52 = vpop.eup %7299  ;;  %3094 = vmatpush.msra.mxu3 %v2940_v37  ;;  %v2965_v37 = vld [vmem:[%s14066_s18 + $0x2b0] sm:$0xff] }
 0xbca   :  { %v2695_v9 = vmul.f32 %v7300_v52, %v7296_v17  ;;  %v3017_v17 = vld [vmem:[%s14066_s18 + $0x450] sm:$0xff] }
 0xbcb   :  { %3074 = vmatpush.msrb.mxu1 %v3017_v17  ;;  %3095 = vmatpush.msra.mxu3 %v2934_v36  ;;  %v2971_v17 = vld [vmem:[%s14066_s18 + $0x2e0] sm:$0xff]  ;;  %v3013_v36 = vld [vmem:[%s14066_s18 + $0x430] sm:$0xff] }
 0xbcc   :  { %6554 = vmatmul.msk.f32.gmra.mxu1 %vm1923_vm11, %v2695_v9 }
 0xbcd   :  { %3096 = vmatpush.msra.mxu3 %v2928_v46  ;;  %v2959_v46 = vld [vmem:[%s14066_s18 + $0x280] sm:$0xff] }
 0xc41   :  { %v2722_v43 = vpop.f32.mrf.mxu1 }
 0xc42   :  { %6571 = vmatmul.msk.f32.vlgmr.msrb.gmra.mxu3 %vm125_vm0, %v2722_v43  ;;  %6573 = vmatmul.msk.f32.vlgmr.msrb.gmra.mxu0 %vm125_vm0, %v2722_v43 }
 0xc49   :  { %v2725_v53 = vpop.f32.mrf.mxu1 }
 0xc4a   :  { %6572 = vmatmul.msk.f32.gmra.mxu3 %vm125_vm0, %v2725_v53  ;;  %6574 = vmatmul.msk.f32.gmra.mxu0 %vm125_vm0, %v2725_v53 }
 0xcbf   :  { %v2791_v21 = vpop.f32.mrf.mxu0 }
 0xcc0   :  { %v2798_v28 = vadd.f32 %v2791_v21, %v2417_v60  ;;  %v2922_v21 = vld [vmem:[%s14066_s18 + $0x158] sm:$0xff] }
 0xcc1   :  { %3097 = vmatpush.msra.mxu3 %v2922_v21  ;;  %v2990_v21 = vld [vmem:[%s14066_s18 + $0x378] sm:$0xff] }
 0xcc2   :  { %v2802_v4 = vadd.f32 %v2798_v28, %v9494_v11  ;;  %v2805_v11 = vperm.slane %v10503_v44, 2  ;;  %v3018_v28 = vld [vmem:[%s14066_s18 + $0x458] sm:$0xff] }
 0xcc3   :  { %3120 = vmatpush.msra.mxu0 %v3018_v28  ;;  %v2935_v28 = vld [vmem:[%s14066_s18 + $0x1c0] sm:$0xff] }
 0xcc4   :  { %v10506_v8 = vadd.f32 %v2806_v5, %v2802_v4  ;;  %v2915_v4 = vld [vmem:[%s14066_s18 + $0x120] sm:$0xff] }
 0xcc5   :  { %v2768_v56 = vpop.f32.mrf.mxu3 }
 0xcc6   :  { %v2797_v2 = vadd.f32 %v2768_v56, %v2394_v63  ;;  %v2811_v31 = vsel %vm125_vm0, %v10506_v8, 0.0  ;;  %v2916_v63 = vld [vmem:[%s14066_s18 + $0x128] sm:$0xff] }
 0xcc7   :  { %v2794_v59 = vpop.f32.mrf.mxu0  ;;  %v3012_v56 = vld [vmem:[%s14066_s18 + $0x428] sm:$0xff]  ;;  %3098 = vmatpush.msra.mxu3 %v2916_v63 }
 0xcc8   :  { %v2801_v62 = vadd.f32 %v2797_v2, %v9496_v1  ;;  %v2800_v42 = vadd.f32 %v2794_v59, %v2420_v27  ;;  %3121 = vmatpush.msra.mxu0 %v3012_v56  ;;  %v2909_v27 = vld [vmem:[%s14066_s18 + $0xf0] sm:$0xff]  ;;  %v3006_v59 = vld [vmem:[%s14066_s18 + $0x3f8] sm:$0xff]  ;;  %v2984_v63 = vld [vmem:[%s14066_s18 + $0x348] sm:$0xff] }
 0xcc9   :  { %v3005_v2 = vld [vmem:[%s14066_s18 + $0x3f0] sm:$0xff] }
 0xcca   :  { %v10509_v23 = vadd.f32 %v2805_v11, %v2801_v62  ;;  %v2804_v29 = vadd.f32 %v2800_v42, %v9503_v16  ;;  %v2969_v16 = vld [vmem:[%s14066_s18 + $0x2d0] sm:$0xff]  ;;  %3122 = vmatpush.msra.mxu0 %v3006_v59  ;;  %v2903_v62 = vld [vmem:[%s14066_s18 + $0xc0] sm:$0xff] }
 0xccb   :  { %3043 = vmatpush.msrb.mxu2 %v2969_v16  ;;  %v2999_v42 = vld [vmem:[%s14066_s18 + $0x3c0] sm:$0xff]  ;;  %v2885_v16 = vld [vmem:[%s14066_s18 + $0x30] sm:$0xff] }
 0xccc   :  { %v2812_v10 = vadd.f32 %v2811_v31, %v10509_v23  ;;  %v10517_v57 = vadd.f32 %v2806_v5, %v2804_v29  ;;  %v3011_v5 = vld [vmem:[%s14066_s18 + $0x420] sm:$0xff]  ;;  %v2904_v31 = vld [vmem:[%s14066_s18 + $0xc8] sm:$0xff]  ;;  %v2897_v29 = vld [vmem:[%s14066_s18 + $0x90] sm:$0xff] }
 0xccd   :  { %v2771_v6 = vpop.f32.mrf.mxu3  ;;  %3075 = vmatpush.msrb.mxu1 %v3011_v5  ;;  %v2983_v5 = vld [vmem:[%s14066_s18 + $0x340] sm:$0xff]  ;;  %v2929_v56 = vld [vmem:[%s14066_s18 + $0x190] sm:$0xff] }
 0xcce   :  { %v2799_v48 = vadd.f32 %v2771_v6, %v2397_v61  ;;  %2813 = vadd.xlane.f32.xlu1 %v2812_v10  ;;  %v2816_v38 = vsel %vm1597_vm3, %v10517_v57, 0.0  ;;  %v3000_v61 = vld [vmem:[%s14066_s18 + $0x3c8] sm:$0xff]  ;;  %v2993_v10 = vld [vmem:[%s14066_s18 + $0x390] sm:$0xff]  ;;  %v2898_v6 = vld [vmem:[%s14066_s18 + $0x98] sm:$0xff] }
 0xccf   :  { %3076 = vmatpush.msrb.mxu1 %v3005_v2  ;;  %3123 = vmatpush.msra.mxu0 %v3000_v61  ;;  %v2977_v2 = vld [vmem:[%s14066_s18 + $0x310] sm:$0xff]  ;;  %v2923_v59 = vld [vmem:[%s14066_s18 + $0x160] sm:$0xff] }
 0xcd0   :  { %v2803_v1 = vadd.f32 %v2799_v48, %v9501_v33  ;;  %v2963_v33 = vld [vmem:[%s14066_s18 + $0x2a0] sm:$0xff]  ;;  %v2994_v48 = vld [vmem:[%s14066_s18 + $0x398] sm:$0xff]  ;;  %v2917_v61 = vld [vmem:[%s14066_s18 + $0x130] sm:$0xff] }
 0xcd1   :  { %3044 = vmatpush.msrb.mxu2 %v2963_v33  ;;  %3077 = vmatpush.msrb.mxu1 %v2999_v42  ;;  %v2886_v33 = vld [vmem:[%s14066_s18 + $0x38] sm:$0xff] }
 0xcd2   :  { %v10520_v50 = vadd.f32 %v2805_v11, %v2803_v1  ;;  %v2910_v11 = vld [vmem:[%s14066_s18 + $0xf8] sm:$0xff]  ;;  %3124 = vmatpush.msra.mxu0 %v2994_v48  ;;  %v2891_v1 = vld [vmem:[%s14066_s18 + $0x60] sm:$0xff]  ;;  %v2912_v48 = vld [vmem:[%s14066_s18 + $0x108] sm:$0xff] }
 0xcd3   :  { %3045 = vmatpush.msrb.mxu2 %v2957_v30  ;;  %3099 = vmatpush.msra.mxu3 %v2910_v11  ;;  %v2879_v30 = vld [vmem:[%s14066_s18] sm:$0xff]  ;;  %v2978_v11 = vld [vmem:[%s14066_s18 + $0x318] sm:$0xff] }
 0xcd4   :  { %v2815_v0 = vsel %vm1595_vm2, %v10520_v50, 0.0  ;;  %3078 = vmatpush.msrb.mxu1 %v2993_v10 }
 0xcd5   :  { %v2817_v47 = vadd.f32 %v2816_v38, %v2815_v0  ;;  %3046 = vmatpush.msrb.mxu2 %v2951_v3  ;;  %3100 = vmatpush.msra.mxu3 %v2904_v31  ;;  %v2987_v0 = vld [vmem:[%s14066_s18 + $0x360] sm:$0xff]  ;;  %v2892_v38 = vld [vmem:[%s14066_s18 + $0x68] sm:$0xff] }
 0xcd6   :  { %3079 = vmatpush.msrb.mxu1 %v2987_v0  ;;  %v2880_v3 = vld [vmem:[%s14066_s18 + $0x8] sm:$0xff]  ;;  %v2906_v0 = vld [vmem:[%s14066_s18 + $0xd8] sm:$0xff] }
 0xcd7   :  { %2818 = vadd.xlane.f32.xlu2 %v2817_v47  ;;  %3047 = vmatpush.msrb.mxu2 %v2945_v35  ;;  %v2988_v47 = vld [vmem:[%s14066_s18 + $0x368] sm:$0xff] }
 0xcd8   :  { %3101 = vmatpush.msra.mxu3 %v2898_v6  ;;  %3125 = vmatpush.msra.mxu0 %v2988_v47  ;;  %v2972_v35 = vld [vmem:[%s14066_s18 + $0x2e8] sm:$0xff]  ;;  %v2911_v6 = vld [vmem:[%s14066_s18 + $0x100] sm:$0xff] }
 0xcd9   :  { %3048 = vmatpush.msrb.mxu2 %v2939_v19  ;;  %3080 = vmatpush.msrb.mxu1 %v2981_v55  ;;  %v3020_v19 = vld [vmem:[%s14066_s18 + $0x468] sm:$0xff]  ;;  %v2894_v55 = vld [vmem:[%s14066_s18 + $0x78] sm:$0xff] }
 0xcda   :  { %3102 = vmatpush.msra.mxu3 %v2892_v38  ;;  %3126 = vmatpush.msra.mxu0 %v2982_v18  ;;  %v2899_v38 = vld [vmem:[%s14066_s18 + $0xa0] sm:$0xff]  ;;  %v2900_v47 = vld [vmem:[%s14066_s18 + $0xa8] sm:$0xff] }
 0xcdb   :  { %3049 = vmatpush.msrb.mxu2 %v2933_v40  ;;  %3081 = vmatpush.msrb.mxu1 %v2975_v32  ;;  %v2966_v40 = vld [vmem:[%s14066_s18 + $0x2b8] sm:$0xff]  ;;  %v2888_v32 = vld [vmem:[%s14066_s18 + $0x48] sm:$0xff] }
 0xcdc   :  { %3103 = vmatpush.msra.mxu3 %v2886_v33  ;;  %3127 = vmatpush.msra.mxu0 %v2976_v58 }
 0xcdd   :  { %3050 = vmatpush.msrb.mxu2 %v2927_v15  ;;  %3135 = vmatpush.msra.mxu1 %v2971_v17  ;;  %v3014_v15 = vld [vmem:[%s14066_s18 + $0x438] sm:$0xff] }
 0xcde   :  { %3104 = vmatpush.msra.mxu3 %v2880_v3  ;;  %3166 = vmatpush.msrb.mxu0 %v3019_v25  ;;  %v2882_v25 = vld [vmem:[%s14066_s18 + $0x18] sm:$0xff] }
 0xcdf   :  { %3051 = vmatpush.msrb.mxu2 %v2921_v34  ;;  %3136 = vmatpush.msra.mxu1 %v2965_v37  ;;  %v3008_v34 = vld [vmem:[%s14066_s18 + $0x408] sm:$0xff] }
 0xce0   :  { %3212 = vmatpush.msrb.mxu3 %v3020_v19  ;;  %3167 = vmatpush.msrb.mxu0 %v3013_v36 }
 0xce1   :  { %3052 = vmatpush.msrb.mxu2 %v2915_v4  ;;  %3137 = vmatpush.msra.mxu1 %v2959_v46  ;;  %v2936_v4 = vld [vmem:[%s14066_s18 + $0x1c8] sm:$0xff]  ;;  %v2867_v46 = vperm.slane %v10503_v44, 3 }
 0xce2   :  { %3213 = vmatpush.msrb.mxu3 %v3014_v15 }
 0xce3   :  { %3053 = vmatpush.msrb.mxu2 %v2909_v27  ;;  %v2930_v27 = vld [vmem:[%s14066_s18 + $0x198] sm:$0xff] }
 0xce4   :  { %3214 = vmatpush.msrb.mxu3 %v3008_v34  ;;  %v2873_v34 = vperm.slane %v10503_v44, 4  ;;  %v2973_v44 = vld [vmem:[%s14066_s18 + $0x2f0] sm:$0xff] }
 0xce5   :  { %3054 = vmatpush.msrb.mxu2 %v2903_v62  ;;  %v2924_v62 = vld [vmem:[%s14066_s18 + $0x168] sm:$0xff] }
 0xce7   :  { %3055 = vmatpush.msrb.mxu2 %v2897_v29  ;;  %v2918_v29 = vld [vmem:[%s14066_s18 + $0x138] sm:$0xff] }
 0xce9   :  { %3056 = vmatpush.msrb.mxu2 %v2891_v1  ;;  %v2905_v1 = vld [vmem:[%s14066_s18 + $0xd0] sm:$0xff] }
 0xceb   :  { %3057 = vmatpush.msrb.mxu2 %v2885_v16  ;;  %v2893_v16 = vld [vmem:[%s14066_s18 + $0x70] sm:$0xff] }
 0xced   :  { %3058 = vmatpush.msrb.mxu2 %v2879_v30  ;;  %v2887_v30 = vld [vmem:[%s14066_s18 + $0x40] sm:$0xff] }
 0xcef   :  { %3181 = vmatpush.msra.mxu2 %v2972_v35  ;;  %v2881_v35 = vld [vmem:[%s14066_s18 + $0x10] sm:$0xff] }
 0xcf1   :  { %3182 = vmatpush.msra.mxu2 %v2966_v40 }
 0xd41   :  { %v2814_v41 = vpop.xlane.xlu1 %2813 }
 0xd42   :  { %v2820_v26 = vmul.f32 %v2814_v41, %v9557_v13  ;;  %v2960_v41 = vld [vmem:[%s14066_s18 + $0x288] sm:$0xff] }
 0xd43   :  { %3183 = vmatpush.msra.mxu2 %v2960_v41  ;;  %v2868_v41 = vperm.slane %v10493_v7, 3 }
 0xd44   :  { %v10582_v49 = vsub.f32 %v10509_v23, %v2820_v26  ;;  %v10585_v45 = vsub.f32 %v10506_v8, %v2820_v26  ;;  %v3007_v26 = vld [vmem:[%s14066_s18 + $0x400] sm:$0xff] }
 0xd45   :  { %3168 = vmatpush.msrb.mxu0 %v3007_v26 }
 0xd46   :  { %v2826_v20 = vmul.f32 %v10582_v49, %v10582_v49  ;;  %v2827_v22 = vmul.f32 %v10585_v45, %v10585_v45 }
 0xd48   :  { %v2830_v51 = vsel %vm125_vm0, %v2827_v22, 0.0  ;;  %v2954_v22 = vld [vmem:[%s14066_s18 + $0x258] sm:$0xff] }
 0xd49   :  { %v2831_v39 = vadd.f32 %v2830_v51, %v2826_v20  ;;  %v2953_v20 = vld [vmem:[%s14066_s18 + $0x250] sm:$0xff]  ;;  %3184 = vmatpush.msra.mxu2 %v2954_v22  ;;  %v2874_v22 = vperm.slane %v10493_v7, 4  ;;  %v2974_v7 = vld [vmem:[%s14066_s18 + $0x2f8] sm:$0xff] }
 0xd4a   :  { %v2819_v14 = vpop.xlane.xlu2 %2818  ;;  %v3001_v51 = vld [vmem:[%s14066_s18 + $0x3d0] sm:$0xff]  ;;  %3138 = vmatpush.msra.mxu1 %v2953_v20 }
 0xd4b   :  { %v2821_v12 = vmul.f32 %v2819_v14, %v9557_v13  ;;  %2832 = vadd.xlane.f32.xlu0 %v2831_v39  ;;  %v3002_v39 = vld [vmem:[%s14066_s18 + $0x3d8] sm:$0xff]  ;;  %v2947_v14 = vld [vmem:[%s14066_s18 + $0x220] sm:$0xff]  ;;  %3169 = vmatpush.msrb.mxu0 %v3001_v51 }
 0xd4c   :  { %3215 = vmatpush.msrb.mxu3 %v3002_v39  ;;  %3139 = vmatpush.msra.mxu1 %v2947_v14 }
 0xd4d   :  { %v10594_v52 = vsub.f32 %v10520_v50, %v2821_v12  ;;  %v10597_v9 = vsub.f32 %v10517_v57, %v2821_v12  ;;  %v2948_v12 = vld [vmem:[%s14066_s18 + $0x228] sm:$0xff] }
 0xd4e   :  { %3185 = vmatpush.msra.mxu2 %v2948_v12 }
 0xd4f   :  { %v2828_v54 = vmul.f32 %v10594_v52, %v10594_v52  ;;  %v2829_v24 = vmul.f32 %v10597_v9, %v10597_v9 }
 0xd51   :  { %v2834_v43 = vsel %vm1595_vm2, %v2828_v54, 0.0  ;;  %v2835_v53 = vsel %vm1597_vm3, %v2829_v24, 0.0  ;;  %v2995_v54 = vld [vmem:[%s14066_s18 + $0x3a0] sm:$0xff]  ;;  %v2996_v24 = vld [vmem:[%s14066_s18 + $0x3a8] sm:$0xff] }
 0xd52   :  { %v2836_v60 = vadd.f32 %v2835_v53, %v2834_v43  ;;  %v2941_v43 = vld [vmem:[%s14066_s18 + $0x1f0] sm:$0xff]  ;;  %v2942_v53 = vld [vmem:[%s14066_s18 + $0x1f8] sm:$0xff]  ;;  %3170 = vmatpush.msrb.mxu0 %v2995_v54  ;;  %3216 = vmatpush.msrb.mxu3 %v2996_v24 }
 0xd53   :  { %3140 = vmatpush.msra.mxu1 %v2941_v43  ;;  %3186 = vmatpush.msra.mxu2 %v2942_v53 }
 0xd54   :  { %2837 = vadd.xlane.f32.xlu1 %v2836_v60  ;;  %v2989_v60 = vld [vmem:[%s14066_s18 + $0x370] sm:$0xff]  ;;  %3217 = vmatpush.msrb.mxu3 %v2990_v21  ;;  %v3022_v21 = vld [vmem:[%s14066_s18 + $0x478] sm:$0xff] }
 0xd55   :  { %3171 = vmatpush.msrb.mxu0 %v2989_v60  ;;  %3141 = vmatpush.msra.mxu1 %v2935_v28  ;;  %v2967_v28 = vld [vmem:[%s14066_s18 + $0x2c0] sm:$0xff] }
 0xd56   :  { %3187 = vmatpush.msra.mxu2 %v2936_v4  ;;  %3218 = vmatpush.msrb.mxu3 %v2984_v63  ;;  %v2968_v4 = vld [vmem:[%s14066_s18 + $0x2c8] sm:$0xff]  ;;  %v3015_v63 = vld [vmem:[%s14066_s18 + $0x440] sm:$0xff] }
 0xd57   :  { %3172 = vmatpush.msrb.mxu0 %v2983_v5  ;;  %3142 = vmatpush.msra.mxu1 %v2929_v56  ;;  %v3016_v56 = vld [vmem:[%s14066_s18 + $0x448] sm:$0xff] }
 0xd58   :  { %3188 = vmatpush.msra.mxu2 %v2930_v27  ;;  %3219 = vmatpush.msrb.mxu3 %v2978_v11  ;;  %v2961_v11 = vld [vmem:[%s14066_s18 + $0x290] sm:$0xff] }
 0xd59   :  { %3173 = vmatpush.msrb.mxu0 %v2977_v2  ;;  %3143 = vmatpush.msra.mxu1 %v2923_v59  ;;  %v2962_v59 = vld [vmem:[%s14066_s18 + $0x298] sm:$0xff] }
 0xd5a   :  { %3189 = vmatpush.msra.mxu2 %v2924_v62  ;;  %v3009_v62 = vld [vmem:[%s14066_s18 + $0x410] sm:$0xff] }
 0xd5b   :  { %3144 = vmatpush.msra.mxu1 %v2917_v61  ;;  %v2956_v61 = vld [vmem:[%s14066_s18 + $0x268] sm:$0xff] }
 0xd5c   :  { %3190 = vmatpush.msra.mxu2 %v2918_v29 }
 0xd5d   :  { %3145 = vmatpush.msra.mxu1 %v2911_v6  ;;  %v2949_v6 = vld [vmem:[%s14066_s18 + $0x230] sm:$0xff] }
 0xd5e   :  { %3191 = vmatpush.msra.mxu2 %v2912_v48  ;;  %v2950_v48 = vld [vmem:[%s14066_s18 + $0x238] sm:$0xff] }
 0xd5f   :  { %3146 = vmatpush.msra.mxu1 %v2905_v1  ;;  %v3003_v1 = vld [vmem:[%s14066_s18 + $0x3e0] sm:$0xff] }
 0xd60   :  { %3192 = vmatpush.msra.mxu2 %v2906_v0  ;;  %v3004_v0 = vld [vmem:[%s14066_s18 + $0x3e8] sm:$0xff] }
 0xd61   :  { %3147 = vmatpush.msra.mxu1 %v2899_v38  ;;  %v2943_v38 = vld [vmem:[%s14066_s18 + $0x200] sm:$0xff] }
 0xd62   :  { %3193 = vmatpush.msra.mxu2 %v2900_v47  ;;  %v2944_v47 = vld [vmem:[%s14066_s18 + $0x208] sm:$0xff] }
 0xd63   :  { %3148 = vmatpush.msra.mxu1 %v2893_v16  ;;  %v2997_v16 = vld [vmem:[%s14066_s18 + $0x3b0] sm:$0xff] }
 0xd64   :  { %3194 = vmatpush.msra.mxu2 %v2894_v55  ;;  %v2998_v55 = vld [vmem:[%s14066_s18 + $0x3b8] sm:$0xff] }
 0xd65   :  { %3149 = vmatpush.msra.mxu1 %v2887_v30  ;;  %v2991_v30 = vld [vmem:[%s14066_s18 + $0x380] sm:$0xff] }
 0xd66   :  { %3195 = vmatpush.msra.mxu2 %v2888_v32  ;;  %v2992_v32 = vld [vmem:[%s14066_s18 + $0x388] sm:$0xff] }
 0xd67   :  { %3150 = vmatpush.msra.mxu1 %v2881_v35  ;;  %v2926_v35 = vld [vmem:[%s14066_s18 + $0x178] sm:$0xff] }
 0xd68   :  { %3196 = vmatpush.msra.mxu2 %v2882_v25  ;;  %v2985_v25 = vld [vmem:[%s14066_s18 + $0x350] sm:$0xff] }
 0xdbe   :  { %v2833_v42 = vpop.xlane.xlu0 %2832 }
 0xdbf   :  { %v2839_v31 = vmul.f32 %v2833_v42, %v9557_v13 }
 0xdc1   :  { %v2841_v10 = vadd.f32 1e-05, %v2839_v31  ;;  %v2955_v31 = vld [vmem:[%s14066_s18 + $0x260] sm:$0xff] }
 0xdc3   :  { %7301 = vrsqrt.f32 %v2841_v10  ;;  %vm2849_vm14 = vweird.f32 %v2841_v10 }
 0xdc7   :  { %v2838_v33 = vpop.xlane.xlu1 %2837 }
 0xdc8   :  { %v2840_v18 = vmul.f32 %v2838_v33, %v9557_v13  ;;  %v2937_v33 = vld [vmem:[%s14066_s18 + $0x1d0] sm:$0xff] }
 0xdc9   :  { %v7302_v3 = vpop.eup %7301 }
 0xdca   :  { %v2844_v58 = vmul.f32 %v7302_v3, %v2841_v10  ;;  %v2842_v17 = vadd.f32 1e-05, %v2840_v18  ;;  %vm2850_vm13 = vweird.f32 %v7302_v3  ;;  %v2938_v18 = vld [vmem:[%s14066_s18 + $0x1d8] sm:$0xff] }
 0xdcb   :  { %vm2851_vm15 = vmor %vm2849_vm14, %vm2850_vm13 }
 0xdcc   :  { %v2845_v19 = vmul.f32 %v7302_v3, %v2844_v58  ;;  %7303 = vrsqrt.f32 %v2842_v17  ;;  %vm2859_vm4 = vweird.f32 %v2842_v17  ;;  %v2932_v58 = vld [vmem:[%s14066_s18 + $0x1a8] sm:$0xff] }
 0xdce   :  { %v2846_v37 = vmul.f32 0.5, %v2845_v19  ;;  %v2986_v19 = vld [vmem:[%s14066_s18 + $0x358] sm:$0xff] }
 0xdd0   :  { %v2847_v40 = vsub.f32 1.5, %v2846_v37  ;;  %v2919_v37 = vld [vmem:[%s14066_s18 + $0x140] sm:$0xff] }
 0xdd2   :  { %v7304_v36 = vpop.eup %7303  ;;  %v2848_v15 = vmul.f32 %v7302_v3, %v2847_v40  ;;  %v2920_v40 = vld [vmem:[%s14066_s18 + $0x148] sm:$0xff] }
 0xdd3   :  { %v2854_v26 = vmul.f32 %v7304_v36, %v2842_v17  ;;  %vm2860_vm1 = vweird.f32 %v7304_v36  ;;  %v2925_v17 = vld [vmem:[%s14066_s18 + $0x170] sm:$0xff] }
 0xdd4   :  { %v2852_v20 = vsel %vm2851_vm15, %v7302_v3, %v2848_v15  ;;  %vm2861_vm5 = vmor %vm2859_vm4, %vm2860_vm1  ;;  %v2931_v3 = vld [vmem:[%s14066_s18 + $0x1a0] sm:$0xff]  ;;  %v2980_v15 = vld [vmem:[%s14066_s18 + $0x328] sm:$0xff] }
 0xdd5   :  { %v2863_v51 = vmul.f32 %v2852_v20, %v10582_v49  ;;  %v2864_v39 = vmul.f32 %v2852_v20, %v10585_v45  ;;  %v2855_v14 = vmul.f32 %v7304_v36, %v2854_v26  ;;  %v3021_v45 = vld [vmem:[%s14066_s18 + $0x470] sm:$0xff]  ;;  %v2907_v20 = vld [vmem:[%s14066_s18 + $0xe0] sm:$0xff] }
 0xdd6   :  { %v3457_v26 = vld [vmem:[%s14067_s19 + $0xf0] sm:$0xff] }
 0xdd7   :  { %v2869_v12 = vmul.f32 %v2867_v46, %v2863_v51  ;;  %v2870_v54 = vmul.f32 %v2868_v41, %v2864_v39  ;;  %v2856_v24 = vmul.f32 0.5, %v2855_v14  ;;  %v2901_v51 = vld [vmem:[%s14066_s18 + $0xb0] sm:$0xff]  ;;  %v2902_v39 = vld [vmem:[%s14066_s18 + $0xb8] sm:$0xff]  ;;  %v3455_v14 = vld [vmem:[%s14067_s19 + $0xe0] sm:$0xff] }
 0xdd9   :  { %v10847_v43 = vadd.f32 %v2873_v34, %v2869_v12  ;;  %v10849_v53 = vadd.f32 %v2874_v22, %v2870_v54  ;;  %v2857_v60 = vsub.f32 1.5, %v2856_v24  ;;  %v3519_v12 = vld [vmem:[%s14067_s19 + $0x2e0] sm:$0xff]  ;;  %v2896_v24 = vld [vmem:[%s14066_s18 + $0x88] sm:$0xff] }
 0xdda   :  { %v2895_v54 = vld [vmem:[%s14066_s18 + $0x80] sm:$0xff] }
 0xddb   :  { %v2858_v49 = vmul.f32 %v7304_v36, %v2857_v60  ;;  %3059 = vmatmul.f32.vlgmr.msrb.gmra.mxu2 %v10847_v43  ;;  %6575 = vmatmul.msk.f32.vlgmr.msrb.gmra.mxu1 %vm125_vm0, %v10849_v53  ;;  %v3453_v60 = vld [vmem:[%s14067_s19 + $0xd0] sm:$0xff] }
 0xddc   :  { %3105 = vmatmul.f32.vlgmr.msra.gmra.mxu3 %v10847_v43  ;;  %6577 = vmatmul.msk.f32.vlgmr.msra.gmra.mxu0 %vm125_vm0, %v10849_v53 }
 0xddd   :  { %v2862_v5 = vsel %vm2861_vm5, %v7304_v36, %v2858_v49  ;;  %3227 = vmatpush.msra.mxu0 %v2973_v44  ;;  %3273 = vmatpush.msra.mxu3 %v2974_v7  ;;  %v2979_v36 = vld [vmem:[%s14066_s18 + $0x320] sm:$0xff]  ;;  %v3517_v44 = vld [vmem:[%s14067_s19 + $0x2d0] sm:$0xff]  ;;  %v2890_v49 = vld [vmem:[%s14066_s18 + $0x58] sm:$0xff] }
 0xdde   :  { %v2865_v27 = vmul.f32 %v2862_v5, %v10594_v52  ;;  %v2866_v2 = vmul.f32 %v2862_v5, %v10597_v9  ;;  %3258 = vmatpush.msrb.mxu1 %v3021_v45  ;;  %3304 = vmatpush.msrb.mxu2 %v3022_v21  ;;  %v3010_v52 = vld [vmem:[%s14066_s18 + $0x418] sm:$0xff]  ;;  %v2889_v7 = vld [vmem:[%s14066_s18 + $0x50] sm:$0xff]  ;;  %v3451_v45 = vld [vmem:[%s14067_s19 + $0xc0] sm:$0xff] }
 0xddf   :  { %3228 = vmatpush.msra.mxu0 %v2967_v28  ;;  %3274 = vmatpush.msra.mxu3 %v2968_v4  ;;  %v3515_v21 = vld [vmem:[%s14067_s19 + $0x2c0] sm:$0xff]  ;;  %v2884_v4 = vld [vmem:[%s14066_s18 + $0x28] sm:$0xff]  ;;  %v3489_v5 = vld [vmem:[%s14067_s19 + $0x1f0] sm:$0xff] }
 0xde0   :  { %v2871_v9 = vmul.f32 %v2867_v46, %v2865_v27  ;;  %v2872_v42 = vmul.f32 %v2868_v41, %v2866_v2  ;;  %3259 = vmatpush.msrb.mxu1 %v3015_v63  ;;  %3305 = vmatpush.msrb.mxu2 %v3016_v56  ;;  %v2913_v46 = vld [vmem:[%s14066_s18 + $0x110] sm:$0xff]  ;;  %v2914_v41 = vld [vmem:[%s14066_s18 + $0x118] sm:$0xff]  ;;  %v2883_v28 = vld [vmem:[%s14066_s18 + $0x20] sm:$0xff] }
 0xde1   :  { %3229 = vmatpush.msra.mxu0 %v2961_v11  ;;  %3275 = vmatpush.msra.mxu3 %v2962_v59  ;;  %v3553_v63 = vld [vmem:[%s14067_s19 + $0x3f0] sm:$0xff]  ;;  %v3487_v2 = vld [vmem:[%s14067_s19 + $0x1e0] sm:$0xff] }
 0xde2   :  { %v10901_v29 = vadd.f32 %v2873_v34, %v2871_v9  ;;  %v10903_v10 = vadd.f32 %v2874_v22, %v2872_v42  ;;  %3260 = vmatpush.msrb.mxu1 %v3009_v62  ;;  %3306 = vmatpush.msrb.mxu2 %v3010_v52  ;;  %v3521_v34 = vld [vmem:[%s14067_s19 + $0x2f0] sm:$0xff]  ;;  %v2908_v22 = vld [vmem:[%s14066_s18 + $0xe8] sm:$0xff]  ;;  %v3551_v11 = vld [vmem:[%s14067_s19 + $0x3e0] sm:$0xff] }
 0xde3   :  { %3230 = vmatpush.msra.mxu0 %v2955_v31  ;;  %3276 = vmatpush.msra.mxu3 %v2956_v61  ;;  %v3449_v56 = vld [vmem:[%s14067_s19 + $0xb0] sm:$0xff]  ;;  %v3447_v59 = vld [vmem:[%s14067_s19 + $0xa0] sm:$0xff] }
 0xde4   :  { %3062 = vmatmul.f32.gmra.mxu2 %v10901_v29  ;;  %6576 = vmatmul.msk.f32.gmra.mxu1 %vm125_vm0, %v10903_v10  ;;  %v3513_v27 = vld [vmem:[%s14067_s19 + $0x2b0] sm:$0xff]  ;;  %v3483_v42 = vld [vmem:[%s14067_s19 + $0x1c0] sm:$0xff] }
 0xde5   :  { %3108 = vmatmul.f32.gmra.mxu3 %v10901_v29  ;;  %6578 = vmatmul.msk.f32.gmra.mxu0 %vm125_vm0, %v10903_v10  ;;  %v3549_v62 = vld [vmem:[%s14067_s19 + $0x3d0] sm:$0xff]  ;;  %v3547_v31 = vld [vmem:[%s14067_s19 + $0x3c0] sm:$0xff] }
 0xde6   :  { %3231 = vmatpush.msra.mxu0 %v2949_v6  ;;  %3277 = vmatpush.msra.mxu3 %v2950_v48  ;;  %v3445_v52 = vld [vmem:[%s14067_s19 + $0x90] sm:$0xff]  ;;  %v3443_v61 = vld [vmem:[%s14067_s19 + $0x80] sm:$0xff] }
 0xde7   :  { %3261 = vmatpush.msrb.mxu1 %v3003_v1  ;;  %3307 = vmatpush.msrb.mxu2 %v3004_v0  ;;  %v3509_v9 = vld [vmem:[%s14067_s19 + $0x290] sm:$0xff]  ;;  %v3507_v6 = vld [vmem:[%s14067_s19 + $0x280] sm:$0xff] }
 0xde8   :  { %3232 = vmatpush.msra.mxu0 %v2943_v38  ;;  %3278 = vmatpush.msra.mxu3 %v2944_v47  ;;  %v3481_v48 = vld [vmem:[%s14067_s19 + $0x1b0] sm:$0xff]  ;;  %v3543_v38 = vld [vmem:[%s14067_s19 + $0x3a0] sm:$0xff] }
 0xde9   :  { %3262 = vmatpush.msrb.mxu1 %v2997_v16  ;;  %3308 = vmatpush.msrb.mxu2 %v2998_v55  ;;  %v3545_v1 = vld [vmem:[%s14067_s19 + $0x3b0] sm:$0xff]  ;;  %v3439_v47 = vld [vmem:[%s14067_s19 + $0x60] sm:$0xff] }
 0xdea   :  { %3233 = vmatpush.msra.mxu0 %v2937_v33  ;;  %3279 = vmatpush.msra.mxu3 %v2938_v18  ;;  %v3441_v0 = vld [vmem:[%s14067_s19 + $0x70] sm:$0xff]  ;;  %v3503_v55 = vld [vmem:[%s14067_s19 + $0x260] sm:$0xff] }
 0xdeb   :  { %3263 = vmatpush.msrb.mxu1 %v2991_v30  ;;  %3309 = vmatpush.msrb.mxu2 %v2992_v32  ;;  %v3477_v16 = vld [vmem:[%s14067_s19 + $0x190] sm:$0xff]  ;;  %v3475_v30 = vld [vmem:[%s14067_s19 + $0x180] sm:$0xff] }
 0xdec   :  { %3234 = vmatpush.msra.mxu0 %v2931_v3  ;;  %3280 = vmatpush.msra.mxu3 %v2932_v58  ;;  %v3541_v33 = vld [vmem:[%s14067_s19 + $0x390] sm:$0xff]  ;;  %v3539_v3 = vld [vmem:[%s14067_s19 + $0x380] sm:$0xff] }
 0xded   :  { %3151 = vmatmul.f32.vlgmr.msra.gmra.mxu1 %v10847_v43  ;;  %6579 = vmatmul.msk.f32.vlgmr.msrb.gmra.mxu0 %vm125_vm0, %v10849_v53  ;;  %v3437_v18 = vld [vmem:[%s14067_s19 + $0x50] sm:$0xff]  ;;  %v3435_v58 = vld [vmem:[%s14067_s19 + $0x40] sm:$0xff] }
 0xdee   :  { %3197 = vmatmul.f32.vlgmr.msra.gmra.mxu2 %v10847_v43  ;;  %6581 = vmatmul.msk.f32.vlgmr.msrb.gmra.mxu3 %vm125_vm0, %v10849_v53  ;;  %v3501_v32 = vld [vmem:[%s14067_s19 + $0x250] sm:$0xff] }
 0xdef   :  { %3235 = vmatpush.msra.mxu0 %v2925_v17  ;;  %3281 = vmatpush.msra.mxu3 %v2926_v35  ;;  %v3473_v17 = vld [vmem:[%s14067_s19 + $0x170] sm:$0xff]  ;;  %v3499_v35 = vld [vmem:[%s14067_s19 + $0x240] sm:$0xff] }
 0xdf0   :  { %3264 = vmatpush.msrb.mxu1 %v2985_v25  ;;  %3310 = vmatpush.msrb.mxu2 %v2986_v19  ;;  %v3537_v25 = vld [vmem:[%s14067_s19 + $0x370] sm:$0xff] }
 0xdf1   :  { %3236 = vmatpush.msra.mxu0 %v2919_v37  ;;  %3282 = vmatpush.msra.mxu3 %v2920_v40  ;;  %v3433_v19 = vld [vmem:[%s14067_s19 + $0x30] sm:$0xff]  ;;  %v3471_v37 = vld [vmem:[%s14067_s19 + $0x160] sm:$0xff] }
 0xdf2   :  { %3265 = vmatpush.msrb.mxu1 %v2979_v36  ;;  %3311 = vmatpush.msrb.mxu2 %v2980_v15  ;;  %v3497_v40 = vld [vmem:[%s14067_s19 + $0x230] sm:$0xff]  ;;  %v3535_v36 = vld [vmem:[%s14067_s19 + $0x360] sm:$0xff] }
 0xdf3   :  { %3237 = vmatpush.msra.mxu0 %v2913_v46  ;;  %3283 = vmatpush.msra.mxu3 %v2914_v41  ;;  %v3431_v15 = vld [vmem:[%s14067_s19 + $0x20] sm:$0xff]  ;;  %v3469_v46 = vld [vmem:[%s14067_s19 + $0x150] sm:$0xff] }
 0xdf4   :  { %3619 = vmatpush.msra.mxu1 %v3457_v26  ;;  %3665 = vmatpush.msra.mxu2 %v3521_v34  ;;  %v3495_v41 = vld [vmem:[%s14067_s19 + $0x220] sm:$0xff]  ;;  %v3533_v26 = vld [vmem:[%s14067_s19 + $0x350] sm:$0xff] }
 0xdf5   :  { %3238 = vmatpush.msra.mxu0 %v2907_v20  ;;  %3284 = vmatpush.msra.mxu3 %v2908_v22  ;;  %v3429_v34 = vld [vmem:[%s14067_s19 + $0x10] sm:$0xff]  ;;  %v3467_v20 = vld [vmem:[%s14067_s19 + $0x140] sm:$0xff] }
 0xdf6   :  { %3154 = vmatmul.f32.gmra.mxu1 %v10901_v29  ;;  %6580 = vmatmul.msk.f32.gmra.mxu0 %vm125_vm0, %v10903_v10  ;;  %v3493_v22 = vld [vmem:[%s14067_s19 + $0x210] sm:$0xff] }
 0xdf7   :  { %3200 = vmatmul.f32.gmra.mxu2 %v10901_v29  ;;  %6582 = vmatmul.msk.f32.gmra.mxu3 %vm125_vm0, %v10903_v10 }
 0xdf8   :  { %3239 = vmatpush.msra.mxu0 %v2901_v51  ;;  %3285 = vmatpush.msra.mxu3 %v2902_v39  ;;  %v3531_v51 = vld [vmem:[%s14067_s19 + $0x340] sm:$0xff] }
 0xdf9   :  { %3620 = vmatpush.msra.mxu1 %v3455_v14  ;;  %3666 = vmatpush.msra.mxu2 %v3519_v12  ;;  %v3427_v39 = vld [vmem:[%s14067_s19] sm:$0xff]  ;;  %v3465_v14 = vld [vmem:[%s14067_s19 + $0x130] sm:$0xff] }
 0xdfa   :  { %3240 = vmatpush.msra.mxu0 %v2895_v54  ;;  %3286 = vmatpush.msra.mxu3 %v2896_v24  ;;  %v3491_v12 = vld [vmem:[%s14067_s19 + $0x200] sm:$0xff]  ;;  %v3529_v54 = vld [vmem:[%s14067_s19 + $0x330] sm:$0xff] }
 0xdfb   :  { %3621 = vmatpush.msra.mxu1 %v3453_v60  ;;  %3667 = vmatpush.msra.mxu2 %v3517_v44  ;;  %v3585_v24 = vld [vmem:[%s14067_s19 + $0x4f0] sm:$0xff]  ;;  %v3458_v60 = vld [vmem:[%s14067_s19 + $0xf8] sm:$0xff]  ;;  %v3463_v44 = vld [vmem:[%s14067_s19 + $0x120] sm:$0xff] }
 0xdfc   :  { %3241 = vmatpush.msra.mxu0 %v2889_v7  ;;  %3287 = vmatpush.msra.mxu3 %v2890_v49  ;;  %v3527_v7 = vld [vmem:[%s14067_s19 + $0x320] sm:$0xff] }
 0xdfd   :  { %3622 = vmatpush.msra.mxu1 %v3451_v45  ;;  %3668 = vmatpush.msra.mxu2 %v3515_v21  ;;  %v3583_v49 = vld [vmem:[%s14067_s19 + $0x4e0] sm:$0xff]  ;;  %v3456_v45 = vld [vmem:[%s14067_s19 + $0xe8] sm:$0xff]  ;;  %v3461_v21 = vld [vmem:[%s14067_s19 + $0x110] sm:$0xff] }
 0xdfe   :  { %3242 = vmatpush.msra.mxu0 %v2883_v28  ;;  %3288 = vmatpush.msra.mxu3 %v2884_v4  ;;  %v3525_v28 = vld [vmem:[%s14067_s19 + $0x310] sm:$0xff] }
 0xdff   :  { %3243 = vmatmul.f32.vlgmr.msra.gmra.mxu0 %v10847_v43  ;;  %6583 = vmatmul.msk.f32.vlgmr.msrb.gmra.mxu1 %vm125_vm0, %v10849_v53  ;;  %v3581_v4 = vld [vmem:[%s14067_s19 + $0x4d0] sm:$0xff] }
 0xe00   :  { %3289 = vmatmul.f32.vlgmr.msra.gmra.mxu3 %v10847_v43  ;;  %6585 = vmatmul.msk.f32.vlgmr.msrb.gmra.mxu2 %vm125_vm0, %v10849_v53  ;;  %v3511_v43 = vld [vmem:[%s14067_s19 + $0x2a0] sm:$0xff]  ;;  %v3485_v53 = vld [vmem:[%s14067_s19 + $0x1d0] sm:$0xff] }
 0xe01   :  { %3642 = vmatpush.msrb.mxu0 %v3489_v5  ;;  %3688 = vmatpush.msrb.mxu3 %v3553_v63  ;;  %v3454_v5 = vld [vmem:[%s14067_s19 + $0xd8] sm:$0xff]  ;;  %v3459_v63 = vld [vmem:[%s14067_s19 + $0x100] sm:$0xff] }
 0xe02   :  { %3623 = vmatpush.msra.mxu1 %v3449_v56  ;;  %3669 = vmatpush.msra.mxu2 %v3513_v27  ;;  %v3523_v56 = vld [vmem:[%s14067_s19 + $0x300] sm:$0xff] }
 0xe03   :  { %3643 = vmatpush.msrb.mxu0 %v3487_v2  ;;  %3689 = vmatpush.msrb.mxu3 %v3551_v11  ;;  %v3579_v27 = vld [vmem:[%s14067_s19 + $0x4c0] sm:$0xff]  ;;  %v3617_v2 = vld [vmem:[%s14067_s19 + $0x5f0] sm:$0xff]  ;;  %v3452_v11 = vld [vmem:[%s14067_s19 + $0xc8] sm:$0xff] }
 0xe04   :  { %3624 = vmatpush.msra.mxu1 %v3447_v59  ;;  %3670 = vmatpush.msra.mxu2 %v3511_v43  ;;  %v3490_v59 = vld [vmem:[%s14067_s19 + $0x1f8] sm:$0xff]  ;;  %v3577_v43 = vld [vmem:[%s14067_s19 + $0x4b0] sm:$0xff] }
 0xe05   :  { %3644 = vmatpush.msrb.mxu0 %v3485_v53  ;;  %3690 = vmatpush.msrb.mxu3 %v3549_v62  ;;  %v3615_v53 = vld [vmem:[%s14067_s19 + $0x5e0] sm:$0xff]  ;;  %v3450_v62 = vld [vmem:[%s14067_s19 + $0xb8] sm:$0xff] }
 0xe06   :  { %3625 = vmatpush.msra.mxu1 %v3445_v52  ;;  %3671 = vmatpush.msra.mxu2 %v3509_v9  ;;  %v3488_v52 = vld [vmem:[%s14067_s19 + $0x1e8] sm:$0xff]  ;;  %v3575_v9 = vld [vmem:[%s14067_s19 + $0x4a0] sm:$0xff] }
 0xe07   :  { %3246 = vmatmul.f32.gmra.mxu0 %v10901_v29  ;;  %6584 = vmatmul.msk.f32.gmra.mxu1 %vm125_vm0, %v10903_v10 }
 0xe08   :  { %3292 = vmatmul.f32.gmra.mxu3 %v10901_v29  ;;  %6586 = vmatmul.msk.f32.gmra.mxu2 %vm125_vm0, %v10903_v10  ;;  %v3505_v29 = vld [vmem:[%s14067_s19 + $0x270] sm:$0xff]  ;;  %v3479_v10 = vld [vmem:[%s14067_s19 + $0x1a0] sm:$0xff] }
 0xe09   :  { %3645 = vmatpush.msrb.mxu0 %v3483_v42  ;;  %3691 = vmatpush.msrb.mxu3 %v3547_v31  ;;  %v3613_v42 = vld [vmem:[%s14067_s19 + $0x5d0] sm:$0xff]  ;;  %v3448_v31 = vld [vmem:[%s14067_s19 + $0xa8] sm:$0xff] }
 0xe0a   :  { %3626 = vmatpush.msra.mxu1 %v3443_v61  ;;  %3672 = vmatpush.msra.mxu2 %v3507_v6  ;;  %v3486_v61 = vld [vmem:[%s14067_s19 + $0x1d8] sm:$0xff]  ;;  %v3573_v6 = vld [vmem:[%s14067_s19 + $0x490] sm:$0xff] }
 0xe0b   :  { %3646 = vmatpush.msrb.mxu0 %v3481_v48  ;;  %3692 = vmatpush.msrb.mxu3 %v3545_v1  ;;  %v3611_v48 = vld [vmem:[%s14067_s19 + $0x5c0] sm:$0xff]  ;;  %v3446_v1 = vld [vmem:[%s14067_s19 + $0x98] sm:$0xff] }
 0xe0c   :  { %3627 = vmatpush.msra.mxu1 %v3441_v0  ;;  %3673 = vmatpush.msra.mxu2 %v3505_v29  ;;  %v3484_v0 = vld [vmem:[%s14067_s19 + $0x1c8] sm:$0xff]  ;;  %v3571_v29 = vld [vmem:[%s14067_s19 + $0x480] sm:$0xff] }
 0xe0d   :  { %3647 = vmatpush.msrb.mxu0 %v3479_v10  ;;  %3693 = vmatpush.msrb.mxu3 %v3543_v38  ;;  %v3609_v10 = vld [vmem:[%s14067_s19 + $0x5b0] sm:$0xff]  ;;  %v3444_v38 = vld [vmem:[%s14067_s19 + $0x88] sm:$0xff] }
 0xe0e   :  { %3628 = vmatpush.msra.mxu1 %v3439_v47  ;;  %3674 = vmatpush.msra.mxu2 %v3503_v55  ;;  %v11307_v47 = vld [vmem:[%s14065_s17] sm:$0x3f] }
 0xe0f   :  { %3648 = vmatpush.msrb.mxu0 %v3477_v16  ;;  %3694 = vmatpush.msrb.mxu3 %v3541_v33  ;;  %v3482_v16 = vld [vmem:[%s14067_s19 + $0x1b8] sm:$0xff]  ;;  %v3569_v33 = vld [vmem:[%s14067_s19 + $0x470] sm:$0xff] }
 0xe10   :  { %3629 = vmatpush.msra.mxu1 %v3437_v18  ;;  %3675 = vmatpush.msra.mxu2 %v3501_v32  ;;  %v3607_v18 = vld [vmem:[%s14067_s19 + $0x5a0] sm:$0xff] }
 0xe11   :  { %3649 = vmatpush.msrb.mxu0 %v3475_v30  ;;  %3695 = vmatpush.msrb.mxu3 %v3539_v3  ;;  %v3442_v30 = vld [vmem:[%s14067_s19 + $0x78] sm:$0xff]  ;;  %v3480_v3 = vld [vmem:[%s14067_s19 + $0x1a8] sm:$0xff] }
 0xe12   :  { %3630 = vmatpush.msra.mxu1 %v3435_v58  ;;  %3676 = vmatpush.msra.mxu2 %v3499_v35  ;;  %v3567_v58 = vld [vmem:[%s14067_s19 + $0x460] sm:$0xff]  ;;  %v3440_v35 = vld [vmem:[%s14067_s19 + $0x68] sm:$0xff] }
 0xe13   :  { %3650 = vmatpush.msrb.mxu0 %v3473_v17  ;;  %3696 = vmatpush.msrb.mxu3 %v3537_v25  ;;  %v3605_v17 = vld [vmem:[%s14067_s19 + $0x590] sm:$0xff]  ;;  %v3025_v25 = vperm.slane %v11307_v47, 0 }
 0xe14   :  { %3631 = vmatpush.msra.mxu1 %v3433_v19  ;;  %3677 = vmatpush.msra.mxu2 %v3497_v40  ;;  %v3478_v19 = vld [vmem:[%s14067_s19 + $0x198] sm:$0xff]  ;;  %v3565_v40 = vld [vmem:[%s14067_s19 + $0x450] sm:$0xff] }
 0xe15   :  { %3651 = vmatpush.msrb.mxu0 %v3471_v37  ;;  %3697 = vmatpush.msrb.mxu3 %v3535_v36  ;;  %v3026_v37 = vperm.slane %v11307_v47, 1  ;;  %v3603_v36 = vld [vmem:[%s14067_s19 + $0x580] sm:$0xff] }
 0xe16   :  { %3632 = vmatpush.msra.mxu1 %v3431_v15  ;;  %3678 = vmatpush.msra.mxu2 %v3495_v41  ;;  %v3438_v15 = vld [vmem:[%s14067_s19 + $0x58] sm:$0xff] }
 0xe17   :  { %3652 = vmatpush.msrb.mxu0 %v3469_v46  ;;  %3698 = vmatpush.msrb.mxu3 %v3533_v26  ;;  %v3476_v46 = vld [vmem:[%s14067_s19 + $0x188] sm:$0xff]  ;;  %v3563_v26 = vld [vmem:[%s14067_s19 + $0x440] sm:$0xff] }
 0xe18   :  { %3633 = vmatpush.msra.mxu1 %v3429_v34  ;;  %3679 = vmatpush.msra.mxu2 %v3493_v22  ;;  %v3601_v34 = vld [vmem:[%s14067_s19 + $0x570] sm:$0xff] }
 0xe19   :  { %3653 = vmatpush.msrb.mxu0 %v3467_v20  ;;  %3699 = vmatpush.msrb.mxu3 %v3531_v51  ;;  %v3436_v20 = vld [vmem:[%s14067_s19 + $0x48] sm:$0xff] }
 0xe1a   :  { %3634 = vmatpush.msra.mxu1 %v3427_v39  ;;  %3680 = vmatpush.msra.mxu2 %v3491_v12  ;;  %v3474_v39 = vld [vmem:[%s14067_s19 + $0x178] sm:$0xff]  ;;  %v3561_v12 = vld [vmem:[%s14067_s19 + $0x430] sm:$0xff] }
 0xe1b   :  { %3654 = vmatpush.msrb.mxu0 %v3465_v14  ;;  %3700 = vmatpush.msrb.mxu3 %v3529_v54  ;;  %v3599_v54 = vld [vmem:[%s14067_s19 + $0x560] sm:$0xff] }
 0xe1c   :  { %3711 = vmatpush.msrb.mxu1 %v3585_v24  ;;  %3757 = vmatpush.msrb.mxu2 %v3458_v60  ;;  %v3434_v24 = vld [vmem:[%s14067_s19 + $0x38] sm:$0xff] }
 0xe1d   :  { %3655 = vmatpush.msrb.mxu0 %v3463_v44  ;;  %3701 = vmatpush.msrb.mxu3 %v3527_v7  ;;  %v3472_v7 = vld [vmem:[%s14067_s19 + $0x168] sm:$0xff] }
 0xe1e   :  { %3712 = vmatpush.msrb.mxu1 %v3583_v49  ;;  %3758 = vmatpush.msrb.mxu2 %v3456_v45 }
 0xe1f   :  { %3656 = vmatpush.msrb.mxu0 %v3461_v21  ;;  %3702 = vmatpush.msrb.mxu3 %v3525_v28  ;;  %v3559_v21 = vld [vmem:[%s14067_s19 + $0x420] sm:$0xff]  ;;  %v3597_v28 = vld [vmem:[%s14067_s19 + $0x550] sm:$0xff] }
 0xe20   :  { %3713 = vmatpush.msrb.mxu1 %v3581_v4  ;;  %3759 = vmatpush.msrb.mxu2 %v3454_v5  ;;  %v3432_v4 = vld [vmem:[%s14067_s19 + $0x28] sm:$0xff] }
 0xe21   :  { %3657 = vmatpush.msrb.mxu0 %v3459_v63  ;;  %3703 = vmatpush.msrb.mxu3 %v3523_v56  ;;  %v3470_v63 = vld [vmem:[%s14067_s19 + $0x158] sm:$0xff] }
 0xe22   :  { %3714 = vmatpush.msrb.mxu1 %v3579_v27  ;;  %3760 = vmatpush.msrb.mxu2 %v3452_v11  ;;  %v3557_v27 = vld [vmem:[%s14067_s19 + $0x410] sm:$0xff]  ;;  %v3430_v11 = vld [vmem:[%s14067_s19 + $0x18] sm:$0xff] }
 0xe23   :  { %3734 = vmatpush.msra.mxu0 %v3617_v2  ;;  %3780 = vmatpush.msra.mxu3 %v3490_v59  ;;  %v3595_v2 = vld [vmem:[%s14067_s19 + $0x540] sm:$0xff] }
 0xe24   :  { %3715 = vmatpush.msrb.mxu1 %v3577_v43  ;;  %3761 = vmatpush.msrb.mxu2 %v3450_v62  ;;  %v3468_v43 = vld [vmem:[%s14067_s19 + $0x148] sm:$0xff]  ;;  %v3555_v62 = vld [vmem:[%s14067_s19 + $0x400] sm:$0xff] }
 0xe25   :  { %3735 = vmatpush.msra.mxu0 %v3615_v53  ;;  %3781 = vmatpush.msra.mxu3 %v3488_v52  ;;  %v3593_v52 = vld [vmem:[%s14067_s19 + $0x530] sm:$0xff] }
 0xe26   :  { %3716 = vmatpush.msrb.mxu1 %v3575_v9  ;;  %3762 = vmatpush.msrb.mxu2 %v3448_v31  ;;  %v3428_v9 = vld [vmem:[%s14067_s19 + $0x8] sm:$0xff] }
 0xe27   :  { %3736 = vmatpush.msra.mxu0 %v3613_v42  ;;  %3782 = vmatpush.msra.mxu3 %v3486_v61  ;;  %v3027_v61 = vperm.slane %v11307_v47, 2 }
 0xe28   :  { %3717 = vmatpush.msrb.mxu1 %v3573_v6  ;;  %3763 = vmatpush.msrb.mxu2 %v3446_v1  ;;  %v3466_v6 = vld [vmem:[%s14067_s19 + $0x138] sm:$0xff] }
 0xe29   :  { %3737 = vmatpush.msra.mxu0 %v3611_v48  ;;  %3783 = vmatpush.msra.mxu3 %v3484_v0 }
 0xe2a   :  { %3718 = vmatpush.msrb.mxu1 %v3571_v29  ;;  %3764 = vmatpush.msrb.mxu2 %v3444_v38  ;;  %v3591_v29 = vld [vmem:[%s14067_s19 + $0x520] sm:$0xff] }
 0xe2b   :  { %3738 = vmatpush.msra.mxu0 %v3609_v10  ;;  %3784 = vmatpush.msra.mxu3 %v3482_v16  ;;  %v3464_v10 = vld [vmem:[%s14067_s19 + $0x128] sm:$0xff] }
 0xe2c   :  { %3719 = vmatpush.msrb.mxu1 %v3569_v33  ;;  %3765 = vmatpush.msrb.mxu2 %v3442_v30 }
 0xe2d   :  { %3739 = vmatpush.msra.mxu0 %v3607_v18  ;;  %3785 = vmatpush.msra.mxu3 %v3480_v3  ;;  %v3462_v3 = vld [vmem:[%s14067_s19 + $0x118] sm:$0xff] }
 0xe2e   :  { %3720 = vmatpush.msrb.mxu1 %v3567_v58  ;;  %3766 = vmatpush.msrb.mxu2 %v3440_v35 }
 0xe2f   :  { %3740 = vmatpush.msra.mxu0 %v3605_v17  ;;  %3786 = vmatpush.msra.mxu3 %v3478_v19 }
 0xe30   :  { %3721 = vmatpush.msrb.mxu1 %v3565_v40  ;;  %3767 = vmatpush.msrb.mxu2 %v3438_v15  ;;  %v3460_v40 = vld [vmem:[%s14067_s19 + $0x108] sm:$0xff] }
 0xe31   :  { %3741 = vmatpush.msra.mxu0 %v3603_v36  ;;  %3787 = vmatpush.msra.mxu3 %v3476_v46  ;;  %v3028_v46 = vperm.slane %v11307_v47, 3 }
 0xe32   :  { %3722 = vmatpush.msrb.mxu1 %v3563_v26  ;;  %3768 = vmatpush.msrb.mxu2 %v3436_v20 }
 0xe33   :  { %3742 = vmatpush.msra.mxu0 %v3601_v34  ;;  %3788 = vmatpush.msra.mxu3 %v3474_v39 }
 0xe34   :  { %3723 = vmatpush.msrb.mxu1 %v3561_v12  ;;  %3769 = vmatpush.msrb.mxu2 %v3434_v24 }
 0xe35   :  { %3743 = vmatpush.msra.mxu0 %v3599_v54  ;;  %3789 = vmatpush.msra.mxu3 %v3472_v7 }
 0xe36   :  { %3724 = vmatpush.msrb.mxu1 %v3559_v21  ;;  %3770 = vmatpush.msrb.mxu2 %v3432_v4 }
 0xe37   :  { %3744 = vmatpush.msra.mxu0 %v3597_v28  ;;  %3790 = vmatpush.msra.mxu3 %v3470_v63 }
 0xe38   :  { %3725 = vmatpush.msrb.mxu1 %v3557_v27  ;;  %3771 = vmatpush.msrb.mxu2 %v3430_v11 }
 0xe39   :  { %3745 = vmatpush.msra.mxu0 %v3595_v2  ;;  %3791 = vmatpush.msra.mxu3 %v3468_v43 }
 0xe3a   :  { %3726 = vmatpush.msrb.mxu1 %v3555_v62  ;;  %3772 = vmatpush.msrb.mxu2 %v3428_v9 }
 0xe3b   :  { %3746 = vmatpush.msra.mxu0 %v3593_v52  ;;  %3792 = vmatpush.msra.mxu3 %v3466_v6  ;;  %v3522_v52 = vld [vmem:[%s14067_s19 + $0x2f8] sm:$0xff]  ;;  %v3520_v6 = vld [vmem:[%s14067_s19 + $0x2e8] sm:$0xff] }
 0xe3d   :  { %3747 = vmatpush.msra.mxu0 %v3591_v29  ;;  %3793 = vmatpush.msra.mxu3 %v3464_v10 }
 0xe3f   :  { %3794 = vmatpush.msra.mxu3 %v3462_v3 }
 0xe41   :  { %3795 = vmatpush.msra.mxu3 %v3460_v40  ;;  %v3030_v40 = vperm.slane %v11307_v47, 5 }
 0xe58   :  { %v3083_v55 = vpop.f32.mrf.mxu1 }
 0xe59   :  { %v3129_v32 = vpop.f32.mrf.mxu0 }
 0xe5e   :  { %v3060_v41 = vpop.f32.mrf.mxu2 }
 0xe5f   :  { %v3061_v22 = vadd.f32 %v3060_v41, %v3025_v25  ;;  %v3106_v51 = vpop.f32.mrf.mxu3 }
 0xe60   :  { %v3107_v14 = vadd.f32 %v3106_v51, %v3026_v37 }
 0xe61   :  { %v11375_v60 = vadd.f32 %v3083_v55, %v3061_v22  ;;  %v3086_v44 = vpop.f32.mrf.mxu1 }
 0xe62   :  { %v11380_v49 = vadd.f32 %v3129_v32, %v3107_v14  ;;  %v3132_v45 = vpop.f32.mrf.mxu0  ;;  %v3589_v32 = vld [vmem:[%s14067_s19 + $0x510] sm:$0xff] }
 0xe63   :  { %v3331_v5 = vmul.f32 %v11375_v60, %v11375_v60  ;;  %3748 = vmatpush.msra.mxu0 %v3589_v32 }
 0xe64   :  { %v3332_v56 = vmul.f32 %v11380_v49, %v11380_v49  ;;  %v3320_v2 = vmul.f32 0.5, %v11380_v49 }
 0xe65   :  { %v3343_v59 = vmul.f32 %v3331_v5, %v11375_v60 }
 0xe66   :  { %v3344_v53 = vmul.f32 %v3332_v56, %v11380_v49 }
 0xe67   :  { %v3355_v42 = vmul.f32 0.044715, %v3343_v59  ;;  %v3063_v31 = vpop.f32.mrf.mxu2 }
 0xe68   :  { %v3356_v48 = vmul.f32 0.044715, %v3344_v53  ;;  %v3064_v1 = vadd.f32 %v3063_v31, %v3025_v25  ;;  %v3109_v0 = vpop.f32.mrf.mxu3 }
 0xe69   :  { %v3367_v38 = vadd.f32 %v3355_v42, %v11375_v60  ;;  %v3110_v16 = vadd.f32 %v3109_v0, %v3026_v37  ;;  %v3587_v37 = vld [vmem:[%s14067_s19 + $0x500] sm:$0xff] }
 0xe6a   :  { %v3368_v55 = vadd.f32 %v3356_v48, %v11380_v49  ;;  %v11437_v33 = vadd.f32 %v3086_v44, %v3064_v1  ;;  %v3152_v18 = vpop.f32.mrf.mxu1  ;;  %v3175_v30 = vpop.f32.mrf.mxu0  ;;  %3749 = vmatpush.msra.mxu0 %v3587_v37  ;;  %v3319_v44 = vmul.f32 0.5, %v11375_v60  ;;  %v3554_v49 = vld [vmem:[%s14067_s19 + $0x3f8] sm:$0xff]  ;;  %v3029_v48 = vperm.slane %v11307_v47, 4  ;;  %v3552_v1 = vld [vmem:[%s14067_s19 + $0x3e8] sm:$0xff] }
 0xe6b   :  { %v3379_v58 = vmul.f32 0.7978846, %v3367_v38  ;;  %v11445_v17 = vadd.f32 %v3132_v45, %v3110_v16  ;;  %v3153_v35 = vadd.f32 %v3152_v18, %v3027_v61  ;;  %v3518_v16 = vld [vmem:[%s14067_s19 + $0x2d8] sm:$0xff] }
 0xe6c   :  { %v3380_v25 = vmul.f32 0.7978846, %v3368_v55  ;;  %v3337_v19 = vmul.f32 %v11437_v33, %v11437_v33  ;;  %v3550_v18 = vld [vmem:[%s14067_s19 + $0x3d8] sm:$0xff] }
 0xe6d   :  { %7305 = vtanh.f32 %v3379_v58  ;;  %v3338_v36 = vmul.f32 %v11445_v17, %v11445_v17  ;;  %v11457_v15 = vadd.f32 %v3175_v30, %v3153_v35  ;;  %v3516_v35 = vld [vmem:[%s14067_s19 + $0x2c8] sm:$0xff]  ;;  %v3614_v47 = vld [vmem:[%s14067_s19 + $0x5d8] sm:$0xff] }
 0xe6e   :  { %7307 = vtanh.f32 %v3380_v25  ;;  %v3349_v41 = vmul.f32 %v3337_v19, %v11437_v33 }
 0xe6f   :  { %v3333_v26 = vmul.f32 %v11457_v15, %v11457_v15  ;;  %v3350_v34 = vmul.f32 %v3338_v36, %v11445_v17  ;;  %v3325_v36 = vmul.f32 0.5, %v11437_v33 }
 0xe70   :  { %v3361_v20 = vmul.f32 0.044715, %v3349_v41 }
 0xe71   :  { %v3345_v22 = vmul.f32 %v3333_v26, %v11457_v15  ;;  %v3198_v51 = vpop.f32.mrf.mxu2  ;;  %v3221_v39 = vpop.f32.mrf.mxu3  ;;  %v3362_v14 = vmul.f32 0.044715, %v3350_v34 }
 0xe72   :  { %v3199_v12 = vadd.f32 %v3198_v51, %v3028_v46  ;;  %v3373_v54 = vadd.f32 %v3361_v20, %v11437_v33  ;;  %v3326_v20 = vmul.f32 0.5, %v11445_v17  ;;  %v3514_v51 = vld [vmem:[%s14067_s19 + $0x2b8] sm:$0xff]  ;;  %v3321_v33 = vmul.f32 0.5, %v11457_v15 }
 0xe73   :  { %v7306_v24 = vpop.eup %7305  ;;  %v3357_v7 = vmul.f32 0.044715, %v3345_v22  ;;  %v3155_v45 = vpop.f32.mrf.mxu1  ;;  %v3374_v28 = vadd.f32 %v3362_v14, %v11445_v17  ;;  %v3546_v17 = vld [vmem:[%s14067_s19 + $0x3b8] sm:$0xff] }
 0xe74   :  { %v3178_v21 = vpop.f32.mrf.mxu0  ;;  %v7308_v4 = vpop.eup %7307  ;;  %v11468_v5 = vadd.f32 %v3221_v39, %v3199_v12  ;;  %v3156_v63 = vadd.f32 %v3155_v45, %v3027_v61  ;;  %v3403_v56 = vadd.f32 1.0, %v7306_v24  ;;  %v3385_v27 = vmul.f32 0.7978846, %v3373_v54 }
 0xe75   :  { %v3369_v11 = vadd.f32 %v3357_v7, %v11457_v15  ;;  %v3404_v59 = vadd.f32 1.0, %v7308_v4  ;;  %v3386_v43 = vmul.f32 0.7978846, %v3374_v28  ;;  %v3512_v15 = vld [vmem:[%s14067_s19 + $0x2a8] sm:$0xff] }
 0xe76   :  { %v3334_v60 = vmul.f32 %v11468_v5, %v11468_v5  ;;  %v11474_v53 = vadd.f32 %v3178_v21, %v3156_v63  ;;  %v11476_v62 = vmul.f32 %v3403_v56, %v3319_v44  ;;  %7309 = vtanh.f32 %v3385_v27  ;;  %v3544_v4 = vld [vmem:[%s14067_s19 + $0x3a8] sm:$0xff]  ;;  %v3586_v56 = vld [vmem:[%s14067_s19 + $0x4f8] sm:$0xff] }
 0xe77   :  { %v3381_v9 = vmul.f32 0.7978846, %v3369_v11  ;;  %v11481_v42 = vmul.f32 %v3404_v59, %v3320_v2  ;;  %7311 = vtanh.f32 %v3386_v43  ;;  %v3510_v27 = vld [vmem:[%s14067_s19 + $0x298] sm:$0xff] }
 0xe78   :  { %v3346_v31 = vmul.f32 %v3334_v60, %v11468_v5  ;;  %v3339_v61 = vmul.f32 %v11474_v53, %v11474_v53  ;;  %3635 = vmatmul.f32.vlgmr.msra.gmra.mxu1 %v11476_v62  ;;  %v3542_v60 = vld [vmem:[%s14067_s19 + $0x398] sm:$0xff] }
 0xe79   :  { %7313 = vtanh.f32 %v3381_v9  ;;  %3658 = vmatmul.f32.vlgmr.msrb.gmra.mxu0 %v11481_v42  ;;  %3803 = vmatpush.msra.mxu1 %v3522_v52 }
 0xe7a   :  { %v3358_v0 = vmul.f32 0.044715, %v3346_v31  ;;  %v3351_v29 = vmul.f32 %v3339_v61, %v11474_v53  ;;  %v3201_v10 = vpop.f32.mrf.mxu2  ;;  %v3224_v38 = vpop.f32.mrf.mxu3  ;;  %3826 = vmatpush.msrb.mxu0 %v3554_v49  ;;  %v3584_v49 = vld [vmem:[%s14067_s19 + $0x4e8] sm:$0xff] }
 0xe7b   :  { %v3202_v55 = vadd.f32 %v3201_v10, %v3028_v46  ;;  %3804 = vmatpush.msra.mxu1 %v3520_v6  ;;  %v3548_v46 = vld [vmem:[%s14067_s19 + $0x3c8] sm:$0xff]  ;;  %v3322_v10 = vmul.f32 0.5, %v11468_v5 }
 0xe7c   :  { %v3370_v30 = vadd.f32 %v3358_v0, %v11468_v5  ;;  %v3363_v32 = vmul.f32 0.044715, %v3351_v29  ;;  %v3244_v3 = vpop.f32.mrf.mxu0  ;;  %v3267_v58 = vpop.f32.mrf.mxu1  ;;  %3827 = vmatpush.msrb.mxu0 %v3552_v1  ;;  %v3508_v31 = vld [vmem:[%s14067_s19 + $0x288] sm:$0xff]  ;;  %v3538_v5 = vld [vmem:[%s14067_s19 + $0x378] sm:$0xff] }
 0xe7d   :  { %v7310_v25 = vpop.eup %7309  ;;  %v11509_v19 = vadd.f32 %v3224_v38, %v3202_v55  ;;  %v3245_v37 = vadd.f32 %v3244_v3, %v3029_v48  ;;  %3805 = vmatpush.msra.mxu1 %v3518_v16  ;;  %v3540_v0 = vld [vmem:[%s14067_s19 + $0x388] sm:$0xff]  ;;  %v3582_v55 = vld [vmem:[%s14067_s19 + $0x4d8] sm:$0xff] }
 0xe7e   :  { %v7312_v41 = vpop.eup %7311  ;;  %v3382_v26 = vmul.f32 0.7978846, %v3370_v30  ;;  %v3409_v34 = vadd.f32 1.0, %v7310_v25  ;;  %v3375_v22 = vadd.f32 %v3363_v32, %v11474_v53  ;;  %3828 = vmatpush.msrb.mxu0 %v3550_v18  ;;  %v3580_v25 = vld [vmem:[%s14067_s19 + $0x4c8] sm:$0xff] }
 0xe7f   :  { %v7314_v39 = vpop.eup %7313  ;;  %v3340_v14 = vmul.f32 %v11509_v19, %v11509_v19  ;;  %v11526_v12 = vadd.f32 %v3267_v58, %v3245_v37  ;;  %v3410_v54 = vadd.f32 1.0, %v7312_v41  ;;  %3806 = vmatpush.msra.mxu1 %v3516_v35  ;;  %v3327_v37 = vmul.f32 0.5, %v11474_v53 }
 0xe80   :  { %v3405_v24 = vadd.f32 1.0, %v7314_v39  ;;  %7315 = vtanh.f32 %v3382_v26  ;;  %v11531_v44 = vmul.f32 %v3409_v34, %v3325_v36  ;;  %v3387_v7 = vmul.f32 0.7978846, %v3375_v22  ;;  %3829 = vmatpush.msrb.mxu0 %v3548_v46  ;;  %v3618_v26 = vld [vmem:[%s14067_s19 + $0x5f8] sm:$0xff]  ;;  %v3536_v22 = vld [vmem:[%s14067_s19 + $0x368] sm:$0xff] }
 0xe81   :  { %v3352_v45 = vmul.f32 %v3340_v14, %v11509_v19  ;;  %v3335_v21 = vmul.f32 %v11526_v12, %v11526_v12  ;;  %v11539_v28 = vmul.f32 %v3410_v54, %v3326_v20  ;;  %3807 = vmatpush.msra.mxu1 %v3514_v51  ;;  %v3504_v20 = vld [vmem:[%s14067_s19 + $0x268] sm:$0xff]  ;;  %v3578_v14 = vld [vmem:[%s14067_s19 + $0x4b8] sm:$0xff] }
 0xe82   :  { %v11544_v63 = vmul.f32 %v3405_v24, %v3321_v33  ;;  %3638 = vmatmul.f32.gmra.mxu1 %v11531_v44  ;;  %7317 = vtanh.f32 %v3387_v7  ;;  %3830 = vmatpush.msrb.mxu0 %v3546_v17  ;;  %v3616_v54 = vld [vmem:[%s14067_s19 + $0x5e8] sm:$0xff]  ;;  %v3502_v7 = vld [vmem:[%s14067_s19 + $0x258] sm:$0xff] }
 0xe83   :  { %v3364_v2 = vmul.f32 0.044715, %v3352_v45  ;;  %v3347_v11 = vmul.f32 %v3335_v21, %v11526_v12  ;;  %v3290_v59 = vpop.f32.mrf.mxu3  ;;  %v3313_v43 = vpop.f32.mrf.mxu2  ;;  %3661 = vmatmul.f32.gmra.mxu0 %v11539_v28  ;;  %3808 = vmatpush.msra.mxu1 %v3512_v15  ;;  %v3534_v15 = vld [vmem:[%s14067_s19 + $0x358] sm:$0xff] }
 0xe84   :  { %v3291_v52 = vadd.f32 %v3290_v59, %v3030_v40  ;;  %v3247_v9 = vpop.f32.mrf.mxu0  ;;  %3681 = vmatmul.f32.vlgmr.msra.gmra.mxu2 %v11544_v63  ;;  %3831 = vmatpush.msrb.mxu0 %v3544_v4  ;;  %v3270_v16 = vpop.f32.mrf.mxu1  ;;  %v3576_v4 = vld [vmem:[%s14067_s19 + $0x4a8] sm:$0xff] }
 0xe85   :  { %v3359_v61 = vmul.f32 0.044715, %v3347_v11  ;;  %v3248_v6 = vadd.f32 %v3247_v9, %v3029_v48  ;;  %3849 = vmatpush.msra.mxu2 %v3586_v56  ;;  %3809 = vmatpush.msra.mxu1 %v3510_v27  ;;  %v3376_v1 = vadd.f32 %v3364_v2, %v11509_v19  ;;  %v3506_v48 = vld [vmem:[%s14067_s19 + $0x278] sm:$0xff]  ;;  %v3500_v27 = vld [vmem:[%s14067_s19 + $0x248] sm:$0xff] }
 0xe86   :  { %v7316_v29 = vpop.eup %7315  ;;  %v11574_v38 = vadd.f32 %v3313_v43, %v3291_v52  ;;  %3832 = vmatpush.msrb.mxu0 %v3542_v60  ;;  %v3532_v2 = vld [vmem:[%s14067_s19 + $0x348] sm:$0xff]  ;;  %v3574_v11 = vld [vmem:[%s14067_s19 + $0x498] sm:$0xff] }
 0xe87   :  { %v3406_v18 = vadd.f32 1.0, %v7316_v29  ;;  %v3371_v30 = vadd.f32 %v3359_v61, %v11526_v12  ;;  %v11583_v32 = vadd.f32 %v3270_v16, %v3248_v6  ;;  %3850 = vmatpush.msra.mxu2 %v3584_v49  ;;  %v3388_v3 = vmul.f32 0.7978846, %v3376_v1  ;;  %3810 = vmatpush.msra.mxu1 %v3508_v31  ;;  %v3612_v59 = vld [vmem:[%s14067_s19 + $0x5c8] sm:$0xff]  ;;  %v3498_v49 = vld [vmem:[%s14067_s19 + $0x238] sm:$0xff] }
 0xe88   :  { %v7318_v58 = vpop.eup %7317  ;;  %v3336_v35 = vmul.f32 %v11574_v38, %v11574_v38  ;;  %3833 = vmatpush.msrb.mxu0 %v3540_v0  ;;  %v3530_v31 = vld [vmem:[%s14067_s19 + $0x338] sm:$0xff]  ;;  %v3328_v6 = vmul.f32 0.5, %v11509_v19  ;;  %v3572_v0 = vld [vmem:[%s14067_s19 + $0x488] sm:$0xff]  ;;  %v3323_v16 = vmul.f32 0.5, %v11526_v12 }
 0xe89   :  { %v11594_v36 = vmul.f32 %v3406_v18, %v3322_v10  ;;  %v3383_v46 = vmul.f32 0.7978846, %v3371_v30  ;;  %v3341_v41 = vmul.f32 %v11583_v32, %v11583_v32  ;;  %3851 = vmatpush.msra.mxu2 %v3582_v55  ;;  %v3411_v34 = vadd.f32 1.0, %v7318_v58  ;;  %3811 = vmatpush.msra.mxu1 %v3506_v48  ;;  %v3610_v29 = vld [vmem:[%s14067_s19 + $0x5b8] sm:$0xff]  ;;  %v3608_v12 = vld [vmem:[%s14067_s19 + $0x5a8] sm:$0xff] }
 0xe8a   :  { %v3348_v53 = vmul.f32 %v3336_v35, %v11574_v38  ;;  %7319 = vtanh.f32 %v3388_v3  ;;  %3834 = vmatpush.msrb.mxu0 %v3538_v5  ;;  %v3570_v18 = vld [vmem:[%s14067_s19 + $0x478] sm:$0xff]  ;;  %v3496_v5 = vld [vmem:[%s14067_s19 + $0x228] sm:$0xff] }
 0xe8b   :  { %7321 = vtanh.f32 %v3383_v46  ;;  %v3353_v51 = vmul.f32 %v3341_v41, %v11583_v32  ;;  %v3293_v39 = vpop.f32.mrf.mxu3  ;;  %3704 = vmatmul.f32.vlgmr.msrb.gmra.mxu3 %v11594_v36  ;;  %3852 = vmatpush.msra.mxu2 %v3580_v25  ;;  %v11610_v33 = vmul.f32 %v3411_v34, %v3327_v37  ;;  %v3316_v21 = vpop.f32.mrf.mxu2  ;;  %v3568_v58 = vld [vmem:[%s14067_s19 + $0x468] sm:$0xff]  ;;  %v3606_v25 = vld [vmem:[%s14067_s19 + $0x598] sm:$0xff] }
 0xe8c   :  { %v3360_v17 = vmul.f32 0.044715, %v3348_v53  ;;  %v3294_v24 = vadd.f32 %v3293_v39, %v3030_v40  ;;  %3872 = vmatpush.msrb.mxu3 %v3618_v26  ;;  %3812 = vmatpush.msra.mxu1 %v3504_v20  ;;  %v3528_v35 = vld [vmem:[%s14067_s19 + $0x328] sm:$0xff]  ;;  %v3494_v37 = vld [vmem:[%s14067_s19 + $0x218] sm:$0xff] }
 0xe8d   :  { %v3365_v45 = vmul.f32 0.044715, %v3353_v51  ;;  %3684 = vmatmul.f32.gmra.mxu2 %v11610_v33  ;;  %3835 = vmatpush.msrb.mxu0 %v3536_v22  ;;  %v3566_v46 = vld [vmem:[%s14067_s19 + $0x458] sm:$0xff]  ;;  %v3604_v34 = vld [vmem:[%s14067_s19 + $0x588] sm:$0xff]  ;;  %v3324_v51 = vmul.f32 0.5, %v11574_v38 }
 0xe8e   :  { %v3372_v40 = vadd.f32 %v3360_v17, %v11574_v38  ;;  %v11634_v56 = vadd.f32 %v3316_v21, %v3294_v24  ;;  %3853 = vmatpush.msra.mxu2 %v3578_v14  ;;  %3873 = vmatpush.msrb.mxu3 %v3616_v54  ;;  %v3526_v41 = vld [vmem:[%s14067_s19 + $0x318] sm:$0xff]  ;;  %v3492_v53 = vld [vmem:[%s14067_s19 + $0x208] sm:$0xff]  ;;  %v3329_v17 = vmul.f32 0.5, %v11583_v32 }
 0xe8f   :  { %3813 = vmatpush.msra.mxu1 %v3502_v7  ;;  %v3377_v43 = vadd.f32 %v3365_v45, %v11583_v32  ;;  %3836 = vmatpush.msrb.mxu0 %v3534_v15  ;;  %v3564_v14 = vld [vmem:[%s14067_s19 + $0x448] sm:$0xff]  ;;  %v3602_v38 = vld [vmem:[%s14067_s19 + $0x578] sm:$0xff] }
 0xe90   :  { %v7320_v60 = vpop.eup %7319  ;;  %v3384_v52 = vmul.f32 0.7978846, %v3372_v40  ;;  %v3342_v9 = vmul.f32 %v11634_v56, %v11634_v56  ;;  %3854 = vmatpush.msra.mxu2 %v3576_v4  ;;  %3874 = vmatpush.msrb.mxu3 %v3614_v47  ;;  %v3524_v54 = vld [vmem:[%s14067_s19 + $0x308] sm:$0xff]  ;;  %v3562_v32 = vld [vmem:[%s14067_s19 + $0x438] sm:$0xff] }
 0xe91   :  { %v7322_v61 = vpop.eup %7321  ;;  %v3412_v1 = vadd.f32 1.0, %v7320_v60  ;;  %3814 = vmatpush.msra.mxu1 %v3500_v27  ;;  %v3389_v10 = vmul.f32 0.7978846, %v3377_v43  ;;  %3837 = vmatpush.msrb.mxu0 %v3532_v2  ;;  %v3600_v45 = vld [vmem:[%s14067_s19 + $0x568] sm:$0xff]  ;;  %v3558_v47 = vld [vmem:[%s14067_s19 + $0x418] sm:$0xff] }
 0xe92   :  { %v3407_v55 = vadd.f32 1.0, %v7322_v61  ;;  %7323 = vtanh.f32 %v3384_v52  ;;  %v3354_v48 = vmul.f32 %v3342_v9, %v11634_v56  ;;  %3855 = vmatpush.msra.mxu2 %v3574_v11  ;;  %3875 = vmatpush.msrb.mxu3 %v3612_v59  ;;  %v3560_v21 = vld [vmem:[%s14067_s19 + $0x428] sm:$0xff]  ;;  %v3594_v59 = vld [vmem:[%s14067_s19 + $0x538] sm:$0xff] }
 0xe93   :  { %v11666_v19 = vmul.f32 %v3412_v1, %v3328_v6  ;;  %7325 = vtanh.f32 %v3389_v10  ;;  %3815 = vmatpush.msra.mxu1 %v3498_v49  ;;  %3838 = vmatpush.msrb.mxu0 %v3530_v31  ;;  %v3596_v40 = vld [vmem:[%s14067_s19 + $0x548] sm:$0xff]  ;;  %v3590_v43 = vld [vmem:[%s14067_s19 + $0x518] sm:$0xff] }
 0xe94   :  { %v11671_v30 = vmul.f32 %v3407_v55, %v3323_v16  ;;  %v3366_v3 = vmul.f32 0.044715, %v3354_v48  ;;  %3856 = vmatpush.msra.mxu2 %v3572_v0  ;;  %3876 = vmatpush.msrb.mxu3 %v3610_v29  ;;  %v3556_v11 = vld [vmem:[%s14067_s19 + $0x408] sm:$0xff] }
 0xe95   :  { %3707 = vmatmul.f32.gmra.mxu3 %v11666_v19  ;;  %3773 = vmatmul.f32.vlgmr.msrb.gmra.mxu2 %v11476_v62  ;;  %v3588_v60 = vld [vmem:[%s14067_s19 + $0x508] sm:$0xff] }
 0xe96   :  { %3727 = vmatmul.f32.vlgmr.msrb.gmra.mxu1 %v11671_v30  ;;  %3857 = vmatpush.msra.mxu2 %v3570_v18  ;;  %v3378_v62 = vadd.f32 %v3366_v3, %v11634_v56 }
 0xe97   :  { %3877 = vmatpush.msrb.mxu3 %v3608_v12  ;;  %3816 = vmatpush.msra.mxu1 %v3496_v5 }
 0xe98   :  { %v7324_v26 = vpop.eup %7323  ;;  %3858 = vmatpush.msra.mxu2 %v3568_v58  ;;  %v3390_v20 = vmul.f32 0.7978846, %v3378_v62  ;;  %3839 = vmatpush.msrb.mxu0 %v3528_v35 }
 0xe99   :  { %v7326_v22 = vpop.eup %7325  ;;  %v3408_v39 = vadd.f32 1.0, %v7324_v26  ;;  %3878 = vmatpush.msrb.mxu3 %v3606_v25  ;;  %3817 = vmatpush.msra.mxu1 %v3494_v37 }
 0xe9a   :  { %3859 = vmatpush.msra.mxu2 %v3566_v46  ;;  %v3413_v24 = vadd.f32 1.0, %v7326_v22  ;;  %7327 = vtanh.f32 %v3390_v20  ;;  %3840 = vmatpush.msrb.mxu0 %v3526_v41 }
 0xe9b   :  { %v3420_v7 = vmul.f32 %v3408_v39, %v3324_v51  ;;  %3879 = vmatpush.msrb.mxu3 %v3604_v34  ;;  %3818 = vmatpush.msra.mxu1 %v3492_v53 }
 0xe9c   :  { %3860 = vmatpush.msra.mxu2 %v3564_v14  ;;  %v3425_v15 = vmul.f32 %v3413_v24, %v3329_v17  ;;  %3841 = vmatpush.msrb.mxu0 %v3524_v54  ;;  %v7389_v14 = vld [vmem:[%s14064_s16 + $0x8] sm:$0x3f]  ;;  %v7390_v24 = vld [vmem:[%s14064_s16] sm:$0x3f] }
 0xe9d   :  { %3750 = vmatmul.f32.vlgmr.msra.gmra.mxu0 %v3420_v7  ;;  %3796 = vmatmul.f32.vlgmr.msra.gmra.mxu3 %v11481_v42  ;;  %v3598_v42 = vld [vmem:[%s14067_s19 + $0x558] sm:$0xff]  ;;  %v3900_v54 = vperm.slane %v7389_v14, 5  ;;  %v6628_v14 = vld [vmem:[%s14061_s13 + $0x2a8] sm:$0xff] }
 0xe9e   :  { %3880 = vmatpush.msrb.mxu3 %v3602_v38  ;;  %3730 = vmatmul.f32.gmra.mxu1 %v3425_v15 }
 0xe9f   :  { %3776 = vmatmul.f32.gmra.mxu2 %v11531_v44  ;;  %v3330_v44 = vmul.f32 0.5, %v11634_v56  ;;  %v3592_v56 = vld [vmem:[%s14067_s19 + $0x528] sm:$0xff] }
 0xea0   :  { %v7328_v4 = vpop.eup %7327  ;;  %3861 = vmatpush.msra.mxu2 %v3562_v32  ;;  %3881 = vmatpush.msrb.mxu3 %v3600_v45 }
 0xea1   :  { %v3414_v27 = vadd.f32 1.0, %v7328_v4 }
 0xea2   :  { %3862 = vmatpush.msra.mxu2 %v3560_v21  ;;  %3882 = vmatpush.msrb.mxu3 %v3598_v42 }
 0xea3   :  { %v3426_v2 = vmul.f32 %v3414_v27, %v3330_v44 }
 0xea4   :  { %3863 = vmatpush.msra.mxu2 %v3558_v47  ;;  %3883 = vmatpush.msrb.mxu3 %v3596_v40 }
 0xea5   :  { %3753 = vmatmul.f32.gmra.mxu0 %v3426_v2  ;;  %3799 = vmatmul.f32.gmra.mxu3 %v11539_v28 }
 0xea6   :  { %3864 = vmatpush.msra.mxu2 %v3556_v11  ;;  %3884 = vmatpush.msrb.mxu3 %v3594_v59 }
 0xea7   :  { %3819 = vmatmul.f32.vlgmr.msra.gmra.mxu1 %v11544_v63  ;;  %3865 = vmatmul.f32.vlgmr.msra.gmra.mxu2 %v11671_v30 }
 0xea8   :  { %3885 = vmatpush.msrb.mxu3 %v3592_v56 }
 0xeaa   :  { %3886 = vmatpush.msrb.mxu3 %v3590_v43 }
 0xeac   :  { %3887 = vmatpush.msrb.mxu3 %v3588_v60  ;;  %v6604_v60 = vld [vmem:[%s14060_s12 + $0x2b8] sm:$0xff] }
 0xead   :  { %3842 = vmatmul.f32.vlgmr.msrb.gmra.mxu0 %v11594_v36  ;;  %3888 = vmatmul.f32.vlgmr.msrb.gmra.mxu3 %v3420_v7  ;;  %v3899_v7 = vperm.slane %v7390_v24, 5  ;;  %v6627_v24 = vld [vmem:[%s14061_s13 + $0x2a0] sm:$0xff] }
 0xeae   :  { %4007 = vmatpush.msrb.mxu1 %v6604_v60  ;;  %v6648_v60 = vld [vmem:[%s14062_s14 + $0x278] sm:$0xff] }
 0xeaf   :  { %3822 = vmatmul.f32.gmra.mxu1 %v11610_v33  ;;  %3868 = vmatmul.f32.gmra.mxu2 %v3425_v15 }
 0xeb5   :  { %3845 = vmatmul.f32.gmra.mxu0 %v11666_v19  ;;  %3891 = vmatmul.f32.gmra.mxu3 %v3426_v2 }
 0xef5   :  { %v3636_v28 = vpop.f32.mrf.mxu1 }
 0xef6   :  { %v3659_v52 = vpop.f32.mrf.mxu0 }
 0xef7   :  { %v3660_v48 = vadd.f32 %v3659_v52, %v3636_v28  ;;  %v6612_v28 = vld [vmem:[%s14060_s12 + $0x2f8] sm:$0xff]  ;;  %v6602_v52 = vld [vmem:[%s14060_s12 + $0x2a8] sm:$0xff] }
 0xef8   :  { %4038 = vmatpush.msra.mxu0 %v6612_v28  ;;  %v6664_v28 = vld [vmem:[%s14062_s14 + $0x2f8] sm:$0xff] }
 0xeff   :  { %v3639_v9 = vpop.f32.mrf.mxu1 }
 0xf00   :  { %v3662_v61 = vpop.f32.mrf.mxu0 }
 0xf01   :  { %v3663_v58 = vadd.f32 %v3662_v61, %v3639_v9  ;;  %v6610_v9 = vld [vmem:[%s14060_s12 + $0x2e8] sm:$0xff]  ;;  %v6630_v61 = vld [vmem:[%s14061_s13 + $0x2b8] sm:$0xff] }
 0xf02   :  { %4078 = vmatpush.msrb.mxu2 %v6630_v61  ;;  %v6646_v61 = vld [vmem:[%s14062_s14 + $0x268] sm:$0xff] }
 0xf07   :  { %v3682_v63 = vpop.f32.mrf.mxu2 }
 0xf08   :  { %v3683_v19 = vadd.f32 %v3682_v63, %v3660_v48  ;;  %v6611_v63 = vld [vmem:[%s14060_s12 + $0x2f0] sm:$0xff]  ;;  %v6656_v48 = vld [vmem:[%s14062_s14 + $0x2b8] sm:$0xff] }
 0xf09   :  { %4039 = vmatpush.msra.mxu0 %v6611_v63  ;;  %v6637_v63 = vld [vmem:[%s14061_s13 + $0x2f0] sm:$0xff] }
 0xf0b   :  { %4040 = vmatpush.msra.mxu0 %v6610_v9  ;;  %v6663_v9 = vld [vmem:[%s14062_s14 + $0x2f0] sm:$0xff] }
 0xf0e   :  { %v3705_v49 = vpop.f32.mrf.mxu3 }
 0xf0f   :  { %v3706_v12 = vadd.f32 %v3705_v49, %v3683_v19  ;;  %v6601_v49 = vld [vmem:[%s14060_s12 + $0x2a0] sm:$0xff]  ;;  %v6596_v19 = vld [vmem:[%s14060_s12 + $0x278] sm:$0xff] }
 0xf10   :  { %v3685_v31 = vpop.f32.mrf.mxu2 }
 0xf11   :  { %v3686_v62 = vadd.f32 %v3685_v31, %v3663_v58  ;;  %v6609_v31 = vld [vmem:[%s14060_s12 + $0x2e0] sm:$0xff] }
 0xf12   :  { %4041 = vmatpush.msra.mxu0 %v6609_v31  ;;  %v6636_v31 = vld [vmem:[%s14061_s13 + $0x2e8] sm:$0xff] }
 0xf13   :  { %v3728_v6 = vpop.f32.mrf.mxu1 }
 0xf14   :  { %v3729_v25 = vadd.f32 %v3728_v6, %v3706_v12  ;;  %v6600_v6 = vld [vmem:[%s14060_s12 + $0x298] sm:$0xff] }
 0xf18   :  { %v3708_v1 = vpop.f32.mrf.mxu3  ;;  %v3774_v0 = vpop.f32.mrf.mxu2 }
 0xf19   :  { %v3709_v26 = vadd.f32 %v3708_v1, %v3686_v62  ;;  %v6608_v1 = vld [vmem:[%s14060_s12 + $0x2d8] sm:$0xff] }
 0xf1a   :  { %v3751_v29 = vpop.f32.mrf.mxu0  ;;  %4042 = vmatpush.msra.mxu0 %v6608_v1  ;;  %v6619_v1 = vld [vmem:[%s14061_s13 + $0x260] sm:$0xff] }
 0xf1b   :  { %v3731_v10 = vpop.f32.mrf.mxu1  ;;  %v3752_v46 = vadd.f32 %v3751_v29, %v3729_v25  ;;  %v6599_v29 = vld [vmem:[%s14060_s12 + $0x290] sm:$0xff] }
 0xf1c   :  { %v3732_v22 = vadd.f32 %v3731_v10, %v3709_v26  ;;  %v6607_v10 = vld [vmem:[%s14060_s12 + $0x2d0] sm:$0xff] }
 0xf1d   :  { %v3895_v17 = vadd.f32 %v3752_v46, %v10509_v23  ;;  %4043 = vmatpush.msra.mxu0 %v6607_v10  ;;  %v6661_v10 = vld [vmem:[%s14062_s14 + $0x2e0] sm:$0xff] }
 0xf1f   :  { %v11770_v42 = vadd.f32 %v3899_v7, %v3895_v17  ;;  %v6594_v17 = vld [vmem:[%s14060_s12 + $0x268] sm:$0xff] }
 0xf20   :  { %v3797_v36 = vpop.f32.mrf.mxu3 }
 0xf21   :  { %v3798_v18 = vadd.f32 %v3797_v36, %v3774_v0  ;;  %v6629_v0 = vld [vmem:[%s14061_s13 + $0x2b0] sm:$0xff]  ;;  %v6598_v36 = vld [vmem:[%s14060_s12 + $0x288] sm:$0xff] }
 0xf22   :  { %v3754_v16 = vpop.f32.mrf.mxu0  ;;  %v3777_v55 = vpop.f32.mrf.mxu2  ;;  %4079 = vmatpush.msrb.mxu2 %v6629_v0  ;;  %v6635_v0 = vld [vmem:[%s14061_s13 + $0x2e0] sm:$0xff] }
 0xf23   :  { %v3755_v15 = vadd.f32 %v3754_v16, %v3732_v22  ;;  %v6606_v16 = vld [vmem:[%s14060_s12 + $0x2c8] sm:$0xff] }
 0xf24   :  { %v3820_v33 = vpop.f32.mrf.mxu1  ;;  %4044 = vmatpush.msra.mxu0 %v6606_v16  ;;  %4080 = vmatpush.msrb.mxu2 %v6628_v14  ;;  %v6634_v16 = vld [vmem:[%s14061_s13 + $0x2d8] sm:$0xff] }
 0xf25   :  { %v3821_v3 = vadd.f32 %v3820_v33, %v3798_v18  ;;  %v3897_v47 = vadd.f32 %v3755_v15, %v10520_v50  ;;  %v6605_v33 = vld [vmem:[%s14060_s12 + $0x2c0] sm:$0xff]  ;;  %v6626_v15 = vld [vmem:[%s14061_s13 + $0x298] sm:$0xff] }
 0xf26   :  { %4045 = vmatpush.msra.mxu0 %v6605_v33  ;;  %4081 = vmatpush.msrb.mxu2 %v6627_v24  ;;  %v6660_v33 = vld [vmem:[%s14062_s14 + $0x2d8] sm:$0xff] }
 0xf27   :  { %v11776_v11 = vadd.f32 %v3899_v7, %v3897_v47  ;;  %v6653_v7 = vld [vmem:[%s14062_s14 + $0x2a0] sm:$0xff]  ;;  %v6651_v47 = vld [vmem:[%s14062_s14 + $0x290] sm:$0xff] }
 0xf28   :  { %v3800_v30 = vpop.f32.mrf.mxu3  ;;  %4149 = vmatpush.msrb.mxu0 %v6656_v48  ;;  %4082 = vmatpush.msrb.mxu2 %v6626_v15  ;;  %v6617_v48 = vld [vmem:[%s14061_s13 + $0x250] sm:$0xff]  ;;  %v6588_v15 = vld [vmem:[%s14064_s16 + $0x18] sm:$0x3f] }
 0xf29   :  { %v3801_v34 = vadd.f32 %v3800_v30, %v3777_v55  ;;  %v3912_v56 = vsel %vm1595_vm2, %v11776_v11, 0.0  ;;  %v6597_v55 = vld [vmem:[%s14060_s12 + $0x280] sm:$0xff] }
 0xf2a   :  { %v3843_v5 = vpop.f32.mrf.mxu0  ;;  %v3866_v37 = vpop.f32.mrf.mxu2 }
 0xf2b   :  { %v3844_v35 = vadd.f32 %v3843_v5, %v3821_v3 }
 0xf2c   :  { %v3823_v41 = vpop.f32.mrf.mxu1 }
 0xf2d   :  { %v3867_v20 = vadd.f32 %v3866_v37, %v3844_v35  ;;  %v3824_v51 = vadd.f32 %v3823_v41, %v3801_v34 }
 0xf30   :  { %v3889_v53 = vpop.f32.mrf.mxu3 }
 0xf31   :  { %v3890_v39 = vadd.f32 %v3889_v53, %v3867_v20 }
 0xf32   :  { %v3846_v38 = vpop.f32.mrf.mxu0  ;;  %v3869_v4 = vpop.f32.mrf.mxu2 }
 0xf33   :  { %v3896_v32 = vadd.f32 %v3890_v39, %v10506_v8  ;;  %v3847_v45 = vadd.f32 %v3846_v38, %v3824_v51  ;;  %v6655_v51 = vld [vmem:[%s14062_s14 + $0x2b0] sm:$0xff]  ;;  %v6593_v38 = vld [vmem:[%s14060_s12 + $0x260] sm:$0xff] }
 0xf34   :  { %4150 = vmatpush.msrb.mxu0 %v6655_v51  ;;  %v6595_v39 = vld [vmem:[%s14060_s12 + $0x270] sm:$0xff] }
 0xf35   :  { %v11768_v21 = vadd.f32 %v3900_v54, %v3896_v32  ;;  %v3870_v40 = vadd.f32 %v3869_v4, %v3847_v45  ;;  %v6652_v32 = vld [vmem:[%s14062_s14 + $0x298] sm:$0xff]  ;;  %v6625_v4 = vld [vmem:[%s14061_s13 + $0x290] sm:$0xff] }
 0xf36   :  { %v6592_v45 = vld [vmem:[%s14060_s12 + $0x258] sm:$0xff]  ;;  %4083 = vmatpush.msrb.mxu2 %v6625_v4 }
 0xf37   :  { %v3908_v23 = vsel %vm125_vm0, %v11768_v21, 0.0 }
 0xf38   :  { %v3892_v44 = vpop.f32.mrf.mxu3  ;;  %v3909_v27 = vadd.f32 %v3908_v23, %v11770_v42  ;;  %v6624_v23 = vld [vmem:[%s14061_s13 + $0x288] sm:$0xff] }
 0xf39   :  { %v3893_v2 = vadd.f32 %v3892_v44, %v3870_v40  ;;  %v6591_v40 = vld [vmem:[%s14060_s12 + $0x250] sm:$0xff]  ;;  %4084 = vmatpush.msrb.mxu2 %v6624_v23  ;;  %v6650_v44 = vld [vmem:[%s14062_s14 + $0x288] sm:$0xff]  ;;  %v3965_v23 = vperm.slane %v6588_v15, 0 }
 0xf3a   :  { %3910 = vadd.xlane.f32.xlu2 %v3909_v27  ;;  %v6590_v27 = vld [vmem:[%s14060_s12 + $0x248] sm:$0xff] }
 0xf3b   :  { %v3898_v8 = vadd.f32 %v3893_v2, %v10517_v57  ;;  %v6603_v57 = vld [vmem:[%s14060_s12 + $0x2b0] sm:$0xff]  ;;  %v6623_v2 = vld [vmem:[%s14061_s13 + $0x280] sm:$0xff] }
 0xf3c   :  { %4008 = vmatpush.msrb.mxu1 %v6603_v57  ;;  %4085 = vmatpush.msrb.mxu2 %v6623_v2  ;;  %v6621_v57 = vld [vmem:[%s14061_s13 + $0x270] sm:$0xff] }
 0xf3d   :  { %v11779_v59 = vadd.f32 %v3900_v54, %v3898_v8  ;;  %v6654_v54 = vld [vmem:[%s14062_s14 + $0x2a8] sm:$0xff]  ;;  %v6649_v8 = vld [vmem:[%s14062_s14 + $0x280] sm:$0xff] }
 0xf3e   :  { %4009 = vmatpush.msrb.mxu1 %v6602_v52  ;;  %4151 = vmatpush.msrb.mxu0 %v6654_v54  ;;  %v6647_v52 = vld [vmem:[%s14062_s14 + $0x270] sm:$0xff] }
 0xf3f   :  { %v3913_v50 = vsel %vm1597_vm3, %v11779_v59, 0.0 }
 0xf40   :  { %v3914_v43 = vadd.f32 %v3913_v50, %v3912_v56  ;;  %4010 = vmatpush.msrb.mxu1 %v6601_v49  ;;  %4152 = vmatpush.msrb.mxu0 %v6653_v7  ;;  %v6589_v56 = vld [vmem:[%s14060_s12 + $0x240] sm:$0xff]  ;;  %v6622_v50 = vld [vmem:[%s14061_s13 + $0x278] sm:$0xff]  ;;  %v6620_v49 = vld [vmem:[%s14061_s13 + $0x268] sm:$0xff] }
 0xf41   :  { %4086 = vmatpush.msrb.mxu2 %v6622_v50 }
 0xf42   :  { %3915 = vadd.xlane.f32.xlu0 %v3914_v43  ;;  %4011 = vmatpush.msrb.mxu1 %v6600_v6  ;;  %v6638_v43 = vld [vmem:[%s14061_s13 + $0x2f8] sm:$0xff]  ;;  %v6662_v6 = vld [vmem:[%s14062_s14 + $0x2e8] sm:$0xff] }
 0xf43   :  { %4153 = vmatpush.msrb.mxu0 %v6652_v32  ;;  %4109 = vmatpush.msra.mxu3 %v6638_v43 }
 0xf44   :  { %4012 = vmatpush.msrb.mxu1 %v6599_v29  ;;  %4087 = vmatpush.msrb.mxu2 %v6621_v57  ;;  %v6645_v29 = vld [vmem:[%s14062_s14 + $0x260] sm:$0xff] }
 0xf45   :  { %4154 = vmatpush.msrb.mxu0 %v6651_v47  ;;  %4110 = vmatpush.msra.mxu3 %v6637_v63 }
 0xf46   :  { %4013 = vmatpush.msrb.mxu1 %v6598_v36  ;;  %4088 = vmatpush.msrb.mxu2 %v6620_v49  ;;  %v6618_v36 = vld [vmem:[%s14061_s13 + $0x258] sm:$0xff] }
 0xf47   :  { %4155 = vmatpush.msrb.mxu0 %v6650_v44  ;;  %4111 = vmatpush.msra.mxu3 %v6636_v31  ;;  %v6705_v49 = vld [vmem:[%s14060_s12 + $0x378] sm:$0xff]  ;;  %v6704_v31 = vld [vmem:[%s14060_s12 + $0x370] sm:$0xff] }
 0xf48   :  { %4014 = vmatpush.msrb.mxu1 %v6597_v55  ;;  %4089 = vmatpush.msrb.mxu2 %v6619_v1  ;;  %v6644_v55 = vld [vmem:[%s14062_s14 + $0x258] sm:$0xff] }
 0xf49   :  { %4156 = vmatpush.msrb.mxu0 %v6649_v8  ;;  %4112 = vmatpush.msra.mxu3 %v6635_v0  ;;  %v3971_v8 = vperm.slane %v6588_v15, 1  ;;  %v6703_v0 = vld [vmem:[%s14060_s12 + $0x368] sm:$0xff] }
 0xf4a   :  { %4015 = vmatpush.msrb.mxu1 %v6596_v19  ;;  %4090 = vmatpush.msrb.mxu2 %v6618_v36  ;;  %v6643_v19 = vld [vmem:[%s14062_s14 + $0x250] sm:$0xff] }
 0xf4b   :  { %4157 = vmatpush.msrb.mxu0 %v6648_v60  ;;  %4113 = vmatpush.msra.mxu3 %v6634_v16 }
 0xf4c   :  { %4016 = vmatpush.msrb.mxu1 %v6595_v39  ;;  %4091 = vmatpush.msrb.mxu2 %v6617_v48  ;;  %v6727_v48 = vld [vmem:[%s14061_s13 + $0x358] sm:$0xff] }
 0xf4d   :  { %4158 = vmatpush.msrb.mxu0 %v6647_v52 }
 0xf4e   :  { %4017 = vmatpush.msrb.mxu1 %v6594_v17 }
 0xf4f   :  { %4159 = vmatpush.msrb.mxu0 %v6646_v61  ;;  %v6730_v61 = vld [vmem:[%s14061_s13 + $0x370] sm:$0xff] }
 0xf50   :  { %4018 = vmatpush.msrb.mxu1 %v6593_v38  ;;  %v6587_v38 = vld [vmem:[%s14064_s16 + $0x10] sm:$0x3f] }
 0xf51   :  { %4160 = vmatpush.msrb.mxu0 %v6645_v29  ;;  %v3970_v2 = vperm.slane %v6587_v38, 1  ;;  %v6729_v29 = vld [vmem:[%s14061_s13 + $0x368] sm:$0xff] }
 0xf52   :  { %4019 = vmatpush.msrb.mxu1 %v6592_v45 }
 0xf53   :  { %4161 = vmatpush.msrb.mxu0 %v6644_v55 }
 0xf54   :  { %4020 = vmatpush.msrb.mxu1 %v6591_v40  ;;  %v3964_v40 = vperm.slane %v6587_v38, 0  ;;  %v6716_v38 = vld [vmem:[%s14061_s13 + $0x300] sm:$0xff] }
 0xf55   :  { %4162 = vmatpush.msrb.mxu0 %v6643_v19  ;;  %v6726_v19 = vld [vmem:[%s14061_s13 + $0x350] sm:$0xff] }
 0xf56   :  { %4021 = vmatpush.msrb.mxu1 %v6590_v27 }
 0xf58   :  { %4022 = vmatpush.msrb.mxu1 %v6589_v56 }
 0xf5a   :  { %4180 = vmatpush.msra.mxu1 %v6664_v28 }
 0xf5c   :  { %4181 = vmatpush.msra.mxu1 %v6663_v9 }
 0xf5e   :  { %4182 = vmatpush.msra.mxu1 %v6662_v6 }
 0xf60   :  { %4183 = vmatpush.msra.mxu1 %v6661_v10 }
 0xf62   :  { %4184 = vmatpush.msra.mxu1 %v6660_v33  ;;  %v6701_v33 = vld [vmem:[%s14060_s12 + $0x358] sm:$0xff] }
 0xfad   :  { %v3911_v18 = vpop.xlane.xlu2 %3910 }
 0xfae   :  { %v3917_v30 = vmul.f32 %v3911_v18, %v9557_v13  ;;  %v6633_v18 = vld [vmem:[%s14061_s13 + $0x2d0] sm:$0xff] }
 0xfaf   :  { %4114 = vmatpush.msra.mxu3 %v6633_v18  ;;  %v6700_v18 = vld [vmem:[%s14060_s12 + $0x350] sm:$0xff] }
 0xfb0   :  { %v11847_v3 = vsub.f32 %v11770_v42, %v3917_v30  ;;  %v11850_v12 = vsub.f32 %v11768_v21, %v3917_v30  ;;  %v6659_v30 = vld [vmem:[%s14062_s14 + $0x2d0] sm:$0xff] }
 0xfb1   :  { %4185 = vmatpush.msra.mxu1 %v6659_v30  ;;  %v6699_v30 = vld [vmem:[%s14060_s12 + $0x348] sm:$0xff] }
 0xfb2   :  { %v3923_v5 = vmul.f32 %v11847_v3, %v11847_v3  ;;  %v3924_v58 = vmul.f32 %v11850_v12, %v11850_v12 }
 0xfb4   :  { %v3927_v35 = vsel %vm125_vm0, %v3924_v58, 0.0  ;;  %v6632_v58 = vld [vmem:[%s14061_s13 + $0x2c8] sm:$0xff] }
 0xfb5   :  { %v3916_v25 = vpop.xlane.xlu0 %3915  ;;  %v3928_v37 = vadd.f32 %v3927_v35, %v3923_v5  ;;  %v6616_v5 = vld [vmem:[%s14061_s13 + $0x248] sm:$0xff]  ;;  %4115 = vmatpush.msra.mxu3 %v6632_v58  ;;  %v6698_v58 = vld [vmem:[%s14060_s12 + $0x340] sm:$0xff] }
 0xfb6   :  { %v3918_v62 = vmul.f32 %v3916_v25, %v9557_v13  ;;  %4092 = vmatpush.msrb.mxu2 %v6616_v5  ;;  %v6642_v35 = vld [vmem:[%s14062_s14 + $0x248] sm:$0xff] }
 0xfb7   :  { %3929 = vadd.xlane.f32.xlu1 %v3928_v37  ;;  %v6658_v25 = vld [vmem:[%s14062_s14 + $0x2c8] sm:$0xff]  ;;  %4163 = vmatpush.msrb.mxu0 %v6642_v35  ;;  %v6615_v37 = vld [vmem:[%s14061_s13 + $0x240] sm:$0xff] }
 0xfb8   :  { %v11859_v46 = vsub.f32 %v11776_v11, %v3918_v62  ;;  %v11862_v41 = vsub.f32 %v11779_v59, %v3918_v62  ;;  %v6631_v62 = vld [vmem:[%s14061_s13 + $0x2c0] sm:$0xff]  ;;  %4186 = vmatpush.msra.mxu1 %v6658_v25  ;;  %4093 = vmatpush.msrb.mxu2 %v6615_v37  ;;  %v6725_v5 = vld [vmem:[%s14061_s13 + $0x348] sm:$0xff]  ;;  %v6697_v25 = vld [vmem:[%s14060_s12 + $0x338] sm:$0xff] }
 0xfb9   :  { %4116 = vmatpush.msra.mxu3 %v6631_v62  ;;  %v6724_v35 = vld [vmem:[%s14061_s13 + $0x340] sm:$0xff]  ;;  %v6723_v37 = vld [vmem:[%s14061_s13 + $0x338] sm:$0xff]  ;;  %v6696_v62 = vld [vmem:[%s14060_s12 + $0x330] sm:$0xff] }
 0xfba   :  { %v3925_v26 = vmul.f32 %v11859_v46, %v11859_v46  ;;  %v3926_v34 = vmul.f32 %v11862_v41, %v11862_v41 }
 0xfbc   :  { %v3931_v20 = vsel %vm1595_vm2, %v3925_v26, 0.0  ;;  %v3932_v53 = vsel %vm1597_vm3, %v3926_v34, 0.0  ;;  %v6641_v26 = vld [vmem:[%s14062_s14 + $0x240] sm:$0xff] }
 0xfbd   :  { %v3933_v22 = vadd.f32 %v3932_v53, %v3931_v20  ;;  %v6657_v34 = vld [vmem:[%s14062_s14 + $0x2c0] sm:$0xff]  ;;  %4164 = vmatpush.msrb.mxu0 %v6641_v26  ;;  %v6722_v26 = vld [vmem:[%s14061_s13 + $0x330] sm:$0xff] }
 0xfbe   :  { %4187 = vmatpush.msra.mxu1 %v6657_v34  ;;  %v6695_v34 = vld [vmem:[%s14060_s12 + $0x328] sm:$0xff] }
 0xfbf   :  { %3934 = vadd.xlane.f32.xlu2 %v3933_v22 }
0x102a   :  { %v3930_v20 = vpop.xlane.xlu1 %3929 }
0x102b   :  { %v3936_v53 = vmul.f32 %v3930_v20, %v9557_v13  ;;  %v6721_v20 = vld [vmem:[%s14061_s13 + $0x328] sm:$0xff] }
0x102d   :  { %v3938_v22 = vadd.f32 1e-05, %v3936_v53  ;;  %v6694_v53 = vld [vmem:[%s14060_s12 + $0x320] sm:$0xff] }
0x102f   :  { %7329 = vrsqrt.f32 %v3938_v22  ;;  %vm3946_vm7 = vweird.f32 %v3938_v22 }
0x1032   :  { %v3935_v51 = vpop.xlane.xlu2 %3934 }
0x1033   :  { %v3937_v39 = vmul.f32 %v3935_v51, %v9557_v13  ;;  %v6693_v51 = vld [vmem:[%s14060_s12 + $0x318] sm:$0xff] }
0x1035   :  { %v7330_v14 = vpop.eup %7329  ;;  %v3939_v54 = vadd.f32 1e-05, %v3937_v39  ;;  %v6719_v39 = vld [vmem:[%s14061_s13 + $0x318] sm:$0xff] }
0x1036   :  { %v3941_v17 = vmul.f32 %v7330_v14, %v3938_v22  ;;  %vm3947_vm6 = vweird.f32 %v7330_v14  ;;  %v6720_v22 = vld [vmem:[%s14061_s13 + $0x320] sm:$0xff] }
0x1037   :  { %7331 = vrsqrt.f32 %v3939_v54  ;;  %vm3948_vm8 = vmor %vm3946_vm7, %vm3947_vm6  ;;  %vm3956_vm10 = vweird.f32 %v3939_v54  ;;  %vm6263_vm7 = vcmask 519170  }
0x1038   :  { %v3942_v24 = vmul.f32 %v7330_v14, %v3941_v17  ;;  %v6691_v17 = vld [vmem:[%s14060_s12 + $0x308] sm:$0xff] }
0x103a   :  { %v3943_v7 = vmul.f32 0.5, %v3942_v24  ;;  %v6717_v24 = vld [vmem:[%s14061_s13 + $0x308] sm:$0xff] }
0x103c   :  { %v3944_v32 = vsub.f32 1.5, %v3943_v7  ;;  %v6690_v7 = vld [vmem:[%s14060_s12 + $0x300] sm:$0xff] }
0x103d   :  { %v7332_v45 = vpop.eup %7331 }
0x103e   :  { %v3945_v4 = vmul.f32 %v7330_v14, %v3944_v32  ;;  %v3951_v47 = vmul.f32 %v7332_v45, %v3939_v54  ;;  %vm3957_vm9 = vweird.f32 %v7332_v45  ;;  %v6718_v54 = vld [vmem:[%s14061_s13 + $0x310] sm:$0xff] }
0x103f   :  { %vm3958_vm13 = vmor %vm3956_vm10, %vm3957_vm9 }
0x1040   :  { %v3949_v44 = vsel %vm3948_vm8, %v7330_v14, %v3945_v4  ;;  %v3952_v27 = vmul.f32 %v7332_v45, %v3951_v47  ;;  %v6692_v14 = vld [vmem:[%s14060_s12 + $0x310] sm:$0xff]  ;;  %vm6264_vm8 = vmor %vm6263_vm7, %vm1595_vm2 }
0x1041   :  { %v3960_v56 = vmul.f32 %v3949_v44, %v11847_v3  ;;  %v3961_v50 = vmul.f32 %v3949_v44, %v11850_v12  ;;  %v6731_v3 = vld [vmem:[%s14061_s13 + $0x378] sm:$0xff] }
0x1042   :  { %v3953_v43 = vmul.f32 0.5, %v3952_v27 }
0x1043   :  { %v3966_v60 = vmul.f32 %v3964_v40, %v3960_v56  ;;  %v3967_v28 = vmul.f32 %v3965_v23, %v3961_v50  ;;  %v6713_v50 = vld [vmem:[%s14060_s12 + $0x3b8] sm:$0xff] }
0x1044   :  { %v3954_v57 = vsub.f32 1.5, %v3953_v43 }
0x1045   :  { %v12036_v63 = vadd.f32 %v3970_v2, %v3966_v60  ;;  %v12038_v52 = vadd.f32 %v3971_v8, %v3967_v28  ;;  %v6712_v60 = vld [vmem:[%s14060_s12 + $0x3b0] sm:$0xff] }
0x1046   :  { %v3955_v9 = vmul.f32 %v7332_v45, %v3954_v57 }
0x1047   :  { %4023 = vmatmul.f32.vlgmr.msrb.gmra.mxu1 %v12036_v63  ;;  %6613 = vmatmul.msk.f32.vlgmr.msra.gmra.mxu0 %vm125_vm0, %v12038_v52 }
0x1048   :  { %v3959_v12 = vsel %vm3958_vm13, %v7332_v45, %v3955_v9  ;;  %4094 = vmatmul.f32.vlgmr.msrb.gmra.mxu2 %v12036_v63  ;;  %6639 = vmatmul.msk.f32.vlgmr.msra.gmra.mxu3 %vm125_vm0, %v12038_v52  ;;  %v6711_v9 = vld [vmem:[%s14060_s12 + $0x3a8] sm:$0xff] }
0x1049   :  { %v3962_v6 = vmul.f32 %v3959_v12, %v11859_v46  ;;  %v3963_v1 = vmul.f32 %v3959_v12, %v11862_v41  ;;  %4330 = vmatpush.msrb.mxu1 %v6705_v49  ;;  %4401 = vmatpush.msra.mxu0 %v6731_v3  ;;  %v6702_v46 = vld [vmem:[%s14060_s12 + $0x360] sm:$0xff] }
0x104a   :  { %v6728_v41 = vld [vmem:[%s14061_s13 + $0x360] sm:$0xff] }
0x104b   :  { %v3968_v10 = vmul.f32 %v3964_v40, %v3962_v6  ;;  %v3969_v36 = vmul.f32 %v3965_v23, %v3963_v1  ;;  %4331 = vmatpush.msrb.mxu1 %v6704_v31  ;;  %4402 = vmatpush.msra.mxu0 %v6730_v61  ;;  %v6710_v3 = vld [vmem:[%s14060_s12 + $0x3a0] sm:$0xff]  ;;  %v6709_v31 = vld [vmem:[%s14060_s12 + $0x398] sm:$0xff]  ;;  %v6708_v6 = vld [vmem:[%s14060_s12 + $0x390] sm:$0xff] }
0x104c   :  { %v6707_v1 = vld [vmem:[%s14060_s12 + $0x388] sm:$0xff] }
0x104d   :  { %v12072_v16 = vadd.f32 %v3970_v2, %v3968_v10  ;;  %v12074_v55 = vadd.f32 %v3971_v8, %v3969_v36  ;;  %4332 = vmatpush.msrb.mxu1 %v6703_v0  ;;  %4403 = vmatpush.msra.mxu0 %v6729_v29  ;;  %v6706_v0 = vld [vmem:[%s14060_s12 + $0x380] sm:$0xff]  ;;  %v6757_v29 = vld [vmem:[%s14062_s14 + $0x378] sm:$0xff]  ;;  %v6756_v10 = vld [vmem:[%s14062_s14 + $0x370] sm:$0xff] }
0x104e   :  { %v6755_v36 = vld [vmem:[%s14062_s14 + $0x368] sm:$0xff] }
0x104f   :  { %4333 = vmatpush.msrb.mxu1 %v6702_v46  ;;  %4404 = vmatpush.msra.mxu0 %v6728_v41  ;;  %v6754_v46 = vld [vmem:[%s14062_s14 + $0x360] sm:$0xff]  ;;  %v6753_v41 = vld [vmem:[%s14062_s14 + $0x358] sm:$0xff] }
0x1050   :  { %4026 = vmatmul.f32.gmra.mxu1 %v12072_v16  ;;  %6614 = vmatmul.msk.f32.gmra.mxu0 %vm125_vm0, %v12074_v55 }
0x1051   :  { %4097 = vmatmul.f32.gmra.mxu2 %v12072_v16  ;;  %6640 = vmatmul.msk.f32.gmra.mxu3 %vm125_vm0, %v12074_v55 }
0x1052   :  { %4334 = vmatpush.msrb.mxu1 %v6701_v33  ;;  %4405 = vmatpush.msra.mxu0 %v6727_v48  ;;  %v6752_v33 = vld [vmem:[%s14062_s14 + $0x350] sm:$0xff]  ;;  %v6751_v48 = vld [vmem:[%s14062_s14 + $0x348] sm:$0xff] }
0x1054   :  { %4335 = vmatpush.msrb.mxu1 %v6700_v18  ;;  %4406 = vmatpush.msra.mxu0 %v6726_v19  ;;  %v6750_v18 = vld [vmem:[%s14062_s14 + $0x340] sm:$0xff]  ;;  %v6749_v19 = vld [vmem:[%s14062_s14 + $0x338] sm:$0xff] }
0x1056   :  { %4336 = vmatpush.msrb.mxu1 %v6699_v30  ;;  %4407 = vmatpush.msra.mxu0 %v6725_v5  ;;  %v6748_v30 = vld [vmem:[%s14062_s14 + $0x330] sm:$0xff]  ;;  %v6747_v5 = vld [vmem:[%s14062_s14 + $0x328] sm:$0xff] }
0x1058   :  { %4337 = vmatpush.msrb.mxu1 %v6698_v58  ;;  %4408 = vmatpush.msra.mxu0 %v6724_v35  ;;  %v6746_v58 = vld [vmem:[%s14062_s14 + $0x320] sm:$0xff]  ;;  %v6745_v35 = vld [vmem:[%s14062_s14 + $0x318] sm:$0xff] }
0x1059   :  { %4165 = vmatmul.f32.vlgmr.msrb.gmra.mxu0 %v12036_v63  ;;  %6665 = vmatmul.msk.f32.vlgmr.msra.gmra.mxu1 %vm125_vm0, %v12038_v52 }
0x105a   :  { %4338 = vmatpush.msrb.mxu1 %v6697_v25  ;;  %4409 = vmatpush.msra.mxu0 %v6723_v37  ;;  %v6744_v25 = vld [vmem:[%s14062_s14 + $0x310] sm:$0xff]  ;;  %v6743_v37 = vld [vmem:[%s14062_s14 + $0x308] sm:$0xff] }
0x105c   :  { %4339 = vmatpush.msrb.mxu1 %v6696_v62  ;;  %4410 = vmatpush.msra.mxu0 %v6722_v26  ;;  %v6742_v62 = vld [vmem:[%s14062_s14 + $0x300] sm:$0xff] }
0x105e   :  { %4340 = vmatpush.msrb.mxu1 %v6695_v34  ;;  %4411 = vmatpush.msra.mxu0 %v6721_v20  ;;  %v12250_v20 = vld [vmem:[%s14059_s11] sm:$0xff] }
0x1060   :  { %4341 = vmatpush.msrb.mxu1 %v6694_v53  ;;  %4412 = vmatpush.msra.mxu0 %v6720_v22 }
0x1061   :  { %4168 = vmatmul.f32.gmra.mxu0 %v12072_v16  ;;  %6666 = vmatmul.msk.f32.gmra.mxu1 %vm125_vm0, %v12074_v55 }
0x1062   :  { %4342 = vmatpush.msrb.mxu1 %v6693_v51  ;;  %4413 = vmatpush.msra.mxu0 %v6719_v39 }
0x1064   :  { %4343 = vmatpush.msrb.mxu1 %v6692_v14  ;;  %4414 = vmatpush.msra.mxu0 %v6718_v54  ;;  %v12257_v14 = vld [vmem:[%s14059_s11 + $0x8] sm:$0x3] }
0x1066   :  { %4344 = vmatpush.msrb.mxu1 %v6691_v17  ;;  %4415 = vmatpush.msra.mxu0 %v6717_v24 }
0x1068   :  { %4345 = vmatpush.msrb.mxu1 %v6690_v7  ;;  %4416 = vmatpush.msra.mxu0 %v6716_v38 }
0x1069   :  { %4346 = vmatmul.f32.vlgmr.msrb.gmra.mxu1 %v12036_v63  ;;  %4417 = vmatmul.f32.vlgmr.msra.gmra.mxu0 %v12036_v63 }
0x1071   :  { %4349 = vmatmul.f32.gmra.mxu1 %v12072_v16  ;;  %4420 = vmatmul.f32.gmra.mxu0 %v12072_v16 }
0x10c4   :  { %v4024_v15 = vpop.f32.mrf.mxu1  ;;  %v4047_v32 = vpop.f32.mrf.mxu0 }
0x10c5   :  { %v4048_v43 = vadd.f32 %v4047_v32, %v4024_v15 }
0x10cb   :  { %v4095_v45 = vpop.f32.mrf.mxu2  ;;  %v4118_v4 = vpop.f32.mrf.mxu3 }
0x10cc   :  { %v4119_v56 = vadd.f32 %v4118_v4, %v4095_v45 }
0x10cd   :  { %v4027_v47 = vpop.f32.mrf.mxu1  ;;  %v4050_v40 = vpop.f32.mrf.mxu0 }
0x10ce   :  { %v4051_v61 = vadd.f32 %v4050_v40, %v4027_v47 }
0x10d4   :  { %v4098_v23 = vpop.f32.mrf.mxu2  ;;  %v4121_v44 = vpop.f32.mrf.mxu3 }
0x10d5   :  { %v4122_v27 = vadd.f32 %v4121_v44, %v4098_v23  ;;  %v6739_v44 = vld [vmem:[%s14061_s13 + $0x3b8] sm:$0xff] }
0x10d6   :  { %v4166_v2 = vpop.f32.mrf.mxu0  ;;  %v4189_v8 = vpop.f32.mrf.mxu1 }
0x10d7   :  { %6667 = vmatpush.xpose.msk.msrb.mxu3 %vm125_vm0, %v4122_v27  ;;  %v4190_v12 = vadd.f32 %v4189_v8, %v4166_v2  ;;  %v6738_v27 = vld [vmem:[%s14061_s13 + $0x3b0] sm:$0xff]  ;;  %v6737_v2 = vld [vmem:[%s14061_s13 + $0x3a8] sm:$0xff]  ;;  %v6736_v8 = vld [vmem:[%s14061_s13 + $0x3a0] sm:$0xff] }
0x10db   :  { %6668 = vmatpush.xpose.msk.msrb.mxu3 %vm125_vm0, %v4119_v56  ;;  %v6735_v56 = vld [vmem:[%s14061_s13 + $0x398] sm:$0xff] }
0x10de   :  { %v4169_v28 = vpop.f32.mrf.mxu0  ;;  %v4192_v57 = vpop.f32.mrf.mxu1  ;;  %6669 = vmatmul.msk.f32.vlgmr.msrb.gmra.mxu3 %vm125_vm0, %v4048_v43  ;;  %v6733_v43 = vld [vmem:[%s14061_s13 + $0x388] sm:$0xff] }
0x10df   :  { %4361 = vmatpush.msra.mxu3 %v6713_v50  ;;  %v4193_v49 = vadd.f32 %v4192_v57, %v4169_v28  ;;  %v6734_v50 = vld [vmem:[%s14061_s13 + $0x390] sm:$0xff] }
0x10e1   :  { %4362 = vmatpush.msra.mxu3 %v6712_v60  ;;  %6671 = vmatpush.msk.msra.mxu2 %vm1595_vm2, %v4193_v49  ;;  %v6732_v60 = vld [vmem:[%s14061_s13 + $0x380] sm:$0xff] }
0x10e3   :  { %4363 = vmatpush.msra.mxu3 %v6711_v9  ;;  %4280 = vmatpush.msra.mxu2 %v4190_v12  ;;  %v6764_v12 = vld [vmem:[%s14062_s14 + $0x3b0] sm:$0xff] }
0x10e5   :  { %4364 = vmatpush.msra.mxu3 %v6710_v3  ;;  %4432 = vmatpush.msrb.mxu2 %v6739_v44  ;;  %v6765_v3 = vld [vmem:[%s14062_s14 + $0x3b8] sm:$0xff] }
0x10e6   :  { %6670 = vmatmul.msk.f32.gmra.mxu3 %vm125_vm0, %v4051_v61  ;;  %v6762_v61 = vld [vmem:[%s14062_s14 + $0x3a0] sm:$0xff] }
0x10e7   :  { %4365 = vmatpush.msra.mxu3 %v6709_v31  ;;  %4433 = vmatpush.msrb.mxu2 %v6738_v27  ;;  %v6763_v31 = vld [vmem:[%s14062_s14 + $0x3a8] sm:$0xff] }
0x10e9   :  { %4366 = vmatpush.msra.mxu3 %v6708_v6  ;;  %4434 = vmatpush.msrb.mxu2 %v6737_v2  ;;  %v4347_v2 = vpop.f32.mrf.mxu1 }
0x10eb   :  { %4367 = vmatpush.msra.mxu3 %v6707_v1  ;;  %4435 = vmatpush.msrb.mxu2 %v6736_v8 }
0x10ed   :  { %4368 = vmatpush.msra.mxu3 %v6706_v0  ;;  %4436 = vmatpush.msrb.mxu2 %v6735_v56  ;;  %v6761_v0 = vld [vmem:[%s14062_s14 + $0x398] sm:$0xff] }
0x10ee   :  { %6714 = vmatmul.msk.f32.vlgmr.msra.gmra.mxu3 %vm125_vm0, %v12038_v52 }
0x10ef   :  { %4472 = vmatpush.msrb.mxu3 %v6757_v29  ;;  %4437 = vmatpush.msrb.mxu2 %v6734_v50  ;;  %v6760_v29 = vld [vmem:[%s14062_s14 + $0x390] sm:$0xff] }
0x10f1   :  { %4473 = vmatpush.msrb.mxu3 %v6756_v10  ;;  %4438 = vmatpush.msrb.mxu2 %v6733_v43  ;;  %v6688_v10 = vld [vmem:[%s14063_s15 + $0x1f0] sm:$0xff] }
0x10f3   :  { %4474 = vmatpush.msrb.mxu3 %v6755_v36  ;;  %4439 = vmatpush.msrb.mxu2 %v6732_v60  ;;  %v6686_v36 = vld [vmem:[%s14063_s15 + $0x1e0] sm:$0xff]  ;;  %v4350_v60 = vpop.f32.mrf.mxu1 }
0x10f5   :  { %4475 = vmatpush.msrb.mxu3 %v6754_v46  ;;  %v6759_v46 = vld [vmem:[%s14062_s14 + $0x388] sm:$0xff] }
0x10f6   :  { %6715 = vmatmul.msk.f32.gmra.mxu3 %vm125_vm0, %v12074_v55 }
0x10f7   :  { %4476 = vmatpush.msrb.mxu3 %v6753_v41  ;;  %v6684_v41 = vld [vmem:[%s14063_s15 + $0x1d0] sm:$0xff] }
0x10f9   :  { %4477 = vmatpush.msrb.mxu3 %v6752_v33  ;;  %v6758_v33 = vld [vmem:[%s14062_s14 + $0x380] sm:$0xff] }
0x10fb   :  { %4478 = vmatpush.msrb.mxu3 %v6751_v48  ;;  %v6682_v48 = vld [vmem:[%s14063_s15 + $0x1c0] sm:$0xff] }
0x10fd   :  { %4479 = vmatpush.msrb.mxu3 %v6750_v18  ;;  %v6680_v18 = vld [vmem:[%s14063_s15 + $0x1b0] sm:$0xff] }
0x10ff   :  { %4480 = vmatpush.msrb.mxu3 %v6749_v19  ;;  %v6678_v19 = vld [vmem:[%s14063_s15 + $0x1a0] sm:$0xff] }
0x1101   :  { %4481 = vmatpush.msrb.mxu3 %v6748_v30  ;;  %v6676_v30 = vld [vmem:[%s14063_s15 + $0x190] sm:$0xff] }
0x1103   :  { %4482 = vmatpush.msrb.mxu3 %v6747_v5  ;;  %v6674_v5 = vld [vmem:[%s14063_s15 + $0x180] sm:$0xff] }
0x1105   :  { %4483 = vmatpush.msrb.mxu3 %v6746_v58  ;;  %v6840_v58 = vld [vmem:[%s14061_s13 + $0x438] sm:$0xff] }
0x1107   :  { %4484 = vmatpush.msrb.mxu3 %v6745_v35  ;;  %v6839_v35 = vld [vmem:[%s14061_s13 + $0x430] sm:$0xff] }
0x1109   :  { %4485 = vmatpush.msrb.mxu3 %v6744_v25  ;;  %v6838_v25 = vld [vmem:[%s14061_s13 + $0x428] sm:$0xff] }
0x110b   :  { %4486 = vmatpush.msrb.mxu3 %v6743_v37  ;;  %v6837_v37 = vld [vmem:[%s14061_s13 + $0x420] sm:$0xff] }
0x110d   :  { %4487 = vmatpush.msrb.mxu3 %v6742_v62  ;;  %v6836_v62 = vld [vmem:[%s14061_s13 + $0x418] sm:$0xff] }
0x110e   :  { %4488 = vmatmul.f32.vlgmr.msrb.gmra.mxu3 %v12036_v63 }
0x110f   :  { %4694 = vmatpush.msra.mxu3 %v6688_v10 }
0x1111   :  { %4695 = vmatpush.msra.mxu3 %v6686_v36 }
0x1113   :  { %4696 = vmatpush.msra.mxu3 %v6684_v41 }
0x1115   :  { %4697 = vmatpush.msra.mxu3 %v6682_v48 }
0x1116   :  { %4491 = vmatmul.f32.gmra.mxu3 %v12072_v16 }
0x1117   :  { %4698 = vmatpush.msra.mxu3 %v6680_v18 }
0x1119   :  { %4699 = vmatpush.msra.mxu3 %v6678_v19 }
0x111b   :  { %4700 = vmatpush.msra.mxu3 %v6676_v30 }
0x111d   :  { %4701 = vmatpush.msra.mxu3 %v6674_v5 }
0x111f   :  { %4828 = vmatpush.msrb.mxu3 %v6840_v58 }
0x1121   :  { %4829 = vmatpush.msrb.mxu3 %v6839_v35  ;;  %v6689_v35 = vld [vmem:[%s14063_s15 + $0x1f8] sm:$0xff] }
0x1123   :  { %4830 = vmatpush.msrb.mxu3 %v6838_v25  ;;  %v6687_v25 = vld [vmem:[%s14063_s15 + $0x1e8] sm:$0xff] }
0x1125   :  { %4831 = vmatpush.msrb.mxu3 %v6837_v37  ;;  %v6685_v37 = vld [vmem:[%s14063_s15 + $0x1d8] sm:$0xff] }
0x1127   :  { %4832 = vmatpush.msrb.mxu3 %v6836_v62  ;;  %v6683_v62 = vld [vmem:[%s14063_s15 + $0x1c8] sm:$0xff] }
0x1161   :  { %v4224_v26 = vpop.f32.mrf.mxu3 }
0x1162   :  { %v4230_v34 = vmul.f32 0.125, %v4224_v26  ;;  %v6835_v26 = vld [vmem:[%s14061_s13 + $0x410] sm:$0xff] }
0x1163   :  { %4833 = vmatpush.msrb.mxu3 %v6835_v26  ;;  %v6681_v26 = vld [vmem:[%s14063_s15 + $0x1b8] sm:$0xff] }
0x1164   :  { %v4232_v53 = vadd.f32 %v12250_v20, %v4230_v34  ;;  %v6834_v34 = vld [vmem:[%s14061_s13 + $0x408] sm:$0xff] }
0x1165   :  { %4834 = vmatpush.msrb.mxu3 %v6834_v34  ;;  %v6679_v34 = vld [vmem:[%s14063_s15 + $0x1a8] sm:$0xff] }
0x1166   :  { %v4234_v22 = vsel %vm1923_vm11, %v4232_v53, -inf }
0x1167   :  { %4235 = vmax.xlane.f32.xlu0 %v4234_v22  ;;  %v6832_v22 = vld [vmem:[%s14061_s13 + $0x3f8] sm:$0xff] }
0x1169   :  { %v4227_v51 = vpop.f32.mrf.mxu3 }
0x116a   :  { %v4231_v39 = vmul.f32 0.125, %v4227_v51  ;;  %v6831_v51 = vld [vmem:[%s14061_s13 + $0x3f0] sm:$0xff] }
0x116c   :  { %v4233_v54 = vadd.f32 %v12257_v14, %v4231_v39  ;;  %v6830_v39 = vld [vmem:[%s14061_s13 + $0x3e8] sm:$0xff] }
0x116e   :  { %v4237_v17 = vsel %vm1927_vm12, %v4233_v54, -inf }
0x116f   :  { %4238 = vmax.xlane.f32.xlu1 %v4237_v17  ;;  %v6828_v17 = vld [vmem:[%s14061_s13 + $0x3d8] sm:$0xff] }
0x11da   :  { %v4236_v24 = vpop.xlane.xlu0 %4235 }
0x11db   :  { %v4240_v7 = vsub.f32 %v4232_v53, %v4236_v24  ;;  %v6833_v53 = vld [vmem:[%s14061_s13 + $0x400] sm:$0xff]  ;;  %v6827_v24 = vld [vmem:[%s14061_s13 + $0x3d0] sm:$0xff] }
0x11dc   :  { %4835 = vmatpush.msrb.mxu3 %v6833_v53  ;;  %v6677_v53 = vld [vmem:[%s14063_s15 + $0x198] sm:$0xff] }
0x11dd   :  { %v4242_v38 = vmul.f32 1.442695, %v4240_v7  ;;  %v6826_v7 = vld [vmem:[%s14061_s13 + $0x3c8] sm:$0xff] }
0x11de   :  { %4836 = vmatpush.msrb.mxu3 %v6832_v22  ;;  %v6675_v22 = vld [vmem:[%s14063_s15 + $0x188] sm:$0xff] }
0x11df   :  { %7333 = vpow2.f32 %v4242_v38  ;;  %v6825_v38 = vld [vmem:[%s14061_s13 + $0x3c0] sm:$0xff] }
0x11e0   :  { %4837 = vmatpush.msrb.mxu3 %v6831_v51 }
0x11e2   :  { %v4239_v15 = vpop.xlane.xlu1 %4238  ;;  %4838 = vmatpush.msrb.mxu3 %v6830_v39 }
0x11e3   :  { %v4241_v32 = vsub.f32 %v4233_v54, %v4239_v15  ;;  %v6829_v54 = vld [vmem:[%s14061_s13 + $0x3e0] sm:$0xff] }
0x11e4   :  { %4839 = vmatpush.msrb.mxu3 %v6829_v54 }
0x11e5   :  { %v7334_v45 = vpop.eup %7333  ;;  %v4244_v4 = vmul.f32 1.442695, %v4241_v32 }
0x11e6   :  { %v4246_v47 = vsel %vm1923_vm11, %v7334_v45, 0.0  ;;  %4840 = vmatpush.msrb.mxu3 %v6828_v17 }
0x11e7   :  { %7335 = vpow2.f32 %v4244_v4  ;;  %4247 = vadd.xlane.f32.xlu2 %v4246_v47  ;;  %v4418_v4 = vpop.f32.mrf.mxu0 }
0x11e8   :  { %4841 = vmatpush.msrb.mxu3 %v6827_v24  ;;  %v6848_v24 = vld [vmem:[%s14061_s13 + $0x478] sm:$0xff] }
0x11ea   :  { %4842 = vmatpush.msrb.mxu3 %v6826_v7  ;;  %v6847_v7 = vld [vmem:[%s14061_s13 + $0x470] sm:$0xff] }
0x11ec   :  { %4843 = vmatpush.msrb.mxu3 %v6825_v38  ;;  %v6846_v38 = vld [vmem:[%s14061_s13 + $0x468] sm:$0xff] }
0x11ed   :  { %v7336_v40 = vpop.eup %7335 }
0x11ee   :  { %v4249_v23 = vsel %vm1927_vm12, %v7336_v40, 0.0 }
0x11ef   :  { %4250 = vadd.xlane.f32.xlu0 %v4249_v23  ;;  %v4421_v23 = vpop.f32.mrf.mxu0 }
0x125a   :  { %v4248_v28 = vpop.xlane.xlu2 %4247 }
0x125b   :  { %7337 = vrcp.f32 %v4248_v28 }
0x1261   :  { %v7338_v57 = vpop.eup %7337 }
0x1262   :  { %v4254_v9 = vmul.f32 %v7338_v57, %v7334_v45  ;;  %v4251_v49 = vpop.xlane.xlu0 %4250  ;;  %v4370_v45 = vpop.f32.mrf.mxu3 }
0x1263   :  { %7339 = vrcp.f32 %v4251_v49  ;;  %v4371_v50 = vadd.f32 %v4370_v45, %v4347_v2  ;;  %v6845_v45 = vld [vmem:[%s14061_s13 + $0x460] sm:$0xff]  ;;  %v6874_v2 = vld [vmem:[%s14062_s14 + $0x478] sm:$0xff] }
0x1264   :  { %6672 = vmatmul.msk.f32.vlgmr.msra.gmra.mxu2 %vm1923_vm11, %v4254_v9 }
0x1265   :  { %4503 = vmatpush.msra.mxu2 %v6765_v3 }
0x1267   :  { %4504 = vmatpush.msra.mxu2 %v6764_v12 }
0x1269   :  { %v7340_v6 = vpop.eup %7339  ;;  %4505 = vmatpush.msra.mxu2 %v6763_v31 }
0x126a   :  { %v4255_v1 = vmul.f32 %v7340_v6, %v7336_v40  ;;  %v4373_v40 = vpop.f32.mrf.mxu3 }
0x126b   :  { %4506 = vmatpush.msra.mxu2 %v6762_v61  ;;  %v4374_v28 = vadd.f32 %v4373_v40, %v4350_v60  ;;  %v6844_v40 = vld [vmem:[%s14061_s13 + $0x458] sm:$0xff]  ;;  %v6789_v60 = vld [vmem:[%s14063_s15 + $0x270] sm:$0xff] }
0x126c   :  { %6673 = vmatmul.msk.f32.gmra.mxu2 %vm1923_vm11, %v4255_v1 }
0x126d   :  { %4507 = vmatpush.msra.mxu2 %v6761_v0 }
0x126f   :  { %4508 = vmatpush.msra.mxu2 %v6760_v29 }
0x1271   :  { %4509 = vmatpush.msra.mxu2 %v6759_v46 }
0x1272   :  { %v4489_v56 = vpop.f32.mrf.mxu3 }
0x1273   :  { %4510 = vmatpush.msra.mxu2 %v6758_v33 }
0x1274   :  { %6740 = vmatmul.msk.f32.vlgmr.msrb.gmra.mxu2 %vm125_vm0, %v12038_v52 }
0x1275   :  { %4642 = vmatpush.msrb.mxu2 %v6789_v60  ;;  %v6858_v60 = vld [vmem:[%s14062_s14 + $0x3f8] sm:$0xff] }
0x127a   :  { %v4492_v57 = vpop.f32.mrf.mxu3 }
0x127c   :  { %6741 = vmatmul.msk.f32.gmra.mxu2 %vm125_vm0, %v12074_v55 }
0x1284   :  { %6766 = vmatmul.msk.f32.vlgmr.msra.gmra.mxu2 %vm125_vm0, %v12038_v52 }
0x128c   :  { %6767 = vmatmul.msk.f32.gmra.mxu2 %vm125_vm0, %v12074_v55 }
0x12e7   :  { %v12393_v15 = vpop.f32.mrf.mxu2 }
0x12e8   :  { %6795 = vmatmul.msk.f32.vlgmr.msra.gmra.mxu3 %vm125_vm0, %v12393_v15 }
0x12ef   :  { %v12397_v32 = vpop.f32.mrf.mxu2 }
0x12f0   :  { %6796 = vmatmul.msk.f32.gmra.mxu3 %vm125_vm0, %v12397_v32 }
0x12f7   :  { %v4441_v47 = vpop.f32.mrf.mxu2 }
0x12f8   :  { %4844 = vmatmul.f32.vlgmr.msrb.gmra.mxu3 %v12036_v63  ;;  %v4442_v8 = vadd.f32 %v4441_v47, %v4418_v4 }
0x12ff   :  { %v4444_v44 = vpop.f32.mrf.mxu2 }
0x1300   :  { %v4445_v27 = vadd.f32 %v4444_v44, %v4421_v23  ;;  %4847 = vmatmul.f32.gmra.mxu3 %v12072_v16  ;;  %v6843_v23 = vld [vmem:[%s14061_s13 + $0x450] sm:$0xff]  ;;  %v6842_v44 = vld [vmem:[%s14061_s13 + $0x448] sm:$0xff] }
0x1302   :  { %6768 = vmatpush.xpose.msk.msra.mxu1 %vm125_vm0, %v4445_v27  ;;  %v6841_v27 = vld [vmem:[%s14061_s13 + $0x440] sm:$0xff] }
0x1306   :  { %6769 = vmatpush.xpose.msk.msra.mxu1 %vm125_vm0, %v4442_v8  ;;  %v6873_v8 = vld [vmem:[%s14062_s14 + $0x470] sm:$0xff] }
0x1307   :  { %v4512_v43 = vpop.f32.mrf.mxu2 }
0x1308   :  { %v4513_v3 = vadd.f32 %v4512_v43, %v4489_v56  ;;  %v6872_v56 = vld [vmem:[%s14062_s14 + $0x468] sm:$0xff]  ;;  %v6870_v43 = vld [vmem:[%s14062_s14 + $0x458] sm:$0xff] }
0x1309   :  { %6770 = vmatmul.msk.f32.vlgmr.msra.gmra.mxu1 %vm125_vm0, %v4371_v50  ;;  %v6871_v50 = vld [vmem:[%s14062_s14 + $0x460] sm:$0xff] }
0x130f   :  { %v4515_v9 = vpop.f32.mrf.mxu2 }
0x1310   :  { %v4516_v49 = vadd.f32 %v4515_v9, %v4492_v57  ;;  %v6787_v57 = vld [vmem:[%s14063_s15 + $0x260] sm:$0xff]  ;;  %v6788_v9 = vld [vmem:[%s14063_s15 + $0x268] sm:$0xff] }
0x1311   :  { %6771 = vmatmul.msk.f32.gmra.mxu1 %vm125_vm0, %v4374_v28  ;;  %v6790_v28 = vld [vmem:[%s14063_s15 + $0x278] sm:$0xff]  ;;  %4643 = vmatpush.msrb.mxu2 %v6787_v57  ;;  %v6857_v57 = vld [vmem:[%s14062_s14 + $0x3f0] sm:$0xff] }
0x1312   :  { %6772 = vmatpush.msk.msrb.mxu0 %vm1595_vm2, %v4516_v49  ;;  %4665 = vmatpush.msrb.mxu1 %v6790_v28  ;;  %v6785_v49 = vld [vmem:[%s14063_s15 + $0x250] sm:$0xff] }
0x1313   :  { %4644 = vmatpush.msrb.mxu2 %v6785_v49  ;;  %v6855_v49 = vld [vmem:[%s14062_s14 + $0x3e0] sm:$0xff] }
0x1314   :  { %4603 = vmatpush.msrb.mxu0 %v4513_v3  ;;  %v6786_v3 = vld [vmem:[%s14063_s15 + $0x258] sm:$0xff]  ;;  %4666 = vmatpush.msrb.mxu1 %v6788_v9  ;;  %v6856_v9 = vld [vmem:[%s14062_s14 + $0x3e8] sm:$0xff] }
0x1316   :  { %4717 = vmatpush.msra.mxu0 %v6689_v35  ;;  %4667 = vmatpush.msrb.mxu1 %v6786_v3  ;;  %v6819_v35 = vld [vmem:[%s14060_s12 + $0x460] sm:$0xff] }
0x1318   :  { %4718 = vmatpush.msra.mxu0 %v6687_v25  ;;  %v6810_v25 = vld [vmem:[%s14060_s12 + $0x418] sm:$0xff] }
0x131a   :  { %4719 = vmatpush.msra.mxu0 %v6685_v37  ;;  %v6818_v37 = vld [vmem:[%s14060_s12 + $0x458] sm:$0xff] }
0x131c   :  { %4720 = vmatpush.msra.mxu0 %v6683_v62  ;;  %v6809_v62 = vld [vmem:[%s14060_s12 + $0x410] sm:$0xff] }
0x131e   :  { %4721 = vmatpush.msra.mxu0 %v6681_v26  ;;  %v6817_v26 = vld [vmem:[%s14060_s12 + $0x450] sm:$0xff] }
0x1320   :  { %4722 = vmatpush.msra.mxu0 %v6679_v34  ;;  %v6808_v34 = vld [vmem:[%s14060_s12 + $0x408] sm:$0xff] }
0x1322   :  { %4723 = vmatpush.msra.mxu0 %v6677_v53  ;;  %v6816_v53 = vld [vmem:[%s14060_s12 + $0x448] sm:$0xff] }
0x1324   :  { %4724 = vmatpush.msra.mxu0 %v6675_v22  ;;  %v6807_v22 = vld [vmem:[%s14060_s12 + $0x400] sm:$0xff] }
0x1386   :  { %v4547_v12 = vpop.f32.mrf.mxu1 }
0x1387   :  { %v4553_v31 = vmul.f32 0.125, %v4547_v12  ;;  %v6867_v12 = vld [vmem:[%s14062_s14 + $0x440] sm:$0xff] }
0x1389   :  { %v4555_v61 = vadd.f32 %v12250_v20, %v4553_v31  ;;  %v6783_v31 = vld [vmem:[%s14063_s15 + $0x240] sm:$0xff] }
0x138a   :  { %4645 = vmatpush.msrb.mxu2 %v6783_v31  ;;  %v6852_v31 = vld [vmem:[%s14062_s14 + $0x3c8] sm:$0xff] }
0x138b   :  { %v4557_v6 = vsel %vm1923_vm11, %v4555_v61, -inf }
0x138c   :  { %4558 = vmax.xlane.f32.xlu1 %v4557_v6  ;;  %v6781_v6 = vld [vmem:[%s14063_s15 + $0x230] sm:$0xff] }
0x138d   :  { %4646 = vmatpush.msrb.mxu2 %v6781_v6 }
0x138e   :  { %v4550_v1 = vpop.f32.mrf.mxu1 }
0x138f   :  { %v4554_v0 = vmul.f32 0.125, %v4550_v1  ;;  %v6782_v1 = vld [vmem:[%s14063_s15 + $0x238] sm:$0xff] }
0x1391   :  { %v4556_v29 = vadd.f32 %v12257_v14, %v4554_v0  ;;  %v6779_v0 = vld [vmem:[%s14063_s15 + $0x220] sm:$0xff] }
0x1392   :  { %4647 = vmatpush.msrb.mxu2 %v6779_v0 }
0x1393   :  { %v4560_v10 = vsel %vm1927_vm12, %v4556_v29, -inf }
0x1394   :  { %4561 = vmax.xlane.f32.xlu2 %v4560_v10  ;;  %v6777_v10 = vld [vmem:[%s14063_s15 + $0x210] sm:$0xff] }
0x1395   :  { %4648 = vmatpush.msrb.mxu2 %v6777_v10 }
0x13ff   :  { %v4559_v36 = vpop.xlane.xlu1 %4558 }
0x1400   :  { %v4563_v46 = vsub.f32 %v4555_v61, %v4559_v36  ;;  %v6784_v61 = vld [vmem:[%s14063_s15 + $0x248] sm:$0xff]  ;;  %v6778_v36 = vld [vmem:[%s14063_s15 + $0x218] sm:$0xff] }
0x1401   :  { %4668 = vmatpush.msrb.mxu1 %v6784_v61  ;;  %v6851_v61 = vld [vmem:[%s14062_s14 + $0x3c0] sm:$0xff] }
0x1402   :  { %v4565_v41 = vmul.f32 1.442695, %v4563_v46  ;;  %v6775_v46 = vld [vmem:[%s14063_s15 + $0x200] sm:$0xff] }
0x1403   :  { %4669 = vmatpush.msrb.mxu1 %v6782_v1  ;;  %4649 = vmatpush.msrb.mxu2 %v6775_v46 }
0x1404   :  { %7341 = vpow2.f32 %v4565_v41  ;;  %v6776_v41 = vld [vmem:[%s14063_s15 + $0x208] sm:$0xff] }
0x1407   :  { %v4562_v33 = vpop.xlane.xlu2 %4561 }
0x1408   :  { %v4564_v48 = vsub.f32 %v4556_v29, %v4562_v33  ;;  %v6780_v29 = vld [vmem:[%s14063_s15 + $0x228] sm:$0xff]  ;;  %v6814_v33 = vld [vmem:[%s14060_s12 + $0x438] sm:$0xff] }
0x1409   :  { %4670 = vmatpush.msrb.mxu1 %v6780_v29  ;;  %4757 = vmatpush.msra.mxu2 %v6814_v33 }
0x140a   :  { %v7342_v18 = vpop.eup %7341  ;;  %v4567_v19 = vmul.f32 1.442695, %v4564_v48  ;;  %v6822_v48 = vld [vmem:[%s14060_s12 + $0x478] sm:$0xff] }
0x140b   :  { %v4569_v30 = vsel %vm1923_vm11, %v7342_v18, 0.0  ;;  %4671 = vmatpush.msrb.mxu1 %v6778_v36 }
0x140c   :  { %7343 = vpow2.f32 %v4567_v19  ;;  %4570 = vadd.xlane.f32.xlu0 %v4569_v30  ;;  %v6821_v19 = vld [vmem:[%s14060_s12 + $0x470] sm:$0xff]  ;;  %v6812_v30 = vld [vmem:[%s14060_s12 + $0x428] sm:$0xff] }
0x140d   :  { %4672 = vmatpush.msrb.mxu1 %v6776_v41 }
0x140f   :  { %4788 = vmatpush.msra.mxu1 %v6822_v48 }
0x1411   :  { %4789 = vmatpush.msra.mxu1 %v6821_v19 }
0x1412   :  { %v7344_v5 = vpop.eup %7343 }
0x1413   :  { %v4572_v58 = vsel %vm1927_vm12, %v7344_v5, 0.0 }
0x1414   :  { %4573 = vadd.xlane.f32.xlu1 %v4572_v58  ;;  %v6811_v58 = vld [vmem:[%s14060_s12 + $0x420] sm:$0xff] }
0x147f   :  { %v4571_v51 = vpop.xlane.xlu0 %4570 }
0x1480   :  { %7345 = vrcp.f32 %v4571_v51  ;;  %v6815_v51 = vld [vmem:[%s14060_s12 + $0x440] sm:$0xff] }
0x1486   :  { %v7346_v39 = vpop.eup %7345 }
0x1487   :  { %v4577_v54 = vmul.f32 %v7346_v39, %v7342_v18  ;;  %v4574_v17 = vpop.xlane.xlu1 %4573  ;;  %v6813_v18 = vld [vmem:[%s14060_s12 + $0x430] sm:$0xff]  ;;  %v6806_v39 = vld [vmem:[%s14060_s12 + $0x3f8] sm:$0xff] }
0x1488   :  { %7347 = vrcp.f32 %v4574_v17  ;;  %4758 = vmatpush.msra.mxu2 %v6813_v18  ;;  %v6804_v17 = vld [vmem:[%s14060_s12 + $0x3e8] sm:$0xff] }
0x1489   :  { %6773 = vmatmul.msk.f32.vlgmr.msrb.gmra.mxu0 %vm1923_vm11, %v4577_v54  ;;  %v6805_v54 = vld [vmem:[%s14060_s12 + $0x3f0] sm:$0xff] }
0x148a   :  { %4859 = vmatpush.msrb.mxu0 %v6848_v24  ;;  %4759 = vmatpush.msra.mxu2 %v6812_v30  ;;  %v6803_v24 = vld [vmem:[%s14060_s12 + $0x3e0] sm:$0xff] }
0x148c   :  { %4860 = vmatpush.msrb.mxu0 %v6847_v7  ;;  %4760 = vmatpush.msra.mxu2 %v6811_v58  ;;  %v6802_v7 = vld [vmem:[%s14060_s12 + $0x3d8] sm:$0xff] }
0x148e   :  { %v7348_v4 = vpop.eup %7347  ;;  %4861 = vmatpush.msrb.mxu0 %v6846_v38  ;;  %4761 = vmatpush.msra.mxu2 %v6810_v25  ;;  %v6801_v38 = vld [vmem:[%s14060_s12 + $0x3d0] sm:$0xff] }
0x148f   :  { %v4578_v47 = vmul.f32 %v7348_v4, %v7344_v5  ;;  %v6820_v5 = vld [vmem:[%s14060_s12 + $0x468] sm:$0xff]  ;;  %v6799_v4 = vld [vmem:[%s14060_s12 + $0x3c0] sm:$0xff] }
0x1490   :  { %4862 = vmatpush.msrb.mxu0 %v6845_v45  ;;  %4790 = vmatpush.msra.mxu1 %v6820_v5  ;;  %v6800_v45 = vld [vmem:[%s14060_s12 + $0x3c8] sm:$0xff] }
0x1491   :  { %6774 = vmatmul.msk.f32.gmra.mxu0 %vm1923_vm11, %v4578_v47  ;;  %4762 = vmatpush.msra.mxu2 %v6809_v62  ;;  %v6866_v47 = vld [vmem:[%s14062_s14 + $0x438] sm:$0xff] }
0x1492   :  { %4863 = vmatpush.msrb.mxu0 %v6844_v40  ;;  %4791 = vmatpush.msra.mxu1 %v6819_v35 }
0x1493   :  { %4763 = vmatpush.msra.mxu2 %v6808_v34 }
0x1494   :  { %4864 = vmatpush.msrb.mxu0 %v6843_v23  ;;  %4792 = vmatpush.msra.mxu1 %v6818_v37  ;;  %v6865_v23 = vld [vmem:[%s14062_s14 + $0x430] sm:$0xff] }
0x1495   :  { %4764 = vmatpush.msra.mxu2 %v6807_v22 }
0x1496   :  { %4865 = vmatpush.msrb.mxu0 %v6842_v44  ;;  %4793 = vmatpush.msra.mxu1 %v6817_v26  ;;  %v6864_v44 = vld [vmem:[%s14062_s14 + $0x428] sm:$0xff] }
0x1497   :  { %4765 = vmatpush.msra.mxu2 %v6806_v39 }
0x1498   :  { %4866 = vmatpush.msrb.mxu0 %v6841_v27  ;;  %4794 = vmatpush.msra.mxu1 %v6816_v53  ;;  %v6863_v27 = vld [vmem:[%s14062_s14 + $0x420] sm:$0xff] }
0x1499   :  { %6797 = vmatmul.msk.f32.vlgmr.msra.gmra.mxu0 %vm125_vm0, %v12393_v15  ;;  %v6869_v15 = vld [vmem:[%s14062_s14 + $0x450] sm:$0xff]  ;;  %4766 = vmatpush.msra.mxu2 %v6805_v54 }
0x149a   :  { %4930 = vmatpush.msra.mxu0 %v6874_v2  ;;  %4795 = vmatpush.msra.mxu1 %v6815_v51  ;;  %v6862_v2 = vld [vmem:[%s14062_s14 + $0x418] sm:$0xff] }
0x149b   :  { %4767 = vmatpush.msra.mxu2 %v6804_v17 }
0x149c   :  { %4931 = vmatpush.msra.mxu0 %v6873_v8 }
0x149d   :  { %4768 = vmatpush.msra.mxu2 %v6803_v24 }
0x149e   :  { %4932 = vmatpush.msra.mxu0 %v6872_v56  ;;  %v6861_v56 = vld [vmem:[%s14062_s14 + $0x410] sm:$0xff] }
0x149f   :  { %4769 = vmatpush.msra.mxu2 %v6802_v7 }
0x14a0   :  { %4933 = vmatpush.msra.mxu0 %v6871_v50  ;;  %v12642_v50 = vpop.f32.mrf.mxu3 }
0x14a1   :  { %6798 = vmatmul.msk.f32.gmra.mxu0 %vm125_vm0, %v12397_v32  ;;  %v6868_v32 = vld [vmem:[%s14062_s14 + $0x448] sm:$0xff]  ;;  %4770 = vmatpush.msra.mxu2 %v6801_v38 }
0x14a2   :  { %4934 = vmatpush.msra.mxu0 %v6870_v43  ;;  %v6860_v43 = vld [vmem:[%s14062_s14 + $0x408] sm:$0xff] }
0x14a3   :  { %4771 = vmatpush.msra.mxu2 %v6800_v45 }
0x14a4   :  { %4935 = vmatpush.msra.mxu0 %v6869_v15  ;;  %v6859_v15 = vld [vmem:[%s14062_s14 + $0x400] sm:$0xff] }
0x14a5   :  { %4772 = vmatpush.msra.mxu2 %v6799_v4 }
0x14a6   :  { %4936 = vmatpush.msra.mxu0 %v6868_v32 }
0x14a8   :  { %4937 = vmatpush.msra.mxu0 %v6867_v12  ;;  %v12664_v32 = vpop.f32.mrf.mxu3  ;;  %v6853_v12 = vld [vmem:[%s14062_s14 + $0x3d0] sm:$0xff] }
0x14a9   :  { %6849 = vmatmul.msk.f32.vlgmr.msrb.gmra.mxu0 %vm125_vm0, %v12038_v52 }
0x14b0   :  { %v4845_v6 = vpop.f32.mrf.mxu3 }
0x14b1   :  { %6850 = vmatmul.msk.f32.gmra.mxu0 %vm125_vm0, %v12074_v55 }
0x14b9   :  { %6875 = vmatmul.msk.f32.vlgmr.msra.gmra.mxu0 %vm125_vm0, %v12038_v52 }
0x14c1   :  { %6876 = vmatmul.msk.f32.gmra.mxu0 %vm125_vm0, %v12074_v55 }
0x1506   :  { %v4605_v40 = vpop.f32.mrf.mxu0 }
0x1507   :  { %6791 = vmatmul.msk.f32.vlgmr.msrb.gmra.mxu2 %vm125_vm0, %v4605_v40  ;;  %6793 = vmatmul.msk.f32.vlgmr.msrb.gmra.mxu1 %vm125_vm0, %v4605_v40 }
0x1508   :  { %4899 = vmatpush.msrb.mxu1 %v6866_v47 }
0x150a   :  { %4900 = vmatpush.msrb.mxu1 %v6865_v23 }
0x150c   :  { %4901 = vmatpush.msrb.mxu1 %v6864_v44 }
0x150e   :  { %v4608_v8 = vpop.f32.mrf.mxu0  ;;  %4902 = vmatpush.msrb.mxu1 %v6863_v27  ;;  %v6899_v27 = vld [vmem:[%s14063_s15 + $0x2f8] sm:$0xff] }
0x150f   :  { %6792 = vmatmul.msk.f32.gmra.mxu2 %vm125_vm0, %v4608_v8  ;;  %6794 = vmatmul.msk.f32.gmra.mxu1 %vm125_vm0, %v4608_v8  ;;  %v6897_v8 = vld [vmem:[%s14063_s15 + $0x2e8] sm:$0xff] }
0x1510   :  { %4903 = vmatpush.msrb.mxu1 %v6862_v2  ;;  %v6896_v2 = vld [vmem:[%s14063_s15 + $0x2e0] sm:$0xff] }
0x1512   :  { %4904 = vmatpush.msrb.mxu1 %v6861_v56  ;;  %v6894_v56 = vld [vmem:[%s14063_s15 + $0x2d0] sm:$0xff] }
0x1514   :  { %4905 = vmatpush.msrb.mxu1 %v6860_v43  ;;  %v6895_v43 = vld [vmem:[%s14063_s15 + $0x2d8] sm:$0xff] }
0x1516   :  { %v12653_v28 = vpop.f32.mrf.mxu0  ;;  %4906 = vmatpush.msrb.mxu1 %v6859_v15  ;;  %v6892_v15 = vld [vmem:[%s14063_s15 + $0x2c0] sm:$0xff] }
0x1517   :  { %4773 = vmatmul.f32.vlgmr.msra.gmra.mxu2 %v12036_v63  ;;  %6823 = vmatmul.msk.f32.vlgmr.msra.gmra.mxu1 %vm125_vm0, %v12038_v52  ;;  %v6854_v52 = vld [vmem:[%s14062_s14 + $0x3d8] sm:$0xff] }
0x1518   :  { %4907 = vmatpush.msrb.mxu1 %v6858_v60  ;;  %v6893_v60 = vld [vmem:[%s14063_s15 + $0x2c8] sm:$0xff] }
0x151a   :  { %4908 = vmatpush.msrb.mxu1 %v6857_v57  ;;  %v6890_v57 = vld [vmem:[%s14063_s15 + $0x2b0] sm:$0xff] }
0x151c   :  { %4909 = vmatpush.msrb.mxu1 %v6856_v9  ;;  %v6891_v9 = vld [vmem:[%s14063_s15 + $0x2b8] sm:$0xff] }
0x151e   :  { %v12672_v3 = vpop.f32.mrf.mxu0  ;;  %4910 = vmatpush.msrb.mxu1 %v6855_v49  ;;  %v6888_v49 = vld [vmem:[%s14063_s15 + $0x2a0] sm:$0xff] }
0x151f   :  { %4776 = vmatmul.f32.gmra.mxu2 %v12072_v16  ;;  %6824 = vmatmul.msk.f32.gmra.mxu1 %vm125_vm0, %v12074_v55  ;;  %v4848_v55 = vpop.f32.mrf.mxu3 }
0x1520   :  { %4911 = vmatpush.msrb.mxu1 %v6854_v52  ;;  %v6889_v52 = vld [vmem:[%s14063_s15 + $0x2a8] sm:$0xff] }
0x1522   :  { %4912 = vmatpush.msrb.mxu1 %v6853_v12  ;;  %v6886_v12 = vld [vmem:[%s14063_s15 + $0x290] sm:$0xff] }
0x1524   :  { %4913 = vmatpush.msrb.mxu1 %v6852_v31  ;;  %v6887_v31 = vld [vmem:[%s14063_s15 + $0x298] sm:$0xff] }
0x1526   :  { %v4868_v1 = vpop.f32.mrf.mxu0  ;;  %4914 = vmatpush.msrb.mxu1 %v6851_v61 }
0x1527   :  { %4915 = vmatmul.f32.vlgmr.msrb.gmra.mxu1 %v12036_v63  ;;  %v4869_v10 = vadd.f32 %v4868_v1, %v4845_v6 }
0x152e   :  { %v4871_v0 = vpop.f32.mrf.mxu0 }
0x152f   :  { %v4872_v29 = vadd.f32 %v4871_v0, %v4848_v55  ;;  %4918 = vmatmul.f32.gmra.mxu1 %v12072_v16 }
0x1531   :  { %6877 = vmatpush.xpose.msk.msrb.mxu2 %vm125_vm0, %v4872_v29 }
0x1535   :  { %6878 = vmatpush.xpose.msk.msrb.mxu2 %vm125_vm0, %v4869_v10  ;;  %v6884_v10 = vld [vmem:[%s14063_s15 + $0x280] sm:$0xff] }
0x1536   :  { %v4939_v16 = vpop.f32.mrf.mxu0 }
0x1539   :  { %5092 = vmatpush.msra.mxu2 %v6899_v27  ;;  %v7043_v27 = vld [vmem:[%s14066_s18 + $0x8d8] sm:$0xff] }
0x153b   :  { %5093 = vmatpush.msra.mxu2 %v6897_v8  ;;  %v6965_v8 = vld [vmem:[%s14066_s18 + $0x668] sm:$0xff] }
0x153d   :  { %5094 = vmatpush.msra.mxu2 %v6895_v43  ;;  %v6959_v43 = vld [vmem:[%s14066_s18 + $0x638] sm:$0xff] }
0x153e   :  { %v4942_v35 = vpop.f32.mrf.mxu0 }
0x153f   :  { %5095 = vmatpush.msra.mxu2 %v6893_v60  ;;  %v6953_v60 = vld [vmem:[%s14066_s18 + $0x608] sm:$0xff] }
0x1541   :  { %5096 = vmatpush.msra.mxu2 %v6891_v9  ;;  %v6946_v9 = vld [vmem:[%s14066_s18 + $0x5d0] sm:$0xff] }
0x1543   :  { %5097 = vmatpush.msra.mxu2 %v6889_v52 }
0x1545   :  { %5098 = vmatpush.msra.mxu2 %v6887_v31 }
0x1584   :  { %v12690_v36 = vpop.f32.mrf.mxu1 }
0x158a   :  { %v12692_v46 = vpop.f32.mrf.mxu2 }
0x158c   :  { %v12694_v41 = vpop.f32.mrf.mxu1 }
0x1592   :  { %v12696_v33 = vpop.f32.mrf.mxu2 }
0x1594   :  { %v4797_v48 = vpop.f32.mrf.mxu1 }
0x159a   :  { %v4774_v63 = vpop.f32.mrf.mxu2 }
0x159b   :  { %v4798_v18 = vadd.f32 %v4797_v48, %v4774_v63  ;;  %v6885_v48 = vld [vmem:[%s14063_s15 + $0x288] sm:$0xff] }
0x159c   :  { %v4800_v19 = vpop.f32.mrf.mxu1  ;;  %5099 = vmatpush.msra.mxu2 %v6885_v48 }
0x159d   :  { %6879 = vmatmul.msk.f32.vlgmr.msrb.gmra.mxu2 %vm125_vm0, %v4798_v18 }
0x159e   :  { %5432 = vmatpush.msrb.mxu2 %v7043_v27  ;;  %v6991_v27 = vld [vmem:[%s14066_s18 + $0x738] sm:$0xff] }
0x15a2   :  { %v4777_v30 = vpop.f32.mrf.mxu2 }
0x15a3   :  { %v4801_v5 = vadd.f32 %v4800_v19, %v4777_v30 }
0x15a4   :  { %v4916_v58 = vpop.f32.mrf.mxu1 }
0x15a5   :  { %6880 = vmatmul.msk.f32.gmra.mxu2 %vm125_vm0, %v4801_v5  ;;  %v4940_v62 = vadd.f32 %v4939_v16, %v4916_v58  ;;  %v4704_v16 = vadd.f32 %v12642_v50, %v12692_v46  ;;  %v4727_v5 = vadd.f32 %v12653_v28, %v12690_v36  ;;  %v12777_v50 = vld [vmem:[%s14064_s16 + $0x10] sm:$0x3f] }
0x15a6   :  { %v5115_v28 = vperm.slane %v12777_v50, 2 }
0x15ac   :  { %v4919_v25 = vpop.f32.mrf.mxu1 }
0x15ad   :  { %v4943_v37 = vadd.f32 %v4942_v35, %v4919_v25  ;;  %v4707_v35 = vadd.f32 %v12664_v32, %v12696_v33 }
0x15af   :  { %6881 = vmatpush.msk.msra.mxu3 %vm1595_vm2, %v4943_v37  ;;  %v12770_v37 = vld [vmem:[%s14064_s16 + $0x18] sm:$0x3f] }
0x15b1   :  { %5030 = vmatpush.msra.mxu3 %v4940_v62  ;;  %v5116_v62 = vperm.slane %v12770_v37, 2 }
0x1620   :  { %v4974_v26 = vpop.f32.mrf.mxu2 }
0x1621   :  { %v4980_v34 = vmul.f32 0.125, %v4974_v26 }
0x1623   :  { %v4982_v53 = vadd.f32 %v12250_v20, %v4980_v34 }
0x1625   :  { %v4984_v22 = vsel %vm1923_vm11, %v4982_v53, -inf }
0x1626   :  { %4985 = vmax.xlane.f32.xlu2 %v4984_v22 }
0x1628   :  { %v4977_v51 = vpop.f32.mrf.mxu2 }
0x1629   :  { %v4981_v39 = vmul.f32 0.125, %v4977_v51 }
0x162b   :  { %v4983_v54 = vadd.f32 %v12257_v14, %v4981_v39  ;;  %v6898_v14 = vld [vmem:[%s14063_s15 + $0x2f0] sm:$0xff] }
0x162c   :  { %5069 = vmatpush.msrb.mxu0 %v6898_v14  ;;  %v6971_v14 = vld [vmem:[%s14066_s18 + $0x698] sm:$0xff] }
0x162d   :  { %v4987_v17 = vsel %vm1927_vm12, %v4983_v54, -inf }
0x162e   :  { %4988 = vmax.xlane.f32.xlu0 %v4987_v17  ;;  %5070 = vmatpush.msrb.mxu0 %v6896_v2  ;;  %v6964_v2 = vld [vmem:[%s14066_s18 + $0x660] sm:$0xff] }
0x1630   :  { %5071 = vmatpush.msrb.mxu0 %v6894_v56  ;;  %v6958_v56 = vld [vmem:[%s14066_s18 + $0x630] sm:$0xff] }
0x1632   :  { %5072 = vmatpush.msrb.mxu0 %v6892_v15  ;;  %v6952_v15 = vld [vmem:[%s14066_s18 + $0x600] sm:$0xff] }
0x1634   :  { %5073 = vmatpush.msrb.mxu0 %v6890_v57 }
0x1636   :  { %5074 = vmatpush.msrb.mxu0 %v6888_v49  ;;  %v6947_v49 = vld [vmem:[%s14066_s18 + $0x5d8] sm:$0xff] }
0x1638   :  { %5075 = vmatpush.msrb.mxu0 %v6886_v12 }
0x163a   :  { %5076 = vmatpush.msrb.mxu0 %v6884_v10 }
0x1699   :  { %v4986_v24 = vpop.xlane.xlu2 %4985 }
0x169a   :  { %v4990_v7 = vsub.f32 %v4982_v53, %v4986_v24  ;;  %v4730_v53 = vadd.f32 %v12672_v3, %v12694_v41  ;;  %v6995_v3 = vld [vmem:[%s14066_s18 + $0x758] sm:$0xff]  ;;  %v6989_v41 = vld [vmem:[%s14066_s18 + $0x728] sm:$0xff] }
0x169b   :  { %5401 = vmatpush.msra.mxu0 %v6995_v3  ;;  %v7007_v3 = vld [vmem:[%s14066_s18 + $0x7b8] sm:$0xff] }
0x169c   :  { %v4992_v38 = vmul.f32 1.442695, %v4990_v7 }
0x169d   :  { %5402 = vmatpush.msra.mxu0 %v6989_v41  ;;  %v7000_v41 = vld [vmem:[%s14066_s18 + $0x780] sm:$0xff] }
0x169e   :  { %7349 = vpow2.f32 %v4992_v38 }
0x16a1   :  { %v4989_v45 = vpop.xlane.xlu0 %4988 }
0x16a2   :  { %v4991_v4 = vsub.f32 %v4983_v54, %v4989_v45 }
0x16a4   :  { %v7350_v47 = vpop.eup %7349  ;;  %v4994_v40 = vmul.f32 1.442695, %v4991_v4  ;;  %v6982_v4 = vld [vmem:[%s14066_s18 + $0x6f0] sm:$0xff] }
0x16a5   :  { %v4996_v20 = vsel %vm1923_vm11, %v7350_v47, 0.0 }
0x16a6   :  { %7351 = vpow2.f32 %v4994_v40  ;;  %4997 = vadd.xlane.f32.xlu1 %v4996_v20  ;;  %v6976_v40 = vld [vmem:[%s14066_s18 + $0x6c0] sm:$0xff]  ;;  %v6977_v20 = vld [vmem:[%s14066_s18 + $0x6c8] sm:$0xff] }
0x16ac   :  { %v7352_v23 = vpop.eup %7351 }
0x16ad   :  { %v4999_v44 = vsel %vm1927_vm12, %v7352_v23, 0.0 }
0x16ae   :  { %5000 = vadd.xlane.f32.xlu2 %v4999_v44  ;;  %v6970_v44 = vld [vmem:[%s14066_s18 + $0x690] sm:$0xff] }
0x1719   :  { %v4998_v61 = vpop.xlane.xlu1 %4997 }
0x171a   :  { %7353 = vrcp.f32 %v4998_v61 }
0x1720   :  { %v7354_v6 = vpop.eup %7353 }
0x1721   :  { %v5004_v1 = vmul.f32 %v7354_v6, %v7350_v47  ;;  %v5001_v55 = vpop.xlane.xlu2 %5000  ;;  %v6983_v47 = vld [vmem:[%s14066_s18 + $0x6f8] sm:$0xff] }
0x1722   :  { %7355 = vrcp.f32 %v5001_v55  ;;  %5403 = vmatpush.msra.mxu0 %v6983_v47  ;;  %v7001_v47 = vld [vmem:[%s14066_s18 + $0x788] sm:$0xff] }
0x1723   :  { %6882 = vmatmul.msk.f32.vlgmr.msra.gmra.mxu3 %vm1923_vm11, %v5004_v1 }
0x1724   :  { %5404 = vmatpush.msra.mxu0 %v6977_v20  ;;  %v6997_v20 = vld [vmem:[%s14066_s18 + $0x768] sm:$0xff] }
0x1726   :  { %5405 = vmatpush.msra.mxu0 %v6971_v14  ;;  %v6990_v14 = vld [vmem:[%s14066_s18 + $0x730] sm:$0xff] }
0x1728   :  { %v7356_v0 = vpop.eup %7355  ;;  %5406 = vmatpush.msra.mxu0 %v6965_v8  ;;  %v7039_v8 = vld [vmem:[%s14066_s18 + $0x8b8] sm:$0xff] }
0x1729   :  { %v5005_v29 = vmul.f32 %v7356_v0, %v7352_v23  ;;  %v7042_v23 = vld [vmem:[%s14066_s18 + $0x8d0] sm:$0xff] }
0x172a   :  { %5386 = vmatpush.msrb.mxu3 %v7042_v23  ;;  %5407 = vmatpush.msra.mxu0 %v6959_v43  ;;  %v7044_v23 = vld [vmem:[%s14066_s18 + $0x8e0] sm:$0xff]  ;;  %v6985_v43 = vld [vmem:[%s14066_s18 + $0x708] sm:$0xff] }
0x172b   :  { %6883 = vmatmul.msk.f32.gmra.mxu3 %vm1923_vm11, %v5005_v29 }
0x172c   :  { %5408 = vmatpush.msra.mxu0 %v6953_v60  ;;  %v7033_v60 = vld [vmem:[%s14066_s18 + $0x888] sm:$0xff] }
0x172e   :  { %5409 = vmatpush.msra.mxu0 %v6947_v49  ;;  %v7026_v49 = vld [vmem:[%s14066_s18 + $0x850] sm:$0xff] }
0x17a6   :  { %v5032_v63 = vpop.f32.mrf.mxu3 }
0x17a7   :  { %6900 = vmatmul.msk.f32.vlgmr.msrb.gmra.mxu0 %vm125_vm0, %v5032_v63  ;;  %6902 = vmatmul.msk.f32.vlgmr.msra.gmra.mxu2 %vm125_vm0, %v5032_v63 }
0x17ae   :  { %v5035_v18 = vpop.f32.mrf.mxu3 }
0x17af   :  { %6901 = vmatmul.msk.f32.gmra.mxu0 %vm125_vm0, %v5035_v18  ;;  %6903 = vmatmul.msk.f32.gmra.mxu2 %vm125_vm0, %v5035_v18 }
0x1824   :  { %v5078_v19 = vpop.f32.mrf.mxu0 }
0x1825   :  { %v5107_v30 = vadd.f32 %v5078_v19, %v4704_v16 }
0x1827   :  { %v5111_v26 = vadd.f32 %v5107_v30, %v11770_v42 }
0x1829   :  { %v12783_v34 = vadd.f32 %v5115_v28, %v5111_v26  ;;  %v7030_v26 = vld [vmem:[%s14066_s18 + $0x870] sm:$0xff] }
0x182a   :  { %v5101_v58 = vpop.f32.mrf.mxu2 }
0x182b   :  { %v5108_v25 = vadd.f32 %v5101_v58, %v4727_v5  ;;  %v6940_v5 = vld [vmem:[%s14066_s18 + $0x5a0] sm:$0xff] }
0x182c   :  { %v5081_v36 = vpop.f32.mrf.mxu0  ;;  %v7036_v58 = vld [vmem:[%s14066_s18 + $0x8a0] sm:$0xff] }
0x182d   :  { %v5112_v32 = vadd.f32 %v5108_v25, %v11768_v21  ;;  %v5109_v46 = vadd.f32 %v5081_v36, %v4707_v35  ;;  %5387 = vmatpush.msrb.mxu3 %v7036_v58  ;;  %v6941_v35 = vld [vmem:[%s14066_s18 + $0x5a8] sm:$0xff]  ;;  %v7031_v36 = vld [vmem:[%s14066_s18 + $0x878] sm:$0xff]  ;;  %v6954_v58 = vld [vmem:[%s14066_s18 + $0x610] sm:$0xff] }
0x182e   :  { %v7037_v25 = vld [vmem:[%s14066_s18 + $0x8a8] sm:$0xff]  ;;  %5410 = vmatpush.msra.mxu0 %v6941_v35  ;;  %v6955_v35 = vld [vmem:[%s14066_s18 + $0x618] sm:$0xff] }
0x182f   :  { %v12781_v33 = vadd.f32 %v5116_v62, %v5112_v32  ;;  %v5113_v42 = vadd.f32 %v5109_v46, %v11776_v11  ;;  %v6994_v11 = vld [vmem:[%s14066_s18 + $0x750] sm:$0xff]  ;;  %5433 = vmatpush.msrb.mxu2 %v7037_v25  ;;  %5388 = vmatpush.msrb.mxu3 %v7030_v26  ;;  %v6928_v32 = vld [vmem:[%s14066_s18 + $0x540] sm:$0xff] }
0x1830   :  { %5355 = vmatpush.msra.mxu1 %v6994_v11  ;;  %v7024_v46 = vld [vmem:[%s14066_s18 + $0x840] sm:$0xff]  ;;  %v6911_v11 = vld [vmem:[%s14066_s18 + $0x4b8] sm:$0xff]  ;;  %v7002_v25 = vld [vmem:[%s14066_s18 + $0x790] sm:$0xff] }
0x1831   :  { %v5121_v22 = vsel %vm125_vm0, %v12781_v33, 0.0  ;;  %v5119_v17 = vadd.f32 %v5115_v28, %v5113_v42  ;;  %v6935_v28 = vld [vmem:[%s14066_s18 + $0x578] sm:$0xff]  ;;  %5434 = vmatpush.msrb.mxu2 %v7031_v36  ;;  %5389 = vmatpush.msrb.mxu3 %v7024_v46  ;;  %v7025_v42 = vld [vmem:[%s14066_s18 + $0x848] sm:$0xff]  ;;  %v6948_v26 = vld [vmem:[%s14066_s18 + $0x5e0] sm:$0xff] }
0x1832   :  { %v5104_v51 = vpop.f32.mrf.mxu2  ;;  %v5122_v39 = vadd.f32 %v5121_v22, %v12783_v34  ;;  %5411 = vmatpush.msra.mxu0 %v6935_v28  ;;  %v6922_v22 = vld [vmem:[%s14066_s18 + $0x510] sm:$0xff]  ;;  %v6949_v28 = vld [vmem:[%s14066_s18 + $0x5e8] sm:$0xff]  ;;  %v6943_v46 = vld [vmem:[%s14066_s18 + $0x5b8] sm:$0xff] }
0x1833   :  { %v5110_v54 = vadd.f32 %v5104_v51, %v4730_v53  ;;  %v5125_v7 = vsel %vm1595_vm2, %v5119_v17, 0.0  ;;  %v6929_v53 = vld [vmem:[%s14066_s18 + $0x548] sm:$0xff]  ;;  %5435 = vmatpush.msrb.mxu2 %v7025_v42  ;;  %v7018_v51 = vld [vmem:[%s14066_s18 + $0x810] sm:$0xff]  ;;  %v6936_v42 = vld [vmem:[%s14066_s18 + $0x580] sm:$0xff] }
0x1834   :  { %5123 = vadd.xlane.f32.xlu0 %v5122_v39  ;;  %5412 = vmatpush.msra.mxu0 %v6929_v53  ;;  %v6923_v39 = vld [vmem:[%s14066_s18 + $0x518] sm:$0xff] }
0x1835   :  { %v5114_v21 = vadd.f32 %v5110_v54, %v11779_v59  ;;  %v6988_v59 = vld [vmem:[%s14066_s18 + $0x720] sm:$0xff]  ;;  %5390 = vmatpush.msrb.mxu3 %v7018_v51  ;;  %v7019_v54 = vld [vmem:[%s14066_s18 + $0x818] sm:$0xff] }
0x1836   :  { %5356 = vmatpush.msra.mxu1 %v6988_v59  ;;  %5413 = vmatpush.msra.mxu0 %v6923_v39  ;;  %v6904_v59 = vld [vmem:[%s14066_s18 + $0x480] sm:$0xff]  ;;  %v6930_v39 = vld [vmem:[%s14066_s18 + $0x550] sm:$0xff] }
0x1837   :  { %v5120_v24 = vadd.f32 %v5116_v62, %v5114_v21  ;;  %v6934_v62 = vld [vmem:[%s14066_s18 + $0x570] sm:$0xff]  ;;  %5436 = vmatpush.msrb.mxu2 %v7019_v54  ;;  %v6916_v21 = vld [vmem:[%s14066_s18 + $0x4e0] sm:$0xff]  ;;  %v6931_v54 = vld [vmem:[%s14066_s18 + $0x558] sm:$0xff] }
0x1838   :  { %5357 = vmatpush.msra.mxu1 %v6982_v4  ;;  %v6905_v4 = vld [vmem:[%s14066_s18 + $0x488] sm:$0xff] }
0x1839   :  { %v5126_v38 = vsel %vm1597_vm3, %v5120_v24, 0.0 }
0x183a   :  { %v5127_v45 = vadd.f32 %v5126_v38, %v5125_v7  ;;  %5358 = vmatpush.msra.mxu1 %v6976_v40  ;;  %v7013_v7 = vld [vmem:[%s14066_s18 + $0x7e8] sm:$0xff]  ;;  %v6910_v38 = vld [vmem:[%s14066_s18 + $0x4b0] sm:$0xff]  ;;  %v6996_v40 = vld [vmem:[%s14066_s18 + $0x760] sm:$0xff] }
0x183b   :  { %5437 = vmatpush.msrb.mxu2 %v7013_v7  ;;  %v6918_v7 = vld [vmem:[%s14066_s18 + $0x4f0] sm:$0xff] }
0x183c   :  { %5128 = vadd.xlane.f32.xlu1 %v5127_v45  ;;  %5359 = vmatpush.msra.mxu1 %v6970_v44  ;;  %v7006_v45 = vld [vmem:[%s14066_s18 + $0x7b0] sm:$0xff]  ;;  %v7045_v44 = vld [vmem:[%s14066_s18 + $0x8e8] sm:$0xff] }
0x183d   :  { %5438 = vmatpush.msrb.mxu2 %v7007_v3  ;;  %v6913_v3 = vld [vmem:[%s14066_s18 + $0x4c8] sm:$0xff] }
0x183e   :  { %5360 = vmatpush.msra.mxu1 %v6964_v2  ;;  %v7038_v2 = vld [vmem:[%s14066_s18 + $0x8b0] sm:$0xff] }
0x183f   :  { %5439 = vmatpush.msrb.mxu2 %v7001_v47  ;;  %v6906_v47 = vld [vmem:[%s14066_s18 + $0x490] sm:$0xff] }
0x1840   :  { %5361 = vmatpush.msra.mxu1 %v6958_v56  ;;  %v6984_v56 = vld [vmem:[%s14066_s18 + $0x700] sm:$0xff] }
0x1841   :  { %5478 = vmatpush.msra.mxu2 %v7044_v23 }
0x1842   :  { %5362 = vmatpush.msra.mxu1 %v6952_v15  ;;  %v7032_v15 = vld [vmem:[%s14066_s18 + $0x880] sm:$0xff] }
0x1843   :  { %5479 = vmatpush.msra.mxu2 %v7038_v2 }
0x1844   :  { %5363 = vmatpush.msra.mxu1 %v6946_v9  ;;  %v6979_v9 = vld [vmem:[%s14066_s18 + $0x6d8] sm:$0xff] }
0x1845   :  { %5480 = vmatpush.msra.mxu2 %v7032_v15 }
0x1846   :  { %5364 = vmatpush.msra.mxu1 %v6940_v5  ;;  %v7009_v5 = vld [vmem:[%s14066_s18 + $0x7c8] sm:$0xff] }
0x1847   :  { %5481 = vmatpush.msra.mxu2 %v7026_v49 }
0x1848   :  { %5365 = vmatpush.msra.mxu1 %v6934_v62  ;;  %v7003_v62 = vld [vmem:[%s14066_s18 + $0x798] sm:$0xff] }
0x184a   :  { %5366 = vmatpush.msra.mxu1 %v6928_v32  ;;  %v6942_v32 = vld [vmem:[%s14066_s18 + $0x5b0] sm:$0xff] }
0x184c   :  { %5367 = vmatpush.msra.mxu1 %v6922_v22  ;;  %v6937_v22 = vld [vmem:[%s14066_s18 + $0x588] sm:$0xff] }
0x184e   :  { %5368 = vmatpush.msra.mxu1 %v6916_v21  ;;  %v6924_v21 = vld [vmem:[%s14066_s18 + $0x520] sm:$0xff] }
0x1850   :  { %5369 = vmatpush.msra.mxu1 %v6910_v38  ;;  %v6919_v38 = vld [vmem:[%s14066_s18 + $0x4f8] sm:$0xff] }
0x1852   :  { %5370 = vmatpush.msra.mxu1 %v6904_v59 }
0x1854   :  { %5493 = vmatpush.msrb.mxu1 %v6997_v20 }
0x1856   :  { %5494 = vmatpush.msrb.mxu1 %v6991_v27 }
0x1858   :  { %5495 = vmatpush.msrb.mxu1 %v6985_v43 }
0x185a   :  { %5496 = vmatpush.msrb.mxu1 %v6979_v9 }
0x18a7   :  { %v5124_v57 = vpop.xlane.xlu0 %5123 }
0x18a8   :  { %v5130_v52 = vmul.f32 %v5124_v57, %v9557_v13  ;;  %v6978_v57 = vld [vmem:[%s14066_s18 + $0x6d0] sm:$0xff] }
0x18aa   :  { %v12856_v12 = vsub.f32 %v12783_v34, %v5130_v52  ;;  %v12859_v31 = vsub.f32 %v12781_v33, %v5130_v52  ;;  %v7027_v52 = vld [vmem:[%s14066_s18 + $0x858] sm:$0xff] }
0x18ac   :  { %v5136_v61 = vmul.f32 %v12856_v12, %v12856_v12  ;;  %v5137_v6 = vmul.f32 %v12859_v31, %v12859_v31 }
0x18ae   :  { %v5140_v1 = vsel %vm125_vm0, %v5137_v6, 0.0  ;;  %v6973_v6 = vld [vmem:[%s14066_s18 + $0x6a8] sm:$0xff] }
0x18af   :  { %v5129_v55 = vpop.xlane.xlu1 %5128  ;;  %v5141_v0 = vadd.f32 %v5140_v1, %v5136_v61  ;;  %v6972_v61 = vld [vmem:[%s14066_s18 + $0x6a0] sm:$0xff]  ;;  %5497 = vmatpush.msrb.mxu1 %v6973_v6 }
0x18b0   :  { %v5131_v29 = vmul.f32 %v5129_v55, %v9557_v13  ;;  %v7020_v1 = vld [vmem:[%s14066_s18 + $0x820] sm:$0xff]  ;;  %v7021_v55 = vld [vmem:[%s14066_s18 + $0x828] sm:$0xff] }
0x18b1   :  { %5142 = vadd.xlane.f32.xlu2 %v5141_v0  ;;  %v6966_v0 = vld [vmem:[%s14066_s18 + $0x670] sm:$0xff]  ;;  %5482 = vmatpush.msra.mxu2 %v7020_v1 }
0x18b2   :  { %v12867_v10 = vsub.f32 %v5119_v17, %v5131_v29  ;;  %v12869_v48 = vsub.f32 %v5120_v24, %v5131_v29  ;;  %v7012_v17 = vld [vmem:[%s14066_s18 + $0x7e0] sm:$0xff]  ;;  %v6917_v24 = vld [vmem:[%s14066_s18 + $0x4e8] sm:$0xff]  ;;  %v6967_v29 = vld [vmem:[%s14066_s18 + $0x678] sm:$0xff] }
0x18b3   :  { %5391 = vmatpush.msrb.mxu3 %v7012_v17  ;;  %5414 = vmatpush.msra.mxu0 %v6917_v24  ;;  %v6925_v17 = vld [vmem:[%s14066_s18 + $0x528] sm:$0xff] }
0x18b4   :  { %v5138_v63 = vmul.f32 %v12867_v10, %v12867_v10  ;;  %v5139_v18 = vmul.f32 %v12869_v48, %v12869_v48  ;;  %5498 = vmatpush.msrb.mxu1 %v6967_v29 }
0x18b5   :  { %5392 = vmatpush.msrb.mxu3 %v7006_v45  ;;  %5415 = vmatpush.msra.mxu0 %v6911_v11  ;;  %v6912_v11 = vld [vmem:[%s14066_s18 + $0x4c0] sm:$0xff] }
0x18b6   :  { %v5144_v19 = vsel %vm1595_vm2, %v5138_v63, 0.0  ;;  %v5145_v16 = vsel %vm1597_vm3, %v5139_v18, 0.0  ;;  %v7014_v63 = vld [vmem:[%s14066_s18 + $0x7f0] sm:$0xff]  ;;  %v7015_v18 = vld [vmem:[%s14066_s18 + $0x7f8] sm:$0xff] }
0x18b7   :  { %v5146_v30 = vadd.f32 %v5145_v16, %v5144_v19  ;;  %5393 = vmatpush.msrb.mxu3 %v7000_v41  ;;  %5416 = vmatpush.msra.mxu0 %v6905_v4  ;;  %v6960_v19 = vld [vmem:[%s14066_s18 + $0x640] sm:$0xff]  ;;  %v6961_v16 = vld [vmem:[%s14066_s18 + $0x648] sm:$0xff] }
0x18b8   :  { %5483 = vmatpush.msra.mxu2 %v7014_v63  ;;  %5499 = vmatpush.msrb.mxu1 %v6961_v16 }
0x18b9   :  { %5147 = vadd.xlane.f32.xlu0 %v5146_v30  ;;  %5447 = vmatpush.msra.mxu3 %v6996_v40  ;;  %v7008_v30 = vld [vmem:[%s14066_s18 + $0x7c0] sm:$0xff]  ;;  %v6907_v40 = vld [vmem:[%s14066_s18 + $0x498] sm:$0xff] }
0x18ba   :  { %5524 = vmatpush.msrb.mxu0 %v7045_v44  ;;  %5484 = vmatpush.msra.mxu2 %v7008_v30 }
0x18bb   :  { %5448 = vmatpush.msra.mxu3 %v6990_v14  ;;  %5500 = vmatpush.msrb.mxu1 %v6955_v35  ;;  %v6986_v35 = vld [vmem:[%s14066_s18 + $0x710] sm:$0xff] }
0x18bc   :  { %5525 = vmatpush.msrb.mxu0 %v7039_v8  ;;  %5485 = vmatpush.msra.mxu2 %v7002_v25  ;;  %v5177_v8 = vperm.slane %v12777_v50, 3 }
0x18bd   :  { %5449 = vmatpush.msra.mxu3 %v6984_v56  ;;  %5501 = vmatpush.msrb.mxu1 %v6949_v28  ;;  %v5178_v56 = vperm.slane %v12770_v37, 3  ;;  %v6980_v28 = vld [vmem:[%s14066_s18 + $0x6e0] sm:$0xff] }
0x18be   :  { %5526 = vmatpush.msrb.mxu0 %v7033_v60  ;;  %v5183_v60 = vperm.slane %v12777_v50, 4  ;;  %v6998_v50 = vld [vmem:[%s14066_s18 + $0x770] sm:$0xff] }
0x18bf   :  { %5450 = vmatpush.msra.mxu3 %v6978_v57  ;;  %5502 = vmatpush.msrb.mxu1 %v6943_v46  ;;  %v5184_v57 = vperm.slane %v12770_v37, 4  ;;  %v6999_v37 = vld [vmem:[%s14066_s18 + $0x778] sm:$0xff] }
0x18c0   :  { %5527 = vmatpush.msrb.mxu0 %v7027_v52 }
0x18c1   :  { %5451 = vmatpush.msra.mxu3 %v6972_v61  ;;  %5503 = vmatpush.msrb.mxu1 %v6937_v22  ;;  %v7028_v22 = vld [vmem:[%s14066_s18 + $0x860] sm:$0xff] }
0x18c2   :  { %5528 = vmatpush.msrb.mxu0 %v7021_v55 }
0x18c3   :  { %5452 = vmatpush.msra.mxu3 %v6966_v0  ;;  %5504 = vmatpush.msrb.mxu1 %v6931_v54  ;;  %v6969_v54 = vld [vmem:[%s14066_s18 + $0x688] sm:$0xff] }
0x18c4   :  { %5529 = vmatpush.msrb.mxu0 %v7015_v18  ;;  %v6992_v18 = vld [vmem:[%s14066_s18 + $0x740] sm:$0xff] }
0x18c5   :  { %5453 = vmatpush.msra.mxu3 %v6960_v19  ;;  %5505 = vmatpush.msrb.mxu1 %v6925_v17  ;;  %v6993_v19 = vld [vmem:[%s14066_s18 + $0x748] sm:$0xff]  ;;  %v7023_v17 = vld [vmem:[%s14066_s18 + $0x838] sm:$0xff] }
0x18c6   :  { %5530 = vmatpush.msrb.mxu0 %v7009_v5  ;;  %v7040_v5 = vld [vmem:[%s14066_s18 + $0x8c0] sm:$0xff] }
0x18c7   :  { %5454 = vmatpush.msra.mxu3 %v6954_v58  ;;  %5506 = vmatpush.msrb.mxu1 %v6919_v38  ;;  %v7041_v58 = vld [vmem:[%s14066_s18 + $0x8c8] sm:$0xff]  ;;  %v7016_v38 = vld [vmem:[%s14066_s18 + $0x800] sm:$0xff] }
0x18c8   :  { %5531 = vmatpush.msrb.mxu0 %v7003_v62  ;;  %v7034_v62 = vld [vmem:[%s14066_s18 + $0x890] sm:$0xff] }
0x18c9   :  { %5455 = vmatpush.msra.mxu3 %v6948_v26  ;;  %5507 = vmatpush.msrb.mxu1 %v6913_v3  ;;  %v7035_v26 = vld [vmem:[%s14066_s18 + $0x898] sm:$0xff]  ;;  %v6957_v3 = vld [vmem:[%s14066_s18 + $0x628] sm:$0xff] }
0x18cb   :  { %5456 = vmatpush.msra.mxu3 %v6942_v32  ;;  %5508 = vmatpush.msrb.mxu1 %v6907_v40  ;;  %v6944_v40 = vld [vmem:[%s14066_s18 + $0x5c0] sm:$0xff] }
0x18cd   :  { %5457 = vmatpush.msra.mxu3 %v6936_v42  ;;  %v6975_v42 = vld [vmem:[%s14066_s18 + $0x6b8] sm:$0xff] }
0x18cf   :  { %5458 = vmatpush.msra.mxu3 %v6930_v39  ;;  %v6968_v39 = vld [vmem:[%s14066_s18 + $0x680] sm:$0xff] }
0x18d1   :  { %5459 = vmatpush.msra.mxu3 %v6924_v21  ;;  %v7022_v21 = vld [vmem:[%s14066_s18 + $0x830] sm:$0xff] }
0x18d3   :  { %5460 = vmatpush.msra.mxu3 %v6918_v7  ;;  %v6963_v7 = vld [vmem:[%s14066_s18 + $0x658] sm:$0xff] }
0x18d5   :  { %5461 = vmatpush.msra.mxu3 %v6912_v11  ;;  %v6956_v11 = vld [vmem:[%s14066_s18 + $0x620] sm:$0xff] }
0x18d7   :  { %5462 = vmatpush.msra.mxu3 %v6906_v47  ;;  %v7011_v47 = vld [vmem:[%s14066_s18 + $0x7d8] sm:$0xff] }
0x1924   :  { %v5143_v36 = vpop.xlane.xlu2 %5142 }
0x1925   :  { %v5149_v53 = vmul.f32 %v5143_v36, %v9557_v13  ;;  %v6981_v36 = vld [vmem:[%s14066_s18 + $0x6e8] sm:$0xff] }
0x1927   :  { %v5151_v51 = vadd.f32 1e-05, %v5149_v53  ;;  %v6974_v53 = vld [vmem:[%s14066_s18 + $0x6b0] sm:$0xff] }
0x1929   :  { %7357 = vrsqrt.f32 %v5151_v51  ;;  %vm5159_vm12 = vweird.f32 %v5151_v51 }
0x192c   :  { %v5148_v24 = vpop.xlane.xlu0 %5147 }
0x192d   :  { %v5150_v45 = vmul.f32 %v5148_v24, %v9557_v13  ;;  %v6962_v24 = vld [vmem:[%s14066_s18 + $0x650] sm:$0xff] }
0x192f   :  { %v7358_v59 = vpop.eup %7357  ;;  %v5152_v41 = vadd.f32 1e-05, %v5150_v45  ;;  %v7017_v45 = vld [vmem:[%s14066_s18 + $0x808] sm:$0xff] }
0x1930   :  { %v5154_v4 = vmul.f32 %v7358_v59, %v5151_v51  ;;  %vm5160_vm11 = vweird.f32 %v7358_v59  ;;  %v7029_v51 = vld [vmem:[%s14066_s18 + $0x868] sm:$0xff] }
0x1931   :  { %7359 = vrsqrt.f32 %v5152_v41  ;;  %vm5161_vm14 = vmor %vm5159_vm12, %vm5160_vm11  ;;  %vm5169_vm1 = vweird.f32 %v5152_v41 }
0x1932   :  { %v5155_v20 = vmul.f32 %v7358_v59, %v5154_v4  ;;  %v7010_v4 = vld [vmem:[%s14066_s18 + $0x7d0] sm:$0xff] }
0x1934   :  { %v5156_v23 = vmul.f32 0.5, %v5155_v20  ;;  %v6945_v20 = vld [vmem:[%s14066_s18 + $0x5c8] sm:$0xff] }
0x1936   :  { %v5157_v44 = vsub.f32 1.5, %v5156_v23  ;;  %v7004_v23 = vld [vmem:[%s14066_s18 + $0x7a0] sm:$0xff] }
0x1937   :  { %v7360_v14 = vpop.eup %7359 }
0x1938   :  { %v5158_v27 = vmul.f32 %v7358_v59, %v5157_v44  ;;  %v5164_v2 = vmul.f32 %v7360_v14, %v5152_v41  ;;  %vm5170_vm15 = vweird.f32 %v7360_v14  ;;  %v6951_v41 = vld [vmem:[%s14066_s18 + $0x5f8] sm:$0xff]  ;;  %v7005_v44 = vld [vmem:[%s14066_s18 + $0x7a8] sm:$0xff] }
0x1939   :  { %vm5171_vm4 = vmor %vm5169_vm1, %vm5170_vm15 }
0x193a   :  { %v5162_v43 = vsel %vm5161_vm14, %v7358_v59, %v5158_v27  ;;  %v5165_v15 = vmul.f32 %v7360_v14, %v5164_v2  ;;  %v6950_v59 = vld [vmem:[%s14066_s18 + $0x5f0] sm:$0xff]  ;;  %v6939_v27 = vld [vmem:[%s14066_s18 + $0x598] sm:$0xff] }
0x193b   :  { %v5173_v9 = vmul.f32 %v5162_v43, %v12856_v12  ;;  %v5174_v49 = vmul.f32 %v5162_v43, %v12859_v31  ;;  %v7046_v12 = vld [vmem:[%s14066_s18 + $0x8f0] sm:$0xff]  ;;  %v7047_v31 = vld [vmem:[%s14066_s18 + $0x8f8] sm:$0xff]  ;;  %v6933_v43 = vld [vmem:[%s14066_s18 + $0x568] sm:$0xff] }
0x193c   :  { %v5166_v52 = vmul.f32 0.5, %v5165_v15  ;;  %v7091_v2 = vld [vmem:[%s14067_s19 + $0x6f0] sm:$0xff] }
0x193d   :  { %v5179_v61 = vmul.f32 %v5177_v8, %v5173_v9  ;;  %v5180_v6 = vmul.f32 %v5178_v56, %v5174_v49  ;;  %v6926_v15 = vld [vmem:[%s14066_s18 + $0x530] sm:$0xff]  ;;  %v7153_v9 = vld [vmem:[%s14067_s19 + $0x8e0] sm:$0xff] }
0x193e   :  { %v5167_v1 = vsub.f32 1.5, %v5166_v52  ;;  %v6920_v49 = vld [vmem:[%s14066_s18 + $0x500] sm:$0xff]  ;;  %v6921_v52 = vld [vmem:[%s14066_s18 + $0x508] sm:$0xff] }
0x193f   :  { %v13113_v55 = vadd.f32 %v5183_v60, %v5179_v61  ;;  %v13115_v0 = vadd.f32 %v5184_v57, %v5180_v6  ;;  %v7087_v61 = vld [vmem:[%s14067_s19 + $0x6d0] sm:$0xff] }
0x1940   :  { %v5168_v29 = vmul.f32 %v7360_v14, %v5167_v1  ;;  %v7151_v6 = vld [vmem:[%s14067_s19 + $0x8d0] sm:$0xff] }
0x1941   :  { %5371 = vmatmul.f32.vlgmr.msra.gmra.mxu1 %v13113_v55  ;;  %7049 = vmatmul.msk.f32.vlgmr.msrb.gmra.mxu3 %vm125_vm0, %v13115_v0  ;;  %v6914_v1 = vld [vmem:[%s14066_s18 + $0x4d0] sm:$0xff] }
0x1942   :  { %v5172_v63 = vsel %vm5171_vm4, %v7360_v14, %v5168_v29  ;;  %5417 = vmatmul.f32.vlgmr.msra.gmra.mxu0 %v13113_v55  ;;  %7051 = vmatmul.msk.f32.vlgmr.msrb.gmra.mxu2 %vm125_vm0, %v13115_v0  ;;  %v6938_v14 = vld [vmem:[%s14066_s18 + $0x590] sm:$0xff]  ;;  %v6915_v29 = vld [vmem:[%s14066_s18 + $0x4d8] sm:$0xff] }
0x1943   :  { %v5175_v16 = vmul.f32 %v5172_v63, %v12867_v10  ;;  %v5176_v30 = vmul.f32 %v5172_v63, %v12869_v48  ;;  %5539 = vmatpush.msrb.mxu2 %v6998_v50  ;;  %5585 = vmatpush.msra.mxu0 %v6999_v37  ;;  %v6987_v10 = vld [vmem:[%s14066_s18 + $0x718] sm:$0xff]  ;;  %v7085_v50 = vld [vmem:[%s14067_s19 + $0x6c0] sm:$0xff]  ;;  %v7123_v63 = vld [vmem:[%s14067_s19 + $0x7f0] sm:$0xff] }
0x1944   :  { %5570 = vmatpush.msrb.mxu3 %v7046_v12  ;;  %5616 = vmatpush.msra.mxu1 %v7047_v31  ;;  %v7149_v37 = vld [vmem:[%s14067_s19 + $0x8c0] sm:$0xff]  ;;  %v6909_v31 = vld [vmem:[%s14066_s18 + $0x4a8] sm:$0xff] }
0x1945   :  { %v5181_v48 = vmul.f32 %v5177_v8, %v5175_v16  ;;  %v5182_v25 = vmul.f32 %v5178_v56, %v5176_v30  ;;  %5540 = vmatpush.msrb.mxu2 %v6992_v18  ;;  %5586 = vmatpush.msra.mxu0 %v6993_v19  ;;  %v7155_v8 = vld [vmem:[%s14067_s19 + $0x8f0] sm:$0xff]  ;;  %v6932_v56 = vld [vmem:[%s14066_s18 + $0x560] sm:$0xff] }
0x1946   :  { %5571 = vmatpush.msrb.mxu3 %v7040_v5  ;;  %5617 = vmatpush.msra.mxu1 %v7041_v58  ;;  %v6908_v12 = vld [vmem:[%s14066_s18 + $0x4a0] sm:$0xff]  ;;  %v7187_v18 = vld [vmem:[%s14067_s19 + $0x9f0] sm:$0xff] }
0x1947   :  { %v13167_v32 = vadd.f32 %v5183_v60, %v5181_v48  ;;  %v13169_v46 = vadd.f32 %v5184_v57, %v5182_v25  ;;  %5541 = vmatpush.msrb.mxu2 %v6986_v35  ;;  %5587 = vmatpush.msra.mxu0 %v6987_v10  ;;  %v6927_v60 = vld [vmem:[%s14066_s18 + $0x538] sm:$0xff]  ;;  %v7089_v57 = vld [vmem:[%s14067_s19 + $0x6e0] sm:$0xff]  ;;  %v7083_v19 = vld [vmem:[%s14067_s19 + $0x6b0] sm:$0xff] }
0x1948   :  { %5572 = vmatpush.msrb.mxu3 %v7034_v62  ;;  %5618 = vmatpush.msra.mxu1 %v7035_v26  ;;  %v7147_v16 = vld [vmem:[%s14067_s19 + $0x8b0] sm:$0xff]  ;;  %v7121_v30 = vld [vmem:[%s14067_s19 + $0x7e0] sm:$0xff] }
0x1949   :  { %5542 = vmatpush.msrb.mxu2 %v6980_v28  ;;  %5588 = vmatpush.msra.mxu0 %v6981_v36  ;;  %v7185_v5 = vld [vmem:[%s14067_s19 + $0x9e0] sm:$0xff]  ;;  %v7183_v35 = vld [vmem:[%s14067_s19 + $0x9d0] sm:$0xff] }
0x194a   :  { %5374 = vmatmul.f32.gmra.mxu1 %v13167_v32  ;;  %7050 = vmatmul.msk.f32.gmra.mxu3 %vm125_vm0, %v13169_v46  ;;  %v7081_v58 = vld [vmem:[%s14067_s19 + $0x6a0] sm:$0xff]  ;;  %v7079_v10 = vld [vmem:[%s14067_s19 + $0x690] sm:$0xff] }
0x194b   :  { %5420 = vmatmul.f32.gmra.mxu0 %v13167_v32  ;;  %7052 = vmatmul.msk.f32.gmra.mxu2 %vm125_vm0, %v13169_v46  ;;  %v7143_v48 = vld [vmem:[%s14067_s19 + $0x890] sm:$0xff]  ;;  %v7117_v25 = vld [vmem:[%s14067_s19 + $0x7c0] sm:$0xff] }
0x194c   :  { %5543 = vmatpush.msrb.mxu2 %v6974_v53  ;;  %5589 = vmatpush.msra.mxu0 %v6975_v42  ;;  %v7181_v62 = vld [vmem:[%s14067_s19 + $0x9c0] sm:$0xff]  ;;  %v7115_v26 = vld [vmem:[%s14067_s19 + $0x7b0] sm:$0xff] }
0x194d   :  { %5573 = vmatpush.msrb.mxu3 %v7028_v22  ;;  %5619 = vmatpush.msra.mxu1 %v7029_v51  ;;  %v7179_v28 = vld [vmem:[%s14067_s19 + $0x9b0] sm:$0xff]  ;;  %v7113_v36 = vld [vmem:[%s14067_s19 + $0x7a0] sm:$0xff] }
0x194e   :  { %5544 = vmatpush.msrb.mxu2 %v6968_v39  ;;  %5590 = vmatpush.msra.mxu0 %v6969_v54  ;;  %v7175_v53 = vld [vmem:[%s14067_s19 + $0x990] sm:$0xff]  ;;  %v7109_v42 = vld [vmem:[%s14067_s19 + $0x780] sm:$0xff] }
0x194f   :  { %5574 = vmatpush.msrb.mxu3 %v7022_v21  ;;  %5620 = vmatpush.msra.mxu1 %v7023_v17  ;;  %v7173_v22 = vld [vmem:[%s14067_s19 + $0x980] sm:$0xff]  ;;  %v7107_v51 = vld [vmem:[%s14067_s19 + $0x770] sm:$0xff] }
0x1950   :  { %5545 = vmatpush.msrb.mxu2 %v6962_v24  ;;  %5591 = vmatpush.msra.mxu0 %v6963_v7  ;;  %v7171_v39 = vld [vmem:[%s14067_s19 + $0x970] sm:$0xff]  ;;  %v7105_v54 = vld [vmem:[%s14067_s19 + $0x760] sm:$0xff] }
0x1951   :  { %5575 = vmatpush.msrb.mxu3 %v7016_v38  ;;  %5621 = vmatpush.msra.mxu1 %v7017_v45  ;;  %v7169_v21 = vld [vmem:[%s14067_s19 + $0x960] sm:$0xff]  ;;  %v7103_v24 = vld [vmem:[%s14067_s19 + $0x750] sm:$0xff] }
0x1952   :  { %5546 = vmatpush.msrb.mxu2 %v6956_v11  ;;  %5592 = vmatpush.msra.mxu0 %v6957_v3  ;;  %v7077_v17 = vld [vmem:[%s14067_s19 + $0x680] sm:$0xff]  ;;  %v7167_v38 = vld [vmem:[%s14067_s19 + $0x950] sm:$0xff] }
0x1953   :  { %5463 = vmatmul.f32.vlgmr.msra.gmra.mxu3 %v13113_v55  ;;  %7053 = vmatmul.msk.f32.vlgmr.msra.gmra.mxu2 %vm125_vm0, %v13115_v0  ;;  %v7141_v7 = vld [vmem:[%s14067_s19 + $0x880] sm:$0xff]  ;;  %v7075_v45 = vld [vmem:[%s14067_s19 + $0x670] sm:$0xff] }
0x1954   :  { %5509 = vmatmul.f32.vlgmr.msrb.gmra.mxu1 %v13113_v55  ;;  %7055 = vmatmul.msk.f32.vlgmr.msrb.gmra.mxu0 %vm125_vm0, %v13115_v0  ;;  %v7101_v11 = vld [vmem:[%s14067_s19 + $0x740] sm:$0xff]  ;;  %v7139_v3 = vld [vmem:[%s14067_s19 + $0x870] sm:$0xff] }
0x1955   :  { %5547 = vmatpush.msrb.mxu2 %v6950_v59  ;;  %5593 = vmatpush.msra.mxu0 %v6951_v41  ;;  %v7165_v59 = vld [vmem:[%s14067_s19 + $0x940] sm:$0xff] }
0x1956   :  { %5576 = vmatpush.msrb.mxu3 %v7010_v4  ;;  %5622 = vmatpush.msra.mxu1 %v7011_v47  ;;  %v7073_v41 = vld [vmem:[%s14067_s19 + $0x660] sm:$0xff]  ;;  %v7099_v4 = vld [vmem:[%s14067_s19 + $0x730] sm:$0xff] }
0x1957   :  { %5548 = vmatpush.msrb.mxu2 %v6944_v40  ;;  %5594 = vmatpush.msra.mxu0 %v6945_v20  ;;  %v7137_v47 = vld [vmem:[%s14067_s19 + $0x860] sm:$0xff]  ;;  %v7163_v40 = vld [vmem:[%s14067_s19 + $0x930] sm:$0xff] }
0x1958   :  { %5577 = vmatpush.msrb.mxu3 %v7004_v23  ;;  %5623 = vmatpush.msra.mxu1 %v7005_v44  ;;  %v7071_v20 = vld [vmem:[%s14067_s19 + $0x650] sm:$0xff]  ;;  %v7097_v23 = vld [vmem:[%s14067_s19 + $0x720] sm:$0xff] }
0x1959   :  { %5549 = vmatpush.msrb.mxu2 %v6938_v14  ;;  %5595 = vmatpush.msra.mxu0 %v6939_v27  ;;  %v7135_v44 = vld [vmem:[%s14067_s19 + $0x850] sm:$0xff]  ;;  %v7161_v14 = vld [vmem:[%s14067_s19 + $0x920] sm:$0xff] }
0x195a   :  { %5932 = vmatpush.msra.mxu3 %v7091_v2  ;;  %5976 = vmatpush.msrb.mxu1 %v7155_v8  ;;  %v7069_v27 = vld [vmem:[%s14067_s19 + $0x640] sm:$0xff]  ;;  %v7095_v2 = vld [vmem:[%s14067_s19 + $0x710] sm:$0xff] }
0x195b   :  { %5550 = vmatpush.msrb.mxu2 %v6932_v56  ;;  %5596 = vmatpush.msra.mxu0 %v6933_v43  ;;  %v7133_v8 = vld [vmem:[%s14067_s19 + $0x840] sm:$0xff]  ;;  %v7159_v56 = vld [vmem:[%s14067_s19 + $0x910] sm:$0xff] }
0x195c   :  { %5466 = vmatmul.f32.gmra.mxu3 %v13167_v32  ;;  %7054 = vmatmul.msk.f32.gmra.mxu2 %vm125_vm0, %v13169_v46  ;;  %v7067_v43 = vld [vmem:[%s14067_s19 + $0x630] sm:$0xff] }
0x195d   :  { %5512 = vmatmul.f32.gmra.mxu1 %v13167_v32  ;;  %7056 = vmatmul.msk.f32.gmra.mxu0 %vm125_vm0, %v13169_v46 }
0x195e   :  { %5551 = vmatpush.msrb.mxu2 %v6926_v15  ;;  %5597 = vmatpush.msra.mxu0 %v6927_v60  ;;  %v7093_v15 = vld [vmem:[%s14067_s19 + $0x700] sm:$0xff]  ;;  %v7131_v60 = vld [vmem:[%s14067_s19 + $0x830] sm:$0xff] }
0x195f   :  { %5933 = vmatpush.msra.mxu3 %v7089_v57  ;;  %5977 = vmatpush.msrb.mxu1 %v7153_v9  ;;  %v7157_v57 = vld [vmem:[%s14067_s19 + $0x900] sm:$0xff]  ;;  %v7251_v9 = vld [vmem:[%s14067_s19 + $0xbf0] sm:$0xff] }
0x1960   :  { %5552 = vmatpush.msrb.mxu2 %v6920_v49  ;;  %5598 = vmatpush.msra.mxu0 %v6921_v52  ;;  %v7124_v49 = vld [vmem:[%s14067_s19 + $0x7f8] sm:$0xff]  ;;  %v7065_v52 = vld [vmem:[%s14067_s19 + $0x620] sm:$0xff] }
0x1961   :  { %5934 = vmatpush.msra.mxu3 %v7087_v61  ;;  %5978 = vmatpush.msrb.mxu1 %v7151_v6  ;;  %v7129_v61 = vld [vmem:[%s14067_s19 + $0x820] sm:$0xff] }
0x1962   :  { %5553 = vmatpush.msrb.mxu2 %v6914_v1  ;;  %5599 = vmatpush.msra.mxu0 %v6915_v29  ;;  %v7249_v6 = vld [vmem:[%s14067_s19 + $0xbe0] sm:$0xff]  ;;  %v7122_v1 = vld [vmem:[%s14067_s19 + $0x7e8] sm:$0xff]  ;;  %v7063_v29 = vld [vmem:[%s14067_s19 + $0x610] sm:$0xff] }
0x1963   :  { %5935 = vmatpush.msra.mxu3 %v7085_v50  ;;  %5979 = vmatpush.msrb.mxu1 %v7149_v37  ;;  %v7127_v50 = vld [vmem:[%s14067_s19 + $0x810] sm:$0xff] }
0x1964   :  { %5554 = vmatpush.msrb.mxu2 %v6908_v12  ;;  %5600 = vmatpush.msra.mxu0 %v6909_v31  ;;  %v7247_v37 = vld [vmem:[%s14067_s19 + $0xbd0] sm:$0xff]  ;;  %v7120_v12 = vld [vmem:[%s14067_s19 + $0x7d8] sm:$0xff]  ;;  %v7061_v31 = vld [vmem:[%s14067_s19 + $0x600] sm:$0xff] }
0x1965   :  { %5555 = vmatmul.f32.vlgmr.msrb.gmra.mxu2 %v13113_v55  ;;  %7057 = vmatmul.msk.f32.vlgmr.msrb.gmra.mxu3 %vm125_vm0, %v13115_v0 }
0x1966   :  { %5601 = vmatmul.f32.vlgmr.msra.gmra.mxu0 %v13113_v55  ;;  %7059 = vmatmul.msk.f32.vlgmr.msra.gmra.mxu1 %vm125_vm0, %v13115_v0  ;;  %v7145_v55 = vld [vmem:[%s14067_s19 + $0x8a0] sm:$0xff]  ;;  %v7119_v0 = vld [vmem:[%s14067_s19 + $0x7d0] sm:$0xff] }
0x1967   :  { %5954 = vmatpush.msra.mxu2 %v7123_v63  ;;  %5998 = vmatpush.msrb.mxu0 %v7187_v18  ;;  %v7125_v63 = vld [vmem:[%s14067_s19 + $0x800] sm:$0xff]  ;;  %v7219_v18 = vld [vmem:[%s14067_s19 + $0xaf0] sm:$0xff] }
0x1968   :  { %5936 = vmatpush.msra.mxu3 %v7083_v19  ;;  %5980 = vmatpush.msrb.mxu1 %v7147_v16  ;;  %v7245_v19 = vld [vmem:[%s14067_s19 + $0xbc0] sm:$0xff]  ;;  %v7092_v16 = vld [vmem:[%s14067_s19 + $0x6f8] sm:$0xff] }
0x1969   :  { %5955 = vmatpush.msra.mxu2 %v7121_v30  ;;  %5999 = vmatpush.msrb.mxu0 %v7185_v5  ;;  %v7118_v30 = vld [vmem:[%s14067_s19 + $0x7c8] sm:$0xff]  ;;  %v7217_v5 = vld [vmem:[%s14067_s19 + $0xae0] sm:$0xff] }
0x196a   :  { %5937 = vmatpush.msra.mxu3 %v7081_v58  ;;  %5981 = vmatpush.msrb.mxu1 %v7145_v55  ;;  %v7243_v58 = vld [vmem:[%s14067_s19 + $0xbb0] sm:$0xff]  ;;  %v7090_v55 = vld [vmem:[%s14067_s19 + $0x6e8] sm:$0xff] }
0x196b   :  { %5956 = vmatpush.msra.mxu2 %v7119_v0  ;;  %6000 = vmatpush.msrb.mxu0 %v7183_v35  ;;  %v7116_v0 = vld [vmem:[%s14067_s19 + $0x7b8] sm:$0xff]  ;;  %v7215_v35 = vld [vmem:[%s14067_s19 + $0xad0] sm:$0xff] }
0x196c   :  { %5938 = vmatpush.msra.mxu3 %v7079_v10  ;;  %5982 = vmatpush.msrb.mxu1 %v7143_v48  ;;  %v7241_v10 = vld [vmem:[%s14067_s19 + $0xba0] sm:$0xff]  ;;  %v7088_v48 = vld [vmem:[%s14067_s19 + $0x6d8] sm:$0xff] }
0x196d   :  { %5558 = vmatmul.f32.gmra.mxu2 %v13167_v32  ;;  %7058 = vmatmul.msk.f32.gmra.mxu3 %vm125_vm0, %v13169_v46 }
0x196e   :  { %5604 = vmatmul.f32.gmra.mxu0 %v13167_v32  ;;  %7060 = vmatmul.msk.f32.gmra.mxu1 %vm125_vm0, %v13169_v46  ;;  %v7177_v32 = vld [vmem:[%s14067_s19 + $0x9a0] sm:$0xff]  ;;  %v7111_v46 = vld [vmem:[%s14067_s19 + $0x790] sm:$0xff]  ;;  %vm6208_vm0 = vcmask 1040384  }
0x196f   :  { %5957 = vmatpush.msra.mxu2 %v7117_v25  ;;  %6001 = vmatpush.msrb.mxu0 %v7181_v62  ;;  %v7114_v25 = vld [vmem:[%s14067_s19 + $0x7a8] sm:$0xff]  ;;  %v7213_v62 = vld [vmem:[%s14067_s19 + $0xac0] sm:$0xff] }
0x1970   :  { %5939 = vmatpush.msra.mxu3 %v7077_v17  ;;  %5983 = vmatpush.msrb.mxu1 %v7141_v7  ;;  %v7108_v7 = vld [vmem:[%s14067_s19 + $0x778] sm:$0xff] }
0x1971   :  { %5958 = vmatpush.msra.mxu2 %v7115_v26  ;;  %6002 = vmatpush.msrb.mxu0 %v7179_v28  ;;  %v7239_v26 = vld [vmem:[%s14067_s19 + $0xb90] sm:$0xff]  ;;  %v7086_v28 = vld [vmem:[%s14067_s19 + $0x6c8] sm:$0xff] }
0x1972   :  { %5940 = vmatpush.msra.mxu3 %v7075_v45  ;;  %5984 = vmatpush.msrb.mxu1 %v7139_v3  ;;  %v7207_v45 = vld [vmem:[%s14067_s19 + $0xa90] sm:$0xff]  ;;  %v7080_v3 = vld [vmem:[%s14067_s19 + $0x698] sm:$0xff] }
0x1973   :  { %5959 = vmatpush.msra.mxu2 %v7113_v36  ;;  %6003 = vmatpush.msrb.mxu0 %v7177_v32  ;;  %v13561_v36 = vld [vmem:[%s14065_s17 + $0x6] sm:$0x3f]  ;;  %v7112_v32 = vld [vmem:[%s14067_s19 + $0x798] sm:$0xff] }
0x1974   :  { %5941 = vmatpush.msra.mxu3 %v7073_v41  ;;  %5985 = vmatpush.msrb.mxu1 %v7137_v47  ;;  %v5337_v17 = vperm.slane %v13561_v36, 0  ;;  %v7205_v41 = vld [vmem:[%s14067_s19 + $0xa80] sm:$0xff]  ;;  %v7078_v47 = vld [vmem:[%s14067_s19 + $0x688] sm:$0xff] }
0x1975   :  { %5960 = vmatpush.msra.mxu2 %v7111_v46  ;;  %6004 = vmatpush.msrb.mxu0 %v7175_v53  ;;  %v7211_v46 = vld [vmem:[%s14067_s19 + $0xab0] sm:$0xff]  ;;  %v7237_v53 = vld [vmem:[%s14067_s19 + $0xb80] sm:$0xff] }
0x1976   :  { %5942 = vmatpush.msra.mxu3 %v7071_v20  ;;  %5986 = vmatpush.msrb.mxu1 %v7135_v44  ;;  %v7104_v20 = vld [vmem:[%s14067_s19 + $0x758] sm:$0xff] }
0x1977   :  { %5961 = vmatpush.msra.mxu2 %v7109_v42  ;;  %6005 = vmatpush.msrb.mxu0 %v7173_v22  ;;  %v7084_v42 = vld [vmem:[%s14067_s19 + $0x6b8] sm:$0xff]  ;;  %v7110_v22 = vld [vmem:[%s14067_s19 + $0x788] sm:$0xff] }
0x1978   :  { %5943 = vmatpush.msra.mxu3 %v7069_v27  ;;  %5987 = vmatpush.msrb.mxu1 %v7133_v8  ;;  %v7229_v27 = vld [vmem:[%s14067_s19 + $0xb40] sm:$0xff] }
0x1979   :  { %5962 = vmatpush.msra.mxu2 %v7107_v51  ;;  %6006 = vmatpush.msrb.mxu0 %v7171_v39  ;;  %v7209_v39 = vld [vmem:[%s14067_s19 + $0xaa0] sm:$0xff] }
0x197a   :  { %5944 = vmatpush.msra.mxu3 %v7067_v43  ;;  %5988 = vmatpush.msrb.mxu1 %v7131_v60  ;;  %v7102_v43 = vld [vmem:[%s14067_s19 + $0x748] sm:$0xff]  ;;  %v7201_v60 = vld [vmem:[%s14067_s19 + $0xa60] sm:$0xff] }
0x197b   :  { %5963 = vmatpush.msra.mxu2 %v7105_v54  ;;  %6007 = vmatpush.msrb.mxu0 %v7169_v21  ;;  %v7235_v54 = vld [vmem:[%s14067_s19 + $0xb70] sm:$0xff]  ;;  %v7082_v21 = vld [vmem:[%s14067_s19 + $0x6a8] sm:$0xff] }
0x197c   :  { %5945 = vmatpush.msra.mxu3 %v7065_v52  ;;  %5989 = vmatpush.msrb.mxu1 %v7129_v61  ;;  %v7100_v61 = vld [vmem:[%s14067_s19 + $0x738] sm:$0xff] }
0x197d   :  { %5964 = vmatpush.msra.mxu2 %v7103_v24  ;;  %6008 = vmatpush.msrb.mxu0 %v7167_v38  ;;  %v5338_v38 = vperm.slane %v13561_v36, 1 }
0x197e   :  { %5946 = vmatpush.msra.mxu3 %v7063_v29  ;;  %5990 = vmatpush.msrb.mxu1 %v7127_v50  ;;  %v7199_v29 = vld [vmem:[%s14067_s19 + $0xa50] sm:$0xff]  ;;  %v7225_v50 = vld [vmem:[%s14067_s19 + $0xb20] sm:$0xff] }
0x197f   :  { %5965 = vmatpush.msra.mxu2 %v7101_v11  ;;  %6009 = vmatpush.msrb.mxu0 %v7165_v59  ;;  %v7233_v11 = vld [vmem:[%s14067_s19 + $0xb60] sm:$0xff]  ;;  %v7106_v59 = vld [vmem:[%s14067_s19 + $0x768] sm:$0xff] }
0x1980   :  { %5947 = vmatpush.msra.mxu3 %v7061_v31  ;;  %5991 = vmatpush.msrb.mxu1 %v7125_v63  ;;  %v7098_v31 = vld [vmem:[%s14067_s19 + $0x728] sm:$0xff] }
0x1981   :  { %5966 = vmatpush.msra.mxu2 %v7099_v4  ;;  %6010 = vmatpush.msrb.mxu0 %v7163_v40  ;;  %v7231_v4 = vld [vmem:[%s14067_s19 + $0xb50] sm:$0xff] }
0x1982   :  { %6020 = vmatpush.msrb.mxu3 %v7219_v18  ;;  %6064 = vmatpush.msra.mxu1 %v7092_v16  ;;  %v7197_v18 = vld [vmem:[%s14067_s19 + $0xa40] sm:$0xff]  ;;  %v7070_v16 = vld [vmem:[%s14067_s19 + $0x648] sm:$0xff] }
0x1983   :  { %5967 = vmatpush.msra.mxu2 %v7097_v23  ;;  %6011 = vmatpush.msrb.mxu0 %v7161_v14  ;;  %v7203_v14 = vld [vmem:[%s14067_s19 + $0xa70] sm:$0xff] }
0x1984   :  { %6021 = vmatpush.msrb.mxu3 %v7217_v5  ;;  %6065 = vmatpush.msra.mxu1 %v7090_v55  ;;  %v7096_v5 = vld [vmem:[%s14067_s19 + $0x718] sm:$0xff] }
0x1985   :  { %5968 = vmatpush.msra.mxu2 %v7095_v2  ;;  %6012 = vmatpush.msrb.mxu0 %v7159_v56  ;;  %v7076_v2 = vld [vmem:[%s14067_s19 + $0x678] sm:$0xff] }
0x1986   :  { %6022 = vmatpush.msrb.mxu3 %v7215_v35  ;;  %6066 = vmatpush.msra.mxu1 %v7088_v48  ;;  %v7221_v35 = vld [vmem:[%s14067_s19 + $0xb00] sm:$0xff] }
0x1987   :  { %5969 = vmatpush.msra.mxu2 %v7093_v15  ;;  %6013 = vmatpush.msrb.mxu0 %v7157_v57  ;;  %v7227_v57 = vld [vmem:[%s14067_s19 + $0xb30] sm:$0xff] }
0x1988   :  { %6023 = vmatpush.msrb.mxu3 %v7213_v62  ;;  %6067 = vmatpush.msra.mxu1 %v7086_v28 }
0x1989   :  { %6042 = vmatpush.msrb.mxu2 %v7251_v9  ;;  %6086 = vmatpush.msra.mxu0 %v7124_v49  ;;  %v7074_v9 = vld [vmem:[%s14067_s19 + $0x668] sm:$0xff] }
0x198a   :  { %6024 = vmatpush.msrb.mxu3 %v7211_v46  ;;  %6068 = vmatpush.msra.mxu1 %v7084_v42  ;;  %v7193_v42 = vld [vmem:[%s14067_s19 + $0xa20] sm:$0xff] }
0x198b   :  { %6043 = vmatpush.msrb.mxu2 %v7249_v6  ;;  %6087 = vmatpush.msra.mxu0 %v7122_v1 }
0x198c   :  { %6025 = vmatpush.msrb.mxu3 %v7209_v39  ;;  %6069 = vmatpush.msra.mxu1 %v7082_v21 }
0x198d   :  { %6044 = vmatpush.msrb.mxu2 %v7247_v37  ;;  %6088 = vmatpush.msra.mxu0 %v7120_v12  ;;  %v7072_v37 = vld [vmem:[%s14067_s19 + $0x658] sm:$0xff] }
0x198e   :  { %6026 = vmatpush.msrb.mxu3 %v7207_v45  ;;  %6070 = vmatpush.msra.mxu1 %v7080_v3 }
0x198f   :  { %6045 = vmatpush.msrb.mxu2 %v7245_v19  ;;  %6089 = vmatpush.msra.mxu0 %v7118_v30  ;;  %v7223_v19 = vld [vmem:[%s14067_s19 + $0xb10] sm:$0xff] }
0x1990   :  { %6027 = vmatpush.msrb.mxu3 %v7205_v41  ;;  %6071 = vmatpush.msra.mxu1 %v7078_v47  ;;  %v7062_v41 = vld [vmem:[%s14067_s19 + $0x608] sm:$0xff]  ;;  %v5339_v47 = vperm.slane %v13561_v36, 2 }
0x1991   :  { %6046 = vmatpush.msrb.mxu2 %v7243_v58  ;;  %6090 = vmatpush.msra.mxu0 %v7116_v0  ;;  %v7195_v0 = vld [vmem:[%s14067_s19 + $0xa30] sm:$0xff] }
0x1992   :  { %6028 = vmatpush.msrb.mxu3 %v7203_v14  ;;  %6072 = vmatpush.msra.mxu1 %v7076_v2 }
0x1993   :  { %6047 = vmatpush.msrb.mxu2 %v7241_v10  ;;  %6091 = vmatpush.msra.mxu0 %v7114_v25  ;;  %v7068_v10 = vld [vmem:[%s14067_s19 + $0x638] sm:$0xff] }
0x1994   :  { %6029 = vmatpush.msrb.mxu3 %v7201_v60  ;;  %6073 = vmatpush.msra.mxu1 %v7074_v9 }
0x1995   :  { %6048 = vmatpush.msrb.mxu2 %v7239_v26  ;;  %6092 = vmatpush.msra.mxu0 %v7112_v32  ;;  %v7094_v26 = vld [vmem:[%s14067_s19 + $0x708] sm:$0xff] }
0x1996   :  { %6030 = vmatpush.msrb.mxu3 %v7199_v29  ;;  %6074 = vmatpush.msra.mxu1 %v7072_v37 }
0x1997   :  { %6049 = vmatpush.msrb.mxu2 %v7237_v53  ;;  %6093 = vmatpush.msra.mxu0 %v7110_v22  ;;  %v5340_v53 = vperm.slane %v13561_v36, 3  ;;  %v7066_v22 = vld [vmem:[%s14067_s19 + $0x628] sm:$0xff] }
0x1998   :  { %6031 = vmatpush.msrb.mxu3 %v7197_v18  ;;  %6075 = vmatpush.msra.mxu1 %v7070_v16  ;;  %v7188_v16 = vld [vmem:[%s14067_s19 + $0x9f8] sm:$0xff] }
0x1999   :  { %6050 = vmatpush.msrb.mxu2 %v7235_v54  ;;  %6094 = vmatpush.msra.mxu0 %v7108_v7 }
0x199a   :  { %6032 = vmatpush.msrb.mxu3 %v7195_v0  ;;  %6076 = vmatpush.msra.mxu1 %v7068_v10  ;;  %v7186_v0 = vld [vmem:[%s14067_s19 + $0x9e8] sm:$0xff]  ;;  %v7152_v10 = vld [vmem:[%s14067_s19 + $0x8d8] sm:$0xff] }
0x199b   :  { %6051 = vmatpush.msrb.mxu2 %v7233_v11  ;;  %6095 = vmatpush.msra.mxu0 %v7106_v59  ;;  %v7189_v59 = vld [vmem:[%s14067_s19 + $0xa00] sm:$0xff] }
0x199c   :  { %6033 = vmatpush.msrb.mxu3 %v7193_v42  ;;  %6077 = vmatpush.msra.mxu1 %v7066_v22  ;;  %v5342_v42 = vperm.slane %v13561_v36, 5  ;;  %v7150_v22 = vld [vmem:[%s14067_s19 + $0x8c8] sm:$0xff] }
0x199d   :  { %6052 = vmatpush.msrb.mxu2 %v7231_v4  ;;  %6096 = vmatpush.msra.mxu0 %v7104_v20 }
0x199f   :  { %6053 = vmatpush.msrb.mxu2 %v7229_v27  ;;  %6097 = vmatpush.msra.mxu0 %v7102_v43 }
0x19a1   :  { %6054 = vmatpush.msrb.mxu2 %v7227_v57  ;;  %6098 = vmatpush.msra.mxu0 %v7100_v61 }
0x19a3   :  { %6055 = vmatpush.msrb.mxu2 %v7225_v50  ;;  %6099 = vmatpush.msra.mxu0 %v7098_v31 }
0x19a5   :  { %6056 = vmatpush.msrb.mxu2 %v7223_v19  ;;  %6100 = vmatpush.msra.mxu0 %v7096_v5  ;;  %v7154_v5 = vld [vmem:[%s14067_s19 + $0x8e8] sm:$0xff] }
0x19a7   :  { %6057 = vmatpush.msrb.mxu2 %v7221_v35  ;;  %6101 = vmatpush.msra.mxu0 %v7094_v26 }
0x19be   :  { %v5372_v51 = vpop.f32.mrf.mxu1 }
0x19bf   :  { %v5418_v24 = vpop.f32.mrf.mxu0  ;;  %v5373_v40 = vadd.f32 %v5372_v51, %v5337_v17 }
0x19c0   :  { %v5419_v23 = vadd.f32 %v5418_v24, %v5338_v38  ;;  %v7064_v24 = vld [vmem:[%s14067_s19 + $0x618] sm:$0xff] }
0x19c1   :  { %6078 = vmatpush.msra.mxu1 %v7064_v24  ;;  %v7182_v24 = vld [vmem:[%s14067_s19 + $0x9c8] sm:$0xff] }
0x19c3   :  { %6079 = vmatpush.msra.mxu1 %v7062_v41 }
0x19c4   :  { %v5395_v44 = vpop.f32.mrf.mxu3 }
0x19c5   :  { %v13629_v8 = vadd.f32 %v5395_v44, %v5373_v40  ;;  %v5441_v56 = vpop.f32.mrf.mxu2 }
0x19c6   :  { %v13634_v15 = vadd.f32 %v5441_v56, %v5419_v23 }
0x19c7   :  { %v5643_v49 = vmul.f32 %v13629_v8, %v13629_v8  ;;  %v5375_v52 = vpop.f32.mrf.mxu1  ;;  %v5631_v9 = vmul.f32 0.5, %v13629_v8 }
0x19c8   :  { %v5644_v6 = vmul.f32 %v13634_v15, %v13634_v15  ;;  %v5421_v1 = vpop.f32.mrf.mxu0  ;;  %v5376_v55 = vadd.f32 %v5375_v52, %v5337_v17  ;;  %v7191_v17 = vld [vmem:[%s14067_s19 + $0xa10] sm:$0xff] }
0x19c9   :  { %v5655_v12 = vmul.f32 %v5643_v49, %v13629_v8  ;;  %v5422_v25 = vadd.f32 %v5421_v1, %v5338_v38  ;;  %6034 = vmatpush.msrb.mxu3 %v7191_v17 }
0x19ca   :  { %v5656_v63 = vmul.f32 %v5644_v6, %v13634_v15  ;;  %v5632_v6 = vmul.f32 0.5, %v13634_v15 }
0x19cb   :  { %v5667_v30 = vmul.f32 0.044715, %v5655_v12  ;;  %6035 = vmatpush.msrb.mxu3 %v7189_v59 }
0x19cc   :  { %v5668_v58 = vmul.f32 0.044715, %v5656_v63 }
0x19cd   :  { %v5679_v48 = vadd.f32 %v5667_v30, %v13629_v8  ;;  %v5398_v62 = vpop.f32.mrf.mxu3  ;;  %v7156_v8 = vld [vmem:[%s14067_s19 + $0x8f8] sm:$0xff] }
0x19ce   :  { %v5680_v28 = vadd.f32 %v5668_v58, %v13634_v15  ;;  %v13696_v32 = vadd.f32 %v5398_v62, %v5376_v55  ;;  %v5444_v46 = vpop.f32.mrf.mxu2 }
0x19cf   :  { %v5691_v51 = vmul.f32 0.7978846, %v5679_v48  ;;  %v13705_v39 = vadd.f32 %v5444_v46, %v5422_v25 }
0x19d0   :  { %v5692_v54 = vmul.f32 0.7978846, %v5680_v28  ;;  %v5649_v21 = vmul.f32 %v13696_v32, %v13696_v32  ;;  %v7184_v28 = vld [vmem:[%s14067_s19 + $0x9d8] sm:$0xff] }
0x19d1   :  { %7361 = vtanh.f32 %v5691_v51  ;;  %v5650_v7 = vmul.f32 %v13705_v39, %v13705_v39  ;;  %v5510_v38 = vpop.f32.mrf.mxu1  ;;  %v5533_v45 = vpop.f32.mrf.mxu0 }
0x19d2   :  { %7363 = vtanh.f32 %v5692_v54  ;;  %v5661_v11 = vmul.f32 %v5649_v21, %v13696_v32  ;;  %v5511_v3 = vadd.f32 %v5510_v38, %v5340_v53  ;;  %v5637_v21 = vmul.f32 0.5, %v13696_v32 }
0x19d3   :  { %v5662_v4 = vmul.f32 %v5650_v7, %v13705_v39 }
0x19d4   :  { %v5673_v40 = vmul.f32 0.044715, %v5661_v11  ;;  %v13726_v20 = vadd.f32 %v5533_v45, %v5511_v3  ;;  %v5638_v45 = vmul.f32 0.5, %v13705_v39  ;;  %v7180_v11 = vld [vmem:[%s14067_s19 + $0x9b8] sm:$0xff] }
0x19d5   :  { %v5674_v23 = vmul.f32 0.044715, %v5662_v4 }
0x19d6   :  { %v5685_v44 = vadd.f32 %v5673_v40, %v13696_v32  ;;  %v5646_v14 = vmul.f32 %v13726_v20, %v13726_v20  ;;  %v5464_v27 = vpop.f32.mrf.mxu3  ;;  %v5487_v2 = vpop.f32.mrf.mxu2  ;;  %v7148_v40 = vld [vmem:[%s14067_s19 + $0x8b8] sm:$0xff] }
0x19d7   :  { %v7362_v56 = vpop.eup %7361  ;;  %v5686_v43 = vadd.f32 %v5674_v23, %v13705_v39  ;;  %v5465_v60 = vadd.f32 %v5464_v27, %v5339_v47 }
0x19d8   :  { %v7364_v57 = vpop.eup %7363  ;;  %v5715_v49 = vadd.f32 1.0, %v7362_v56  ;;  %v5658_v52 = vmul.f32 %v5646_v14, %v13726_v20  ;;  %v5697_v61 = vmul.f32 0.7978846, %v5685_v44  ;;  %v5341_v14 = vperm.slane %v13561_v36, 4  ;;  %v7146_v56 = vld [vmem:[%s14067_s19 + $0x8a8] sm:$0xff]  ;;  %v7216_v36 = vld [vmem:[%s14067_s19 + $0xad8] sm:$0xff] }
0x19d9   :  { %v5716_v1 = vadd.f32 1.0, %v7364_v57  ;;  %v13735_v29 = vadd.f32 %v5487_v2, %v5465_v60  ;;  %v5698_v50 = vmul.f32 0.7978846, %v5686_v43  ;;  %v7178_v2 = vld [vmem:[%s14067_s19 + $0x9a8] sm:$0xff] }
0x19da   :  { %v13737_v37 = vmul.f32 %v5715_v49, %v5631_v9  ;;  %v5670_v12 = vmul.f32 0.044715, %v5658_v52  ;;  %v5513_v31 = vpop.f32.mrf.mxu1  ;;  %v5536_v63 = vpop.f32.mrf.mxu0  ;;  %7365 = vtanh.f32 %v5697_v61  ;;  %v5634_v9 = vmul.f32 0.5, %v13726_v20  ;;  %v7176_v61 = vld [vmem:[%s14067_s19 + $0x998] sm:$0xff] }
0x19db   :  { %v13742_v18 = vmul.f32 %v5716_v1, %v5632_v6  ;;  %v5645_v19 = vmul.f32 %v13735_v29, %v13735_v29  ;;  %v5514_v15 = vadd.f32 %v5513_v31, %v5340_v53  ;;  %7367 = vtanh.f32 %v5698_v50  ;;  %v7144_v6 = vld [vmem:[%s14067_s19 + $0x898] sm:$0xff] }
0x19dc   :  { %v5682_v30 = vadd.f32 %v5670_v12, %v13726_v20  ;;  %5948 = vmatmul.f32.vlgmr.msra.gmra.mxu3 %v13737_v37 }
0x19dd   :  { %v5657_v58 = vmul.f32 %v5645_v19, %v13735_v29  ;;  %v13755_v55 = vadd.f32 %v5536_v63, %v5514_v15  ;;  %5970 = vmatmul.f32.vlgmr.msra.gmra.mxu2 %v13742_v18  ;;  %6108 = vmatpush.msra.mxu3 %v7156_v8  ;;  %v7252_v8 = vld [vmem:[%s14067_s19 + $0xbf8] sm:$0xff]  ;;  %v7174_v19 = vld [vmem:[%s14067_s19 + $0x988] sm:$0xff] }
0x19de   :  { %v5694_v35 = vmul.f32 0.7978846, %v5682_v30  ;;  %6130 = vmatpush.msra.mxu2 %v7188_v16  ;;  %v7142_v30 = vld [vmem:[%s14067_s19 + $0x888] sm:$0xff] }
0x19df   :  { %v5669_v48 = vmul.f32 0.044715, %v5657_v58  ;;  %v5652_v25 = vmul.f32 %v13755_v55, %v13755_v55  ;;  %v5467_v62 = vpop.f32.mrf.mxu3  ;;  %v5490_v26 = vpop.f32.mrf.mxu2  ;;  %6109 = vmatpush.msra.mxu3 %v7154_v5  ;;  %v5633_v58 = vmul.f32 0.5, %v13735_v29 }
0x19e0   :  { %v7366_v46 = vpop.eup %7365  ;;  %7369 = vtanh.f32 %v5694_v35  ;;  %v5468_v53 = vadd.f32 %v5467_v62, %v5339_v47  ;;  %6131 = vmatpush.msra.mxu2 %v7186_v0 }
0x19e1   :  { %v5681_v51 = vadd.f32 %v5669_v48, %v13735_v29  ;;  %v5664_v54 = vmul.f32 %v5652_v25, %v13755_v55  ;;  %v5721_v17 = vadd.f32 1.0, %v7366_v46  ;;  %6110 = vmatpush.msra.mxu3 %v7152_v10  ;;  %v7368_v7 = vpop.eup %7367  ;;  %v7250_v10 = vld [vmem:[%s14067_s19 + $0xbe8] sm:$0xff]  ;;  %v7172_v48 = vld [vmem:[%s14067_s19 + $0x978] sm:$0xff] }
0x19e2   :  { %v13779_v38 = vadd.f32 %v5490_v26, %v5468_v53  ;;  %6132 = vmatpush.msra.mxu2 %v7184_v28  ;;  %v5722_v47 = vadd.f32 1.0, %v7368_v7  ;;  %v7140_v28 = vld [vmem:[%s14067_s19 + $0x878] sm:$0xff] }
0x19e3   :  { %v5693_v3 = vmul.f32 0.7978846, %v5681_v51  ;;  %v5676_v59 = vmul.f32 0.044715, %v5664_v54  ;;  %v5602_v41 = vpop.f32.mrf.mxu0  ;;  %v5625_v32 = vpop.f32.mrf.mxu1  ;;  %v13785_v4 = vmul.f32 %v5721_v17, %v5637_v21  ;;  %6111 = vmatpush.msra.mxu3 %v7150_v22  ;;  %v7248_v22 = vld [vmem:[%s14067_s19 + $0xbd8] sm:$0xff]  ;;  %v7170_v17 = vld [vmem:[%s14067_s19 + $0x968] sm:$0xff] }
0x19e4   :  { %v5651_v39 = vmul.f32 %v13779_v38, %v13779_v38  ;;  %v5603_v23 = vadd.f32 %v5602_v41, %v5342_v42  ;;  %6133 = vmatpush.msra.mxu2 %v7182_v24  ;;  %v13797_v27 = vmul.f32 %v5722_v47, %v5638_v45  ;;  %v7220_v21 = vld [vmem:[%s14067_s19 + $0xaf8] sm:$0xff]  ;;  %v7246_v45 = vld [vmem:[%s14067_s19 + $0xbc8] sm:$0xff] }
0x19e5   :  { %7371 = vtanh.f32 %v5693_v3  ;;  %v5688_v44 = vadd.f32 %v5676_v59, %v13755_v55  ;;  %5951 = vmatmul.f32.gmra.mxu3 %v13785_v4 }
0x19e6   :  { %v7370_v43 = vpop.eup %7369  ;;  %v5663_v60 = vmul.f32 %v5651_v39, %v13779_v38  ;;  %v13806_v57 = vadd.f32 %v5625_v32, %v5603_v23  ;;  %6134 = vmatpush.msra.mxu2 %v7180_v11  ;;  %6112 = vmatpush.msra.mxu3 %v7148_v40  ;;  %v7138_v11 = vld [vmem:[%s14067_s19 + $0x868] sm:$0xff]  ;;  %v5640_v32 = vmul.f32 0.5, %v13755_v55  ;;  %v7168_v39 = vld [vmem:[%s14067_s19 + $0x958] sm:$0xff] }
0x19e7   :  { %v5718_v49 = vadd.f32 1.0, %v7370_v43  ;;  %5973 = vmatmul.f32.gmra.mxu2 %v13797_v27  ;;  %v5700_v52 = vmul.f32 0.7978846, %v5688_v44  ;;  %v7218_v40 = vld [vmem:[%s14067_s19 + $0xae8] sm:$0xff] }
0x19e8   :  { %v5675_v1 = vmul.f32 0.044715, %v5663_v60  ;;  %v5648_v50 = vmul.f32 %v13806_v57, %v13806_v57  ;;  %v5556_v12 = vpop.f32.mrf.mxu2  ;;  %v5579_v31 = vpop.f32.mrf.mxu3  ;;  %6135 = vmatpush.msra.mxu2 %v7178_v2  ;;  %6113 = vmatpush.msra.mxu3 %v7146_v56  ;;  %v7136_v2 = vld [vmem:[%s14067_s19 + $0x858] sm:$0xff] }
0x19e9   :  { %v13818_v20 = vmul.f32 %v5718_v49, %v5634_v9  ;;  %v5557_v63 = vadd.f32 %v5556_v12, %v5341_v14  ;;  %7373 = vtanh.f32 %v5700_v52  ;;  %v7244_v60 = vld [vmem:[%s14067_s19 + $0xbb8] sm:$0xff]  ;;  %v7166_v49 = vld [vmem:[%s14067_s19 + $0x948] sm:$0xff] }
0x19ea   :  { %v5687_v15 = vadd.f32 %v5675_v1, %v13779_v38  ;;  %v5660_v16 = vmul.f32 %v5648_v50, %v13806_v57  ;;  %6136 = vmatpush.msra.mxu2 %v7176_v61  ;;  %6114 = vmatpush.msra.mxu3 %v7144_v6  ;;  %v7134_v52 = vld [vmem:[%s14067_s19 + $0x848] sm:$0xff] }
0x19eb   :  { %v7372_v5 = vpop.eup %7371  ;;  %v13834_v0 = vadd.f32 %v5579_v31, %v5557_v63  ;;  %v5605_v35 = vpop.f32.mrf.mxu0  ;;  %6014 = vmatmul.f32.vlgmr.msrb.gmra.mxu0 %v13818_v20  ;;  %v7242_v1 = vld [vmem:[%s14067_s19 + $0xba8] sm:$0xff]  ;;  %v5639_v63 = vmul.f32 0.5, %v13779_v38 }
0x19ec   :  { %v5717_v25 = vadd.f32 1.0, %v7372_v5  ;;  %v5672_v62 = vmul.f32 0.044715, %v5660_v16  ;;  %v5606_v26 = vadd.f32 %v5605_v35, %v5342_v42  ;;  %6174 = vmatpush.msrb.mxu0 %v7252_v8  ;;  %v5699_v29 = vmul.f32 0.7978846, %v5687_v15  ;;  %6137 = vmatpush.msra.mxu2 %v7174_v19  ;;  %v5628_v53 = vpop.f32.mrf.mxu1  ;;  %v7214_v50 = vld [vmem:[%s14067_s19 + $0xac8] sm:$0xff] }
0x19ed   :  { %v5647_v46 = vmul.f32 %v13834_v0, %v13834_v0  ;;  %6115 = vmatpush.msra.mxu3 %v7142_v30  ;;  %v7164_v19 = vld [vmem:[%s14067_s19 + $0x938] sm:$0xff]  ;;  %v7162_v35 = vld [vmem:[%s14067_s19 + $0x928] sm:$0xff] }
0x19ee   :  { %v13853_v51 = vmul.f32 %v5717_v25, %v5633_v58  ;;  %v5684_v42 = vadd.f32 %v5672_v62, %v13806_v57  ;;  %v13856_v54 = vadd.f32 %v5628_v53, %v5606_v26  ;;  %6175 = vmatpush.msrb.mxu0 %v7250_v10  ;;  %7375 = vtanh.f32 %v5699_v29  ;;  %6138 = vmatpush.msra.mxu2 %v7172_v48  ;;  %v7132_v15 = vld [vmem:[%s14067_s19 + $0x838] sm:$0xff]  ;;  %v7238_v48 = vld [vmem:[%s14067_s19 + $0xb88] sm:$0xff] }
0x19ef   :  { %v7374_v24 = vpop.eup %7373  ;;  %v5659_v7 = vmul.f32 %v5647_v46, %v13834_v0  ;;  %6116 = vmatpush.msra.mxu3 %v7140_v28  ;;  %v7240_v30 = vld [vmem:[%s14067_s19 + $0xb98] sm:$0xff]  ;;  %v7130_v62 = vld [vmem:[%s14067_s19 + $0x828] sm:$0xff]  ;;  %v5636_v26 = vmul.f32 0.5, %v13806_v57 }
0x19f0   :  { %v5696_v3 = vmul.f32 0.7978846, %v5684_v42  ;;  %v5654_v59 = vmul.f32 %v13856_v54, %v13856_v54  ;;  %v5559_v41 = vpop.f32.mrf.mxu2  ;;  %6176 = vmatpush.msrb.mxu0 %v7248_v22  ;;  %5992 = vmatmul.f32.vlgmr.msrb.gmra.mxu1 %v13853_v51  ;;  %v5724_v47 = vadd.f32 1.0, %v7374_v24  ;;  %v5582_v56 = vpop.f32.mrf.mxu3  ;;  %v7212_v58 = vld [vmem:[%s14067_s19 + $0xab8] sm:$0xff]  ;;  %v7210_v46 = vld [vmem:[%s14067_s19 + $0xaa8] sm:$0xff] }
0x19f1   :  { %v5671_v23 = vmul.f32 0.044715, %v5659_v7  ;;  %v5560_v44 = vadd.f32 %v5559_v41, %v5341_v14  ;;  %6152 = vmatpush.msrb.mxu1 %v7220_v21  ;;  %6139 = vmatpush.msra.mxu2 %v7170_v17  ;;  %v7236_v53 = vld [vmem:[%s14067_s19 + $0xb78] sm:$0xff]  ;;  %v7234_v17 = vld [vmem:[%s14067_s19 + $0xb68] sm:$0xff] }
0x19f2   :  { %7377 = vtanh.f32 %v5696_v3  ;;  %v5666_v55 = vmul.f32 %v5654_v59, %v13856_v54  ;;  %6177 = vmatpush.msrb.mxu0 %v7246_v45  ;;  %v13887_v43 = vmul.f32 %v5724_v47, %v5640_v32  ;;  %6117 = vmatpush.msra.mxu3 %v7138_v11  ;;  %v7208_v42 = vld [vmem:[%s14067_s19 + $0xa98] sm:$0xff]  ;;  %v7206_v45 = vld [vmem:[%s14067_s19 + $0xa88] sm:$0xff]  ;;  %v5635_v3 = vmul.f32 0.5, %v13834_v0 }
0x19f3   :  { %v5683_v14 = vadd.f32 %v5671_v23, %v13834_v0  ;;  %v13896_v9 = vadd.f32 %v5582_v56, %v5560_v44  ;;  %6153 = vmatpush.msrb.mxu1 %v7218_v40  ;;  %6140 = vmatpush.msra.mxu2 %v7168_v39  ;;  %v7160_v21 = vld [vmem:[%s14067_s19 + $0x918] sm:$0xff]  ;;  %v7230_v0 = vld [vmem:[%s14067_s19 + $0xb48] sm:$0xff]  ;;  %v5642_v23 = vmul.f32 0.5, %v13856_v54 }
0x19f4   :  { %v7376_v61 = vpop.eup %7375  ;;  %v5678_v6 = vmul.f32 0.044715, %v5666_v55  ;;  %6017 = vmatmul.f32.gmra.mxu0 %v13887_v43  ;;  %6118 = vmatpush.msra.mxu3 %v7136_v2  ;;  %v7128_v24 = vld [vmem:[%s14067_s19 + $0x818] sm:$0xff]  ;;  %v7126_v39 = vld [vmem:[%s14067_s19 + $0x808] sm:$0xff] }
0x19f5   :  { %v5695_v12 = vmul.f32 0.7978846, %v5683_v14  ;;  %v5653_v31 = vmul.f32 %v13896_v9, %v13896_v9  ;;  %6178 = vmatpush.msrb.mxu0 %v7244_v60  ;;  %6154 = vmatpush.msrb.mxu1 %v7216_v36  ;;  %v5723_v8 = vadd.f32 1.0, %v7376_v61  ;;  %v7232_v41 = vld [vmem:[%s14067_s19 + $0xb58] sm:$0xff]  ;;  %v7202_v2 = vld [vmem:[%s14067_s19 + $0xa68] sm:$0xff] }
0x19f6   :  { %v5690_v16 = vadd.f32 %v5678_v6, %v13856_v54  ;;  %6141 = vmatpush.msra.mxu2 %v7166_v49  ;;  %6119 = vmatpush.msra.mxu3 %v7134_v52  ;;  %v7204_v32 = vld [vmem:[%s14067_s19 + $0xa78] sm:$0xff]  ;;  %v7198_v36 = vld [vmem:[%s14067_s19 + $0xa48] sm:$0xff]  ;;  %v5641_v49 = vmul.f32 0.5, %v13896_v9 }
0x19f7   :  { %7379 = vtanh.f32 %v5695_v12  ;;  %v5665_v38 = vmul.f32 %v5653_v31, %v13896_v9  ;;  %6179 = vmatpush.msrb.mxu0 %v7242_v1  ;;  %6155 = vmatpush.msrb.mxu1 %v7214_v50  ;;  %v13925_v5 = vmul.f32 %v5723_v8, %v5639_v63  ;;  %v7228_v55 = vld [vmem:[%s14067_s19 + $0xb38] sm:$0xff]  ;;  %v7222_v6 = vld [vmem:[%s14067_s19 + $0xb08] sm:$0xff] }
0x19f8   :  { %v7378_v10 = vpop.eup %7377  ;;  %v5702_v25 = vmul.f32 0.7978846, %v5690_v16  ;;  %6142 = vmatpush.msra.mxu2 %v7164_v19  ;;  %6120 = vmatpush.msra.mxu3 %v7132_v15  ;;  %v7200_v60 = vld [vmem:[%s14067_s19 + $0xa58] sm:$0xff]  ;;  %v7194_v1 = vld [vmem:[%s14067_s19 + $0xa28] sm:$0xff] }
0x19f9   :  { %v5720_v29 = vadd.f32 1.0, %v7378_v10  ;;  %v5677_v28 = vmul.f32 0.044715, %v5665_v38  ;;  %6180 = vmatpush.msrb.mxu0 %v7240_v30  ;;  %5995 = vmatmul.f32.gmra.mxu1 %v13925_v5  ;;  %v7224_v14 = vld [vmem:[%s14067_s19 + $0xb18] sm:$0xff] }
0x19fa   :  { %6156 = vmatpush.msrb.mxu1 %v7212_v58  ;;  %7381 = vtanh.f32 %v5702_v25  ;;  %6143 = vmatpush.msra.mxu2 %v7162_v35  ;;  %v7196_v52 = vld [vmem:[%s14067_s19 + $0xa38] sm:$0xff] }
0x19fb   :  { %v13947_v22 = vmul.f32 %v5720_v29, %v5636_v26  ;;  %v5689_v57 = vadd.f32 %v5677_v28, %v13896_v9  ;;  %6181 = vmatpush.msrb.mxu0 %v7238_v48  ;;  %6121 = vmatpush.msra.mxu3 %v7130_v62  ;;  %v7192_v9 = vld [vmem:[%s14067_s19 + $0xa18] sm:$0xff] }
0x19fc   :  { %6102 = vmatmul.f32.vlgmr.msra.gmra.mxu0 %v13742_v18  ;;  %6157 = vmatpush.msrb.mxu1 %v7210_v46  ;;  %v7158_v18 = vld [vmem:[%s14067_s19 + $0x908] sm:$0xff] }
0x19fd   :  { %v7380_v7 = vpop.eup %7379  ;;  %6058 = vmatmul.f32.vlgmr.msrb.gmra.mxu2 %v13947_v22  ;;  %6182 = vmatpush.msrb.mxu0 %v7236_v53  ;;  %v5701_v11 = vmul.f32 0.7978846, %v5689_v57 }
0x19fe   :  { %v5719_v59 = vadd.f32 1.0, %v7380_v7  ;;  %6158 = vmatpush.msrb.mxu1 %v7208_v42  ;;  %6144 = vmatpush.msra.mxu2 %v7160_v21  ;;  %v7395_v21 = vld [vmem:[%s14064_s16 + $0x10] sm:$0x3f] }
0x19ff   :  { %6183 = vmatpush.msrb.mxu0 %v7234_v17  ;;  %7383 = vtanh.f32 %v5701_v11  ;;  %6122 = vmatpush.msra.mxu3 %v7128_v24  ;;  %v6198_v17 = vperm.slane %v7395_v21, 5 }
0x1a00   :  { %v7382_v47 = vpop.eup %7381  ;;  %v5731_v40 = vmul.f32 %v5719_v59, %v5635_v3  ;;  %6159 = vmatpush.msrb.mxu1 %v7206_v45  ;;  %6145 = vmatpush.msra.mxu2 %v7158_v18 }
0x1a01   :  { %6184 = vmatpush.msrb.mxu0 %v7232_v41  ;;  %6080 = vmatmul.f32.vlgmr.msra.gmra.mxu1 %v13737_v37  ;;  %v5726_v44 = vadd.f32 1.0, %v7382_v47  ;;  %v7226_v37 = vld [vmem:[%s14067_s19 + $0xb28] sm:$0xff]  ;;  %v7396_v41 = vld [vmem:[%s14064_s16 + $0x18] sm:$0x3f] }
0x1a02   :  { %6036 = vmatmul.f32.vlgmr.msrb.gmra.mxu3 %v5731_v40  ;;  %6160 = vmatpush.msrb.mxu1 %v7204_v32  ;;  %v6199_v32 = vperm.slane %v7396_v41, 5 }
0x1a03   :  { %6185 = vmatpush.msrb.mxu0 %v7230_v0  ;;  %v5738_v56 = vmul.f32 %v5726_v44, %v5642_v23  ;;  %6123 = vmatpush.msra.mxu3 %v7126_v39 }
0x1a04   :  { %6105 = vmatmul.f32.gmra.mxu0 %v13797_v27  ;;  %6161 = vmatpush.msrb.mxu1 %v7202_v2 }
0x1a05   :  { %v7384_v54 = vpop.eup %7383  ;;  %6061 = vmatmul.f32.gmra.mxu2 %v5738_v56  ;;  %6186 = vmatpush.msrb.mxu0 %v7228_v55 }
0x1a06   :  { %6162 = vmatpush.msrb.mxu1 %v7200_v60  ;;  %v5725_v27 = vadd.f32 1.0, %v7384_v54 }
0x1a07   :  { %6187 = vmatpush.msrb.mxu0 %v7226_v37 }
0x1a08   :  { %6163 = vmatpush.msrb.mxu1 %v7198_v36  ;;  %v5737_v61 = vmul.f32 %v5725_v27, %v5641_v49 }
0x1a09   :  { %6188 = vmatpush.msrb.mxu0 %v7224_v14  ;;  %6083 = vmatmul.f32.gmra.mxu1 %v13785_v4  ;;  %v7190_v4 = vld [vmem:[%s14067_s19 + $0xa08] sm:$0xff] }
0x1a0a   :  { %6039 = vmatmul.f32.gmra.mxu3 %v5737_v61  ;;  %6164 = vmatpush.msrb.mxu1 %v7196_v52 }
0x1a0b   :  { %6189 = vmatpush.msrb.mxu0 %v7222_v6 }
0x1a0c   :  { %6190 = vmatmul.f32.vlgmr.msrb.gmra.mxu0 %v13947_v22  ;;  %6165 = vmatpush.msrb.mxu1 %v7194_v1 }
0x1a0d   :  { %6146 = vmatmul.f32.vlgmr.msra.gmra.mxu2 %v13818_v20 }
0x1a0e   :  { %6166 = vmatpush.msrb.mxu1 %v7192_v9 }
0x1a10   :  { %6167 = vmatpush.msrb.mxu1 %v7190_v4 }
0x1a11   :  { %6168 = vmatmul.f32.vlgmr.msrb.gmra.mxu1 %v5731_v40 }
0x1a12   :  { %6124 = vmatmul.f32.vlgmr.msra.gmra.mxu3 %v13853_v51 }
0x1a14   :  { %6193 = vmatmul.f32.gmra.mxu0 %v5738_v56 }
0x1a15   :  { %6149 = vmatmul.f32.gmra.mxu2 %v13887_v43 }
0x1a19   :  { %6171 = vmatmul.f32.gmra.mxu1 %v5737_v61 }
0x1a1a   :  { %6127 = vmatmul.f32.gmra.mxu3 %v13925_v5 }
0x1a5f   :  { %v5949_v50 = vpop.f32.mrf.mxu3 }
0x1a60   :  { %v5971_v12 = vpop.f32.mrf.mxu2 }
0x1a61   :  { %v5972_v51 = vadd.f32 %v5971_v12, %v5949_v50  ;;  %v6211_v12 = vld [vmem:[%s14068_s20] sm:$0xf]  ;;  %s7424_s20 = smov [#allocation2]  }
0x1a62   :  { %s6271_s26 = sshll.u32 %s7424_s20, 4  ;;  %s6272_s26 = int_to_ptr.vmem [resolvable:$true] %s6271_s26 }
0x1a68   :  { %v6015_v31 = vpop.f32.mrf.mxu0  ;;  %v5952_v63 = vpop.f32.mrf.mxu3 }
0x1a69   :  { %v6242_v63 = vperm.slane %v6211_v12, 0 }
0x1a6a   :  { %v5974_v20 = vpop.f32.mrf.mxu2 }
0x1a6b   :  { %v6243_v20 = vperm.slane %v6211_v12, 2 }
0x1a6d   :  { %v5993_v8 = vpop.f32.mrf.mxu1 }
0x1a6e   :  { %v5994_v48 = vadd.f32 %v5993_v8, %v5972_v51 }
0x1a70   :  { %v6016_v62 = vadd.f32 %v6015_v31, %v5994_v48 }
0x1a71   :  { %v6018_v19 = vpop.f32.mrf.mxu0 }
0x1a72   :  { %v6251_v19 = vperm.slane %v6211_v12, 3 }
0x1a74   :  { %v6255_v51 = vperm.slane %v6251_v19, 1 }
0x1a76   :  { %v5996_v15 = vpop.f32.mrf.mxu1 }
0x1a79   :  { %v6103_v16 = vpop.f32.mrf.mxu0 }
0x1a7e   :  { %v6081_v30 = vpop.f32.mrf.mxu1 }
0x1a7f   :  { %v6104_v22 = vadd.f32 %v6103_v16, %v6081_v30  ;;  %v6246_v16 = vperm.slane %v6242_v63, 0  ;;  %v6250_v30 = vperm.slane %v6211_v12, 1 }
0x1a80   :  { %v6059_v38 = vpop.f32.mrf.mxu2 }
0x1a81   :  { %v6106_v58 = vpop.f32.mrf.mxu0 }
0x1a85   :  { %v6037_v35 = vpop.f32.mrf.mxu3 }
0x1a86   :  { %v6084_v10 = vpop.f32.mrf.mxu1  ;;  %v6038_v26 = vadd.f32 %v6037_v35, %v6016_v62 }
0x1a88   :  { %v6062_v43 = vpop.f32.mrf.mxu2  ;;  %v6060_v53 = vadd.f32 %v6059_v38, %v6038_v26 }
0x1a89   :  { %v6191_v25 = vpop.f32.mrf.mxu0  ;;  %v6254_v43 = vperm.slane %v6250_v30, 1 }
0x1a8a   :  { %v6196_v42 = vadd.f32 %v6060_v53, %v12783_v34 }
0x1a8c   :  { %v6200_v18 = vadd.f32 %v6198_v17, %v6196_v42 }
0x1a8d   :  { %v6040_v5 = vpop.f32.mrf.mxu3 }
0x1a8e   :  { %v6169_v29 = vpop.f32.mrf.mxu1  ;;  %v6204_v40 = vrot.slane %v6200_v18, 4 }
0x1a90   :  { %v6147_v28 = vpop.f32.mrf.mxu2  ;;  %v6209_v23 = vsel %vm6208_vm0, %v6200_v18, %v6204_v40 }
0x1a91   :  { %v6194_v46 = vpop.f32.mrf.mxu0  ;;  %v6212_v2 = vsel %vm1595_vm2, %v6209_v23, 0.0 }
0x1a95   :  { %v6125_v57 = vpop.f32.mrf.mxu3 }
0x1a96   :  { %v6126_v24 = vadd.f32 %v6125_v57, %v6104_v22  ;;  %v6172_v7 = vpop.f32.mrf.mxu1 }
0x1a98   :  { %v6148_v45 = vadd.f32 %v6147_v28, %v6126_v24  ;;  %v6150_v11 = vpop.f32.mrf.mxu2 }
0x1a9a   :  { %v6170_v3 = vadd.f32 %v6169_v29, %v6148_v45 }
0x1a9c   :  { %v6192_v59 = vadd.f32 %v6191_v25, %v6170_v3 }
0x1a9d   :  { %v6128_v47 = vpop.f32.mrf.mxu3 }
0x1a9e   :  { %v6197_v34 = vadd.f32 %v6192_v59, %v12781_v33 }
0x1aa0   :  { %v6201_v0 = vadd.f32 %v6199_v32, %v6197_v34 }
0x1aa2   :  { %v6205_v39 = vrot.slane %v6201_v0, 4 }
0x1aa4   :  { %v6210_v44 = vsel %vm6208_vm0, %v6201_v0, %v6205_v39 }
0x1aa5   :  { %v6213_v55 = vsel %vm1597_vm3, %v6210_v44, 0.0 }
0x1aa6   :  { %v6214_v56 = vadd.f32 %v6213_v55, %v6212_v2 }
0x1aa8   :  { %6215 = vadd.xlane.f32.xlu1 %v6214_v56 }
0x1b1b   :  { %v6216_v60 = vpop.xlane.xlu1 %6215 }
0x1b1c   :  { %v6217_v37 = vmul.f32 %v6216_v60, %v9557_v13 }
0x1b1e   :  { %v6218_v54 = vsub.f32 %v6209_v23, %v6217_v37  ;;  %v6219_v36 = vsub.f32 %v6210_v44, %v6217_v37 }
0x1b20   :  { %v6220_v14 = vmul.f32 %v6218_v54, %v6218_v54  ;;  %v6221_v49 = vmul.f32 %v6219_v36, %v6219_v36 }
0x1b22   :  { %v6222_v33 = vsel %vm1595_vm2, %v6220_v14, 0.0  ;;  %v6223_v27 = vsel %vm1597_vm3, %v6221_v49, 0.0 }
0x1b23   :  { %v6224_v52 = vadd.f32 %v6223_v27, %v6222_v33 }
0x1b25   :  { %6225 = vadd.xlane.f32.xlu2 %v6224_v52 }
0x1b98   :  { %v6226_v61 = vpop.xlane.xlu2 %6225 }
0x1b99   :  { %v6227_v6 = vmul.f32 %v6226_v61, %v9557_v13  ;;  %v6247_v13 = vperm.slane %v6243_v20, 0 }
0x1b9b   :  { %v6228_v1 = vadd.f32 1e-05, %v6227_v6 }
0x1b9d   :  { %7385 = vrsqrt.f32 %v6228_v1  ;;  %vm6235_vm3 = vweird.f32 %v6228_v1 }
0x1ba3   :  { %v7386_v9 = vpop.eup %7385 }
0x1ba4   :  { %v6230_v4 = vmul.f32 %v7386_v9, %v6228_v1  ;;  %vm6236_vm5 = vweird.f32 %v7386_v9 }
0x1ba5   :  { %vm6237_vm6 = vmor %vm6235_vm3, %vm6236_vm5 }
0x1ba6   :  { %v6231_v50 = vmul.f32 %v7386_v9, %v6230_v4 }
0x1ba8   :  { %v6232_v31 = vmul.f32 0.5, %v6231_v50 }
0x1baa   :  { %v6233_v8 = vsub.f32 1.5, %v6232_v31 }
0x1bac   :  { %v6234_v15 = vmul.f32 %v7386_v9, %v6233_v8 }
0x1bae   :  { %v6238_v38 = vsel %vm6237_vm6, %v7386_v9, %v6234_v15 }
0x1baf   :  { %v6239_v58 = vmul.f32 %v6238_v38, %v6218_v54  ;;  %v6240_v35 = vmul.f32 %v6238_v38, %v6219_v36 }
0x1bb1   :  { %v6248_v10 = vmul.f32 %v6246_v16, %v6239_v58  ;;  %v6249_v48 = vmul.f32 %v6247_v13, %v6240_v35 }
0x1bb3   :  { %v6257_v25 = vadd.f32 %v6255_v51, %v6249_v48  ;;  %v6256_v62 = vadd.f32 %v6254_v43, %v6248_v10 }
0x1bb5   :  { %v6260_v5 = vrot.slane %v6257_v25, 6 }
0x1bb7   :  { %v6261_v26 = vsel %vm1595_vm2, %v6256_v62, %v6260_v5 }
0x1bb8   :  { %6265 = vst.msk [vmem:[#allocation2] sm:$0xf] %vm6264_vm8, %v6261_v26 }
0x1bb9   :  { %6276 = dma.vmem_to_hbm [thread:$0]  %s6272_s26, 64, %s6274_s23, [#allocation3]  }
0x1bba   :  { %7421 = dma.done.wait [#allocation3], 64  }
0x1bbb   :  { %7422 = vsyncadd [#allocation3], 4294967232 }
0x1bbc   :  { %6281 = vsyncpa [#allocation3], 1 }

</bundles_post_ra>
